<compile_context>
chip_gen: v6e
topology: v6e:2x2x1
jax: 0.10.0
libtpu: 0.0.40
codegen_flags: <defaults>
</compile_context>

<pallas_src>
import functools

import jax
import jax.numpy as jnp
from jax import lax
from jax.experimental import pallas as pl
from jax.experimental.pallas import tpu as pltpu

BN_EPS = 1e-5
LANE = 128


# ----------------------------------------------------------------------------
# small helpers
# ----------------------------------------------------------------------------
def _round_up(x, m):
    return (x + m - 1) // m * m


def _pad_axis(x, axis, new_size):
    if x.shape[axis] == new_size:
        return x
    widths = [(0, 0)] * x.ndim
    widths[axis] = (0, new_size - x.shape[axis])
    return jnp.pad(x, widths)


def _stats_rows(s1, s2):
    """Pack per-channel sum / sum-of-squares into an (8, C) tile (rows 2..7 = 0)."""
    c = s1.shape[-1]
    row = lax.broadcasted_iota(jnp.int32, (8, c), 0)
    return jnp.where(row == 0, s1, 0.0) + jnp.where(row == 1, s2, 0.0)


# ----------------------------------------------------------------------------
# kernels
# ----------------------------------------------------------------------------
def _matmul_stats_kernel(x_ref, w_ref, o_ref, st_ref):
    """y = x @ w (bf16 x bf16 -> f32 on the MXU) + per-channel (sum, sum^2)."""
    y = jnp.dot(x_ref[...], w_ref[...], preferred_element_type=jnp.float32)
    o_ref[...] = y.astype(o_ref.dtype)
    st_ref[...] = _stats_rows(jnp.sum(y, axis=0, keepdims=True),
                              jnp.sum(y * y, axis=0, keepdims=True))


def _bn_relu_conv3x3_kernel(xp_ref, sc_ref, sh_ref, w_ref, y_ref, st_ref,
                            a_ref, *, h, w, ho, wo, stride):
    """Fused bn1-affine + ReLU on a spatially padded image, then 3x3 conv as
    nine shifted-slab matmuls accumulated in VMEM, plus bn2 statistics."""
    hp, wp, c = xp_ref.shape
    c_out = w_ref.shape[-1]

    # bn1 affine + ReLU applied to the whole padded slab; the zero-padded
    # border would become relu(shift) so it is re-masked to zero.
    xv = xp_ref[...].astype(jnp.float32)
    act = jnp.maximum(xv * sc_ref[...] + sh_ref[...], 0.0)
    row = lax.broadcasted_iota(jnp.int32, (hp, wp, c), 0)
    col = lax.broadcasted_iota(jnp.int32, (hp, wp, c), 1)
    interior = (row >= 1) & (row <= h) & (col >= 1) & (col <= w)
    a_ref[...] = jnp.where(interior, act, 0.0).astype(a_ref.dtype)

    acc = jnp.zeros((ho * wo, c_out), jnp.float32)
    tap = 0
    for dy in range(3):
        for dx in range(3):
            if stride == 1:
                patch = a_ref[dy:dy + ho, dx:dx + wo, :]
            else:
                # TODO(synk): stride > 1 uses an in-kernel strided value slice;
                # only the downsampling blocks exercise it (not this test).
                av = a_ref[...]
                patch = lax.slice(
                    av, (dy, dx, 0),
                    (dy + (ho - 1) * stride + 1,
                     dx + (wo - 1) * stride + 1, c),
                    (stride, stride, 1))
            acc = acc + jnp.dot(patch.reshape(ho * wo, c), w_ref[tap],
                                preferred_element_type=jnp.float32)
            tap += 1
    y_ref[...] = acc.astype(y_ref.dtype)
    st_ref[...] = _stats_rows(jnp.sum(acc, axis=0, keepdims=True),
                              jnp.sum(acc * acc, axis=0, keepdims=True))


def _bn_relu_matmul_stats_kernel(y_ref, sc_ref, sh_ref, w_ref, o_ref, st_ref):
    """Fused bn2-affine + ReLU + conv3 (1x1) matmul + bn3 statistics."""
    a = jnp.maximum(y_ref[...].astype(jnp.float32) * sc_ref[...] + sh_ref[...],
                    0.0)
    y = jnp.dot(a.astype(jnp.bfloat16), w_ref[...],
                preferred_element_type=jnp.float32)
    o_ref[...] = y.astype(o_ref.dtype)
    st_ref[...] = _stats_rows(jnp.sum(y, axis=0, keepdims=True),
                              jnp.sum(y * y, axis=0, keepdims=True))


def _bn_add_relu_kernel(y_ref, sc_ref, sh_ref, r_ref, o_ref):
    out = y_ref[...] * sc_ref[...] + sh_ref[...] + r_ref[...].astype(jnp.float32)
    o_ref[...] = jnp.maximum(out, 0.0).astype(o_ref.dtype)


def _bn_add_bn_relu_kernel(y_ref, sc_ref, sh_ref, yd_ref, scd_ref, shd_ref,
                           o_ref):
    idn = yd_ref[...].astype(jnp.float32) * scd_ref[...] + shd_ref[...]
    out = y_ref[...] * sc_ref[...] + sh_ref[...] + idn
    o_ref[...] = jnp.maximum(out, 0.0).astype(o_ref.dtype)


# ----------------------------------------------------------------------------
# pallas_call wrappers (grid = images, "parallel")
# ----------------------------------------------------------------------------
_PARAMS = pltpu.CompilerParams(dimension_semantics=("parallel",))


def _conv1x1_stats(x_flat, w, out_dtype):
    """x_flat: (N, M, K) bf16, w: (K, C) bf16 -> y (N, M, C), stats (N, 8, C)."""
    n, m, k = x_flat.shape
    k2, c = w.shape
    assert k == k2
    return pl.pallas_call(
        _matmul_stats_kernel,
        grid=(n,),
        in_specs=[
            pl.BlockSpec((None, m, k), lambda i: (i, 0, 0)),
            pl.BlockSpec((k, c), lambda i: (0, 0)),     # weight stays resident
        ],
        out_specs=(
            pl.BlockSpec((None, m, c), lambda i: (i, 0, 0)),
            pl.BlockSpec((None, 8, c), lambda i: (i, 0, 0)),
        ),
        out_shape=(
            jax.ShapeDtypeStruct((n, m, c), out_dtype),
            jax.ShapeDtypeStruct((n, 8, c), jnp.float32),
        ),
        compiler_params=_PARAMS,
    )(x_flat, w)


def _bn_relu_conv3x3_stats(y1_pad, scale1, shift1, w_taps, stride):
    """y1_pad: (N, H+2, W+2, C) bf16 (spatially zero padded pre-BN conv1 out),
    scale1/shift1: (1, C) f32, w_taps: (9, C, Cout) bf16."""
    n, hp, wp, c = y1_pad.shape
    taps, c2, c_out = w_taps.shape
    assert taps == 9 and c == c2
    h, w = hp - 2, wp - 2
    ho = (h - 1) // stride + 1
    wo = (w - 1) // stride + 1
    kernel = functools.partial(_bn_relu_conv3x3_kernel, h=h, w=w, ho=ho, wo=wo,
                               stride=stride)
    y2, stats = pl.pallas_call(
        kernel,
        grid=(n,),
        in_specs=[
            pl.BlockSpec((None, hp, wp, c), lambda i: (i, 0, 0, 0)),
            pl.BlockSpec((1, c), lambda i: (0, 0)),
            pl.BlockSpec((1, c), lambda i: (0, 0)),
            pl.BlockSpec((9, c, c_out), lambda i: (0, 0, 0)),
        ],
        out_specs=(
            pl.BlockSpec((None, ho * wo, c_out), lambda i: (i, 0, 0)),
            pl.BlockSpec((None, 8, c_out), lambda i: (i, 0, 0)),
        ),
        out_shape=(
            jax.ShapeDtypeStruct((n, ho * wo, c_out), jnp.bfloat16),
            jax.ShapeDtypeStruct((n, 8, c_out), jnp.float32),
        ),
        scratch_shapes=[pltpu.VMEM((hp, wp, c), jnp.bfloat16)],
        compiler_params=_PARAMS,
    )(y1_pad, scale1, shift1, w_taps)
    return y2, stats, (ho, wo)


def _bn_relu_conv1x1_stats(y, scale, shift, w, out_dtype):
    """y: (N, M, K) bf16 pre-BN activation, w: (K, C) bf16."""
    n, m, k = y.shape
    k2, c = w.shape
    assert k == k2
    return pl.pallas_call(
        _bn_relu_matmul_stats_kernel,
        grid=(n,),
        in_specs=[
            pl.BlockSpec((None, m, k), lambda i: (i, 0, 0)),
            pl.BlockSpec((1, k), lambda i: (0, 0)),
            pl.BlockSpec((1, k), lambda i: (0, 0)),
            pl.BlockSpec((k, c), lambda i: (0, 0)),
        ],
        out_specs=(
            pl.BlockSpec((None, m, c), lambda i: (i, 0, 0)),
            pl.BlockSpec((None, 8, c), lambda i: (i, 0, 0)),
        ),
        out_shape=(
            jax.ShapeDtypeStruct((n, m, c), out_dtype),
            jax.ShapeDtypeStruct((n, 8, c), jnp.float32),
        ),
        compiler_params=_PARAMS,
    )(y, scale, shift, w)


def _bn_add_relu(y, scale, shift, residual):
    n, m, c = y.shape
    return pl.pallas_call(
        _bn_add_relu_kernel,
        grid=(n,),
        in_specs=[
            pl.BlockSpec((None, m, c), lambda i: (i, 0, 0)),
            pl.BlockSpec((1, c), lambda i: (0, 0)),
            pl.BlockSpec((1, c), lambda i: (0, 0)),
            pl.BlockSpec((None, m, c), lambda i: (i, 0, 0)),
        ],
        out_specs=pl.BlockSpec((None, m, c), lambda i: (i, 0, 0)),
        out_shape=jax.ShapeDtypeStruct((n, m, c), jnp.float32),
        input_output_aliases={3: 0},          # write result in the residual buf
        compiler_params=_PARAMS,
    )(y, scale, shift, residual)


def _bn_add_bn_relu(y, scale, shift, yd, scaled, shiftd):
    n, m, c = y.shape
    return pl.pallas_call(
        _bn_add_bn_relu_kernel,
        grid=(n,),
        in_specs=[
            pl.BlockSpec((None, m, c), lambda i: (i, 0, 0)),
            pl.BlockSpec((1, c), lambda i: (0, 0)),
            pl.BlockSpec((1, c), lambda i: (0, 0)),
            pl.BlockSpec((None, m, c), lambda i: (i, 0, 0)),
            pl.BlockSpec((1, c), lambda i: (0, 0)),
            pl.BlockSpec((1, c), lambda i: (0, 0)),
        ],
        out_specs=pl.BlockSpec((None, m, c), lambda i: (i, 0, 0)),
        out_shape=jax.ShapeDtypeStruct((n, m, c), jnp.float32),
        input_output_aliases={3: 0},
        compiler_params=_PARAMS,
    )(y, scale, shift, yd, scaled, shiftd)


# ----------------------------------------------------------------------------
# BN glue: reduce per-image partials, fold gamma/beta into scale/shift
# ----------------------------------------------------------------------------
def _bn_scale_shift(stats, gamma_p, beta_p, m_true, eps=BN_EPS):
    s1 = jnp.sum(stats[:, 0, :], axis=0)
    s2 = jnp.sum(stats[:, 1, :], axis=0)
    mean = s1 / m_true
    var = jnp.maximum(s2 / m_true - mean * mean, 0.0)   # one-pass variance
    scale = gamma_p.astype(jnp.float32) * lax.rsqrt(var + eps)
    shift = beta_p.astype(jnp.float32) - mean * scale
    return scale[None, :], shift[None, :]


# ----------------------------------------------------------------------------
# Bottleneck forward (NCHW in / NCHW out, like the PyTorch module)
# ----------------------------------------------------------------------------
def bottleneck_forward(x_nchw, params, stride=1, has_downsample=False):
    """BatchNorm uses training-mode batch statistics (fresh nn.BatchNorm2d)."""
    if not has_downsample:
        # PyTorch would shape-error on the residual add in this case too.
        assert stride == 1, "stride > 1 requires the downsample path"

    # TODO(synk): the NCHW<->NHWC transposes and channel pad/slice remain plain
    # XLA ops; they could be removed by requiring NHWC at the API boundary.
    x = jnp.transpose(x_nchw, (0, 2, 3, 1)).astype(jnp.float32)   # NHWC
    n, h, w, c_in = x.shape

    c_mid = params["g1"].shape[0]
    c_out = params["g3"].shape[0]
    c_in_p = _round_up(c_in, LANE)
    c_mid_p = _round_up(c_mid, LANE)
    c_out_p = _round_up(c_out, LANE)

    # ---- weights: matmul layout, lane-padded, bf16 --------------------------
    w1 = _pad_axis(_pad_axis(
        params["w1_hwio"].reshape(c_in, c_mid), 0, c_in_p), 1, c_mid_p
    ).astype(jnp.bfloat16)
    w2 = _pad_axis(_pad_axis(
        params["w2_hwio"].reshape(9, c_mid, c_mid), 1, c_mid_p), 2, c_mid_p
    ).astype(jnp.bfloat16)
    w3 = _pad_axis(_pad_axis(
        params["w3_hwio"].reshape(c_mid, c_out), 0, c_mid_p), 1, c_out_p
    ).astype(jnp.bfloat16)
    g1 = _pad_axis(params["g1"], 0, c_mid_p)
    b1 = _pad_axis(params["b1"], 0, c_mid_p)
    g2 = _pad_axis(params["g2"], 0, c_mid_p)
    b2 = _pad_axis(params["b2"], 0, c_mid_p)
    g3 = _pad_axis(params["g3"], 0, c_out_p)
    b3 = _pad_axis(params["b3"], 0, c_out_p)

    # ---- input: lane-padded channels, per-image row blocks -------------------
    x_cp = _pad_axis(x, 3, c_in_p)                                # (n,h,w,Cin_p)
    x_flat_bf16 = x_cp.reshape(n, h * w, c_in_p).astype(jnp.bfloat16)
    m1 = n * h * w

    # ---- stage 1: conv1 (1x1) + bn1 statistics -------------------------------
    y1, st1 = _conv1x1_stats(x_flat_bf16, w1, jnp.bfloat16)
    sc1, sh1 = _bn_scale_shift(st1, g1, b1, m1)

    # ---- stage 2: fused bn1+relu -> conv2 (3x3, stride, pad=1) + bn2 stats ---
    y1_pad = jnp.pad(y1.reshape(n, h, w, c_mid_p),
                     ((0, 0), (1, 1), (1, 1), (0, 0)))
    y2, st2, (ho, wo) = _bn_relu_conv3x3_stats(y1_pad, sc1, sh1, w2, stride)
    m2 = n * ho * wo
    sc2, sh2 = _bn_scale_shift(st2, g2, b2, m2)

    # ---- stage 3: fused bn2+relu -> conv3 (1x1) + bn3 stats ------------------
    y3, st3 = _bn_relu_conv1x1_stats(y2, sc2, sh2, w3, jnp.float32)
    sc3, sh3 = _bn_scale_shift(st3, g3, b3, m2)

    # ---- stage 4: bn3 + residual add + relu (residual buffer aliased) -------
    if has_downsample:
        # TODO(synk): PyTorch accepts an arbitrary `downsample` module; only
        # the standard Conv1x1(stride)+BN downsample is implemented here.
        xs = x_cp[:, ::stride, ::stride, :]
        xs_flat = xs.reshape(n, ho * wo, c_in_p).astype(jnp.bfloat16)
        wds = _pad_axis(_pad_axis(
            params["wds_hwio"].reshape(c_in, c_out), 0, c_in_p), 1, c_out_p
        ).astype(jnp.bfloat16)
        gds = _pad_axis(params["gds"], 0, c_out_p)
        bds = _pad_axis(params["bds"], 0, c_out_p)
        yd, std_ = _conv1x1_stats(xs_flat, wds, jnp.float32)
        scd, shd = _bn_scale_shift(std_, gds, bds, m2)
        out_flat = _bn_add_bn_relu(y3, sc3, sh3, yd, scd, shd)
    else:
        assert c_out == c_in, "identity residual needs matching channels"
        identity = x_cp.reshape(n, h * w, c_out_p)                 # f32
        out_flat = _bn_add_relu(y3, sc3, sh3, identity)

    out = out_flat[:, :, :c_out].reshape(n, ho, wo, c_out)
    return jnp.transpose(out, (0, 3, 1, 2))   # -> NCHW


# ----------------------------------------------------------------------------
# Pure-JAX reference (independent path via lax.conv) for correctness check.
# ----------------------------------------------------------------------------
def bottleneck_reference(x_nchw, params, stride=1):
    x = jnp.transpose(x_nchw, (0, 2, 3, 1)).astype(jnp.float32)
    prec = jax.lax.Precision.HIGHEST

    def conv(h, w_hwio, s, p):
        return jax.lax.conv_general_dilated(
            h, w_hwio, (s, s), [(p, p), (p, p)],
            dimension_numbers=("NHWC", "HWIO", "NHWC"), precision=prec)

    def bn(h, g, b):
        m = jnp.mean(h, axis=(0, 1, 2), keepdims=True)
        v = jnp.mean((h - m) ** 2, axis=(0, 1, 2), keepdims=True)
        return (h - m) * jax.lax.rsqrt(v + BN_EPS) * g + b

    identity = x
    out = jax.nn.relu(bn(conv(x, params["w1_hwio"], 1, 0), params["g1"], params["b1"]))
    out = jax.nn.relu(bn(conv(out, params["w2_hwio"], stride, 1), params["g2"], params["b2"]))
    out = bn(conv(out, params["w3_hwio"], 1, 0), params["g3"], params["b3"])
    out = jax.nn.relu(out + identity)
    return jnp.transpose(out, (0, 3, 1, 2))


# ----------------------------------------------------------------------------
# Deterministic parameter construction (shapes from Bottleneck.__init__).
# ----------------------------------------------------------------------------
def make_params(key, in_channels, out_channels, with_downsample=False):
    exp = 4
    ks = jax.random.split(key, 12)
    p = {
        "w1_hwio": 0.1 * jax.random.normal(ks[0], (1, 1, in_channels, out_channels), jnp.float32),
        "w2_hwio": 0.1 * jax.random.normal(ks[1], (3, 3, out_channels, out_channels), jnp.float32),
        "w3_hwio": 0.1 * jax.random.normal(ks[2], (1, 1, out_channels, out_channels * exp), jnp.float32),
        "g1": 1.0 + 0.1 * jax.random.normal(ks[3], (out_channels,), jnp.float32),
        "b1": 0.1 * jax.random.normal(ks[4], (out_channels,), jnp.float32),
        "g2": 1.0 + 0.1 * jax.random.normal(ks[5], (out_channels,), jnp.float32),
        "b2": 0.1 * jax.random.normal(ks[6], (out_channels,), jnp.float32),
        "g3": 1.0 + 0.1 * jax.random.normal(ks[7], (out_channels * exp,), jnp.float32),
        "b3": 0.1 * jax.random.normal(ks[8], (out_channels * exp,), jnp.float32),
    }
    if with_downsample:
        p["wds_hwio"] = 0.1 * jax.random.normal(ks[9], (1, 1, in_channels, out_channels * exp), jnp.float32)
        p["gds"] = 1.0 + 0.1 * jax.random.normal(ks[10], (out_channels * exp,), jnp.float32)
        p["bds"] = 0.1 * jax.random.normal(ks[11], (out_channels * exp,), jnp.float32)
    return p


if __name__ == "__main__":
    key = jax.random.PRNGKey(0)
    # Bottleneck(in_channels=16, out_channels=4, stride=1, downsample=None)
    # -> output channels = 4 * expansion = 16 == in_channels (identity add ok).
    n, out_channels = 2, 4
    in_channels = out_channels * 4
    h = w = 16

    kx, kp = jax.random.split(key)
    x = jax.random.normal(kx, (n, in_channels, h, w), jnp.float32)  # NCHW
    params = make_params(kp, in_channels, out_channels)

    fwd = jax.jit(bottleneck_forward,
                  static_argnames=("stride", "has_downsample"))
    out = fwd(x, params, stride=1, has_downsample=False)
    out = jax.block_until_ready(out)
    assert out.shape == (n, in_channels, h, w), out.shape

    ref = bottleneck_reference(x, params, stride=1)
    max_err = float(jnp.max(jnp.abs(out - ref)))
    # Tolerance accounts for bf16 matmul inputs / bf16 inter-stage tensors
    # vs the f32 HIGHEST-precision reference.
    if not bool(jnp.allclose(out, ref, atol=5e-2, rtol=5e-2)):
        raise AssertionError(f"mismatch vs reference, max abs err = {max_err}")

    print("KERNEL_OK")
</pallas_src>

<mosaic_0001>
module attributes {stable_mosaic.version = 11 : i64} {
  func.func @_matmul_stats_kernel(%arg0: i32, %arg1: memref<1x256x128xbf16, #tpu.memory_space<vmem>>, %arg2: memref<128x128xbf16, #tpu.memory_space<vmem>>, %arg3: memref<1x256x128xbf16, #tpu.memory_space<vmem>>, %arg4: memref<1x8x128xf32, #tpu.memory_space<vmem>>) attributes {dimension_semantics = [#tpu.dimension_semantics<parallel>], iteration_bounds = array<i64: 2>, scalar_prefetch = 0 : i64, scratch_operands = 0 : i64, tpu.core_type = #tpu.core_type<tc>, window_params = [{transform_indices = @transform_0, window_bounds = array<i64: 1, 256, 128>}, {pipeline_mode = #tpu.pipeline_mode<synchronous>, transform_indices = @transform_1, window_bounds = array<i64: 128, 128>}, {transform_indices = @transform_2, window_bounds = array<i64: 1, 256, 128>}, {transform_indices = @transform_3, window_bounds = array<i64: 1, 8, 128>}]} {
    %c0 = arith.constant 0 : index
    %c0_0 = arith.constant 0 : index
    %c0_1 = arith.constant 0 : index
    %0 = vector.load %arg1[%c0, %c0_0, %c0_1] : memref<1x256x128xbf16, #tpu.memory_space<vmem>>, vector<1x256x128xbf16>
    %1 = vector.shape_cast %0 : vector<1x256x128xbf16> to vector<256x128xbf16>
    %c0_2 = arith.constant 0 : index
    %c0_3 = arith.constant 0 : index
    %2 = vector.load %arg2[%c0_2, %c0_3] : memref<128x128xbf16, #tpu.memory_space<vmem>>, vector<128x128xbf16>
    %cst = arith.constant dense<0.000000e+00> : vector<256x128xf32>
    %3 = tpu.matmul %1, %2, %cst {dimension_numbers = #tpu.dot_dimension_numbers<[1], [0], [0], [1], [0, 0, 1, 1], [], []>} : vector<256x128xbf16>, vector<128x128xbf16>, vector<256x128xf32> -> vector<256x128xf32>
    %4 = arith.truncf %3 : vector<256x128xf32> to vector<256x128xbf16>
    %c0_4 = arith.constant 0 : index
    %c0_5 = arith.constant 0 : index
    %c0_6 = arith.constant 0 : index
    %5 = vector.load %arg3[%c0_4, %c0_5, %c0_6] : memref<1x256x128xbf16, #tpu.memory_space<vmem>>, vector<1x256x128xbf16>
    %6 = vector.shape_cast %5 : vector<1x256x128xbf16> to vector<256x128xbf16>
    %7 = vector.shape_cast %4 : vector<256x128xbf16> to vector<1x256x128xbf16>
    tpu.vector_store %arg3[%c0_4, %c0_5, %c0_6], %7 {strides = array<i32>} : memref<1x256x128xbf16, #tpu.memory_space<vmem>>, vector<1x256x128xbf16>,
    %cst_7 = arith.constant dense<0.000000e+00> : vector<128xf32>
    %8 = vector.multi_reduction <add>, %3, %cst_7 [0] : vector<256x128xf32> to vector<128xf32>
    %9 = vector.shape_cast %8 : vector<128xf32> to vector<1x128xf32>
    %10 = arith.mulf %3, %3 : vector<256x128xf32>
    %cst_8 = arith.constant dense<0.000000e+00> : vector<128xf32>
    %11 = vector.multi_reduction <add>, %10, %cst_8 [0] : vector<256x128xf32> to vector<128xf32>
    %12 = vector.shape_cast %11 : vector<128xf32> to vector<1x128xf32>
    %13 = tpu.iota {dimensions = array<i32: 0>} : vector<8x128xi32>
    %c0_i32 = arith.constant 0 : i32
    %14 = vector.broadcast %c0_i32 : i32 to vector<8x128xi32>
    %15 = arith.cmpi eq, %13, %14 : vector<8x128xi32>
    %cst_9 = arith.constant 0.000000e+00 : f32
    %16 = vector.shape_cast %9 : vector<1x128xf32> to vector<1x128xf32>
    %17 = vector.broadcast %16 : vector<1x128xf32> to vector<8x128xf32>
    %18 = vector.broadcast %cst_9 : f32 to vector<8x128xf32>
    %19 = arith.select %15, %17, %18 : vector<8x128xi1>, vector<8x128xf32>
    %c1_i32 = arith.constant 1 : i32
    %20 = vector.broadcast %c1_i32 : i32 to vector<8x128xi32>
    %21 = arith.cmpi eq, %13, %20 : vector<8x128xi32>
    %cst_10 = arith.constant 0.000000e+00 : f32
    %22 = vector.shape_cast %12 : vector<1x128xf32> to vector<1x128xf32>
    %23 = vector.broadcast %22 : vector<1x128xf32> to vector<8x128xf32>
    %24 = vector.broadcast %cst_10 : f32 to vector<8x128xf32>
    %25 = arith.select %21, %23, %24 : vector<8x128xi1>, vector<8x128xf32>
    %26 = arith.addf %19, %25 : vector<8x128xf32>
    %c0_11 = arith.constant 0 : index
    %c0_12 = arith.constant 0 : index
    %c0_13 = arith.constant 0 : index
    %27 = vector.load %arg4[%c0_11, %c0_12, %c0_13] : memref<1x8x128xf32, #tpu.memory_space<vmem>>, vector<1x8x128xf32>
    %28 = vector.shape_cast %27 : vector<1x8x128xf32> to vector<8x128xf32>
    %29 = vector.shape_cast %26 : vector<8x128xf32> to vector<1x8x128xf32>
    tpu.vector_store %arg4[%c0_11, %c0_12, %c0_13], %29 {strides = array<i32>} : memref<1x8x128xf32, #tpu.memory_space<vmem>>, vector<1x8x128xf32>,
    return
  }
  func.func @transform_0(%arg0: i32) -> (i32, i32, i32) {
    %c0_i32 = arith.constant 0 : i32
    %c0_i32_0 = arith.constant 0 : i32
    %c0_i32_1 = arith.constant 0 : i32
    return %arg0, %c0_i32, %c0_i32_0 : i32, i32, i32
  }
  func.func @transform_1(%arg0: i32) -> (i32, i32) {
    %c0_i32 = arith.constant 0 : i32
    %c0_i32_0 = arith.constant 0 : i32
    %c0_i32_1 = arith.constant 0 : i32
    return %c0_i32, %c0_i32_0 : i32, i32
  }
  func.func @transform_2(%arg0: i32) -> (i32, i32, i32) {
    %c0_i32 = arith.constant 0 : i32
    %c0_i32_0 = arith.constant 0 : i32
    %c0_i32_1 = arith.constant 0 : i32
    return %arg0, %c0_i32, %c0_i32_0 : i32, i32, i32
  }
  func.func @transform_3(%arg0: i32) -> (i32, i32, i32) {
    %c0_i32 = arith.constant 0 : i32
    %c0_i32_0 = arith.constant 0 : i32
    %c0_i32_1 = arith.constant 0 : i32
    return %arg0, %c0_i32, %c0_i32_0 : i32, i32, i32
  }
}

module attributes {stable_mosaic.version = 11 : i64} {
  func.func @_bn_relu_conv3x3_kernel(%arg0: i32, %arg1: memref<1x18x18x128xbf16, #tpu.memory_space<vmem>>, %arg2: memref<1x128xf32, #tpu.memory_space<vmem>>, %arg3: memref<1x128xf32, #tpu.memory_space<vmem>>, %arg4: memref<9x128x128xbf16, #tpu.memory_space<vmem>>, %arg5: memref<1x256x128xbf16, #tpu.memory_space<vmem>>, %arg6: memref<1x8x128xf32, #tpu.memory_space<vmem>>, %arg7: memref<18x18x128xbf16, #tpu.memory_space<vmem>>) attributes {dimension_semantics = [#tpu.dimension_semantics<parallel>], iteration_bounds = array<i64: 2>, scalar_prefetch = 0 : i64, scratch_operands = 1 : i64, tpu.core_type = #tpu.core_type<tc>, window_params = [{transform_indices = @transform_0, window_bounds = array<i64: 1, 18, 18, 128>}, {pipeline_mode = #tpu.pipeline_mode<synchronous>, transform_indices = @transform_1, window_bounds = array<i64: 1, 128>}, {pipeline_mode = #tpu.pipeline_mode<synchronous>, transform_indices = @transform_2, window_bounds = array<i64: 1, 128>}, {pipeline_mode = #tpu.pipeline_mode<synchronous>, transform_indices = @transform_3, window_bounds = array<i64: 9, 128, 128>}, {transform_indices = @transform_4, window_bounds = array<i64: 1, 256, 128>}, {transform_indices = @transform_5, window_bounds = array<i64: 1, 8, 128>}]} {
    %c0 = arith.constant 0 : index
    %c0_0 = arith.constant 0 : index
    %c0_1 = arith.constant 0 : index
    %c0_2 = arith.constant 0 : index
    %0 = vector.load %arg1[%c0, %c0_0, %c0_1, %c0_2] : memref<1x18x18x128xbf16, #tpu.memory_space<vmem>>, vector<1x18x18x128xbf16>
    %1 = vector.shape_cast %0 : vector<1x18x18x128xbf16> to vector<18x18x128xbf16>
    %2 = arith.extf %1 : vector<18x18x128xbf16> to vector<18x18x128xf32>
    %c0_3 = arith.constant 0 : index
    %c0_4 = arith.constant 0 : index
    %3 = vector.load %arg2[%c0_3, %c0_4] : memref<1x128xf32, #tpu.memory_space<vmem>>, vector<1x128xf32>
    %4 = vector.shape_cast %3 : vector<1x128xf32> to vector<1x1x128xf32>
    %5 = vector.broadcast %4 : vector<1x1x128xf32> to vector<18x18x128xf32>
    %6 = arith.mulf %2, %5 : vector<18x18x128xf32>
    %c0_5 = arith.constant 0 : index
    %c0_6 = arith.constant 0 : index
    %7 = vector.load %arg3[%c0_5, %c0_6] : memref<1x128xf32, #tpu.memory_space<vmem>>, vector<1x128xf32>
    %8 = vector.shape_cast %7 : vector<1x128xf32> to vector<1x1x128xf32>
    %9 = vector.broadcast %8 : vector<1x1x128xf32> to vector<18x18x128xf32>
    %10 = arith.addf %6, %9 : vector<18x18x128xf32>
    %cst = arith.constant 0.000000e+00 : f32
    %11 = vector.broadcast %cst : f32 to vector<18x18x128xf32>
    %12 = arith.maximumf %10, %11 : vector<18x18x128xf32>
    %13 = tpu.iota {dimensions = array<i32: 0>} : vector<18x18x128xi32>
    %14 = tpu.iota {dimensions = array<i32: 1>} : vector<18x18x128xi32>
    %c1_i32 = arith.constant 1 : i32
    %15 = vector.broadcast %c1_i32 : i32 to vector<18x18x128xi32>
    %16 = arith.cmpi sge, %13, %15 : vector<18x18x128xi32>
    %c16_i32 = arith.constant 16 : i32
    %17 = vector.broadcast %c16_i32 : i32 to vector<18x18x128xi32>
    %18 = arith.cmpi sle, %13, %17 : vector<18x18x128xi32>
    %19 = arith.andi %16, %18 : vector<18x18x128xi1>
    %c1_i32_7 = arith.constant 1 : i32
    %20 = vector.broadcast %c1_i32_7 : i32 to vector<18x18x128xi32>
    %21 = arith.cmpi sge, %14, %20 : vector<18x18x128xi32>
    %22 = arith.andi %19, %21 : vector<18x18x128xi1>
    %c16_i32_8 = arith.constant 16 : i32
    %23 = vector.broadcast %c16_i32_8 : i32 to vector<18x18x128xi32>
    %24 = arith.cmpi sle, %14, %23 : vector<18x18x128xi32>
    %25 = arith.andi %22, %24 : vector<18x18x128xi1>
    %cst_9 = arith.constant 0.000000e+00 : f32
    %26 = vector.broadcast %cst_9 : f32 to vector<18x18x128xf32>
    %27 = arith.select %25, %12, %26 : vector<18x18x128xi1>, vector<18x18x128xf32>
    %28 = arith.truncf %27 : vector<18x18x128xf32> to vector<18x18x128xbf16>
    %c0_10 = arith.constant 0 : index
    %c0_11 = arith.constant 0 : index
    %c0_12 = arith.constant 0 : index
    %29 = vector.load %arg7[%c0_10, %c0_11, %c0_12] : memref<18x18x128xbf16, #tpu.memory_space<vmem>>, vector<18x18x128xbf16>
    tpu.vector_store %arg7[%c0_10, %c0_11, %c0_12], %28 {strides = array<i32>} : memref<18x18x128xbf16, #tpu.memory_space<vmem>>, vector<18x18x128xbf16>,
    %cst_13 = arith.constant 0.000000e+00 : f32
    %30 = vector.broadcast %cst_13 : f32 to vector<256x128xf32>
    %c0_14 = arith.constant 0 : index
    %c0_15 = arith.constant 0 : index
    %c0_16 = arith.constant 0 : index
    %31 = vector.load %arg7[%c0_14, %c0_15, %c0_16] : memref<18x18x128xbf16, #tpu.memory_space<vmem>>, vector<16x16x128xbf16>
    %32 = vector.shape_cast %31 : vector<16x16x128xbf16> to vector<256x128xbf16>
    %c0_17 = arith.constant 0 : index
    %c0_18 = arith.constant 0 : index
    %c0_19 = arith.constant 0 : index
    %33 = vector.load %arg4[%c0_17, %c0_18, %c0_19] : memref<9x128x128xbf16, #tpu.memory_space<vmem>>, vector<1x128x128xbf16>
    %34 = vector.shape_cast %33 : vector<1x128x128xbf16> to vector<128x128xbf16>
    %cst_20 = arith.constant dense<0.000000e+00> : vector<256x128xf32>
    %35 = tpu.matmul %32, %34, %cst_20 {dimension_numbers = #tpu.dot_dimension_numbers<[1], [0], [0], [1], [0, 0, 1, 1], [], []>} : vector<256x128xbf16>, vector<128x128xbf16>, vector<256x128xf32> -> vector<256x128xf32>
    %36 = arith.addf %30, %35 : vector<256x128xf32>
    %c0_21 = arith.constant 0 : index
    %c1 = arith.constant 1 : index
    %c0_22 = arith.constant 0 : index
    %37 = vector.load %arg7[%c0_21, %c1, %c0_22] : memref<18x18x128xbf16, #tpu.memory_space<vmem>>, vector<16x16x128xbf16>
    %38 = vector.shape_cast %37 : vector<16x16x128xbf16> to vector<256x128xbf16>
    %c1_23 = arith.constant 1 : index
    %c0_24 = arith.constant 0 : index
    %c0_25 = arith.constant 0 : index
    %39 = vector.load %arg4[%c1_23, %c0_24, %c0_25] : memref<9x128x128xbf16, #tpu.memory_space<vmem>>, vector<1x128x128xbf16>
    %40 = vector.shape_cast %39 : vector<1x128x128xbf16> to vector<128x128xbf16>
    %cst_26 = arith.constant dense<0.000000e+00> : vector<256x128xf32>
    %41 = tpu.matmul %38, %40, %cst_26 {dimension_numbers = #tpu.dot_dimension_numbers<[1], [0], [0], [1], [0, 0, 1, 1], [], []>} : vector<256x128xbf16>, vector<128x128xbf16>, vector<256x128xf32> -> vector<256x128xf32>
    %42 = arith.addf %36, %41 : vector<256x128xf32>
    %c0_27 = arith.constant 0 : index
    %c2 = arith.constant 2 : index
    %c0_28 = arith.constant 0 : index
    %43 = vector.load %arg7[%c0_27, %c2, %c0_28] : memref<18x18x128xbf16, #tpu.memory_space<vmem>>, vector<16x16x128xbf16>
    %44 = vector.shape_cast %43 : vector<16x16x128xbf16> to vector<256x128xbf16>
    %c2_29 = arith.constant 2 : index
    %c0_30 = arith.constant 0 : index
    %c0_31 = arith.constant 0 : index
    %45 = vector.load %arg4[%c2_29, %c0_30, %c0_31] : memref<9x128x128xbf16, #tpu.memory_space<vmem>>, vector<1x128x128xbf16>
    %46 = vector.shape_cast %45 : vector<1x128x128xbf16> to vector<128x128xbf16>
    %cst_32 = arith.constant dense<0.000000e+00> : vector<256x128xf32>
    %47 = tpu.matmul %44, %46, %cst_32 {dimension_numbers = #tpu.dot_dimension_numbers<[1], [0], [0], [1], [0, 0, 1, 1], [], []>} : vector<256x128xbf16>, vector<128x128xbf16>, vector<256x128xf32> -> vector<256x128xf32>
    %48 = arith.addf %42, %47 : vector<256x128xf32>
    %c1_33 = arith.constant 1 : index
    %c0_34 = arith.constant 0 : index
    %c0_35 = arith.constant 0 : index
    %49 = vector.load %arg7[%c1_33, %c0_34, %c0_35] : memref<18x18x128xbf16, #tpu.memory_space<vmem>>, vector<16x16x128xbf16>
    %50 = vector.shape_cast %49 : vector<16x16x128xbf16> to vector<256x128xbf16>
    %c3 = arith.constant 3 : index
    %c0_36 = arith.constant 0 : index
    %c0_37 = arith.constant 0 : index
    %51 = vector.load %arg4[%c3, %c0_36, %c0_37] : memref<9x128x128xbf16, #tpu.memory_space<vmem>>, vector<1x128x128xbf16>
    %52 = vector.shape_cast %51 : vector<1x128x128xbf16> to vector<128x128xbf16>
    %cst_38 = arith.constant dense<0.000000e+00> : vector<256x128xf32>
    %53 = tpu.matmul %50, %52, %cst_38 {dimension_numbers = #tpu.dot_dimension_numbers<[1], [0], [0], [1], [0, 0, 1, 1], [], []>} : vector<256x128xbf16>, vector<128x128xbf16>, vector<256x128xf32> -> vector<256x128xf32>
    %54 = arith.addf %48, %53 : vector<256x128xf32>
    %c1_39 = arith.constant 1 : index
    %c1_40 = arith.constant 1 : index
    %c0_41 = arith.constant 0 : index
    %55 = vector.load %arg7[%c1_39, %c1_40, %c0_41] : memref<18x18x128xbf16, #tpu.memory_space<vmem>>, vector<16x16x128xbf16>
    %56 = vector.shape_cast %55 : vector<16x16x128xbf16> to vector<256x128xbf16>
    %c4 = arith.constant 4 : index
    %c0_42 = arith.constant 0 : index
    %c0_43 = arith.constant 0 : index
    %57 = vector.load %arg4[%c4, %c0_42, %c0_43] : memref<9x128x128xbf16, #tpu.memory_space<vmem>>, vector<1x128x128xbf16>
    %58 = vector.shape_cast %57 : vector<1x128x128xbf16> to vector<128x128xbf16>
    %cst_44 = arith.constant dense<0.000000e+00> : vector<256x128xf32>
    %59 = tpu.matmul %56, %58, %cst_44 {dimension_numbers = #tpu.dot_dimension_numbers<[1], [0], [0], [1], [0, 0, 1, 1], [], []>} : vector<256x128xbf16>, vector<128x128xbf16>, vector<256x128xf32> -> vector<256x128xf32>
    %60 = arith.addf %54, %59 : vector<256x128xf32>
    %c1_45 = arith.constant 1 : index
    %c2_46 = arith.constant 2 : index
    %c0_47 = arith.constant 0 : index
    %61 = vector.load %arg7[%c1_45, %c2_46, %c0_47] : memref<18x18x128xbf16, #tpu.memory_space<vmem>>, vector<16x16x128xbf16>
    %62 = vector.shape_cast %61 : vector<16x16x128xbf16> to vector<256x128xbf16>
    %c5 = arith.constant 5 : index
    %c0_48 = arith.constant 0 : index
    %c0_49 = arith.constant 0 : index
    %63 = vector.load %arg4[%c5, %c0_48, %c0_49] : memref<9x128x128xbf16, #tpu.memory_space<vmem>>, vector<1x128x128xbf16>
    %64 = vector.shape_cast %63 : vector<1x128x128xbf16> to vector<128x128xbf16>
    %cst_50 = arith.constant dense<0.000000e+00> : vector<256x128xf32>
    %65 = tpu.matmul %62, %64, %cst_50 {dimension_numbers = #tpu.dot_dimension_numbers<[1], [0], [0], [1], [0, 0, 1, 1], [], []>} : vector<256x128xbf16>, vector<128x128xbf16>, vector<256x128xf32> -> vector<256x128xf32>
    %66 = arith.addf %60, %65 : vector<256x128xf32>
    %c2_51 = arith.constant 2 : index
    %c0_52 = arith.constant 0 : index
    %c0_53 = arith.constant 0 : index
    %67 = vector.load %arg7[%c2_51, %c0_52, %c0_53] : memref<18x18x128xbf16, #tpu.memory_space<vmem>>, vector<16x16x128xbf16>
    %68 = vector.shape_cast %67 : vector<16x16x128xbf16> to vector<256x128xbf16>
    %c6 = arith.constant 6 : index
    %c0_54 = arith.constant 0 : index
    %c0_55 = arith.constant 0 : index
    %69 = vector.load %arg4[%c6, %c0_54, %c0_55] : memref<9x128x128xbf16, #tpu.memory_space<vmem>>, vector<1x128x128xbf16>
    %70 = vector.shape_cast %69 : vector<1x128x128xbf16> to vector<128x128xbf16>
    %cst_56 = arith.constant dense<0.000000e+00> : vector<256x128xf32>
    %71 = tpu.matmul %68, %70, %cst_56 {dimension_numbers = #tpu.dot_dimension_numbers<[1], [0], [0], [1], [0, 0, 1, 1], [], []>} : vector<256x128xbf16>, vector<128x128xbf16>, vector<256x128xf32> -> vector<256x128xf32>
    %72 = arith.addf %66, %71 : vector<256x128xf32>
    %c2_57 = arith.constant 2 : index
    %c1_58 = arith.constant 1 : index
    %c0_59 = arith.constant 0 : index
    %73 = vector.load %arg7[%c2_57, %c1_58, %c0_59] : memref<18x18x128xbf16, #tpu.memory_space<vmem>>, vector<16x16x128xbf16>
    %74 = vector.shape_cast %73 : vector<16x16x128xbf16> to vector<256x128xbf16>
    %c7 = arith.constant 7 : index
    %c0_60 = arith.constant 0 : index
    %c0_61 = arith.constant 0 : index
    %75 = vector.load %arg4[%c7, %c0_60, %c0_61] : memref<9x128x128xbf16, #tpu.memory_space<vmem>>, vector<1x128x128xbf16>
    %76 = vector.shape_cast %75 : vector<1x128x128xbf16> to vector<128x128xbf16>
    %cst_62 = arith.constant dense<0.000000e+00> : vector<256x128xf32>
    %77 = tpu.matmul %74, %76, %cst_62 {dimension_numbers = #tpu.dot_dimension_numbers<[1], [0], [0], [1], [0, 0, 1, 1], [], []>} : vector<256x128xbf16>, vector<128x128xbf16>, vector<256x128xf32> -> vector<256x128xf32>
    %78 = arith.addf %72, %77 : vector<256x128xf32>
    %c2_63 = arith.constant 2 : index
    %c2_64 = arith.constant 2 : index
    %c0_65 = arith.constant 0 : index
    %79 = vector.load %arg7[%c2_63, %c2_64, %c0_65] : memref<18x18x128xbf16, #tpu.memory_space<vmem>>, vector<16x16x128xbf16>
    %80 = vector.shape_cast %79 : vector<16x16x128xbf16> to vector<256x128xbf16>
    %c8 = arith.constant 8 : index
    %c0_66 = arith.constant 0 : index
    %c0_67 = arith.constant 0 : index
    %81 = vector.load %arg4[%c8, %c0_66, %c0_67] : memref<9x128x128xbf16, #tpu.memory_space<vmem>>, vector<1x128x128xbf16>
    %82 = vector.shape_cast %81 : vector<1x128x128xbf16> to vector<128x128xbf16>
    %cst_68 = arith.constant dense<0.000000e+00> : vector<256x128xf32>
    %83 = tpu.matmul %80, %82, %cst_68 {dimension_numbers = #tpu.dot_dimension_numbers<[1], [0], [0], [1], [0, 0, 1, 1], [], []>} : vector<256x128xbf16>, vector<128x128xbf16>, vector<256x128xf32> -> vector<256x128xf32>
    %84 = arith.addf %78, %83 : vector<256x128xf32>
    %85 = arith.truncf %84 : vector<256x128xf32> to vector<256x128xbf16>
    %c0_69 = arith.constant 0 : index
    %c0_70 = arith.constant 0 : index
    %c0_71 = arith.constant 0 : index
    %86 = vector.load %arg5[%c0_69, %c0_70, %c0_71] : memref<1x256x128xbf16, #tpu.memory_space<vmem>>, vector<1x256x128xbf16>
    %87 = vector.shape_cast %86 : vector<1x256x128xbf16> to vector<256x128xbf16>
    %88 = vector.shape_cast %85 : vector<256x128xbf16> to vector<1x256x128xbf16>
    tpu.vector_store %arg5[%c0_69, %c0_70, %c0_71], %88 {strides = array<i32>} : memref<1x256x128xbf16, #tpu.memory_space<vmem>>, vector<1x256x128xbf16>,
    %cst_72 = arith.constant dense<0.000000e+00> : vector<128xf32>
    %89 = vector.multi_reduction <add>, %84, %cst_72 [0] : vector<256x128xf32> to vector<128xf32>
    %90 = vector.shape_cast %89 : vector<128xf32> to vector<1x128xf32>
    %91 = arith.mulf %84, %84 : vector<256x128xf32>
    %cst_73 = arith.constant dense<0.000000e+00> : vector<128xf32>
    %92 = vector.multi_reduction <add>, %91, %cst_73 [0] : vector<256x128xf32> to vector<128xf32>
    %93 = vector.shape_cast %92 : vector<128xf32> to vector<1x128xf32>
    %94 = tpu.iota {dimensions = array<i32: 0>} : vector<8x128xi32>
    %c0_i32 = arith.constant 0 : i32
    %95 = vector.broadcast %c0_i32 : i32 to vector<8x128xi32>
    %96 = arith.cmpi eq, %94, %95 : vector<8x128xi32>
    %cst_74 = arith.constant 0.000000e+00 : f32
    %97 = vector.shape_cast %90 : vector<1x128xf32> to vector<1x128xf32>
    %98 = vector.broadcast %97 : vector<1x128xf32> to vector<8x128xf32>
    %99 = vector.broadcast %cst_74 : f32 to vector<8x128xf32>
    %100 = arith.select %96, %98, %99 : vector<8x128xi1>, vector<8x128xf32>
    %c1_i32_75 = arith.constant 1 : i32
    %101 = vector.broadcast %c1_i32_75 : i32 to vector<8x128xi32>
    %102 = arith.cmpi eq, %94, %101 : vector<8x128xi32>
    %cst_76 = arith.constant 0.000000e+00 : f32
    %103 = vector.shape_cast %93 : vector<1x128xf32> to vector<1x128xf32>
    %104 = vector.broadcast %103 : vector<1x128xf32> to vector<8x128xf32>
    %105 = vector.broadcast %cst_76 : f32 to vector<8x128xf32>
    %106 = arith.select %102, %104, %105 : vector<8x128xi1>, vector<8x128xf32>
    %107 = arith.addf %100, %106 : vector<8x128xf32>
    %c0_77 = arith.constant 0 : index
    %c0_78 = arith.constant 0 : index
    %c0_79 = arith.constant 0 : index
    %108 = vector.load %arg6[%c0_77, %c0_78, %c0_79] : memref<1x8x128xf32, #tpu.memory_space<vmem>>, vector<1x8x128xf32>
    %109 = vector.shape_cast %108 : vector<1x8x128xf32> to vector<8x128xf32>
    %110 = vector.shape_cast %107 : vector<8x128xf32> to vector<1x8x128xf32>
    tpu.vector_store %arg6[%c0_77, %c0_78, %c0_79], %110 {strides = array<i32>} : memref<1x8x128xf32, #tpu.memory_space<vmem>>, vector<1x8x128xf32>,
    return
  }
  func.func @transform_0(%arg0: i32) -> (i32, i32, i32, i32) {
    %c0_i32 = arith.constant 0 : i32
    %c0_i32_0 = arith.constant 0 : i32
    %c0_i32_1 = arith.constant 0 : i32
    %c0_i32_2 = arith.constant 0 : i32
    return %arg0, %c0_i32, %c0_i32_0, %c0_i32_1 : i32, i32, i32, i32
  }
  func.func @transform_1(%arg0: i32) -> (i32, i32) {
    %c0_i32 = arith.constant 0 : i32
    %c0_i32_0 = arith.constant 0 : i32
    %c0_i32_1 = arith.constant 0 : i32
    return %c0_i32, %c0_i32_0 : i32, i32
  }
  func.func @transform_2(%arg0: i32) -> (i32, i32) {
    %c0_i32 = arith.constant 0 : i32
    %c0_i32_0 = arith.constant 0 : i32
    %c0_i32_1 = arith.constant 0 : i32
    return %c0_i32, %c0_i32_0 : i32, i32
  }
  func.func @transform_3(%arg0: i32) -> (i32, i32, i32) {
    %c0_i32 = arith.constant 0 : i32
    %c0_i32_0 = arith.constant 0 : i32
    %c0_i32_1 = arith.constant 0 : i32
    %c0_i32_2 = arith.constant 0 : i32
    return %c0_i32, %c0_i32_0, %c0_i32_1 : i32, i32, i32
  }
  func.func @transform_4(%arg0: i32) -> (i32, i32, i32) {
    %c0_i32 = arith.constant 0 : i32
    %c0_i32_0 = arith.constant 0 : i32
    %c0_i32_1 = arith.constant 0 : i32
    return %arg0, %c0_i32, %c0_i32_0 : i32, i32, i32
  }
  func.func @transform_5(%arg0: i32) -> (i32, i32, i32) {
    %c0_i32 = arith.constant 0 : i32
    %c0_i32_0 = arith.constant 0 : i32
    %c0_i32_1 = arith.constant 0 : i32
    return %arg0, %c0_i32, %c0_i32_0 : i32, i32, i32
  }
}

module attributes {stable_mosaic.version = 11 : i64} {
  func.func @_bn_relu_matmul_stats_kernel(%arg0: i32, %arg1: memref<1x256x128xbf16, #tpu.memory_space<vmem>>, %arg2: memref<1x128xf32, #tpu.memory_space<vmem>>, %arg3: memref<1x128xf32, #tpu.memory_space<vmem>>, %arg4: memref<128x128xbf16, #tpu.memory_space<vmem>>, %arg5: memref<1x256x128xf32, #tpu.memory_space<vmem>>, %arg6: memref<1x8x128xf32, #tpu.memory_space<vmem>>) attributes {dimension_semantics = [#tpu.dimension_semantics<parallel>], iteration_bounds = array<i64: 2>, scalar_prefetch = 0 : i64, scratch_operands = 0 : i64, tpu.core_type = #tpu.core_type<tc>, window_params = [{transform_indices = @transform_0, window_bounds = array<i64: 1, 256, 128>}, {pipeline_mode = #tpu.pipeline_mode<synchronous>, transform_indices = @transform_1, window_bounds = array<i64: 1, 128>}, {pipeline_mode = #tpu.pipeline_mode<synchronous>, transform_indices = @transform_2, window_bounds = array<i64: 1, 128>}, {pipeline_mode = #tpu.pipeline_mode<synchronous>, transform_indices = @transform_3, window_bounds = array<i64: 128, 128>}, {transform_indices = @transform_4, window_bounds = array<i64: 1, 256, 128>}, {transform_indices = @transform_5, window_bounds = array<i64: 1, 8, 128>}]} {
    %c0 = arith.constant 0 : index
    %c0_0 = arith.constant 0 : index
    %c0_1 = arith.constant 0 : index
    %0 = vector.load %arg1[%c0, %c0_0, %c0_1] : memref<1x256x128xbf16, #tpu.memory_space<vmem>>, vector<1x256x128xbf16>
    %1 = vector.shape_cast %0 : vector<1x256x128xbf16> to vector<256x128xbf16>
    %2 = arith.extf %1 : vector<256x128xbf16> to vector<256x128xf32>
    %c0_2 = arith.constant 0 : index
    %c0_3 = arith.constant 0 : index
    %3 = vector.load %arg2[%c0_2, %c0_3] : memref<1x128xf32, #tpu.memory_space<vmem>>, vector<1x128xf32>
    %4 = vector.broadcast %3 : vector<1x128xf32> to vector<256x128xf32>
    %5 = arith.mulf %2, %4 : vector<256x128xf32>
    %c0_4 = arith.constant 0 : index
    %c0_5 = arith.constant 0 : index
    %6 = vector.load %arg3[%c0_4, %c0_5] : memref<1x128xf32, #tpu.memory_space<vmem>>, vector<1x128xf32>
    %7 = vector.broadcast %6 : vector<1x128xf32> to vector<256x128xf32>
    %8 = arith.addf %5, %7 : vector<256x128xf32>
    %cst = arith.constant 0.000000e+00 : f32
    %9 = vector.broadcast %cst : f32 to vector<256x128xf32>
    %10 = arith.maximumf %8, %9 : vector<256x128xf32>
    %11 = arith.truncf %10 : vector<256x128xf32> to vector<256x128xbf16>
    %c0_6 = arith.constant 0 : index
    %c0_7 = arith.constant 0 : index
    %12 = vector.load %arg4[%c0_6, %c0_7] : memref<128x128xbf16, #tpu.memory_space<vmem>>, vector<128x128xbf16>
    %cst_8 = arith.constant dense<0.000000e+00> : vector<256x128xf32>
    %13 = tpu.matmul %11, %12, %cst_8 {dimension_numbers = #tpu.dot_dimension_numbers<[1], [0], [0], [1], [0, 0, 1, 1], [], []>} : vector<256x128xbf16>, vector<128x128xbf16>, vector<256x128xf32> -> vector<256x128xf32>
    %c0_9 = arith.constant 0 : index
    %c0_10 = arith.constant 0 : index
    %c0_11 = arith.constant 0 : index
    %14 = vector.load %arg5[%c0_9, %c0_10, %c0_11] : memref<1x256x128xf32, #tpu.memory_space<vmem>>, vector<1x256x128xf32>
    %15 = vector.shape_cast %14 : vector<1x256x128xf32> to vector<256x128xf32>
    %16 = vector.shape_cast %13 : vector<256x128xf32> to vector<1x256x128xf32>
    tpu.vector_store %arg5[%c0_9, %c0_10, %c0_11], %16 {strides = array<i32>} : memref<1x256x128xf32, #tpu.memory_space<vmem>>, vector<1x256x128xf32>,
    %cst_12 = arith.constant dense<0.000000e+00> : vector<128xf32>
    %17 = vector.multi_reduction <add>, %13, %cst_12 [0] : vector<256x128xf32> to vector<128xf32>
    %18 = vector.shape_cast %17 : vector<128xf32> to vector<1x128xf32>
    %19 = arith.mulf %13, %13 : vector<256x128xf32>
    %cst_13 = arith.constant dense<0.000000e+00> : vector<128xf32>
    %20 = vector.multi_reduction <add>, %19, %cst_13 [0] : vector<256x128xf32> to vector<128xf32>
    %21 = vector.shape_cast %20 : vector<128xf32> to vector<1x128xf32>
    %22 = tpu.iota {dimensions = array<i32: 0>} : vector<8x128xi32>
    %c0_i32 = arith.constant 0 : i32
    %23 = vector.broadcast %c0_i32 : i32 to vector<8x128xi32>
    %24 = arith.cmpi eq, %22, %23 : vector<8x128xi32>
    %cst_14 = arith.constant 0.000000e+00 : f32
    %25 = vector.shape_cast %18 : vector<1x128xf32> to vector<1x128xf32>
    %26 = vector.broadcast %25 : vector<1x128xf32> to vector<8x128xf32>
    %27 = vector.broadcast %cst_14 : f32 to vector<8x128xf32>
    %28 = arith.select %24, %26, %27 : vector<8x128xi1>, vector<8x128xf32>
    %c1_i32 = arith.constant 1 : i32
    %29 = vector.broadcast %c1_i32 : i32 to vector<8x128xi32>
    %30 = arith.cmpi eq, %22, %29 : vector<8x128xi32>
    %cst_15 = arith.constant 0.000000e+00 : f32
    %31 = vector.shape_cast %21 : vector<1x128xf32> to vector<1x128xf32>
    %32 = vector.broadcast %31 : vector<1x128xf32> to vector<8x128xf32>
    %33 = vector.broadcast %cst_15 : f32 to vector<8x128xf32>
    %34 = arith.select %30, %32, %33 : vector<8x128xi1>, vector<8x128xf32>
    %35 = arith.addf %28, %34 : vector<8x128xf32>
    %c0_16 = arith.constant 0 : index
    %c0_17 = arith.constant 0 : index
    %c0_18 = arith.constant 0 : index
    %36 = vector.load %arg6[%c0_16, %c0_17, %c0_18] : memref<1x8x128xf32, #tpu.memory_space<vmem>>, vector<1x8x128xf32>
    %37 = vector.shape_cast %36 : vector<1x8x128xf32> to vector<8x128xf32>
    %38 = vector.shape_cast %35 : vector<8x128xf32> to vector<1x8x128xf32>
    tpu.vector_store %arg6[%c0_16, %c0_17, %c0_18], %38 {strides = array<i32>} : memref<1x8x128xf32, #tpu.memory_space<vmem>>, vector<1x8x128xf32>,
    return
  }
  func.func @transform_0(%arg0: i32) -> (i32, i32, i32) {
    %c0_i32 = arith.constant 0 : i32
    %c0_i32_0 = arith.constant 0 : i32
    %c0_i32_1 = arith.constant 0 : i32
    return %arg0, %c0_i32, %c0_i32_0 : i32, i32, i32
  }
  func.func @transform_1(%arg0: i32) -> (i32, i32) {
    %c0_i32 = arith.constant 0 : i32
    %c0_i32_0 = arith.constant 0 : i32
    %c0_i32_1 = arith.constant 0 : i32
    return %c0_i32, %c0_i32_0 : i32, i32
  }
  func.func @transform_2(%arg0: i32) -> (i32, i32) {
    %c0_i32 = arith.constant 0 : i32
    %c0_i32_0 = arith.constant 0 : i32
    %c0_i32_1 = arith.constant 0 : i32
    return %c0_i32, %c0_i32_0 : i32, i32
  }
  func.func @transform_3(%arg0: i32) -> (i32, i32) {
    %c0_i32 = arith.constant 0 : i32
    %c0_i32_0 = arith.constant 0 : i32
    %c0_i32_1 = arith.constant 0 : i32
    return %c0_i32, %c0_i32_0 : i32, i32
  }
  func.func @transform_4(%arg0: i32) -> (i32, i32, i32) {
    %c0_i32 = arith.constant 0 : i32
    %c0_i32_0 = arith.constant 0 : i32
    %c0_i32_1 = arith.constant 0 : i32
    return %arg0, %c0_i32, %c0_i32_0 : i32, i32, i32
  }
  func.func @transform_5(%arg0: i32) -> (i32, i32, i32) {
    %c0_i32 = arith.constant 0 : i32
    %c0_i32_0 = arith.constant 0 : i32
    %c0_i32_1 = arith.constant 0 : i32
    return %arg0, %c0_i32, %c0_i32_0 : i32, i32, i32
  }
}

module attributes {stable_mosaic.version = 11 : i64} {
  func.func @_bn_add_relu_kernel(%arg0: i32, %arg1: memref<1x256x128xf32, #tpu.memory_space<vmem>>, %arg2: memref<1x128xf32, #tpu.memory_space<vmem>>, %arg3: memref<1x128xf32, #tpu.memory_space<vmem>>, %arg4: memref<1x256x128xf32, #tpu.memory_space<vmem>>, %arg5: memref<1x256x128xf32, #tpu.memory_space<vmem>>) attributes {dimension_semantics = [#tpu.dimension_semantics<parallel>], iteration_bounds = array<i64: 2>, scalar_prefetch = 0 : i64, scratch_operands = 0 : i64, tpu.core_type = #tpu.core_type<tc>, window_params = [{transform_indices = @transform_0, window_bounds = array<i64: 1, 256, 128>}, {pipeline_mode = #tpu.pipeline_mode<synchronous>, transform_indices = @transform_1, window_bounds = array<i64: 1, 128>}, {pipeline_mode = #tpu.pipeline_mode<synchronous>, transform_indices = @transform_2, window_bounds = array<i64: 1, 128>}, {transform_indices = @transform_3, window_bounds = array<i64: 1, 256, 128>}, {transform_indices = @transform_4, window_bounds = array<i64: 1, 256, 128>}]} {
    %c0 = arith.constant 0 : index
    %c0_0 = arith.constant 0 : index
    %c0_1 = arith.constant 0 : index
    %0 = vector.load %arg1[%c0, %c0_0, %c0_1] : memref<1x256x128xf32, #tpu.memory_space<vmem>>, vector<1x256x128xf32>
    %1 = vector.shape_cast %0 : vector<1x256x128xf32> to vector<256x128xf32>
    %c0_2 = arith.constant 0 : index
    %c0_3 = arith.constant 0 : index
    %2 = vector.load %arg2[%c0_2, %c0_3] : memref<1x128xf32, #tpu.memory_space<vmem>>, vector<1x128xf32>
    %3 = vector.broadcast %2 : vector<1x128xf32> to vector<256x128xf32>
    %4 = arith.mulf %1, %3 : vector<256x128xf32>
    %c0_4 = arith.constant 0 : index
    %c0_5 = arith.constant 0 : index
    %5 = vector.load %arg3[%c0_4, %c0_5] : memref<1x128xf32, #tpu.memory_space<vmem>>, vector<1x128xf32>
    %6 = vector.broadcast %5 : vector<1x128xf32> to vector<256x128xf32>
    %7 = arith.addf %4, %6 : vector<256x128xf32>
    %c0_6 = arith.constant 0 : index
    %c0_7 = arith.constant 0 : index
    %c0_8 = arith.constant 0 : index
    %8 = vector.load %arg4[%c0_6, %c0_7, %c0_8] : memref<1x256x128xf32, #tpu.memory_space<vmem>>, vector<1x256x128xf32>
    %9 = vector.shape_cast %8 : vector<1x256x128xf32> to vector<256x128xf32>
    %10 = arith.addf %7, %9 : vector<256x128xf32>
    %cst = arith.constant 0.000000e+00 : f32
    %11 = vector.broadcast %cst : f32 to vector<256x128xf32>
    %12 = arith.maximumf %10, %11 : vector<256x128xf32>
    %c0_9 = arith.constant 0 : index
    %c0_10 = arith.constant 0 : index
    %c0_11 = arith.constant 0 : index
    %13 = vector.load %arg5[%c0_9, %c0_10, %c0_11] : memref<1x256x128xf32, #tpu.memory_space<vmem>>, vector<1x256x128xf32>
    %14 = vector.shape_cast %13 : vector<1x256x128xf32> to vector<256x128xf32>
    %15 = vector.shape_cast %12 : vector<256x128xf32> to vector<1x256x128xf32>
    tpu.vector_store %arg5[%c0_9, %c0_10, %c0_11], %15 {strides = array<i32>} : memref<1x256x128xf32, #tpu.memory_space<vmem>>, vector<1x256x128xf32>,
    return
  }
  func.func @transform_0(%arg0: i32) -> (i32, i32, i32) {
    %c0_i32 = arith.constant 0 : i32
    %c0_i32_0 = arith.constant 0 : i32
    %c0_i32_1 = arith.constant 0 : i32
    return %arg0, %c0_i32, %c0_i32_0 : i32, i32, i32
  }
  func.func @transform_1(%arg0: i32) -> (i32, i32) {
    %c0_i32 = arith.constant 0 : i32
    %c0_i32_0 = arith.constant 0 : i32
    %c0_i32_1 = arith.constant 0 : i32
    return %c0_i32, %c0_i32_0 : i32, i32
  }
  func.func @transform_2(%arg0: i32) -> (i32, i32) {
    %c0_i32 = arith.constant 0 : i32
    %c0_i32_0 = arith.constant 0 : i32
    %c0_i32_1 = arith.constant 0 : i32
    return %c0_i32, %c0_i32_0 : i32, i32
  }
  func.func @transform_3(%arg0: i32) -> (i32, i32, i32) {
    %c0_i32 = arith.constant 0 : i32
    %c0_i32_0 = arith.constant 0 : i32
    %c0_i32_1 = arith.constant 0 : i32
    return %arg0, %c0_i32, %c0_i32_0 : i32, i32, i32
  }
  func.func @transform_4(%arg0: i32) -> (i32, i32, i32) {
    %c0_i32 = arith.constant 0 : i32
    %c0_i32_0 = arith.constant 0 : i32
    %c0_i32_1 = arith.constant 0 : i32
    return %arg0, %c0_i32, %c0_i32_0 : i32, i32, i32
  }
}

</mosaic_0001>

<bundles_post_ra>
// kernel: bottleneck_forward.4
= control target key start
LH: loop header
LB: loop body
LE: loop exit
PB: predicated region body
PF: predicated region fallthrough
CT: control target
= control target key end

     0   :  { %s1241_s12 = smov 0   ;;  %s1419_s0 = inlined_call_operand.vmem [shape: bf16[2,256,128], index: 0, kind: input, shape index: {}]   ;;  %s1420_s1 = inlined_call_operand.vmem [shape: bf16[128,128], index: 1, kind: input, shape index: {}]   ;;  %s1421_s2 = inlined_call_operand.vmem [shape: bf16[2,256,128], index: 2, kind: output, shape index: {0}]   ;;  %s1422_s3 = inlined_call_operand.vmem [shape: f32[2,8,128], index: 3, kind: output, shape index: {1}]  }
   0x1 LB: > { %s896_s13 = sadd.s32 4294967295, %s1219_s12   ;;  %p900_p0 = scmp.ge.s32.totalorder %s1219_s12, 1  ;;  %s1219_s12 = sphi %s1241_s12, %s14_s12  }
   0x2   : > { %p140_p1 = scmp.lt.s32.totalorder %s1219_s12, 3 }
   0x4   : > { %p141_p2 = pnand %p900_p0, %p140_p1 }
   0x5   : > { %p168_p3 = scmp.lt.s32.totalorder (!%p141_p2), %s896_s13, 1 }
   0x6   : > { %144 = sbr.rel (%p141_p2) target bundleno = 323 (0x143), region = 28 }
   0xb   : > { %v1189_v0 = vld [vmem:[%s1420_s1 + $0x38] sm:$0xff]   ;;  %v1190_v1 = vld [vmem:[%s1420_s1 + $0x30] sm:$0xff]   ;;  %s1424_s13 = smov (!%p168_p3, %s896_s13), 1  ;;  %v1191_v2 = vld [vmem:[%s1420_s1 + $0x28] sm:$0xff]  }
   0xc   : > { %1117 = vmatprep.subr.bf16.mxu0 %v1189_v0  ;;  %1165 = vmatprep.subr.bf16.mxu1 %v1189_v0  ;;  %s964_s20 = sshll.u32 %s1424_s13, 7  ;;  %v1192_v3 = vld [vmem:[%s1420_s1 + $0x20] sm:$0xff]   ;;  %v1193_v5 = vld [vmem:[%s1420_s1 + $0x18] sm:$0xff]   ;;  %v1194_v6 = vld [vmem:[%s1420_s1 + $0x10] sm:$0xff]   ;;  %s905_s10 = sshll.u32 %s1424_s13, 3 }
   0xd   : > { %1118 = vmatpush3.bf16.msra.mxu0 %v1189_v0  ;;  %1173 = vmatpush3.bf16.msra.mxu1 %v1189_v0  ;;  %s1266_s23 = scalar_lea.vmem %s1419_s0, %s964_s20  ;;  %v1195_v8 = vld [vmem:[%s1420_s1 + $0x8] sm:$0xff]   ;;  %v1196_v9 = vld [vmem:[%s1420_s1] sm:$0xff]   ;;  %s1308_s9 = scalar_lea.vmem %s1421_s2, %s964_s20 }
   0xe   : > { %1119 = vmatprep.subr.bf16.mxu0 %v1190_v1  ;;  %1166 = vmatprep.subr.bf16.mxu1 %v1190_v1  ;;  %v1197_v4 = vld [vmem:[%s1266_s23] sm:$0xff]   ;;  %v1198_v10 = vld [vmem:[%s1266_s23 + $0x8] sm:$0xff]   ;;  %v1199_v12 = vld [vmem:[%s1266_s23 + $0x10] sm:$0xff]   ;;  %s181_s15 = scalar_lea.vmem %s1422_s3, %s905_s10 }
   0xf   : > { %1133 = vmatprep.mubr.bf16.mxu0 %v1197_v4  ;;  %v1205_v7 = vld [vmem:[%s1266_s23 + $0x40] sm:$0xff]   ;;  %v1206_v11 = vld [vmem:[%s1266_s23 + $0x48] sm:$0xff]   ;;  %v1207_v13 = vld [vmem:[%s1266_s23 + $0x50] sm:$0xff]  }
  0x10   : > { %1149 = vmatprep.mubr.bf16.mxu1 %v1205_v7  ;;  %v1200_v14 = vld [vmem:[%s1266_s23 + $0x18] sm:$0xff]   ;;  %v1201_v16 = vld [vmem:[%s1266_s23 + $0x20] sm:$0xff]   ;;  %v1202_v18 = vld [vmem:[%s1266_s23 + $0x28] sm:$0xff]  }
  0x11   : > { %1120 = vmatpush3.bf16.msra.mxu0 %v1190_v1  ;;  %1174 = vmatpush3.bf16.msra.mxu1 %v1190_v1  ;;  %v1208_v15 = vld [vmem:[%s1266_s23 + $0x58] sm:$0xff]   ;;  %v1209_v17 = vld [vmem:[%s1266_s23 + $0x60] sm:$0xff]   ;;  %v1210_v19 = vld [vmem:[%s1266_s23 + $0x68] sm:$0xff]  }
  0x12   : > { %1121 = vmatprep.subr.bf16.mxu0 %v1191_v2  ;;  %1167 = vmatprep.subr.bf16.mxu1 %v1191_v2  ;;  %v1203_v20 = vld [vmem:[%s1266_s23 + $0x30] sm:$0xff]   ;;  %v1204_v22 = vld [vmem:[%s1266_s23 + $0x38] sm:$0xff]  }
  0x13   : > { %v1211_v21 = vld [vmem:[%s1266_s23 + $0x70] sm:$0xff]   ;;  %v1212_v23 = vld [vmem:[%s1266_s23 + $0x78] sm:$0xff]  }
  0x15   : > { %1122 = vmatpush3.bf16.msra.mxu0 %v1191_v2  ;;  %1175 = vmatpush3.bf16.msra.mxu1 %v1191_v2 }
  0x16   : > { %1123 = vmatprep.subr.bf16.mxu0 %v1192_v3  ;;  %1168 = vmatprep.subr.bf16.mxu1 %v1192_v3 }
  0x19   : > { %1124 = vmatpush3.bf16.msra.mxu0 %v1192_v3  ;;  %1176 = vmatpush3.bf16.msra.mxu1 %v1192_v3 }
  0x1a   : > { %1125 = vmatprep.subr.bf16.mxu0 %v1193_v5  ;;  %1169 = vmatprep.subr.bf16.mxu1 %v1193_v5 }
  0x1d   : > { %1126 = vmatpush3.bf16.msra.mxu0 %v1193_v5  ;;  %1177 = vmatpush3.bf16.msra.mxu1 %v1193_v5 }
  0x1e   : > { %1127 = vmatprep.subr.bf16.mxu0 %v1194_v6  ;;  %1170 = vmatprep.subr.bf16.mxu1 %v1194_v6 }
  0x21   : > { %1128 = vmatpush3.bf16.msra.mxu0 %v1194_v6  ;;  %1178 = vmatpush3.bf16.msra.mxu1 %v1194_v6 }
  0x22   : > { %1129 = vmatprep.subr.bf16.mxu0 %v1195_v8  ;;  %1171 = vmatprep.subr.bf16.mxu1 %v1195_v8 }
  0x25   : > { %1130 = vmatpush3.bf16.msra.mxu0 %v1195_v8  ;;  %1179 = vmatpush3.bf16.msra.mxu1 %v1195_v8 }
  0x26   : > { %1131 = vmatprep.subr.bf16.mxu0 %v1196_v9  ;;  %1172 = vmatprep.subr.bf16.mxu1 %v1196_v9 }
  0x29   : > { %1132 = vmatpush3.bf16.msra.mxu0 %v1196_v9  ;;  %1180 = vmatpush3.bf16.msra.mxu1 %v1196_v9 }
  0x2c   : > { %1134 = vmatmul.mubr.bf16.vlgmr.msra.gmra.mxu0 %v1198_v10  ;;  %1150 = vmatmul.mubr.bf16.vlgmr.msra.gmra.mxu1 %v1206_v11 }
  0x2d   : > { %1137 = vmatprep.mubr.bf16.mxu0 %v1199_v12  ;;  %1153 = vmatprep.mubr.bf16.mxu1 %v1207_v13 }
  0x34   : > { %1138 = vmatmul.mubr.bf16.gmra.mxu0 %v1200_v14  ;;  %1154 = vmatmul.mubr.bf16.gmra.mxu1 %v1208_v15 }
  0x35   : > { %1141 = vmatprep.mubr.bf16.mxu0 %v1201_v16  ;;  %1157 = vmatprep.mubr.bf16.mxu1 %v1209_v17 }
  0x3c   : > { %1142 = vmatmul.mubr.bf16.gmra.mxu0 %v1202_v18  ;;  %1158 = vmatmul.mubr.bf16.gmra.mxu1 %v1210_v19 }
  0x3d   : > { %1145 = vmatprep.mubr.bf16.mxu0 %v1203_v20  ;;  %1161 = vmatprep.mubr.bf16.mxu1 %v1211_v21 }
  0x44   : > { %1146 = vmatmul.mubr.bf16.gmra.mxu0 %v1204_v22  ;;  %1162 = vmatmul.mubr.bf16.gmra.mxu1 %v1212_v23 }
  0xec   : > { %v1135_v24 = vpop.f32.mrf.mxu0  ;;  %v1299_v25 = vpop.f32.mrf.mxu1 }
  0xed   : > { %v735_v41 = vmul.f32 %v1135_v24, %v1135_v24 }
  0xee   : > { %v409_v26 = vpop.f32.mrf.mxu0  ;;  %v1301_v27 = vpop.f32.mrf.mxu1 }
  0xef   : > { %v733_v32 = vmul.f32 %v409_v26, %v409_v26 }
  0xf0   : > { %v1136_v28 = vpop.f32.mrf.mxu0  ;;  %v1310_v29 = vpop.f32.mrf.mxu1 }
  0xf1   : > { %v1006_v30 = vpack.c.bf16 %v1136_v28, %v1135_v24  ;;  %v1046_v31 = vpack.c.bf16 %v1310_v29, %v1299_v25  ;;  %v736_v46 = vmul.f32 %v1136_v28, %v1136_v28 }
  0xf2   : > { %v412_v33 = vpop.f32.mrf.mxu0  ;;  %v1314_v34 = vpop.f32.mrf.mxu1 }
  0xf3   : > { %1078 = vst [vmem:[%s1308_s9 + $0x8] sm:$0xff] %v1006_v30   ;;  %v1001_v35 = vpack.c.bf16 %v412_v33, %v409_v26  ;;  %v696_v36 = vadd.f32 %v412_v33, %v409_v26  ;;  %v734_v37 = vmul.f32 %v412_v33, %v412_v33  ;;  %1086 = vst [vmem:[%s1308_s9 + $0x48] sm:$0xff] %v1046_v31  }
  0xf4   : > { %v1041_v38 = vpack.c.bf16 %v1314_v34, %v1301_v27  ;;  %v1139_v39 = vpop.f32.mrf.mxu0  ;;  %v1320_v40 = vpop.f32.mrf.mxu1 }
  0xf5   : > { %1002 = vst [vmem:[%s1308_s9] sm:$0xff] %v1001_v35   ;;  %v697_v42 = vadd.f32 %v1135_v24, %v696_v36  ;;  %v765_v43 = vadd.f32 %v734_v37, %v733_v32  ;;  %v739_v1 = vmul.f32 %v1139_v39, %v1139_v39 }
  0xf6   : > { %1085 = vst [vmem:[%s1308_s9 + $0x40] sm:$0xff] %v1041_v38   ;;  %v425_v44 = vpop.f32.mrf.mxu0  ;;  %v1324_v45 = vpop.f32.mrf.mxu1 }
  0xf7   : > { %v766_v47 = vadd.f32 %v765_v43, %v735_v41  ;;  %v698_v48 = vadd.f32 %v1136_v28, %v697_v42  ;;  %v737_v52 = vmul.f32 %v425_v44, %v425_v44 }
  0xf8   : > { %v1140_v49 = vpop.f32.mrf.mxu0  ;;  %v1326_v50 = vpop.f32.mrf.mxu1 }
  0xf9   : > { %v699_v51 = vadd.f32 %v698_v48, %v425_v44  ;;  %v767_v53 = vadd.f32 %v766_v47, %v736_v46  ;;  %v1016_v54 = vpack.c.bf16 %v1140_v49, %v1139_v39  ;;  %v1056_v56 = vpack.c.bf16 %v1326_v50, %v1320_v40 }
  0xfa   : > { %v428_v55 = vpop.f32.mrf.mxu0  ;;  %v1330_v57 = vpop.f32.mrf.mxu1  ;;  %v740_v6 = vmul.f32 %v1140_v49, %v1140_v49 }
  0xfb   : > { %v768_v58 = vadd.f32 %v767_v53, %v737_v52  ;;  %1080 = vst [vmem:[%s1308_s9 + $0x18] sm:$0xff] %v1016_v54   ;;  %v1011_v59 = vpack.c.bf16 %v428_v55, %v425_v44  ;;  %v700_v60 = vadd.f32 %v699_v51, %v428_v55  ;;  %v738_v61 = vmul.f32 %v428_v55, %v428_v55 }
  0xfc   : > { %v1143_v62 = vpop.f32.mrf.mxu0  ;;  %1088 = vst [vmem:[%s1308_s9 + $0x58] sm:$0xff] %v1056_v56   ;;  %v1051_v63 = vpack.c.bf16 %v1330_v57, %v1324_v45  ;;  %v1336_v0 = vpop.f32.mrf.mxu1 }
  0xfd   : > { %1079 = vst [vmem:[%s1308_s9 + $0x10] sm:$0xff] %v1011_v59   ;;  %v701_v2 = vadd.f32 %v1139_v39, %v700_v60  ;;  %v769_v3 = vadd.f32 %v768_v58, %v738_v61  ;;  %v743_v26 = vmul.f32 %v1143_v62, %v1143_v62  ;;  %v749_v61 = vmul.f32 %v1301_v27, %v1301_v27 }
  0xfe   : > { %v441_v4 = vpop.f32.mrf.mxu0  ;;  %1087 = vst [vmem:[%s1308_s9 + $0x50] sm:$0xff] %v1051_v63   ;;  %v1340_v5 = vpop.f32.mrf.mxu1 }
  0xff   : > { %v770_v7 = vadd.f32 %v769_v3, %v739_v1  ;;  %v702_v8 = vadd.f32 %v1140_v49, %v701_v2  ;;  %v741_v12 = vmul.f32 %v441_v4, %v441_v4  ;;  %v750_v2 = vmul.f32 %v1314_v34, %v1314_v34 }
 0x100   : > { %v1144_v9 = vpop.f32.mrf.mxu0  ;;  %v1342_v10 = vpop.f32.mrf.mxu1 }
 0x101   : > { %v703_v11 = vadd.f32 %v702_v8, %v441_v4  ;;  %v771_v13 = vadd.f32 %v770_v7, %v740_v6  ;;  %v1026_v14 = vpack.c.bf16 %v1144_v9, %v1143_v62  ;;  %v1066_v16 = vpack.c.bf16 %v1342_v10, %v1336_v0 }
 0x102   : > { %v444_v15 = vpop.f32.mrf.mxu0  ;;  %v1346_v17 = vpop.f32.mrf.mxu1  ;;  %v744_v33 = vmul.f32 %v1144_v9, %v1144_v9  ;;  %v752_v8 = vmul.f32 %v1310_v29, %v1310_v29 }
 0x103   : > { %v772_v18 = vadd.f32 %v771_v13, %v741_v12  ;;  %1082 = vst [vmem:[%s1308_s9 + $0x28] sm:$0xff] %v1026_v14   ;;  %v1021_v19 = vpack.c.bf16 %v444_v15, %v441_v4  ;;  %v704_v20 = vadd.f32 %v703_v11, %v444_v15  ;;  %v742_v21 = vmul.f32 %v444_v15, %v444_v15 }
 0x104   : > { %v1147_v22 = vpop.f32.mrf.mxu0  ;;  %1090 = vst [vmem:[%s1308_s9 + $0x68] sm:$0xff] %v1066_v16   ;;  %v1061_v23 = vpack.c.bf16 %v1346_v17, %v1340_v5  ;;  %v1352_v24 = vpop.f32.mrf.mxu1  ;;  %v751_v4 = vmul.f32 %v1299_v25, %v1299_v25  ;;  %v753_v12 = vmul.f32 %v1324_v45, %v1324_v45  ;;  %v754_v15 = vmul.f32 %v1330_v57, %v1330_v57 }
 0x105   : > { %1081 = vst [vmem:[%s1308_s9 + $0x20] sm:$0xff] %v1021_v19   ;;  %v705_v28 = vadd.f32 %v1143_v62, %v704_v20  ;;  %v773_v30 = vadd.f32 %v772_v18, %v742_v21  ;;  %v747_v54 = vmul.f32 %v1147_v22, %v1147_v22  ;;  %v757_v21 = vmul.f32 %v1340_v5, %v1340_v5 }
 0x106   : > { %v457_v31 = vpop.f32.mrf.mxu0  ;;  %1089 = vst [vmem:[%s1308_s9 + $0x60] sm:$0xff] %v1061_v23   ;;  %v1356_v32 = vpop.f32.mrf.mxu1 }
 0x107   : > { %v774_v35 = vadd.f32 %v773_v30, %v743_v26  ;;  %v706_v36 = vadd.f32 %v1144_v9, %v705_v28  ;;  %v745_v41 = vmul.f32 %v457_v31, %v457_v31  ;;  %v758_v26 = vmul.f32 %v1346_v17, %v1346_v17 }
 0x108   : > { %v1148_v37 = vpop.f32.mrf.mxu0  ;;  %v1358_v38 = vpop.f32.mrf.mxu1 }
 0x109   : > { %v707_v39 = vadd.f32 %v706_v36, %v457_v31  ;;  %v775_v42 = vadd.f32 %v774_v35, %v744_v33  ;;  %v1036_v43 = vpack.c.bf16 %v1148_v37, %v1147_v22  ;;  %v1076_v46 = vpack.c.bf16 %v1358_v38, %v1352_v24 }
 0x10a   : > { %v460_v44 = vpop.f32.mrf.mxu0  ;;  %v524_v47 = vpop.f32.mrf.mxu1  ;;  %v748_v58 = vmul.f32 %v1148_v37, %v1148_v37  ;;  %v761_v35 = vmul.f32 %v1356_v32, %v1356_v32 }
 0x10b   : > { %v776_v48 = vadd.f32 %v775_v42, %v745_v41  ;;  %1084 = vst [vmem:[%s1308_s9 + $0x38] sm:$0xff] %v1036_v43   ;;  %v1031_v49 = vpack.c.bf16 %v460_v44, %v457_v31  ;;  %v708_v51 = vadd.f32 %v707_v39, %v460_v44  ;;  %v746_v52 = vmul.f32 %v460_v44, %v460_v44 }
 0x10c   : > { %1092 = vst [vmem:[%s1308_s9 + $0x78] sm:$0xff] %v1076_v46   ;;  %v1071_v53 = vpack.c.bf16 %v524_v47, %v1356_v32  ;;  %v762_v39 = vmul.f32 %v524_v47, %v524_v47  ;;  %v763_v41 = vmul.f32 %v1352_v24, %v1352_v24  ;;  %v764_v43 = vmul.f32 %v1358_v38, %v1358_v38 }
 0x10d   : > { %1083 = vst [vmem:[%s1308_s9 + $0x30] sm:$0xff] %v1031_v49   ;;  %v709_v55 = vadd.f32 %v1147_v22, %v708_v51  ;;  %v777_v56 = vadd.f32 %v776_v48, %v746_v52  ;;  %v802_v51 = vlaneseq }
 0x10e   : > { %1091 = vst [vmem:[%s1308_s9 + $0x70] sm:$0xff] %v1071_v53  }
 0x10f   : > { %v710_v59 = vadd.f32 %v1148_v37, %v709_v55  ;;  %v778_v60 = vadd.f32 %v777_v56, %v747_v54  ;;  %v803_v55 = vshrl.u32 %v802_v51, 7 }
 0x111   : > { %v779_v62 = vadd.f32 %v778_v60, %v748_v58  ;;  %v711_v63 = vadd.f32 %v710_v59, %v1301_v27  ;;  %vm804_vm0 = vcmp.eq.s32.totalorder %v803_v55, 0  ;;  %vm806_vm1 = vcmp.eq.s32.totalorder %v803_v55, 1 }
 0x113   : > { %v712_v1 = vadd.f32 %v711_v63, %v1314_v34  ;;  %v780_v3 = vadd.f32 %v779_v62, %v749_v61 }
 0x115   : > { %v713_v6 = vadd.f32 %v1299_v25, %v712_v1  ;;  %v781_v7 = vadd.f32 %v780_v3, %v750_v2  ;;  %v755_v25 = vmul.f32 %v1320_v40, %v1320_v40 }
 0x117   : > { %v782_v9 = vadd.f32 %v781_v7, %v751_v4  ;;  %v714_v11 = vadd.f32 %v1310_v29, %v713_v6  ;;  %v756_v29 = vmul.f32 %v1326_v50, %v1326_v50 }
 0x119   : > { %v715_v27 = vadd.f32 %v714_v11, %v1324_v45  ;;  %v783_v13 = vadd.f32 %v782_v9, %v752_v8 }
 0x11b   : > { %v784_v34 = vadd.f32 %v783_v13, %v753_v12  ;;  %v716_v14 = vadd.f32 %v715_v27, %v1330_v57 }
 0x11d   : > { %v717_v16 = vadd.f32 %v1320_v40, %v716_v14  ;;  %v785_v18 = vadd.f32 %v784_v34, %v754_v15  ;;  %v759_v40 = vmul.f32 %v1336_v0, %v1336_v0 }
 0x11f   : > { %v786_v19 = vadd.f32 %v785_v18, %v755_v25  ;;  %v718_v20 = vadd.f32 %v1326_v50, %v717_v16  ;;  %v760_v50 = vmul.f32 %v1342_v10, %v1342_v10 }
 0x121   : > { %v719_v45 = vadd.f32 %v718_v20, %v1340_v5  ;;  %v787_v22 = vadd.f32 %v786_v19, %v756_v29 }
 0x123   : > { %v788_v23 = vadd.f32 %v787_v22, %v757_v21  ;;  %v720_v57 = vadd.f32 %v719_v45, %v1346_v17 }
 0x125   : > { %v721_v28 = vadd.f32 %v1336_v0, %v720_v57  ;;  %v789_v30 = vadd.f32 %v788_v23, %v758_v26 }
 0x127   : > { %v790_v31 = vadd.f32 %v789_v30, %v759_v40  ;;  %v722_v33 = vadd.f32 %v1342_v10, %v721_v28 }
 0x129   : > { %v723_v5 = vadd.f32 %v722_v33, %v1356_v32  ;;  %v791_v36 = vadd.f32 %v790_v31, %v760_v50 }
 0x12b   : > { %v792_v37 = vadd.f32 %v791_v36, %v761_v35  ;;  %v724_v17 = vadd.f32 %v723_v5, %v524_v47 }
 0x12d   : > { %v725_v0 = vadd.f32 %v1352_v24, %v724_v17  ;;  %v793_v42 = vadd.f32 %v792_v37, %v762_v39 }
 0x12f   : > { %v726_v10 = vadd.f32 %v1358_v38, %v725_v0  ;;  %v794_v44 = vadd.f32 %v793_v42, %v763_v41 }
 0x131   : > { %v727_v46 = vrot.slane %v726_v10, 4  ;;  %v795_v48 = vadd.f32 %v794_v44, %v764_v43 }
 0x133   : > { %v728_v32 = vadd.f32 %v727_v46, %v726_v10  ;;  %v796_v49 = vrot.slane %v795_v48, 4 }
 0x135   : > { %v729_v52 = vrot.slane %v728_v32, 2  ;;  %v797_v47 = vadd.f32 %v796_v49, %v795_v48 }
 0x137   : > { %v730_v53 = vadd.f32 %v729_v52, %v728_v32  ;;  %v798_v54 = vrot.slane %v797_v47, 2 }
 0x139   : > { %v731_v56 = vrot.slane %v730_v53, 1  ;;  %v799_v24 = vadd.f32 %v798_v54, %v797_v47 }
 0x13b   : > { %v732_v58 = vadd.f32 %v731_v56, %v730_v53  ;;  %v800_v59 = vrot.slane %v799_v24, 1 }
 0x13d   : > { %v801_v38 = vadd.f32 %v800_v59, %v799_v24  ;;  %v805_v60 = vsel %vm804_vm0, %v732_v58, 0.0 }
 0x13f   : > { %v807_v61 = vsel %vm806_vm1, %v801_v38, 0.0 }
 0x140   : > { %v808_v62 = vadd.f32 %v807_v61, %v805_v60 }
 0x142   : > { %809 = vst [vmem:[%s181_s15] sm:$0xff] %v808_v62 }
 0x143 PF: > { %s14_s12 = sadd.s32 1, %s1219_s12  }
 0x144   : > { %p11_p4 = scmp.ge.s32.totalorder %s14_s12, 4  }
 0x146   :  { %13 = sbr.rel (!%p11_p4) target bundleno = 1 (0x1), region = 70 }

// kernel: bottleneck_forward.7
= control target key start
LH: loop header
LB: loop body
LE: loop exit
PB: predicated region body
PF: predicated region fallthrough
CT: control target
= control target key end

     0   :  { %s582_s15 = smov 0   ;;  %s850_s0 = inlined_call_operand.vmem [shape: f32[2,256,128], index: 0, kind: input, shape index: {}]   ;;  %s851_s1 = inlined_call_operand.vmem [shape: f32[1,128], index: 1, kind: input, shape index: {}]   ;;  %s852_s2 = inlined_call_operand.vmem [shape: f32[1,128], index: 2, kind: input, shape index: {}]   ;;  %s853_s3 = inlined_call_operand.vmem [shape: f32[2,256,128], index: 3, kind: input, shape index: {}, may-alias: {3,4}]   ;;  %s854_s4 = inlined_call_operand.vmem [shape: f32[2,256,128], index: 4, kind: output, shape index: {}, may-alias: {3,4}]  }
   0x1 LB: > { %s523_s16 = sadd.s32 4294967295, %s555_s15   ;;  %p527_p0 = scmp.ge.s32.totalorder %s555_s15, 1  ;;  %s555_s15 = sphi %s582_s15, %s14_s15  }
   0x2   : > { %p172_p1 = scmp.lt.s32.totalorder %s555_s15, 3 }
   0x4   : > { %p173_p2 = pnand %p527_p0, %p172_p1 }
   0x5   : > { %p203_p3 = scmp.lt.s32.totalorder (!%p173_p2), %s523_s16, 1 }
   0x6   : > { %176 = sbr.rel (%p173_p2) target bundleno = 62 (0x3e), region = 36 }
   0xb   : > { %s856_s16 = smov (!%p203_p3, %s523_s16), 1  ;;  %v593_v0 = vld [vmem:[%s851_s1] ss:$0 sm:$0xff] }
   0xc   : > { %s538_s17 = sshll.u32 %s856_s16, 8  ;;  %v609_v2 = vld [vmem:[%s852_s2] ss:$0 sm:$0xff] }
   0xd   : > { %s598_s22 = scalar_lea.vmem %s850_s0, %s538_s17  ;;  %s603_s25 = scalar_lea.vmem %s853_s3, %s538_s17 }
   0xe   : > { %v218_v1 = vld [vmem:[%s598_s22] sm:$0xff]  ;;  %s617_s30 = scalar_lea.vmem %s854_s4, %s538_s17  ;;  %v329_v8 = vld [vmem:[%s603_s25 + $0x8] sm:$0xff]  ;;  %v330_v9 = vld [vmem:[%s603_s25 + $0x10] sm:$0xff] }
   0xf   : > { %v257_v3 = vmul.f32 %v593_v0, %v218_v1  ;;  %v328_v4 = vld [vmem:[%s603_s25] sm:$0xff]  ;;  %v331_v10 = vld [vmem:[%s603_s25 + $0x18] sm:$0xff]  ;;  %v333_v12 = vld [vmem:[%s603_s25 + $0x28] sm:$0xff] }
  0x10   : > { %v332_v11 = vld [vmem:[%s603_s25 + $0x20] sm:$0xff]  ;;  %v334_v13 = vld [vmem:[%s603_s25 + $0x30] sm:$0xff]  ;;  %v335_v14 = vld [vmem:[%s603_s25 + $0x38] sm:$0xff] }
  0x11   : > { %v296_v5 = vadd.f32 %v609_v2, %v257_v3  ;;  %v627_v15 = vld [vmem:[%s603_s25 + $0x40] sm:$0xff]  ;;  %v630_v16 = vld [vmem:[%s603_s25 + $0x48] sm:$0xff]  ;;  %v633_v17 = vld [vmem:[%s603_s25 + $0x50] sm:$0xff] }
  0x12   : > { %v636_v18 = vld [vmem:[%s603_s25 + $0x58] sm:$0xff]  ;;  %v639_v19 = vld [vmem:[%s603_s25 + $0x60] sm:$0xff]  ;;  %v642_v20 = vld [vmem:[%s603_s25 + $0x68] sm:$0xff] }
  0x13   : > { %v360_v6 = vadd.f32 %v328_v4, %v296_v5  ;;  %v645_v21 = vld [vmem:[%s603_s25 + $0x70] sm:$0xff]  ;;  %v648_v22 = vld [vmem:[%s603_s25 + $0x78] sm:$0xff]  ;;  %v651_v23 = vld [vmem:[%s603_s25 + $0x80] sm:$0xff] }
  0x14   : > { %v654_v24 = vld [vmem:[%s603_s25 + $0x88] sm:$0xff]  ;;  %v657_v25 = vld [vmem:[%s603_s25 + $0x90] sm:$0xff]  ;;  %v660_v26 = vld [vmem:[%s603_s25 + $0x98] sm:$0xff] }
  0x15   : > { %v392_v7 = vmax.f32 %v360_v6, 0.0  ;;  %v663_v27 = vld [vmem:[%s603_s25 + $0xa0] sm:$0xff]  ;;  %v666_v28 = vld [vmem:[%s603_s25 + $0xa8] sm:$0xff]  ;;  %v669_v29 = vld [vmem:[%s603_s25 + $0xb0] sm:$0xff] }
  0x16   : > { %v672_v30 = vld [vmem:[%s603_s25 + $0xb8] sm:$0xff]  ;;  %v675_v31 = vld [vmem:[%s603_s25 + $0xc0] sm:$0xff]  ;;  %v678_v32 = vld [vmem:[%s603_s25 + $0xc8] sm:$0xff] }
  0x17   : > { %v681_v33 = vld [vmem:[%s603_s25 + $0xd0] sm:$0xff]  ;;  %v684_v34 = vld [vmem:[%s603_s25 + $0xd8] sm:$0xff]  ;;  %v687_v35 = vld [vmem:[%s603_s25 + $0xe0] sm:$0xff] }
  0x18   : > { %v690_v36 = vld [vmem:[%s603_s25 + $0xe8] sm:$0xff]  ;;  %v693_v37 = vld [vmem:[%s603_s25 + $0xf0] sm:$0xff]  ;;  %v696_v38 = vld [vmem:[%s603_s25 + $0xf8] sm:$0xff] }
  0x19   : > { %424 = vst [vmem:[%s617_s30] sm:$0xff] %v392_v7  ;;  %v219_v39 = vld [vmem:[%s598_s22 + $0x8] sm:$0xff]  ;;  %v220_v40 = vld [vmem:[%s598_s22 + $0x10] sm:$0xff]  ;;  %v221_v41 = vld [vmem:[%s598_s22 + $0x18] sm:$0xff] }
  0x1a   : > { %v258_v42 = vmul.f32 %v593_v0, %v219_v39  ;;  %v259_v43 = vmul.f32 %v593_v0, %v220_v40  ;;  %v260_v44 = vmul.f32 %v593_v0, %v221_v41  ;;  %v222_v45 = vld [vmem:[%s598_s22 + $0x20] sm:$0xff]  ;;  %v223_v46 = vld [vmem:[%s598_s22 + $0x28] sm:$0xff]  ;;  %v224_v47 = vld [vmem:[%s598_s22 + $0x30] sm:$0xff] }
  0x1b   : > { %v261_v48 = vmul.f32 %v593_v0, %v222_v45  ;;  %v262_v49 = vmul.f32 %v593_v0, %v223_v46  ;;  %v263_v50 = vmul.f32 %v593_v0, %v224_v47  ;;  %v225_v51 = vld [vmem:[%s598_s22 + $0x38] sm:$0xff]  ;;  %v226_v52 = vld [vmem:[%s598_s22 + $0x40] sm:$0xff]  ;;  %v227_v7 = vld [vmem:[%s598_s22 + $0x48] sm:$0xff] }
  0x1c   : > { %v297_v53 = vadd.f32 %v609_v2, %v258_v42  ;;  %v298_v54 = vadd.f32 %v609_v2, %v259_v43  ;;  %v299_v55 = vadd.f32 %v609_v2, %v260_v44  ;;  %v264_v56 = vmul.f32 %v593_v0, %v225_v51  ;;  %v228_v39 = vld [vmem:[%s598_s22 + $0x50] sm:$0xff]  ;;  %v229_v40 = vld [vmem:[%s598_s22 + $0x58] sm:$0xff]  ;;  %v231_v43 = vld [vmem:[%s598_s22 + $0x68] sm:$0xff] }
  0x1d   : > { %v300_v57 = vadd.f32 %v609_v2, %v261_v48  ;;  %v301_v58 = vadd.f32 %v609_v2, %v262_v49  ;;  %v302_v59 = vadd.f32 %v609_v2, %v263_v50  ;;  %v265_v60 = vmul.f32 %v593_v0, %v226_v52  ;;  %v233_v46 = vld [vmem:[%s598_s22 + $0x78] sm:$0xff]  ;;  %v234_v50 = vld [vmem:[%s598_s22 + $0x80] sm:$0xff] }
  0x1e   : > { %v361_v61 = vadd.f32 %v329_v8, %v297_v53  ;;  %v362_v62 = vadd.f32 %v330_v9, %v298_v54  ;;  %v363_v63 = vadd.f32 %v331_v10, %v299_v55  ;;  %v303_v1 = vadd.f32 %v609_v2, %v264_v56  ;;  %v230_v10 = vld [vmem:[%s598_s22 + $0x60] sm:$0xff] }
  0x1f   : > { %v364_v3 = vadd.f32 %v332_v11, %v300_v57  ;;  %v365_v4 = vadd.f32 %v333_v12, %v301_v58  ;;  %v366_v5 = vadd.f32 %v334_v13, %v302_v59  ;;  %v304_v6 = vadd.f32 %v609_v2, %v265_v60  ;;  %v232_v11 = vld [vmem:[%s598_s22 + $0x70] sm:$0xff] }
  0x20   : > { %v393_v41 = vmax.f32 %v361_v61, 0.0  ;;  %v394_v8 = vmax.f32 %v362_v62, 0.0  ;;  %v395_v42 = vmax.f32 %v363_v63, 0.0  ;;  %v367_v9 = vadd.f32 %v335_v14, %v303_v1 }
  0x21   : > { %v396_v12 = vmax.f32 %v364_v3, 0.0  ;;  %v397_v13 = vmax.f32 %v365_v4, 0.0  ;;  %v398_v44 = vmax.f32 %v366_v5, 0.0  ;;  %v368_v45 = vadd.f32 %v627_v15, %v304_v6 }
  0x22   : > { %425 = vst [vmem:[%s617_s30 + $0x8] sm:$0xff] %v393_v41  ;;  %426 = vst [vmem:[%s617_s30 + $0x10] sm:$0xff] %v394_v8  ;;  %v399_v47 = vmax.f32 %v367_v9, 0.0  ;;  %v266_v14 = vmul.f32 %v593_v0, %v227_v7  ;;  %v267_v48 = vmul.f32 %v593_v0, %v228_v39  ;;  %v268_v49 = vmul.f32 %v593_v0, %v229_v40  ;;  %v235_v39 = vld [vmem:[%s598_s22 + $0x88] sm:$0xff] }
  0x23   : > { %427 = vst [vmem:[%s617_s30 + $0x18] sm:$0xff] %v395_v42  ;;  %428 = vst [vmem:[%s617_s30 + $0x20] sm:$0xff] %v396_v12  ;;  %v400_v51 = vmax.f32 %v368_v45, 0.0  ;;  %v269_v15 = vmul.f32 %v593_v0, %v230_v10  ;;  %v270_v52 = vmul.f32 %v593_v0, %v231_v43  ;;  %v271_v53 = vmul.f32 %v593_v0, %v232_v11  ;;  %v241_v11 = vld [vmem:[%s598_s22 + $0xb8] sm:$0xff]  ;;  %v242_v45 = vld [vmem:[%s598_s22 + $0xc0] sm:$0xff] }
  0x24   : > { %429 = vst [vmem:[%s617_s30 + $0x28] sm:$0xff] %v397_v13  ;;  %430 = vst [vmem:[%s617_s30 + $0x30] sm:$0xff] %v398_v44  ;;  %v305_v54 = vadd.f32 %v609_v2, %v266_v14  ;;  %v306_v55 = vadd.f32 %v609_v2, %v267_v48  ;;  %v307_v56 = vadd.f32 %v609_v2, %v268_v49 }
  0x25   : > { %431 = vst [vmem:[%s617_s30 + $0x38] sm:$0xff] %v399_v47  ;;  %v272_v57 = vmul.f32 %v593_v0, %v233_v46  ;;  %432 = vst [vmem:[%s617_s30 + $0x40] sm:$0xff] %v400_v51  ;;  %v308_v58 = vadd.f32 %v609_v2, %v269_v15  ;;  %v309_v59 = vadd.f32 %v609_v2, %v270_v52 }
  0x26   : > { %v310_v60 = vadd.f32 %v609_v2, %v271_v53  ;;  %v273_v61 = vmul.f32 %v593_v0, %v234_v50  ;;  %v369_v62 = vadd.f32 %v630_v16, %v305_v54  ;;  %v370_v63 = vadd.f32 %v633_v17, %v306_v55  ;;  %v236_v16 = vld [vmem:[%s598_s22 + $0x90] sm:$0xff]  ;;  %v237_v17 = vld [vmem:[%s598_s22 + $0x98] sm:$0xff] }
  0x27   : > { %v371_v1 = vadd.f32 %v636_v18, %v307_v56  ;;  %v311_v3 = vadd.f32 %v609_v2, %v272_v57  ;;  %v372_v4 = vadd.f32 %v639_v19, %v308_v58  ;;  %v373_v5 = vadd.f32 %v642_v20, %v309_v59  ;;  %v238_v19 = vld [vmem:[%s598_s22 + $0xa0] sm:$0xff]  ;;  %v239_v20 = vld [vmem:[%s598_s22 + $0xa8] sm:$0xff] }
  0x28   : > { %v374_v6 = vadd.f32 %v645_v21, %v310_v60  ;;  %v312_v7 = vadd.f32 %v609_v2, %v273_v61  ;;  %v401_v40 = vmax.f32 %v369_v62, 0.0  ;;  %v402_v41 = vmax.f32 %v370_v63, 0.0  ;;  %v240_v21 = vld [vmem:[%s598_s22 + $0xb0] sm:$0xff]  ;;  %v243_v63 = vld [vmem:[%s598_s22 + $0xc8] sm:$0xff] }
  0x29   : > { %v403_v18 = vmax.f32 %v371_v1, 0.0  ;;  %v375_v8 = vadd.f32 %v648_v22, %v311_v3  ;;  %v404_v42 = vmax.f32 %v372_v4, 0.0  ;;  %v405_v9 = vmax.f32 %v373_v5, 0.0 }
  0x2a   : > { %v406_v10 = vmax.f32 %v374_v6, 0.0  ;;  %v376_v43 = vadd.f32 %v651_v23, %v312_v7  ;;  %433 = vst [vmem:[%s617_s30 + $0x48] sm:$0xff] %v401_v40  ;;  %434 = vst [vmem:[%s617_s30 + $0x50] sm:$0xff] %v402_v41  ;;  %v274_v22 = vmul.f32 %v593_v0, %v235_v39  ;;  %v275_v13 = vmul.f32 %v593_v0, %v236_v16  ;;  %v249_v16 = vld [vmem:[%s598_s22 + $0xf8] sm:$0xff] }
  0x2b   : > { %435 = vst [vmem:[%s617_s30 + $0x58] sm:$0xff] %v403_v18  ;;  %v407_v12 = vmax.f32 %v375_v8, 0.0  ;;  %v276_v44 = vmul.f32 %v593_v0, %v237_v17  ;;  %436 = vst [vmem:[%s617_s30 + $0x60] sm:$0xff] %v404_v42  ;;  %v277_v23 = vmul.f32 %v593_v0, %v238_v19  ;;  %v278_v47 = vmul.f32 %v593_v0, %v239_v20 }
  0x2c   : > { %437 = vst [vmem:[%s617_s30 + $0x68] sm:$0xff] %v405_v9  ;;  %438 = vst [vmem:[%s617_s30 + $0x70] sm:$0xff] %v406_v10  ;;  %v408_v46 = vmax.f32 %v376_v43, 0.0  ;;  %v279_v14 = vmul.f32 %v593_v0, %v240_v21  ;;  %v313_v48 = vadd.f32 %v609_v2, %v274_v22  ;;  %v314_v49 = vadd.f32 %v609_v2, %v275_v13 }
  0x2d   : > { %439 = vst [vmem:[%s617_s30 + $0x78] sm:$0xff] %v407_v12  ;;  %v315_v50 = vadd.f32 %v609_v2, %v276_v44  ;;  %v280_v51 = vmul.f32 %v593_v0, %v241_v11  ;;  %v316_v15 = vadd.f32 %v609_v2, %v277_v23  ;;  %v317_v52 = vadd.f32 %v609_v2, %v278_v47 }
  0x2e   : > { %440 = vst [vmem:[%s617_s30 + $0x80] sm:$0xff] %v408_v46  ;;  %v318_v53 = vadd.f32 %v609_v2, %v279_v14  ;;  %v281_v54 = vmul.f32 %v593_v0, %v242_v45  ;;  %v377_v55 = vadd.f32 %v654_v24, %v313_v48  ;;  %v378_v56 = vadd.f32 %v657_v25, %v314_v49  ;;  %v244_v24 = vld [vmem:[%s598_s22 + $0xd0] sm:$0xff]  ;;  %v245_v25 = vld [vmem:[%s598_s22 + $0xd8] sm:$0xff] }
  0x2f   : > { %v379_v57 = vadd.f32 %v660_v26, %v315_v50  ;;  %v319_v58 = vadd.f32 %v609_v2, %v280_v51  ;;  %v380_v59 = vadd.f32 %v663_v27, %v316_v15  ;;  %v381_v60 = vadd.f32 %v666_v28, %v317_v52  ;;  %v246_v27 = vld [vmem:[%s598_s22 + $0xe0] sm:$0xff]  ;;  %v247_v28 = vld [vmem:[%s598_s22 + $0xe8] sm:$0xff] }
  0x30   : > { %v382_v61 = vadd.f32 %v669_v29, %v318_v53  ;;  %v320_v62 = vadd.f32 %v609_v2, %v281_v54  ;;  %v409_v1 = vmax.f32 %v377_v55, 0.0  ;;  %v410_v3 = vmax.f32 %v378_v56, 0.0  ;;  %v248_v29 = vld [vmem:[%s598_s22 + $0xf0] sm:$0xff] }
  0x31   : > { %v411_v26 = vmax.f32 %v379_v57, 0.0  ;;  %v383_v4 = vadd.f32 %v672_v30, %v319_v58  ;;  %v412_v5 = vmax.f32 %v380_v59, 0.0  ;;  %v413_v6 = vmax.f32 %v381_v60, 0.0 }
  0x32   : > { %v414_v7 = vmax.f32 %v382_v61, 0.0  ;;  %v384_v39 = vadd.f32 %v675_v31, %v320_v62  ;;  %441 = vst [vmem:[%s617_s30 + $0x88] sm:$0xff] %v409_v1  ;;  %442 = vst [vmem:[%s617_s30 + $0x90] sm:$0xff] %v410_v3  ;;  %v282_v30 = vmul.f32 %v593_v0, %v243_v63  ;;  %v283_v40 = vmul.f32 %v593_v0, %v244_v24 }
  0x33   : > { %443 = vst [vmem:[%s617_s30 + $0x98] sm:$0xff] %v411_v26  ;;  %v415_v17 = vmax.f32 %v383_v4, 0.0  ;;  %v284_v41 = vmul.f32 %v593_v0, %v245_v25  ;;  %444 = vst [vmem:[%s617_s30 + $0xa0] sm:$0xff] %v412_v5  ;;  %v285_v8 = vmul.f32 %v593_v0, %v246_v27  ;;  %v286_v31 = vmul.f32 %v593_v0, %v247_v28 }
  0x34   : > { %445 = vst [vmem:[%s617_s30 + $0xa8] sm:$0xff] %v413_v6  ;;  %446 = vst [vmem:[%s617_s30 + $0xb0] sm:$0xff] %v414_v7  ;;  %v416_v18 = vmax.f32 %v384_v39, 0.0  ;;  %v287_v19 = vmul.f32 %v593_v0, %v248_v29  ;;  %v321_v20 = vadd.f32 %v609_v2, %v282_v30  ;;  %v322_v21 = vadd.f32 %v609_v2, %v283_v40 }
  0x35   : > { %447 = vst [vmem:[%s617_s30 + $0xb8] sm:$0xff] %v415_v17  ;;  %v323_v42 = vadd.f32 %v609_v2, %v284_v41  ;;  %v288_v9 = vmul.f32 %v593_v0, %v249_v16  ;;  %v324_v10 = vadd.f32 %v609_v2, %v285_v8  ;;  %v325_v43 = vadd.f32 %v609_v2, %v286_v31 }
  0x36   : > { %448 = vst [vmem:[%s617_s30 + $0xc0] sm:$0xff] %v416_v18  ;;  %v326_v11 = vadd.f32 %v609_v2, %v287_v19  ;;  %v385_v12 = vadd.f32 %v678_v32, %v321_v20  ;;  %v386_v22 = vadd.f32 %v681_v33, %v322_v21 }
  0x37   : > { %v387_v13 = vadd.f32 %v684_v34, %v323_v42  ;;  %v327_v44 = vadd.f32 %v609_v2, %v288_v9  ;;  %v388_v0 = vadd.f32 %v687_v35, %v324_v10  ;;  %v389_v45 = vadd.f32 %v690_v36, %v325_v43 }
  0x38   : > { %v390_v46 = vadd.f32 %v693_v37, %v326_v11  ;;  %v417_v23 = vmax.f32 %v385_v12, 0.0  ;;  %v418_v47 = vmax.f32 %v386_v22, 0.0 }
  0x39   : > { %v419_v32 = vmax.f32 %v387_v13, 0.0  ;;  %v391_v14 = vadd.f32 %v696_v38, %v327_v44  ;;  %v420_v33 = vmax.f32 %v388_v0, 0.0  ;;  %v421_v48 = vmax.f32 %v389_v45, 0.0 }
  0x3a   : > { %v422_v34 = vmax.f32 %v390_v46, 0.0  ;;  %449 = vst [vmem:[%s617_s30 + $0xc8] sm:$0xff] %v417_v23  ;;  %450 = vst [vmem:[%s617_s30 + $0xd0] sm:$0xff] %v418_v47 }
  0x3b   : > { %451 = vst [vmem:[%s617_s30 + $0xd8] sm:$0xff] %v419_v32  ;;  %v423_v2 = vmax.f32 %v391_v14, 0.0  ;;  %452 = vst [vmem:[%s617_s30 + $0xe0] sm:$0xff] %v420_v33 }
  0x3c   : > { %453 = vst [vmem:[%s617_s30 + $0xe8] sm:$0xff] %v421_v48  ;;  %454 = vst [vmem:[%s617_s30 + $0xf0] sm:$0xff] %v422_v34 }
  0x3d   : > { %455 = vst [vmem:[%s617_s30 + $0xf8] sm:$0xff] %v423_v2 }
  0x3e PF: > { %s14_s15 = sadd.s32 1, %s555_s15  }
  0x3f   : > { %p11_p4 = scmp.ge.s32.totalorder %s14_s15, 4  }
  0x41   :  { %13 = sbr.rel (!%p11_p4) target bundleno = 1 (0x1), region = 69 }

// kernel: bottleneck_forward.6
= control target key start
LH: loop header
LB: loop body
LE: loop exit
PB: predicated region body
PF: predicated region fallthrough
CT: control target
= control target key end

     0   :  { %s1129_s18 = smov 0   ;;  %s1412_s0 = inlined_call_operand.vmem [shape: bf16[2,256,128], index: 0, kind: input, shape index: {}]   ;;  %s1413_s1 = inlined_call_operand.vmem [shape: f32[1,128], index: 1, kind: input, shape index: {}]   ;;  %s1414_s2 = inlined_call_operand.vmem [shape: f32[1,128], index: 2, kind: input, shape index: {}]   ;;  %s1415_s3 = inlined_call_operand.vmem [shape: bf16[128,128], index: 3, kind: input, shape index: {}]   ;;  %s1416_s4 = inlined_call_operand.vmem [shape: f32[2,256,128], index: 4, kind: output, shape index: {0}]   ;;  %s1417_s5 = inlined_call_operand.vmem [shape: f32[2,8,128], index: 5, kind: output, shape index: {1}]  }
   0x1 LB: > { %s884_s19 = sadd.s32 4294967295, %s1097_s18   ;;  %p888_p0 = scmp.ge.s32.totalorder %s1097_s18, 1  ;;  %s1097_s18 = sphi %s1129_s18, %s16_s18  }
   0x2   : > { %p190_p1 = scmp.lt.s32.totalorder %s1097_s18, 3 }
   0x4   : > { %p191_p2 = pnand %p888_p0, %p190_p1 }
   0x5   : > { %p222_p3 = scmp.lt.s32.totalorder (!%p191_p2), %s884_s19, 1 }
   0x6   : > { %194 = sbr.rel (%p191_p2) target bundleno = 323 (0x143), region = 36 }
   0xb   : > { %v1083_v0 = vld [vmem:[%s1415_s3 + $0x38] sm:$0xff]   ;;  %v1084_v1 = vld [vmem:[%s1415_s3 + $0x30] sm:$0xff]   ;;  %s1419_s19 = smov (!%p222_p3, %s884_s19), 1  ;;  %v1085_v2 = vld [vmem:[%s1415_s3 + $0x28] sm:$0xff]  }
   0xc   : > { %1011 = vmatprep.subr.bf16.mxu0 %v1083_v0  ;;  %1059 = vmatprep.subr.bf16.mxu1 %v1083_v0  ;;  %s906_s26 = sshll.u32 %s1419_s19, 7  ;;  %v1086_v3 = vld [vmem:[%s1415_s3 + $0x20] sm:$0xff]   ;;  %v1087_v21 = vld [vmem:[%s1415_s3 + $0x18] sm:$0xff]   ;;  %v1088_v35 = vld [vmem:[%s1415_s3 + $0x10] sm:$0xff]   ;;  %s907_s21 = sshll.u32 %s1419_s19, 8 }
   0xd   : > { %1012 = vmatpush3.bf16.msra.mxu0 %v1083_v0  ;;  %1067 = vmatpush3.bf16.msra.mxu1 %v1083_v0  ;;  %s1152_s29 = scalar_lea.vmem %s1412_s0, %s906_s26  ;;  %v1161_v5 = vld [vmem:[%s1413_s1] ss:$0 sm:$0xff]  ;;  %v1089_v50 = vld [vmem:[%s1415_s3 + $0x8] sm:$0xff]   ;;  %s1299_s24 = scalar_lea.vmem %s1416_s4, %s907_s21 }
   0xe   : > { %1013 = vmatprep.subr.bf16.mxu0 %v1084_v1  ;;  %1060 = vmatprep.subr.bf16.mxu1 %v1084_v1  ;;  %v909_v4 = vld [vmem:[%s1152_s29] sm:$0xff]   ;;  %v972_v8 = vld [vmem:[%s1152_s29 + $0x8] sm:$0xff]   ;;  %v973_v9 = vld [vmem:[%s1152_s29 + $0x10] sm:$0xff]   ;;  %s893_s25 = sshll.u32 %s1419_s19, 3 }
   0xf   : > { %v910_v6 = vunpack.c.l.bf16 %v909_v4  ;;  %v911_v7 = vunpack.c.h.bf16 %v909_v4  ;;  %v974_v10 = vld [vmem:[%s1152_s29 + $0x18] sm:$0xff]   ;;  %v1169_v11 = vld [vmem:[%s1414_s2] ss:$0 sm:$0xff]  ;;  %v914_v12 = vunpack.c.l.bf16 %v972_v8  ;;  %v915_v13 = vunpack.c.h.bf16 %v972_v8  ;;  %v976_v34 = vld [vmem:[%s1152_s29 + $0x28] sm:$0xff]   ;;  %s235_s28 = scalar_lea.vmem %s1417_s5, %s893_s25 }
  0x10   : > { %v918_v14 = vunpack.c.l.bf16 %v973_v9  ;;  %v919_v15 = vunpack.c.h.bf16 %v973_v9  ;;  %v922_v18 = vunpack.c.l.bf16 %v974_v10  ;;  %v923_v19 = vunpack.c.h.bf16 %v974_v10  ;;  %v975_v20 = vld [vmem:[%s1152_s29 + $0x20] sm:$0xff]   ;;  %v977_v39 = vld [vmem:[%s1152_s29 + $0x30] sm:$0xff]   ;;  %v1206_v59 = vld [vmem:[%s1152_s29 + $0x38] sm:$0xff]  }
  0x11   : > { %1014 = vmatpush3.bf16.msra.mxu0 %v1084_v1  ;;  %1068 = vmatpush3.bf16.msra.mxu1 %v1084_v1  ;;  %v308_v16 = vmul.f32 %v910_v6, %v1161_v5  ;;  %v309_v17 = vmul.f32 %v911_v7, %v1161_v5  ;;  %v310_v22 = vmul.f32 %v914_v12, %v1161_v5  ;;  %v926_v30 = vunpack.c.l.bf16 %v975_v20  ;;  %v979_v60 = vld [vmem:[%s1152_s29 + $0x40] sm:$0xff]   ;;  %v980_v6 = vld [vmem:[%s1152_s29 + $0x48] sm:$0xff]  }
  0x12   : > { %1015 = vmatprep.subr.bf16.mxu0 %v1085_v2  ;;  %1061 = vmatprep.subr.bf16.mxu1 %v1085_v2  ;;  %v311_v23 = vmul.f32 %v915_v13, %v1161_v5  ;;  %v312_v24 = vmul.f32 %v918_v14, %v1161_v5  ;;  %v313_v27 = vmul.f32 %v919_v15, %v1161_v5  ;;  %v927_v43 = vunpack.c.h.bf16 %v975_v20  ;;  %v1090_v0 = vld [vmem:[%s1415_s3] sm:$0xff]  }
  0x13   : > { %v347_v25 = vadd.f32 %v1169_v11, %v308_v16  ;;  %v348_v26 = vadd.f32 %v1169_v11, %v309_v17  ;;  %v314_v28 = vmul.f32 %v922_v18, %v1161_v5  ;;  %v315_v29 = vmul.f32 %v923_v19, %v1161_v5  ;;  %v981_v16 = vld [vmem:[%s1152_s29 + $0x50] sm:$0xff]  }
  0x14   : > { %v349_v33 = vadd.f32 %v1169_v11, %v310_v22  ;;  %v350_v36 = vadd.f32 %v1169_v11, %v311_v23  ;;  %v351_v37 = vadd.f32 %v1169_v11, %v312_v24  ;;  %v352_v38 = vadd.f32 %v1169_v11, %v313_v27 }
  0x15   : > { %1016 = vmatpush3.bf16.msra.mxu0 %v1085_v2  ;;  %1069 = vmatpush3.bf16.msra.mxu1 %v1085_v2  ;;  %v379_v31 = vmax.f32 %v347_v25, 0.0  ;;  %v380_v32 = vmax.f32 %v348_v26, 0.0  ;;  %v353_v41 = vadd.f32 %v1169_v11, %v314_v28  ;;  %v354_v42 = vadd.f32 %v1169_v11, %v315_v29 }
  0x16   : > { %1017 = vmatprep.subr.bf16.mxu0 %v1086_v3  ;;  %1062 = vmatprep.subr.bf16.mxu1 %v1086_v3  ;;  %v316_v44 = vmul.f32 %v926_v30, %v1161_v5  ;;  %v930_v45 = vunpack.c.l.bf16 %v976_v34  ;;  %v381_v46 = vmax.f32 %v349_v33, 0.0  ;;  %v317_v47 = vmul.f32 %v927_v43, %v1161_v5  ;;  %v983_v30 = vld [vmem:[%s1152_s29 + $0x60] sm:$0xff]  }
  0x17   : > { %v411_v40 = vpack.c.bf16 %v380_v32, %v379_v31  ;;  %v931_v48 = vunpack.c.h.bf16 %v976_v34  ;;  %v934_v49 = vunpack.c.l.bf16 %v977_v39  ;;  %v382_v51 = vmax.f32 %v350_v36, 0.0 }
  0x18   : > { %v383_v52 = vmax.f32 %v351_v37, 0.0  ;;  %v384_v53 = vmax.f32 %v352_v38, 0.0  ;;  %v318_v54 = vmul.f32 %v930_v45, %v1161_v5  ;;  %v385_v55 = vmax.f32 %v353_v41, 0.0 }
  0x19   : > { %1018 = vmatpush3.bf16.msra.mxu0 %v1086_v3  ;;  %1070 = vmatpush3.bf16.msra.mxu1 %v1086_v3  ;;  %v386_v56 = vmax.f32 %v354_v42, 0.0  ;;  %v1203_v57 = vadd.f32 %v1169_v11, %v316_v44  ;;  %v935_v58 = vunpack.c.h.bf16 %v977_v39  ;;  %v1210_v61 = vadd.f32 %v1169_v11, %v317_v47  ;;  %v984_v47 = vld [vmem:[%s1152_s29 + $0x68] sm:$0xff]  }
  0x1a   : > { %1019 = vmatprep.subr.bf16.mxu0 %v1087_v21  ;;  %1063 = vmatprep.subr.bf16.mxu1 %v1087_v21  ;;  %v319_v62 = vmul.f32 %v931_v48, %v1161_v5  ;;  %v320_v63 = vmul.f32 %v934_v49, %v1161_v5  ;;  %v412_v1 = vpack.c.bf16 %v382_v51, %v381_v46  ;;  %v938_v3 = vunpack.c.l.bf16 %v1206_v59 }
  0x1b   : > { %1027 = vmatprep.mubr.bf16.mxu0 %v411_v40  ;;  %v1218_v2 = vadd.f32 %v1169_v11, %v318_v54  ;;  %v942_v4 = vunpack.c.l.bf16 %v979_v60  ;;  %v413_v7 = vpack.c.bf16 %v384_v53, %v383_v52  ;;  %v1222_v8 = vpack.c.bf16 %v386_v56, %v385_v55  ;;  %v985_v52 = vld [vmem:[%s1152_s29 + $0x70] sm:$0xff]  }
  0x1c   : > { %v387_v9 = vmax.f32 %v1203_v57, 0.0  ;;  %v321_v10 = vmul.f32 %v935_v58, %v1161_v5  ;;  %v388_v12 = vmax.f32 %v1210_v61, 0.0  ;;  %v939_v13 = vunpack.c.h.bf16 %v1206_v59 }
  0x1d   : > { %1020 = vmatpush3.bf16.msra.mxu0 %v1087_v21  ;;  %1071 = vmatpush3.bf16.msra.mxu1 %v1087_v21  ;;  %v943_v14 = vunpack.c.h.bf16 %v979_v60  ;;  %v324_v15 = vmul.f32 %v942_v4, %v1161_v5  ;;  %v1231_v17 = vadd.f32 %v1169_v11, %v319_v62  ;;  %v1234_v18 = vadd.f32 %v1169_v11, %v320_v63  ;;  %v982_v21 = vld [vmem:[%s1152_s29 + $0x58] sm:$0xff]  }
  0x1e   : > { %1021 = vmatprep.subr.bf16.mxu0 %v1088_v35  ;;  %1064 = vmatprep.subr.bf16.mxu1 %v1088_v35  ;;  %v946_v19 = vunpack.c.l.bf16 %v980_v6  ;;  %v947_v20 = vunpack.c.h.bf16 %v980_v6  ;;  %v389_v22 = vmax.f32 %v1218_v2, 0.0  ;;  %v1239_v23 = vmul.f32 %v938_v3, %v1161_v5  ;;  %v986_v6 = vld [vmem:[%s1152_s29 + $0x78] sm:$0xff]  }
  0x1f   : > { %v325_v24 = vmul.f32 %v943_v14, %v1161_v5  ;;  %v363_v25 = vadd.f32 %v1169_v11, %v324_v15  ;;  %v950_v28 = vunpack.c.l.bf16 %v981_v16  ;;  %v951_v29 = vunpack.c.h.bf16 %v981_v16 }
  0x20   : > { %v326_v26 = vmul.f32 %v946_v19, %v1161_v5  ;;  %v327_v27 = vmul.f32 %v947_v20, %v1161_v5  ;;  %v1247_v31 = vadd.f32 %v1169_v11, %v321_v10  ;;  %v954_v34 = vunpack.c.l.bf16 %v982_v21 }
  0x21   : > { %1022 = vmatpush3.bf16.msra.mxu0 %v1088_v35  ;;  %1072 = vmatpush3.bf16.msra.mxu1 %v1088_v35  ;;  %v364_v32 = vadd.f32 %v1169_v11, %v325_v24  ;;  %v395_v33 = vmax.f32 %v363_v25, 0.0  ;;  %v328_v37 = vmul.f32 %v950_v28, %v1161_v5  ;;  %v329_v38 = vmul.f32 %v951_v29, %v1161_v5 }
  0x22   : > { %1023 = vmatprep.subr.bf16.mxu0 %v1089_v50  ;;  %1065 = vmatprep.subr.bf16.mxu1 %v1089_v50  ;;  %v365_v35 = vadd.f32 %v1169_v11, %v326_v26  ;;  %v366_v36 = vadd.f32 %v1169_v11, %v327_v27  ;;  %v955_v40 = vunpack.c.h.bf16 %v982_v21  ;;  %v330_v41 = vmul.f32 %v954_v34, %v1161_v5 }
  0x23   : > { %v396_v39 = vmax.f32 %v364_v32, 0.0  ;;  %v958_v42 = vunpack.c.l.bf16 %v983_v30  ;;  %v367_v45 = vadd.f32 %v1169_v11, %v328_v37  ;;  %v368_v46 = vadd.f32 %v1169_v11, %v329_v38 }
  0x24   : > { %v397_v43 = vmax.f32 %v365_v35, 0.0  ;;  %v398_v44 = vmax.f32 %v366_v36, 0.0  ;;  %v331_v49 = vmul.f32 %v955_v40, %v1161_v5  ;;  %v959_v51 = vunpack.c.h.bf16 %v983_v30 }
  0x25   : > { %1024 = vmatpush3.bf16.msra.mxu0 %v1089_v50  ;;  %1073 = vmatpush3.bf16.msra.mxu1 %v1089_v50  ;;  %v419_v48 = vpack.c.bf16 %v396_v39, %v395_v33  ;;  %v369_v50 = vadd.f32 %v1169_v11, %v330_v41  ;;  %v399_v54 = vmax.f32 %v367_v45, 0.0  ;;  %v400_v55 = vmax.f32 %v368_v46, 0.0 }
  0x26   : > { %1025 = vmatprep.subr.bf16.mxu0 %v1090_v0  ;;  %1066 = vmatprep.subr.bf16.mxu1 %v1090_v0  ;;  %v420_v53 = vpack.c.bf16 %v398_v44, %v397_v43  ;;  %v332_v56 = vmul.f32 %v958_v42, %v1161_v5  ;;  %v370_v58 = vadd.f32 %v1169_v11, %v331_v49  ;;  %v962_v63 = vunpack.c.l.bf16 %v984_v47 }
  0x27   : > { %1043 = vmatprep.mubr.bf16.mxu1 %v419_v48  ;;  %v401_v60 = vmax.f32 %v369_v50, 0.0  ;;  %v333_v62 = vmul.f32 %v959_v51, %v1161_v5  ;;  %v963_v3 = vunpack.c.h.bf16 %v984_v47  ;;  %v966_v4 = vunpack.c.l.bf16 %v985_v52 }
  0x28   : > { %v334_v14 = vmul.f32 %v962_v63, %v1161_v5  ;;  %v967_v15 = vunpack.c.h.bf16 %v985_v52  ;;  %v415_v16 = vpack.c.bf16 %v388_v12, %v387_v9  ;;  %v323_v24 = vmul.f32 %v939_v13, %v1161_v5 }
  0x29   : > { %1026 = vmatpush3.bf16.msra.mxu0 %v1090_v0  ;;  %1074 = vmatpush3.bf16.msra.mxu1 %v1090_v0  ;;  %v421_v0 = vpack.c.bf16 %v400_v55, %v399_v54  ;;  %v372_v10 = vadd.f32 %v1169_v11, %v333_v62  ;;  %v335_v20 = vmul.f32 %v963_v3, %v1161_v5  ;;  %v970_v27 = vunpack.c.l.bf16 %v986_v6 }
  0x2a   : > { %v336_v21 = vmul.f32 %v966_v4, %v1161_v5  ;;  %v337_v26 = vmul.f32 %v967_v15, %v1161_v5  ;;  %v373_v57 = vadd.f32 %v1169_v11, %v334_v14  ;;  %v971_v9 = vunpack.c.h.bf16 %v986_v6 }
  0x2b   : > { %v404_v25 = vmax.f32 %v372_v10, 0.0  ;;  %v374_v61 = vadd.f32 %v1169_v11, %v335_v20  ;;  %v390_v12 = vmax.f32 %v1231_v17, 0.0  ;;  %v391_v13 = vmax.f32 %v1234_v18, 0.0 }
  0x2c   : > { %1028 = vmatmul.mubr.bf16.vlgmr.msra.gmra.mxu0 %v412_v1  ;;  %1044 = vmatmul.mubr.bf16.vlgmr.msra.gmra.mxu1 %v420_v53  ;;  %v371_v1 = vadd.f32 %v1169_v11, %v332_v56  ;;  %v375_v30 = vadd.f32 %v1169_v11, %v336_v21  ;;  %v376_v59 = vadd.f32 %v1169_v11, %v337_v26  ;;  %v392_v32 = vmax.f32 %v1247_v31, 0.0 }
  0x2d   : > { %1031 = vmatprep.mubr.bf16.mxu0 %v413_v7  ;;  %v402_v7 = vmax.f32 %v370_v58, 0.0  ;;  %1047 = vmatprep.mubr.bf16.mxu1 %v421_v0  ;;  %v361_v33 = vadd.f32 %v1169_v11, %v1239_v23  ;;  %v405_v34 = vmax.f32 %v373_v57, 0.0  ;;  %v406_v35 = vmax.f32 %v374_v61, 0.0 }
  0x2e   : > { %v403_v19 = vmax.f32 %v371_v1, 0.0  ;;  %v339_v17 = vmul.f32 %v971_v9, %v1161_v5  ;;  %v416_v36 = vpack.c.bf16 %v390_v12, %v389_v22  ;;  %v362_v37 = vadd.f32 %v1169_v11, %v323_v24 }
  0x2f   : > { %v422_v28 = vpack.c.bf16 %v402_v7, %v401_v60  ;;  %v407_v38 = vmax.f32 %v375_v30, 0.0  ;;  %v408_v18 = vmax.f32 %v376_v59, 0.0  ;;  %v417_v39 = vpack.c.bf16 %v392_v32, %v391_v13 }
  0x30   : > { %v423_v29 = vpack.c.bf16 %v404_v25, %v403_v19  ;;  %v424_v31 = vpack.c.bf16 %v406_v35, %v405_v34  ;;  %v378_v40 = vadd.f32 %v1169_v11, %v339_v17  ;;  %v393_v41 = vmax.f32 %v361_v33, 0.0 }
  0x31   : > { %v394_v42 = vmax.f32 %v362_v37, 0.0  ;;  %v425_v43 = vpack.c.bf16 %v408_v18, %v407_v38 }
  0x32   : > { %v410_v2 = vmax.f32 %v378_v40, 0.0 }
  0x33   : > { %v418_v22 = vpack.c.bf16 %v394_v42, %v393_v41 }
  0x34   : > { %1032 = vmatmul.mubr.bf16.gmra.mxu0 %v1222_v8  ;;  %1048 = vmatmul.mubr.bf16.gmra.mxu1 %v422_v28  ;;  %v338_v8 = vmul.f32 %v970_v27, %v1161_v5 }
  0x35   : > { %1035 = vmatprep.mubr.bf16.mxu0 %v415_v16  ;;  %1051 = vmatprep.mubr.bf16.mxu1 %v423_v29 }
  0x36   : > { %v377_v23 = vadd.f32 %v1169_v11, %v338_v8 }
  0x38   : > { %v409_v5 = vmax.f32 %v377_v23, 0.0 }
  0x3a   : > { %v426_v44 = vpack.c.bf16 %v410_v2, %v409_v5 }
  0x3c   : > { %1036 = vmatmul.mubr.bf16.gmra.mxu0 %v416_v36  ;;  %1052 = vmatmul.mubr.bf16.gmra.mxu1 %v424_v31 }
  0x3d   : > { %1039 = vmatprep.mubr.bf16.mxu0 %v417_v39  ;;  %1055 = vmatprep.mubr.bf16.mxu1 %v425_v43 }
  0x44   : > { %1040 = vmatmul.mubr.bf16.gmra.mxu0 %v418_v22  ;;  %1056 = vmatmul.mubr.bf16.gmra.mxu1 %v426_v44 }
  0xec   : > { %v1029_v11 = vpop.f32.mrf.mxu0  ;;  %v1303_v46 = vpop.f32.mrf.mxu1 }
  0xed   : > { %654 = vst [vmem:[%s1299_s24 + $0x10] sm:$0xff] %v1029_v11  ;;  %670 = vst [vmem:[%s1299_s24 + $0x90] sm:$0xff] %v1303_v46  ;;  %v723_v55 = vmul.f32 %v1029_v11, %v1029_v11 }
  0xee   : > { %v525_v45 = vpop.f32.mrf.mxu0  ;;  %v1308_v48 = vpop.f32.mrf.mxu1 }
  0xef   : > { %652 = vst [vmem:[%s1299_s24] sm:$0xff] %v525_v45  ;;  %668 = vst [vmem:[%s1299_s24 + $0x80] sm:$0xff] %v1308_v48  ;;  %v721_v50 = vmul.f32 %v525_v45, %v525_v45 }
  0xf0   : > { %v1030_v47 = vpop.f32.mrf.mxu0  ;;  %v1313_v53 = vpop.f32.mrf.mxu1 }
  0xf1   : > { %655 = vst [vmem:[%s1299_s24 + $0x18] sm:$0xff] %v1030_v47  ;;  %671 = vst [vmem:[%s1299_s24 + $0x98] sm:$0xff] %v1313_v53  ;;  %v724_v63 = vmul.f32 %v1030_v47, %v1030_v47 }
  0xf2   : > { %v528_v49 = vpop.f32.mrf.mxu0  ;;  %v1318_v60 = vpop.f32.mrf.mxu1 }
  0xf3   : > { %653 = vst [vmem:[%s1299_s24 + $0x8] sm:$0xff] %v528_v49  ;;  %v684_v51 = vadd.f32 %v528_v49, %v525_v45  ;;  %v722_v52 = vmul.f32 %v528_v49, %v528_v49  ;;  %669 = vst [vmem:[%s1299_s24 + $0x88] sm:$0xff] %v1318_v60 }
  0xf4   : > { %v1033_v54 = vpop.f32.mrf.mxu0  ;;  %v1323_v3 = vpop.f32.mrf.mxu1 }
  0xf5   : > { %v685_v56 = vadd.f32 %v1029_v11, %v684_v51  ;;  %v753_v58 = vadd.f32 %v722_v52, %v721_v50  ;;  %658 = vst [vmem:[%s1299_s24 + $0x30] sm:$0xff] %v1033_v54  ;;  %674 = vst [vmem:[%s1299_s24 + $0xb0] sm:$0xff] %v1323_v3  ;;  %v727_v25 = vmul.f32 %v1033_v54, %v1033_v54 }
  0xf6   : > { %v541_v62 = vpop.f32.mrf.mxu0  ;;  %v1328_v14 = vpop.f32.mrf.mxu1 }
  0xf7   : > { %v754_v0 = vadd.f32 %v753_v58, %v723_v55  ;;  %656 = vst [vmem:[%s1299_s24 + $0x20] sm:$0xff] %v541_v62  ;;  %v686_v1 = vadd.f32 %v1030_v47, %v685_v56  ;;  %v725_v7 = vmul.f32 %v541_v62, %v541_v62  ;;  %672 = vst [vmem:[%s1299_s24 + $0xa0] sm:$0xff] %v1328_v14 }
  0xf8   : > { %v1034_v4 = vpop.f32.mrf.mxu0  ;;  %v1333_v21 = vpop.f32.mrf.mxu1 }
  0xf9   : > { %v687_v6 = vadd.f32 %v686_v1, %v541_v62  ;;  %v755_v10 = vadd.f32 %v754_v0, %v724_v63  ;;  %659 = vst [vmem:[%s1299_s24 + $0x38] sm:$0xff] %v1034_v4  ;;  %675 = vst [vmem:[%s1299_s24 + $0xb8] sm:$0xff] %v1333_v21  ;;  %v728_v61 = vmul.f32 %v1034_v4, %v1034_v4 }
  0xfa   : > { %v544_v15 = vpop.f32.mrf.mxu0  ;;  %v1338_v28 = vpop.f32.mrf.mxu1  ;;  %v737_v0 = vmul.f32 %v1308_v48, %v1308_v48 }
  0xfb   : > { %v756_v16 = vadd.f32 %v755_v10, %v725_v7  ;;  %657 = vst [vmem:[%s1299_s24 + $0x28] sm:$0xff] %v544_v15  ;;  %v688_v19 = vadd.f32 %v687_v6, %v544_v15  ;;  %v726_v20 = vmul.f32 %v544_v15, %v544_v15  ;;  %673 = vst [vmem:[%s1299_s24 + $0xa8] sm:$0xff] %v1338_v28 }
  0xfc   : > { %v1037_v24 = vpop.f32.mrf.mxu0  ;;  %v1343_v29 = vpop.f32.mrf.mxu1  ;;  %v738_v7 = vmul.f32 %v1318_v60, %v1318_v60  ;;  %v739_v15 = vmul.f32 %v1303_v46, %v1303_v46 }
  0xfd   : > { %v689_v26 = vadd.f32 %v1033_v54, %v688_v19  ;;  %v757_v27 = vadd.f32 %v756_v16, %v726_v20  ;;  %662 = vst [vmem:[%s1299_s24 + $0x50] sm:$0xff] %v1037_v24  ;;  %678 = vst [vmem:[%s1299_s24 + $0xd0] sm:$0xff] %v1343_v29  ;;  %v731_v38 = vmul.f32 %v1037_v24, %v1037_v24 }
  0xfe   : > { %v557_v57 = vpop.f32.mrf.mxu0  ;;  %v1348_v33 = vpop.f32.mrf.mxu1  ;;  %v740_v20 = vmul.f32 %v1313_v53, %v1313_v53 }
  0xff   : > { %v758_v9 = vadd.f32 %v757_v27, %v727_v25  ;;  %660 = vst [vmem:[%s1299_s24 + $0x40] sm:$0xff] %v557_v57  ;;  %v690_v12 = vadd.f32 %v1034_v4, %v689_v26  ;;  %v729_v13 = vmul.f32 %v557_v57, %v557_v57  ;;  %676 = vst [vmem:[%s1299_s24 + $0xc0] sm:$0xff] %v1348_v33 }
 0x100   : > { %v1038_v30 = vpop.f32.mrf.mxu0  ;;  %v1353_v36 = vpop.f32.mrf.mxu1  ;;  %v741_v26 = vmul.f32 %v1328_v14, %v1328_v14 }
 0x101   : > { %v691_v59 = vadd.f32 %v690_v12, %v557_v57  ;;  %v759_v32 = vadd.f32 %v758_v9, %v728_v61  ;;  %663 = vst [vmem:[%s1299_s24 + $0x58] sm:$0xff] %v1038_v30  ;;  %679 = vst [vmem:[%s1299_s24 + $0xd8] sm:$0xff] %v1353_v36  ;;  %v732_v40 = vmul.f32 %v1038_v30, %v1038_v30 }
 0x102   : > { %v560_v34 = vpop.f32.mrf.mxu0  ;;  %v624_v31 = vpop.f32.mrf.mxu1  ;;  %v742_v61 = vmul.f32 %v1338_v28, %v1338_v28 }
 0x103   : > { %v760_v35 = vadd.f32 %v759_v32, %v729_v13  ;;  %661 = vst [vmem:[%s1299_s24 + $0x48] sm:$0xff] %v560_v34  ;;  %v692_v8 = vadd.f32 %v691_v59, %v560_v34  ;;  %v730_v17 = vmul.f32 %v560_v34, %v560_v34  ;;  %677 = vst [vmem:[%s1299_s24 + $0xc8] sm:$0xff] %v624_v31 }
 0x104   : > { %v1041_v37 = vpop.f32.mrf.mxu0  ;;  %v1360_v43 = vpop.f32.mrf.mxu1  ;;  %v745_v13 = vmul.f32 %v1348_v33, %v1348_v33 }
 0x105   : > { %v693_v18 = vadd.f32 %v1037_v24, %v692_v8  ;;  %v761_v39 = vadd.f32 %v760_v35, %v730_v17  ;;  %666 = vst [vmem:[%s1299_s24 + $0x70] sm:$0xff] %v1041_v37  ;;  %682 = vst [vmem:[%s1299_s24 + $0xf0] sm:$0xff] %v1360_v43  ;;  %v735_v52 = vmul.f32 %v1041_v37, %v1041_v37 }
 0x106   : > { %v573_v23 = vpop.f32.mrf.mxu0  ;;  %v637_v11 = vpop.f32.mrf.mxu1  ;;  %v746_v35 = vmul.f32 %v624_v31, %v624_v31  ;;  %v747_v8 = vmul.f32 %v1343_v29, %v1343_v29 }
 0x107   : > { %v762_v41 = vadd.f32 %v761_v39, %v731_v38  ;;  %664 = vst [vmem:[%s1299_s24 + $0x60] sm:$0xff] %v573_v23  ;;  %v694_v42 = vadd.f32 %v1038_v30, %v693_v18  ;;  %v733_v22 = vmul.f32 %v573_v23, %v573_v23  ;;  %680 = vst [vmem:[%s1299_s24 + $0xe0] sm:$0xff] %v637_v11 }
 0x108   : > { %v1042_v5 = vpop.f32.mrf.mxu0  ;;  %v1058_v51 = vpop.f32.mrf.mxu1  ;;  %v749_v39 = vmul.f32 %v637_v11, %v637_v11 }
 0x109   : > { %v695_v2 = vadd.f32 %v694_v42, %v573_v23  ;;  %v763_v44 = vadd.f32 %v762_v41, %v732_v40  ;;  %667 = vst [vmem:[%s1299_s24 + $0x78] sm:$0xff] %v1042_v5  ;;  %683 = vst [vmem:[%s1299_s24 + $0xf8] sm:$0xff] %v1058_v51  ;;  %v736_v58 = vmul.f32 %v1042_v5, %v1042_v5 }
 0x10a   : > { %v576_v45 = vpop.f32.mrf.mxu0  ;;  %v640_v56 = vpop.f32.mrf.mxu1 }
 0x10b   : > { %v764_v47 = vadd.f32 %v763_v44, %v733_v22  ;;  %665 = vst [vmem:[%s1299_s24 + $0x68] sm:$0xff] %v576_v45  ;;  %v696_v49 = vadd.f32 %v695_v2, %v576_v45  ;;  %v734_v50 = vmul.f32 %v576_v45, %v576_v45  ;;  %681 = vst [vmem:[%s1299_s24 + $0xe8] sm:$0xff] %v640_v56 }
 0x10c   : > { %v750_v41 = vmul.f32 %v640_v56, %v640_v56 }
 0x10d   : > { %v697_v54 = vadd.f32 %v1041_v37, %v696_v49  ;;  %v765_v55 = vadd.f32 %v764_v47, %v734_v50  ;;  %v748_v37 = vmul.f32 %v1353_v36, %v1353_v36  ;;  %v790_v49 = vlaneseq }
 0x10f   : > { %v698_v62 = vadd.f32 %v1042_v5, %v697_v54  ;;  %v766_v63 = vadd.f32 %v765_v55, %v735_v52  ;;  %v791_v55 = vshrl.u32 %v790_v49, 7 }
 0x111   : > { %v767_v1 = vadd.f32 %v766_v63, %v736_v58  ;;  %v699_v4 = vadd.f32 %v698_v62, %v1308_v48  ;;  %vm792_vm0 = vcmp.eq.s32.totalorder %v791_v55, 0  ;;  %vm794_vm1 = vcmp.eq.s32.totalorder %v791_v55, 1 }
 0x113   : > { %v700_v6 = vadd.f32 %v699_v4, %v1318_v60  ;;  %v768_v10 = vadd.f32 %v767_v1, %v737_v0 }
 0x115   : > { %v701_v16 = vadd.f32 %v1303_v46, %v700_v6  ;;  %v769_v19 = vadd.f32 %v768_v10, %v738_v7  ;;  %v743_v46 = vmul.f32 %v1323_v3, %v1323_v3 }
 0x117   : > { %v770_v24 = vadd.f32 %v769_v19, %v739_v15  ;;  %v702_v25 = vadd.f32 %v1313_v53, %v701_v16  ;;  %v744_v53 = vmul.f32 %v1333_v21, %v1333_v21 }
 0x119   : > { %v703_v48 = vadd.f32 %v702_v25, %v1328_v14  ;;  %v771_v27 = vadd.f32 %v770_v24, %v740_v20 }
 0x11b   : > { %v772_v60 = vadd.f32 %v771_v27, %v741_v26  ;;  %v704_v57 = vadd.f32 %v703_v48, %v1338_v28 }
 0x11d   : > { %v705_v9 = vadd.f32 %v1323_v3, %v704_v57  ;;  %v773_v12 = vadd.f32 %v772_v60, %v742_v61 }
 0x11f   : > { %v774_v30 = vadd.f32 %v773_v12, %v743_v46  ;;  %v706_v59 = vadd.f32 %v1333_v21, %v705_v9 }
 0x121   : > { %v707_v14 = vadd.f32 %v706_v59, %v1348_v33  ;;  %v775_v32 = vadd.f32 %v774_v30, %v744_v53 }
 0x123   : > { %v776_v34 = vadd.f32 %v775_v32, %v745_v13  ;;  %v708_v28 = vadd.f32 %v707_v14, %v624_v31  ;;  %v751_v31 = vmul.f32 %v1360_v43, %v1360_v43 }
 0x125   : > { %v709_v3 = vadd.f32 %v1343_v29, %v708_v28  ;;  %v777_v17 = vadd.f32 %v776_v34, %v746_v35  ;;  %v752_v29 = vmul.f32 %v1058_v51, %v1058_v51 }
 0x127   : > { %v778_v38 = vadd.f32 %v777_v17, %v747_v8  ;;  %v710_v21 = vadd.f32 %v1353_v36, %v709_v3 }
 0x129   : > { %v711_v18 = vadd.f32 %v710_v21, %v637_v11  ;;  %v779_v23 = vadd.f32 %v778_v38, %v748_v37 }
 0x12b   : > { %v780_v33 = vadd.f32 %v779_v23, %v749_v39  ;;  %v712_v40 = vadd.f32 %v711_v18, %v640_v56 }
 0x12d   : > { %v713_v42 = vadd.f32 %v1360_v43, %v712_v40  ;;  %v781_v5 = vadd.f32 %v780_v33, %v750_v41 }
 0x12f   : > { %v714_v2 = vadd.f32 %v1058_v51, %v713_v42  ;;  %v782_v22 = vadd.f32 %v781_v5, %v751_v31 }
 0x131   : > { %v715_v44 = vrot.slane %v714_v2, 4  ;;  %v783_v45 = vadd.f32 %v782_v22, %v752_v29 }
 0x133   : > { %v716_v47 = vadd.f32 %v715_v44, %v714_v2  ;;  %v784_v36 = vrot.slane %v783_v45, 4 }
 0x135   : > { %v717_v11 = vrot.slane %v716_v47, 2  ;;  %v785_v50 = vadd.f32 %v784_v36, %v783_v45 }
 0x137   : > { %v718_v52 = vadd.f32 %v717_v11, %v716_v47  ;;  %v786_v54 = vrot.slane %v785_v50, 2 }
 0x139   : > { %v719_v56 = vrot.slane %v718_v52, 1  ;;  %v787_v58 = vadd.f32 %v786_v54, %v785_v50 }
 0x13b   : > { %v720_v62 = vadd.f32 %v719_v56, %v718_v52  ;;  %v788_v63 = vrot.slane %v787_v58, 1 }
 0x13d   : > { %v789_v43 = vadd.f32 %v788_v63, %v787_v58  ;;  %v793_v51 = vsel %vm792_vm0, %v720_v62, 0.0 }
 0x13f   : > { %v795_v0 = vsel %vm794_vm1, %v789_v43, 0.0 }
 0x140   : > { %v796_v1 = vadd.f32 %v795_v0, %v793_v51 }
 0x142   : > { %797 = vst [vmem:[%s235_s28] sm:$0xff] %v796_v1 }
 0x143 PF: > { %s16_s18 = sadd.s32 1, %s1097_s18  }
 0x144   : > { %p13_p4 = scmp.ge.s32.totalorder %s16_s18, 4  }
 0x146   :  { %15 = sbr.rel (!%p13_p4) target bundleno = 1 (0x1), region = 78 }

// kernel: bottleneck_forward.5
= control target key start
LH: loop header
LB: loop body
LE: loop exit
PB: predicated region body
PF: predicated region fallthrough
CT: control target
= control target key end

     0   :  { %s7669_s18 = smov 0   ;;  %s10261_s0 = inlined_call_operand.vmem [shape: bf16[2,18,18,128], index: 0, kind: input, shape index: {}]   ;;  %s10262_s1 = inlined_call_operand.vmem [shape: f32[1,128], index: 1, kind: input, shape index: {}]   ;;  %s10263_s2 = inlined_call_operand.vmem [shape: f32[1,128], index: 2, kind: input, shape index: {}]   ;;  %s10264_s3 = inlined_call_operand.vmem [shape: bf16[9,128,128], index: 3, kind: input, shape index: {}]   ;;  %s10265_s4 = inlined_call_operand.vmem [shape: bf16[2,256,128], index: 4, kind: output, shape index: {0}]   ;;  %s10266_s5 = inlined_call_operand.vmem [shape: f32[2,8,128], index: 5, kind: output, shape index: {1}]  }
   0x1 LB: > { %s6052_s19 = sadd.s32 4294967295, %s7636_s18   ;;  %p6056_p0 = scmp.ge.s32.totalorder %s7636_s18, 1  ;;  %s7636_s18 = sphi %s7669_s18, %s16_s18  }
   0x2   : > { %p190_p1 = scmp.lt.s32.totalorder %s7636_s18, 3 }
   0x4   : > { %p191_p2 = pnand %p6056_p0, %p190_p1 }
   0x6   : > { %194 = sbr.rel (%p191_p2) target bundleno = 648 (0x288), region = 36 }
   0xb   : > { %v7481_v0 = vld [vmem:[%s10264_s3 + $0x78] sm:$0xff]   ;;  %v521_v1 = vlaneseq  ;;  %v7482_v2 = vld [vmem:[%s10264_s3 + $0x70] sm:$0xff]   ;;  %v7638_v3 = vmov 0.0|0.0   ;;  %p222_p3 = scmp.lt.s32.totalorder %s6052_s19, 1  ;;  %v7483_v7 = vld [vmem:[%s10264_s3 + $0x68] sm:$0xff]   ;;  %vm1979_vm5 = vcmask 1042432  }
   0xc   : > { %v6063_v4 = vcombine.low %v7638_v3, %v7638_v3  ;;  %v6064_v5 = vcombine.high %v7638_v3, %v7638_v3  ;;  %7023 = vmatprep.subr.bf16.mxu0 %v7481_v0  ;;  %7455 = vmatprep.subr.bf16.mxu1 %v7481_v0  ;;  %v7484_v9 = vld [vmem:[%s10264_s3 + $0x60] sm:$0xff]   ;;  %vm949_vm0 = vsmask.f32 3328  ;;  %vm950_vm2 = vsmask.f32 7440  ;;  %v7485_v26 = vld [vmem:[%s10264_s3 + $0x58] sm:$0xff]  }
   0xd   : > { %7024 = vmatpush3.bf16.msra.mxu0 %v7481_v0  ;;  %7463 = vmatpush3.bf16.msra.mxu1 %v7481_v0  ;;  %s10468_s19 = smov (!%p222_p3, %s6052_s19), 1  ;;  %v7685_v6 = vshrl.u32 %v521_v1, 7  ;;  %v7709_v15 = vld [vmem:[%s10262_s1] ss:$0 sm:$0xff]  ;;  %v7486_v40 = vld [vmem:[%s10264_s3 + $0x50] sm:$0xff]   ;;  %vm7735_vm4 = vmor %vm949_vm0, %vm950_vm2  ;;  %vm1980_vm6 = vcmask 1046532  }
   0xe   : > { %831 = vst [vmem:[#allocation2] sm:$0xf] %v6063_v4  ;;  %832 = vst [vmem:[#allocation2 + $0x4] sm:$0xf] %v6064_v5  ;;  %7025 = vmatprep.subr.bf16.mxu0 %v7482_v2  ;;  %7456 = vmatprep.subr.bf16.mxu1 %v7482_v2  ;;  %s7471_s26 = smul.u32 216, %s10468_s19  ;;  %v7487_v59 = vld [vmem:[%s10264_s3 + $0x48] sm:$0xff]  }
   0xf   : > { %833 = vst [vmem:[#allocation2 + $0x8] sm:$0x1] %v6063_v4  ;;  %882 = vst [vmem:[#allocation2 + $0xcc] sm:$0xf] %v6063_v4  ;;  %v7692_v8 = vadd.s32 16, %v7685_v6  ;;  %vm525_vm1 = vcmp.ge.s32.totalorder %v7685_v6, 1 }
  0x10   : > { %883 = vst [vmem:[#allocation2 + $0xd0] sm:$0xf] %v6064_v5  ;;  %884 = vst [vmem:[#allocation2 + $0xd4] sm:$0x1] %v6063_v4  ;;  %s7697_s29 = scalar_lea.vmem %s10261_s0, %s7471_s26  ;;  %v7717_v25 = vld [vmem:[%s10263_s2] ss:$0 sm:$0xff] }
  0x11   : > { %10271 = vst [vmem:[#allocation3_spill] sm:$0xff] %v7685_v6  ;;  %10272 = vst [vmem:[#allocation4_spill] sm:$0xff] %v7692_v8  ;;  %7026 = vmatpush3.bf16.msra.mxu0 %v7482_v2  ;;  %7464 = vmatpush3.bf16.msra.mxu1 %v7482_v2  ;;  %v240_v10 = vld [vmem:[%s7697_s29 + $0xc] sm:$0xff]   ;;  %v6779_v11 = vld [vmem:[%s7697_s29 + $0x60] sm:$0xff]   ;;  %vm536_vm3 = vcmp.le.s32.totalorder %v7692_v8, 16  ;;  %s6543_s23 = sshll.u32 %s10468_s19, 7 }
  0x12   : > { %7027 = vmatprep.subr.bf16.mxu0 %v7483_v7  ;;  %7457 = vmatprep.subr.bf16.mxu1 %v7483_v7  ;;  %v242_v12 = vld [vmem:[%s7697_s29 + $0x14] sm:$0x1]  ;;  %v294_v13 = vunpack.c.l.bf16 %v240_v10  ;;  %v295_v14 = vunpack.c.h.bf16 %v240_v10  ;;  %v6638_v20 = vunpack.c.l.bf16 %v6779_v11  ;;  %v6639_v30 = vunpack.c.h.bf16 %v6779_v11  ;;  %v263_v31 = vld [vmem:[%s7697_s29 + $0x68] sm:$0x1]  ;;  %v264_v58 = vld [vmem:[%s7697_s29 + $0x6c] sm:$0xff]   ;;  %s10125_s25 = scalar_lea.vmem %s10265_s4, %s6543_s23  ;;  %s6060_s26 = sshll.u32 %s10468_s19, 3 }
  0x13   : > { %v296_v19 = vunpack.c.l.bf16 %v242_v12  ;;  %v317_v43 = vunpack.c.l.bf16 %v263_v31  ;;  %v266_v0 = vld [vmem:[%s7697_s29 + $0x74] sm:$0x1]  ;;  %v6776_v1 = vld [vmem:[%s7697_s29 + $0x18] sm:$0xff]   ;;  %v318_v11 = vunpack.c.l.bf16 %v264_v58  ;;  %v319_v12 = vunpack.c.h.bf16 %v264_v58  ;;  %vm8167_vm7 = vmor %vm1979_vm5, %vm1980_vm6  ;;  %s235_s30 = scalar_lea.vmem %s10266_s5, %s6060_s26 }
  0x14   : > { %v355_v28 = vmul.f32 %v7709_v15, %v294_v13  ;;  %v356_v29 = vmul.f32 %v7709_v15, %v295_v14  ;;  %v376_v44 = vmul.f32 %v6638_v20, %v7709_v15  ;;  %v377_v49 = vmul.f32 %v6639_v30, %v7709_v15 }
  0x15   : > { %v885_v16 = vld [vmem:[#allocation2] sm:$0xf]  ;;  %v886_v17 = vld [vmem:[#allocation2 + $0x4] sm:$0xf]  ;;  %7028 = vmatpush3.bf16.msra.mxu0 %v7483_v7  ;;  %7465 = vmatpush3.bf16.msra.mxu1 %v7483_v7  ;;  %v357_v37 = vmul.f32 %v7709_v15, %v296_v19  ;;  %v378_v52 = vmul.f32 %v7709_v15, %v317_v43  ;;  %v379_v19 = vmul.f32 %v7709_v15, %v318_v11 }
  0x16   : > { %v7712_v18 = vld [vmem:[#allocation2 + $0x8] sm:$0x1]  ;;  %v953_v21 = vshrl.u32 %v885_v16, 16  ;;  %v956_v22 = vshll.u32 %v885_v16, 16  ;;  %v962_v23 = vshll.u32 %v886_v17, 16  ;;  %v966_v24 = vshrl.u32 %v886_v17, 16  ;;  %7029 = vmatprep.subr.bf16.mxu0 %v7484_v9  ;;  %7458 = vmatprep.subr.bf16.mxu1 %v7484_v9 }
  0x17   : > { %v972_v27 = vshll.u32 %v7712_v18, 16  ;;  %v416_v38 = vadd.f32 %v7717_v25, %v355_v28  ;;  %v417_v39 = vadd.f32 %v7717_v25, %v356_v29  ;;  %v418_v46 = vadd.f32 %v7717_v25, %v357_v37  ;;  %v245_v7 = vld [vmem:[%s7697_s29 + $0x20] sm:$0x1] }
  0x18   : > { %v955_v32 = vrot.slane %v953_v21, 4  ;;  %v958_v33 = vrot.slane %v956_v22, 5  ;;  %v964_v34 = vrot.slane %v962_v23, 5  ;;  %v968_v35 = vrot.slane %v966_v24, 4  ;;  %v7765_v23 = vld [vmem:[%s7697_s29 + $0x24] sm:$0xff]  }
  0x19   : > { %v974_v36 = vrot.slane %v972_v27, 5  ;;  %7030 = vmatpush3.bf16.msra.mxu0 %v7484_v9  ;;  %7466 = vmatpush3.bf16.msra.mxu1 %v7484_v9  ;;  %v470_v47 = vmax.f32 %v416_v38, 0.0  ;;  %v471_v48 = vmax.f32 %v417_v39, 0.0  ;;  %v437_v53 = vadd.f32 %v7717_v25, %v376_v44  ;;  %v7488_v24 = vld [vmem:[%s10264_s3 + $0x40] sm:$0xff]   ;;  %v7784_v38 = vld [vmem:[%s10264_s3 + $0x38] sm:$0xff]  }
  0x1a   : > { %v959_v41 = vor.u32 %v958_v33, %v955_v32  ;;  %v969_v42 = vor.u32 %v968_v35, %v964_v34  ;;  %7031 = vmatprep.subr.bf16.mxu0 %v7485_v26  ;;  %7459 = vmatprep.subr.bf16.mxu1 %v7485_v26  ;;  %v472_v54 = vmax.f32 %v418_v46, 0.0  ;;  %v438_v57 = vadd.f32 %v7717_v25, %v377_v49 }
  0x1b   : > { %v546_v55 = vsel %vm525_vm1, %v470_v47, 0.0  ;;  %v6545_v56 = vpack.c.bf16 %v471_v48, %v471_v48  ;;  %v491_v63 = vmax.f32 %v437_v53, 0.0  ;;  %v439_v4 = vadd.f32 %v7717_v25, %v378_v52  ;;  %v7793_v47 = vld [vmem:[%s10264_s3 + $0xb8] sm:$0xff]  }
  0x1c   : > { %v960_v50 = vrot.slane %v959_v41, 4  ;;  %v970_v51 = vrot.slane %v969_v42, 4  ;;  %v6544_v62 = vpack.c.bf16 %v546_v55, %v546_v55  ;;  %v548_v3 = vsel %vm536_vm3, %v472_v54, 0.0 }
  0x1d   : > { %7032 = vmatpush3.bf16.msra.mxu0 %v7485_v26  ;;  %7467 = vmatpush3.bf16.msra.mxu1 %v7485_v26  ;;  %835 = vst [vmem:[#allocation2 + $0x10] sm:$0xf] %v6545_v56  ;;  %v492_v5 = vmax.f32 %v438_v57, 0.0  ;;  %v6546_v9 = vpack.c.bf16 %v548_v3, %v548_v3  ;;  %v567_v10 = vsel %vm525_vm1, %v491_v63, 0.0  ;;  %v493_v13 = vmax.f32 %v439_v4, 0.0 }
  0x1e   : > { %v965_v60 = vsel %vm7735_vm4, %v960_v50, %v964_v34  ;;  %v975_v61 = vsel %vm7735_vm4, %v970_v51, %v974_v36  ;;  %7033 = vmatprep.subr.bf16.mxu0 %v7486_v40  ;;  %7460 = vmatprep.subr.bf16.mxu1 %v7486_v40  ;;  %834 = vst [vmem:[#allocation2 + $0xc] sm:$0xf] %v6544_v62  ;;  %v320_v16 = vunpack.c.l.bf16 %v266_v0  ;;  %v6626_v17 = vunpack.c.l.bf16 %v6776_v1  ;;  %v7804_v0 = vld [vmem:[%s7697_s29 + $0x2c] sm:$0x1] }
  0x1f   : > { %v6133_v2 = vcombine.low %v965_v60, %v975_v61  ;;  %v6674_v14 = vpack.c.bf16 %v492_v5, %v567_v10  ;;  %836 = vst [vmem:[#allocation2 + $0x14] sm:$0x1] %v6546_v9  ;;  %v380_v20 = vmul.f32 %v7709_v15, %v319_v12  ;;  %v6627_v21 = vunpack.c.h.bf16 %v6776_v1 }
  0x20   : > { %v299_v22 = vunpack.c.l.bf16 %v245_v7  ;;  %v569_v26 = vsel %vm536_vm3, %v493_v13, 0.0  ;;  %v381_v27 = vmul.f32 %v7709_v15, %v320_v16  ;;  %v358_v28 = vmul.f32 %v6626_v17, %v7709_v15 }
  0x21   : > { %7039 = vmatprep.mubr.bf16.mxu0 %v6133_v2  ;;  %7034 = vmatpush3.bf16.msra.mxu0 %v7486_v40  ;;  %6787 = vst [vmem:[#allocation2 + $0x60] sm:$0xff] %v6674_v14   ;;  %v6567_v29 = vpack.c.bf16 %v569_v26, %v569_v26  ;;  %v440_v30 = vadd.f32 %v7717_v25, %v379_v19  ;;  %v1987_v33 = vrot.slane %v7712_v18, 5  ;;  %v300_v36 = vunpack.c.l.bf16 %v7765_v23 }
  0x22   : > { %7468 = vmatpush3.bf16.msra.mxu1 %v7486_v40  ;;  %7035 = vmatprep.subr.bf16.mxu0 %v7487_v59  ;;  %v441_v31 = vadd.f32 %v7717_v25, %v380_v20  ;;  %v359_v32 = vmul.f32 %v6627_v21, %v7709_v15  ;;  %v442_v34 = vadd.f32 %v7717_v25, %v381_v27  ;;  %v301_v42 = vunpack.c.h.bf16 %v7765_v23  ;;  %v7492_v27 = vld [vmem:[%s10264_s3 + $0xb0] sm:$0xff]  }
  0x23   : > { %7461 = vmatprep.subr.bf16.mxu1 %v7487_v59  ;;  %v360_v35 = vmul.f32 %v7709_v15, %v299_v22  ;;  %857 = vst [vmem:[#allocation2 + $0x68] sm:$0x1] %v6567_v29  ;;  %v494_v39 = vmax.f32 %v440_v30, 0.0  ;;  %v7787_v41 = vadd.f32 %v7717_v25, %v358_v28  ;;  %v302_v29 = vunpack.c.l.bf16 %v7804_v0 }
  0x24   : > { %v888_v37 = vld [vmem:[#allocation2 + $0x10] sm:$0xf]  ;;  %v495_v40 = vmax.f32 %v441_v31, 0.0  ;;  %v496_v48 = vmax.f32 %v442_v34, 0.0  ;;  %v7796_v49 = vadd.f32 %v7717_v25, %v359_v32 }
  0x25   : > { %7036 = vmatpush3.bf16.msra.mxu0 %v7487_v59  ;;  %v887_v43 = vld [vmem:[#allocation2 + $0xc] sm:$0xf]  ;;  %v986_v44 = vshll.u32 %v888_v37, 16  ;;  %v990_v46 = vshrl.u32 %v888_v37, 16  ;;  %v570_v52 = vsel %vm525_vm1, %v494_v39, 0.0  ;;  %v421_v63 = vadd.f32 %v7717_v25, %v360_v35 }
  0x26   : > { %7469 = vmatpush3.bf16.msra.mxu1 %v7487_v59  ;;  %7037 = vmatprep.subr.bf16.mxu0 %v7488_v24  ;;  %v977_v50 = vshrl.u32 %v887_v43, 16  ;;  %v980_v51 = vshll.u32 %v887_v43, 16  ;;  %v6569_v53 = vpack.c.bf16 %v495_v40, %v495_v40  ;;  %v934_v54 = vld [vmem:[#allocation2 + $0x14] sm:$0x1]  ;;  %v572_v57 = vsel %vm536_vm3, %v496_v48, 0.0 }
  0x27   : > { %7462 = vmatprep.subr.bf16.mxu1 %v7488_v24  ;;  %v988_v55 = vrot.slane %v986_v44, 5  ;;  %v992_v56 = vrot.slane %v990_v46, 4  ;;  %v6568_v58 = vpack.c.bf16 %v570_v52, %v570_v52  ;;  %v996_v61 = vshll.u32 %v934_v54, 16 }
  0x28   : > { %v979_v59 = vrot.slane %v977_v50, 4  ;;  %v982_v60 = vrot.slane %v980_v51, 5  ;;  %v901_v62 = vld [vmem:[#allocation2 + $0x60] sm:$0xf]  ;;  %859 = vst [vmem:[#allocation2 + $0x70] sm:$0xf] %v6569_v53  ;;  %v6570_v5 = vpack.c.bf16 %v572_v57, %v572_v57 }
  0x29   : > { %7038 = vmatpush3.bf16.msra.mxu0 %v7488_v24  ;;  %v993_v1 = vor.u32 %v992_v56, %v988_v55  ;;  %v902_v2 = vld [vmem:[#allocation2 + $0x64] sm:$0xf]  ;;  %v1145_v3 = vshrl.u32 %v901_v62, 16  ;;  %v1148_v4 = vshll.u32 %v901_v62, 16  ;;  %858 = vst [vmem:[#allocation2 + $0x6c] sm:$0xf] %v6568_v58 }
  0x2a   : > { %7470 = vmatpush3.bf16.msra.mxu1 %v7488_v24  ;;  %7119 = vmatprep.subr.bf16.mxu0 %v7793_v47  ;;  %v983_v7 = vor.u32 %v982_v60, %v979_v59  ;;  %v998_v9 = vrot.slane %v996_v61, 5  ;;  %v1154_v10 = vshll.u32 %v902_v2, 16  ;;  %v1158_v11 = vshrl.u32 %v902_v2, 16  ;;  %v941_v13 = vld [vmem:[#allocation2 + $0x68] sm:$0x1]  ;;  %v6780_v58 = vld [vmem:[%s7697_s29 + $0x78] sm:$0xff]  }
  0x2b   : > { %7071 = vmatprep.subr.bf16.mxu1 %v7784_v38  ;;  %v994_v12 = vrot.slane %v993_v1, 4  ;;  %v1147_v14 = vrot.slane %v1145_v3, 4  ;;  %v1150_v16 = vrot.slane %v1148_v4, 5  ;;  %860 = vst [vmem:[#allocation2 + $0x74] sm:$0x1] %v6570_v5  ;;  %v473_v17 = vmax.f32 %v7787_v41, 0.0 }
  0x2c   : > { %v984_v19 = vrot.slane %v983_v7, 4  ;;  %v1156_v20 = vrot.slane %v1154_v10, 5  ;;  %v1160_v21 = vrot.slane %v1158_v11, 4  ;;  %v1164_v22 = vshll.u32 %v941_v13, 16  ;;  %v269_v3 = vld [vmem:[%s7697_s29 + $0x80] sm:$0x1] }
  0x2d   : > { %v999_v24 = vsel %vm7735_vm4, %v994_v12, %v998_v9  ;;  %v1151_v26 = vor.u32 %v1150_v16, %v1147_v14  ;;  %v474_v28 = vmax.f32 %v7796_v49, 0.0  ;;  %v475_v34 = vmax.f32 %v421_v63, 0.0  ;;  %v7494_v63 = vld [vmem:[%s10264_s3 + $0xa8] sm:$0xff]  }
  0x2e   : > { %v989_v30 = vsel %vm7735_vm4, %v984_v19, %v988_v55  ;;  %v1161_v31 = vor.u32 %v1160_v21, %v1156_v20  ;;  %v1166_v32 = vrot.slane %v1164_v22, 5  ;;  %v549_v40 = vsel %vm525_vm1, %v473_v17, 0.0  ;;  %v7496_v17 = vld [vmem:[%s10264_s3 + $0xa0] sm:$0xff]  }
  0x2f   : > { %v6134_v35 = vcombine.low %v989_v30, %v999_v24  ;;  %v1152_v37 = vrot.slane %v1151_v26, 4  ;;  %v904_v39 = vld [vmem:[#allocation2 + $0x70] sm:$0xf]  ;;  %v361_v41 = vmul.f32 %v7709_v15, %v300_v36  ;;  %v551_v49 = vsel %vm536_vm3, %v475_v34, 0.0 }
  0x30   : > { %v1162_v43 = vrot.slane %v1161_v31, 4  ;;  %v903_v44 = vld [vmem:[#allocation2 + $0x6c] sm:$0xf]  ;;  %v1178_v46 = vshll.u32 %v904_v39, 16  ;;  %v1182_v48 = vshrl.u32 %v904_v39, 16  ;;  %v6549_v53 = vpack.c.bf16 %v551_v49, %v551_v49  ;;  %v7491_v26 = vld [vmem:[%s10264_s3 + $0x30] sm:$0xff]  }
  0x31   : > { %7040 = vmatmul.mubr.bf16.vlgmr.msra.gmra.mxu0 %v6134_v35  ;;  %v1157_v50 = vsel %vm7735_vm4, %v1152_v37, %v1156_v20  ;;  %v1169_v51 = vshrl.u32 %v903_v44, 16  ;;  %v1172_v52 = vshll.u32 %v903_v44, 16  ;;  %v6659_v57 = vpack.c.bf16 %v474_v28, %v549_v40  ;;  %v270_v37 = vld [vmem:[%s7697_s29 + $0x84] sm:$0xff]   ;;  %v7498_v39 = vld [vmem:[%s10264_s3 + $0x98] sm:$0xff]   ;;  %v272_v49 = vld [vmem:[%s7697_s29 + $0x8c] sm:$0x1] }
  0x32   : > { %v1167_v54 = vsel %vm7735_vm4, %v1162_v43, %v1166_v32  ;;  %v942_v55 = vld [vmem:[#allocation2 + $0x74] sm:$0x1]  ;;  %v1180_v36 = vrot.slane %v1178_v46, 5  ;;  %v1184_v56 = vrot.slane %v1182_v48, 4  ;;  %7120 = vmatpush3.bf16.msra.mxu0 %v7793_v47  ;;  %839 = vst [vmem:[#allocation2 + $0x20] sm:$0x1] %v6549_v53  ;;  %v362_v1 = vmul.f32 %v7709_v15, %v301_v42 }
  0x33   : > { %v6141_v59 = vcombine.low %v1157_v50, %v1167_v54  ;;  %v1171_v60 = vrot.slane %v1169_v51, 4  ;;  %v1174_v61 = vrot.slane %v1172_v52, 5  ;;  %v1188_v62 = vshll.u32 %v942_v55, 16  ;;  %7121 = vmatprep.subr.bf16.mxu0 %v7492_v27  ;;  %6784 = vst [vmem:[#allocation2 + $0x18] sm:$0xff] %v6659_v57   ;;  %v7493_v54 = vld [vmem:[%s10264_s3 + $0x28] sm:$0xff]   ;;  %v7871_v55 = vld [vmem:[%s7697_s29 + $0x30] sm:$0xff]  }
  0x34   : > { %v1185_v0 = vor.u32 %v1184_v56, %v1180_v36  ;;  %v363_v47 = vmul.f32 %v7709_v15, %v302_v29  ;;  %v422_v2 = vadd.f32 %v7717_v25, %v361_v41  ;;  %v6642_v7 = vunpack.c.l.bf16 %v6780_v58 }
  0x35   : > { %7055 = vmatprep.mubr.bf16.mxu1 %v6141_v59  ;;  %v1175_v4 = vor.u32 %v1174_v61, %v1171_v60  ;;  %v1190_v5 = vrot.slane %v1188_v62, 5  ;;  %v6643_v9 = vunpack.c.h.bf16 %v6780_v58  ;;  %v423_v11 = vadd.f32 %v7717_v25, %v362_v1 }
  0x36   : > { %v1186_v10 = vrot.slane %v1185_v0, 4  ;;  %7122 = vmatpush3.bf16.msra.mxu0 %v7492_v27  ;;  %v424_v12 = vadd.f32 %v7717_v25, %v363_v47  ;;  %v476_v13 = vmax.f32 %v422_v2, 0.0  ;;  %v323_v14 = vunpack.c.l.bf16 %v269_v3  ;;  %v7879_v47 = vld [vmem:[%s7697_s29 + $0x38] sm:$0x1]  ;;  %v7500_v2 = vld [vmem:[%s10264_s3 + $0x90] sm:$0xff]  }
  0x37   : > { %v1176_v23 = vrot.slane %v1175_v4, 4  ;;  %v382_v42 = vmul.f32 %v6642_v7, %v7709_v15  ;;  %v383_v16 = vmul.f32 %v6643_v9, %v7709_v15  ;;  %7123 = vmatprep.subr.bf16.mxu0 %v7494_v63  ;;  %v477_v20 = vmax.f32 %v423_v11, 0.0 }
  0x38   : > { %v1191_v19 = vsel %vm7735_vm4, %v1186_v10, %v1190_v5  ;;  %v478_v21 = vmax.f32 %v424_v12, 0.0  ;;  %v552_v22 = vsel %vm525_vm1, %v476_v13, 0.0  ;;  %v384_v28 = vmul.f32 %v7709_v15, %v323_v14 }
  0x39   : > { %v1181_v24 = vsel %vm7735_vm4, %v1176_v23, %v1180_v36  ;;  %v6550_v27 = vpack.c.bf16 %v552_v22, %v552_v22  ;;  %v443_v29 = vadd.f32 %v7717_v25, %v382_v42  ;;  %v935_v31 = vld [vmem:[#allocation2 + $0x20] sm:$0x1]  ;;  %v6551_v34 = vpack.c.bf16 %v477_v20, %v477_v20 }
  0x3a   : > { %v6142_v30 = vcombine.low %v1181_v24, %v1191_v19  ;;  %v554_v32 = vsel %vm536_vm3, %v478_v21, 0.0  ;;  %v444_v35 = vadd.f32 %v7717_v25, %v383_v16  ;;  %7124 = vmatpush3.bf16.msra.mxu0 %v7494_v63  ;;  %v889_v40 = vld [vmem:[#allocation2 + $0x18] sm:$0xf]  ;;  %v890_v41 = vld [vmem:[#allocation2 + $0x1c] sm:$0xf]  ;;  %v1020_v43 = vshll.u32 %v935_v31, 16 }
  0x3b   : > { %v6552_v44 = vpack.c.bf16 %v554_v32, %v554_v32  ;;  %840 = vst [vmem:[#allocation2 + $0x24] sm:$0xf] %v6550_v27  ;;  %v445_v46 = vadd.f32 %v7717_v25, %v384_v28  ;;  %v497_v48 = vmax.f32 %v443_v29, 0.0  ;;  %7125 = vmatprep.subr.bf16.mxu0 %v7496_v17  ;;  %v1001_v50 = vshrl.u32 %v889_v40, 16  ;;  %841 = vst [vmem:[#allocation2 + $0x28] sm:$0xf] %v6551_v34 }
  0x3c   : > { %7056 = vmatmul.mubr.bf16.vlgmr.msra.gmra.mxu1 %v6142_v30  ;;  %v1004_v51 = vshll.u32 %v889_v40, 16  ;;  %v1010_v52 = vshll.u32 %v890_v41, 16  ;;  %v1014_v53 = vshrl.u32 %v890_v41, 16  ;;  %v1022_v36 = vrot.slane %v1020_v43, 5  ;;  %v7495_v16 = vld [vmem:[%s10264_s3 + $0x20] sm:$0xff]  }
  0x3d   : > { %7072 = vmatpush3.bf16.msra.mxu1 %v7784_v38  ;;  %842 = vst [vmem:[#allocation2 + $0x2c] sm:$0x1] %v6552_v44  ;;  %v498_v56 = vmax.f32 %v444_v35, 0.0  ;;  %v499_v57 = vmax.f32 %v445_v46, 0.0  ;;  %v573_v58 = vsel %vm525_vm1, %v497_v48, 0.0  ;;  %v1003_v59 = vrot.slane %v1001_v50, 4 }
  0x3e   : > { %7073 = vmatprep.subr.bf16.mxu1 %v7491_v26  ;;  %v1006_v60 = vrot.slane %v1004_v51, 5  ;;  %v1012_v61 = vrot.slane %v1010_v52, 5  ;;  %v1016_v62 = vrot.slane %v1014_v53, 4  ;;  %7126 = vmatpush3.bf16.msra.mxu0 %v7496_v17  ;;  %v324_v1 = vunpack.c.l.bf16 %v270_v37  ;;  %v7916_v46 = vld [vmem:[%s10264_s3 + $0x80] sm:$0xff]  }
  0x3f   : > { %v575_v63 = vsel %vm536_vm3, %v499_v57, 0.0  ;;  %v6679_v0 = vpack.c.bf16 %v498_v56, %v573_v58  ;;  %v325_v38 = vunpack.c.h.bf16 %v270_v37  ;;  %7127 = vmatprep.subr.bf16.mxu0 %v7498_v39  ;;  %v326_v7 = vunpack.c.l.bf16 %v272_v49  ;;  %v7499_v57 = vld [vmem:[%s10264_s3 + $0x10] sm:$0xff]  }
  0x40   : > { %v1007_v3 = vor.u32 %v1006_v60, %v1003_v59  ;;  %v1017_v4 = vor.u32 %v1016_v62, %v1012_v61  ;;  %v6573_v5 = vpack.c.bf16 %v575_v63, %v575_v63  ;;  %v385_v9 = vmul.f32 %v7709_v15, %v324_v1 }
  0x41   : > { %7074 = vmatpush3.bf16.msra.mxu1 %v7491_v26  ;;  %6788 = vst [vmem:[#allocation2 + $0x78] sm:$0xff] %v6679_v0   ;;  %v386_v10 = vmul.f32 %v7709_v15, %v325_v38  ;;  %v6630_v11 = vunpack.c.l.bf16 %v7871_v55  ;;  %v6631_v12 = vunpack.c.h.bf16 %v7871_v55  ;;  %v387_v42 = vmul.f32 %v7709_v15, %v326_v7  ;;  %v7502_v26 = vld [vmem:[%s10264_s3 + $0x88] sm:$0xff]   ;;  %v252_v7 = vld [vmem:[%s7697_s29 + $0x3c] sm:$0xff]  }
  0x42   : > { %v1008_v13 = vrot.slane %v1007_v3, 4  ;;  %v1018_v23 = vrot.slane %v1017_v4, 4  ;;  %v891_v14 = vld [vmem:[#allocation2 + $0x24] sm:$0xf]  ;;  %863 = vst [vmem:[#allocation2 + $0x80] sm:$0x1] %v6573_v5  ;;  %7075 = vmatprep.subr.bf16.mxu1 %v7493_v54  ;;  %v305_v17 = vunpack.c.l.bf16 %v7879_v47  ;;  %7128 = vmatpush3.bf16.msra.mxu0 %v7498_v39  ;;  %v446_v22 = vadd.f32 %v7717_v25, %v385_v9 }
  0x43   : > { %v7893_v19 = vld [vmem:[#allocation2 + $0x28] sm:$0xf]  ;;  %v1025_v20 = vshrl.u32 %v891_v14, 16  ;;  %v1028_v21 = vshll.u32 %v891_v14, 16  ;;  %v447_v24 = vadd.f32 %v7717_v25, %v386_v10  ;;  %7129 = vmatprep.subr.bf16.mxu0 %v7500_v2  ;;  %v7497_v39 = vld [vmem:[%s10264_s3 + $0x18] sm:$0xff]   ;;  %v448_v43 = vadd.f32 %v7717_v25, %v387_v42 }
  0x44   : > { %v1013_v27 = vsel %vm7735_vm4, %v1008_v13, %v1012_v61  ;;  %v1023_v28 = vsel %vm7735_vm4, %v1018_v23, %v1022_v36  ;;  %v7904_v29 = vld [vmem:[#allocation2 + $0x2c] sm:$0x1]  ;;  %v1034_v30 = vshll.u32 %v7893_v19, 16  ;;  %v1038_v31 = vshrl.u32 %v7893_v19, 16  ;;  %v254_v13 = vld [vmem:[%s7697_s29 + $0x44] sm:$0x1] }
  0x45   : > { %v6135_v32 = vcombine.low %v1013_v27, %v1023_v28  ;;  %v1027_v34 = vrot.slane %v1025_v20, 4  ;;  %v1030_v35 = vrot.slane %v1028_v21, 5  ;;  %v1044_v37 = vshll.u32 %v7904_v29, 16  ;;  %7076 = vmatpush3.bf16.msra.mxu1 %v7493_v54  ;;  %v7945_v27 = vld [vmem:[%s10264_s3 + $0x138] sm:$0xff]  }
  0x46   : > { %v1036_v40 = vrot.slane %v1034_v30, 5  ;;  %v1040_v41 = vrot.slane %v1038_v31, 4  ;;  %v500_v44 = vmax.f32 %v446_v22, 0.0  ;;  %7077 = vmatprep.subr.bf16.mxu1 %v7495_v16  ;;  %7130 = vmatpush3.bf16.msra.mxu0 %v7500_v2  ;;  %v501_v50 = vmax.f32 %v447_v24, 0.0  ;;  %v6781_v31 = vld [vmem:[%s7697_s29 + $0x90] sm:$0xff]  }
  0x47   : > { %7043 = vmatprep.mubr.bf16.mxu0 %v6135_v32  ;;  %v1031_v48 = vor.u32 %v1030_v35, %v1027_v34  ;;  %v1046_v49 = vrot.slane %v1044_v37, 5  ;;  %v364_v51 = vmul.f32 %v6630_v11, %v7709_v15  ;;  %7131 = vmatprep.subr.bf16.mxu0 %v7502_v26  ;;  %v502_v55 = vmax.f32 %v448_v43, 0.0  ;;  %v275_v32 = vld [vmem:[%s7697_s29 + $0x98] sm:$0x1] }
  0x48   : > { %v1041_v52 = vor.u32 %v1040_v41, %v1036_v40  ;;  %v905_v53 = vld [vmem:[#allocation2 + $0x78] sm:$0xf]  ;;  %v906_v54 = vld [vmem:[#allocation2 + $0x7c] sm:$0xf]  ;;  %v576_v36 = vsel %vm525_vm1, %v500_v44, 0.0  ;;  %v365_v56 = vmul.f32 %v6631_v12, %v7709_v15  ;;  %v6575_v42 = vpack.c.bf16 %v501_v50, %v501_v50 }
  0x49   : > { %v1032_v58 = vrot.slane %v1031_v48, 4  ;;  %v943_v59 = vld [vmem:[#allocation2 + $0x80] sm:$0x1]  ;;  %v1193_v60 = vshrl.u32 %v905_v53, 16  ;;  %v1196_v61 = vshll.u32 %v905_v53, 16  ;;  %v1202_v62 = vshll.u32 %v906_v54, 16  ;;  %7078 = vmatpush3.bf16.msra.mxu1 %v7495_v16 }
  0x4a   : > { %v1042_v63 = vrot.slane %v1041_v52, 4  ;;  %v1206_v0 = vshrl.u32 %v906_v54, 16  ;;  %v1212_v1 = vshll.u32 %v943_v59, 16  ;;  %v578_v38 = vsel %vm536_vm3, %v502_v55, 0.0  ;;  %7079 = vmatprep.subr.bf16.mxu1 %v7497_v39  ;;  %7132 = vmatpush3.bf16.msra.mxu0 %v7502_v26  ;;  %v7501_v26 = vld [vmem:[%s10264_s3 + $0x8] sm:$0xff]  }
  0x4b   : > { %v1037_v2 = vsel %vm7735_vm4, %v1032_v58, %v1036_v40  ;;  %v1195_v3 = vrot.slane %v1193_v60, 4  ;;  %v1198_v4 = vrot.slane %v1196_v61, 5  ;;  %v1204_v5 = vrot.slane %v1202_v62, 5  ;;  %7133 = vmatprep.subr.bf16.mxu0 %v7916_v46  ;;  %865 = vst [vmem:[#allocation2 + $0x88] sm:$0xf] %v6575_v42  ;;  %v7503_v40 = vld [vmem:[%s10264_s3] sm:$0xff]  }
  0x4c   : > { %v1047_v9 = vsel %vm7735_vm4, %v1042_v63, %v1046_v49  ;;  %v1208_v10 = vrot.slane %v1206_v0, 4  ;;  %v1214_v11 = vrot.slane %v1212_v1, 5  ;;  %v6574_v12 = vpack.c.bf16 %v576_v36, %v576_v36  ;;  %v7973_v0 = vld [vmem:[%s10264_s3 + $0xf8] sm:$0xff]  }
  0x4d   : > { %v6136_v23 = vcombine.low %v1037_v2, %v1047_v9  ;;  %v1199_v14 = vor.u32 %v1198_v4, %v1195_v3  ;;  %v6576_v16 = vpack.c.bf16 %v578_v38, %v578_v38  ;;  %7080 = vmatpush3.bf16.msra.mxu1 %v7497_v39  ;;  %v366_v21 = vmul.f32 %v7709_v15, %v305_v17 }
  0x4e   : > { %v1209_v20 = vor.u32 %v1208_v10, %v1204_v5  ;;  %864 = vst [vmem:[#allocation2 + $0x84] sm:$0xf] %v6574_v12  ;;  %v425_v22 = vadd.f32 %v7717_v25, %v364_v51  ;;  %v426_v24 = vadd.f32 %v7717_v25, %v365_v56  ;;  %7081 = vmatprep.subr.bf16.mxu1 %v7499_v57  ;;  %v306_v47 = vunpack.c.l.bf16 %v252_v7  ;;  %v7985_v12 = vld [vmem:[%s7697_s29 + $0xa4] sm:$0x1] }
  0x4f   : > { %7044 = vmatmul.mubr.bf16.gmra.mxu0 %v6136_v23  ;;  %v1200_v28 = vrot.slane %v1199_v14, 4  ;;  %866 = vst [vmem:[#allocation2 + $0x8c] sm:$0x1] %v6576_v16  ;;  %v307_v17 = vunpack.c.h.bf16 %v252_v7  ;;  %v308_v30 = vunpack.c.l.bf16 %v254_v13  ;;  %v427_v35 = vadd.f32 %v7717_v25, %v366_v21  ;;  %v276_v16 = vld [vmem:[%s7697_s29 + $0x9c] sm:$0xff]  }
  0x50   : > { %v1210_v34 = vrot.slane %v1209_v20, 4  ;;  %v479_v37 = vmax.f32 %v425_v22, 0.0  ;;  %v480_v39 = vmax.f32 %v426_v24, 0.0  ;;  %7134 = vmatpush3.bf16.msra.mxu0 %v7916_v46  ;;  %v367_v43 = vmul.f32 %v7709_v15, %v306_v47 }
  0x51   : > { %v1205_v41 = vsel %vm7735_vm4, %v1200_v28, %v1204_v5  ;;  %v368_v44 = vmul.f32 %v7709_v15, %v307_v17  ;;  %v369_v48 = vmul.f32 %v7709_v15, %v308_v30  ;;  %7082 = vmatpush3.bf16.msra.mxu1 %v7499_v57  ;;  %v481_v50 = vmax.f32 %v427_v35, 0.0  ;;  %7215 = vmatprep.subr.bf16.mxu0 %v7945_v27 }
  0x52   : > { %v1215_v49 = vsel %vm7735_vm4, %v1210_v34, %v1214_v11  ;;  %v555_v51 = vsel %vm525_vm1, %v479_v37, 0.0  ;;  %v6646_v52 = vunpack.c.l.bf16 %v6781_v31  ;;  %7083 = vmatprep.subr.bf16.mxu1 %v7501_v26  ;;  %v428_v54 = vadd.f32 %v7717_v25, %v367_v43  ;;  %v7975_v1 = vld [vmem:[#allocation2 + $0x88] sm:$0xf] }
  0x53   : > { %v6143_v46 = vcombine.low %v1205_v41, %v1215_v49  ;;  %v6664_v53 = vpack.c.bf16 %v480_v39, %v555_v51  ;;  %v429_v55 = vadd.f32 %v7717_v25, %v368_v44  ;;  %v557_v36 = vsel %vm536_vm3, %v481_v50, 0.0 }
  0x54   : > { %v430_v56 = vadd.f32 %v7717_v25, %v369_v48  ;;  %v6647_v57 = vunpack.c.h.bf16 %v6781_v31  ;;  %v329_v58 = vunpack.c.l.bf16 %v275_v32  ;;  %v6555_v60 = vpack.c.bf16 %v557_v36, %v557_v36 }
  0x55   : > { %7059 = vmatprep.mubr.bf16.mxu1 %v6143_v46  ;;  %v907_v59 = vld [vmem:[#allocation2 + $0x84] sm:$0xf]  ;;  %6785 = vst [vmem:[#allocation2 + $0x30] sm:$0xff] %v6664_v53   ;;  %v482_v61 = vmax.f32 %v428_v54, 0.0  ;;  %v483_v62 = vmax.f32 %v429_v55, 0.0  ;;  %v388_v63 = vmul.f32 %v6646_v52, %v7709_v15  ;;  %7084 = vmatpush3.bf16.msra.mxu1 %v7501_v26  ;;  %v1226_v7 = vshll.u32 %v7975_v1, 16 }
  0x56   : > { %v7977_v38 = vld [vmem:[#allocation2 + $0x8c] sm:$0x1]  ;;  %v1217_v2 = vshrl.u32 %v907_v59, 16  ;;  %v1220_v3 = vshll.u32 %v907_v59, 16  ;;  %v389_v4 = vmul.f32 %v6647_v57, %v7709_v15  ;;  %v390_v5 = vmul.f32 %v7709_v15, %v329_v58  ;;  %7085 = vmatprep.subr.bf16.mxu1 %v7503_v40  ;;  %845 = vst [vmem:[#allocation2 + $0x38] sm:$0x1] %v6555_v60 }
  0x57   : > { %v1230_v9 = vshrl.u32 %v7975_v1, 16  ;;  %v1236_v10 = vshll.u32 %v7977_v38, 16  ;;  %v484_v11 = vmax.f32 %v430_v56, 0.0  ;;  %v558_v14 = vsel %vm525_vm1, %v482_v61, 0.0 }
  0x58   : > { %v1219_v13 = vrot.slane %v1217_v2, 4  ;;  %v1222_v23 = vrot.slane %v1220_v3, 5  ;;  %v6557_v42 = vpack.c.bf16 %v483_v62, %v483_v62  ;;  %v1228_v20 = vrot.slane %v1226_v7, 5  ;;  %v8021_v2 = vld [vmem:[%s10262_s1] ss:$0 sm:$0xff] }
  0x59   : > { %v1232_v15 = vrot.slane %v1230_v9, 4  ;;  %v1238_v21 = vrot.slane %v1236_v10, 5  ;;  %v560_v22 = vsel %vm536_vm3, %v484_v11, 0.0  ;;  %7086 = vmatpush3.bf16.msra.mxu1 %v7503_v40  ;;  %v6556_v26 = vpack.c.bf16 %v558_v14, %v558_v14 }
  0x5a   : > { %v1223_v24 = vor.u32 %v1222_v23, %v1219_v13  ;;  %v6558_v28 = vpack.c.bf16 %v560_v22, %v560_v22  ;;  %847 = vst [vmem:[#allocation2 + $0x40] sm:$0xf] %v6557_v42  ;;  %v449_v47 = vadd.f32 %v7717_v25, %v388_v63  ;;  %7167 = vmatprep.subr.bf16.mxu1 %v7973_v0  ;;  %v330_v32 = vunpack.c.l.bf16 %v276_v16 }
  0x5b   : > { %v1233_v17 = vor.u32 %v1232_v15, %v1228_v20  ;;  %v450_v30 = vadd.f32 %v7717_v25, %v389_v4  ;;  %v451_v31 = vadd.f32 %v7717_v25, %v390_v5  ;;  %846 = vst [vmem:[#allocation2 + $0x3c] sm:$0xf] %v6556_v26  ;;  %v331_v40 = vunpack.c.h.bf16 %v276_v16  ;;  %v8040_v26 = vld [vmem:[%s10263_s2] ss:$0 sm:$0xff] }
  0x5c   : > { %v1224_v34 = vrot.slane %v1223_v24, 4  ;;  %v7996_v35 = vld [vmem:[#allocation2 + $0x30] sm:$0xf]  ;;  %v7998_v37 = vld [vmem:[#allocation2 + $0x34] sm:$0xf]  ;;  %v503_v39 = vmax.f32 %v449_v47, 0.0  ;;  %v332_v41 = vunpack.c.l.bf16 %v7985_v12  ;;  %v391_v3 = vmul.f32 %v8021_v2, %v330_v32 }
  0x5d   : > { %848 = vst [vmem:[#allocation2 + $0x44] sm:$0x1] %v6558_v28  ;;  %v1234_v43 = vrot.slane %v1233_v17, 4  ;;  %v1049_v44 = vshrl.u32 %v7996_v35, 16  ;;  %v1052_v48 = vshll.u32 %v7996_v35, 16  ;;  %v1058_v49 = vshll.u32 %v7998_v37, 16 }
  0x5e   : > { %v1229_v25 = vsel %vm7735_vm4, %v1224_v34, %v1228_v20  ;;  %v8006_v50 = vld [vmem:[#allocation2 + $0x38] sm:$0x1]  ;;  %v1062_v51 = vshrl.u32 %v7998_v37, 16  ;;  %v504_v52 = vmax.f32 %v450_v30, 0.0  ;;  %v505_v46 = vmax.f32 %v451_v31, 0.0  ;;  %v6778_v47 = vld [vmem:[%s7697_s29 + $0x48] sm:$0xff]  }
  0x5f   : > { %v1239_v53 = vsel %vm7735_vm4, %v1234_v43, %v1238_v21  ;;  %v1051_v54 = vrot.slane %v1049_v44, 4  ;;  %v1054_v55 = vrot.slane %v1052_v48, 5  ;;  %v1060_v36 = vrot.slane %v1058_v49, 5  ;;  %v257_v34 = vld [vmem:[%s7697_s29 + $0x50] sm:$0x1] }
  0x60   : > { %v6144_v56 = vcombine.low %v1229_v25, %v1239_v53  ;;  %v1064_v57 = vrot.slane %v1062_v51, 4  ;;  %v1068_v58 = vshll.u32 %v8006_v50, 16  ;;  %v579_v59 = vsel %vm525_vm1, %v503_v39, 0.0 }
  0x61   : > { %v1055_v60 = vor.u32 %v1054_v55, %v1051_v54  ;;  %v8014_v61 = vld [vmem:[#allocation2 + $0x40] sm:$0xf]  ;;  %v581_v62 = vsel %vm536_vm3, %v505_v46, 0.0  ;;  %v6684_v63 = vpack.c.bf16 %v504_v52, %v579_v59  ;;  %v392_v23 = vmul.f32 %v8021_v2, %v331_v40 }
  0x62   : > { %7060 = vmatmul.mubr.bf16.gmra.mxu1 %v6144_v56  ;;  %v1065_v4 = vor.u32 %v1064_v57, %v1060_v36  ;;  %v1070_v5 = vrot.slane %v1068_v58, 5  ;;  %v1082_v7 = vshll.u32 %v8014_v61, 16  ;;  %v1086_v9 = vshrl.u32 %v8014_v61, 16  ;;  %v8026_v11 = vld [vmem:[#allocation2 + $0x3c] sm:$0xf] }
  0x63   : > { %v1056_v10 = vrot.slane %v1055_v60, 4  ;;  %v6579_v13 = vpack.c.bf16 %v581_v62, %v581_v62  ;;  %6789 = vst [vmem:[#allocation2 + $0x90] sm:$0xff] %v6684_v63   ;;  %v393_v14 = vmul.f32 %v8021_v2, %v332_v41  ;;  %v1073_v16 = vshrl.u32 %v8026_v11, 16 }
  0x64   : > { %v8028_v12 = vld [vmem:[#allocation2 + $0x44] sm:$0x1]  ;;  %v1066_v42 = vrot.slane %v1065_v4, 4  ;;  %v1076_v20 = vshll.u32 %v8026_v11, 16  ;;  %v1084_v15 = vrot.slane %v1082_v7, 5  ;;  %v1088_v22 = vrot.slane %v1086_v9, 4 }
  0x65   : > { %v1061_v21 = vsel %vm7735_vm4, %v1056_v10, %v1060_v36  ;;  %v1092_v24 = vshll.u32 %v8028_v12, 16  ;;  %869 = vst [vmem:[#allocation2 + $0x98] sm:$0x1] %v6579_v13  ;;  %v452_v28 = vadd.f32 %v8040_v26, %v391_v3  ;;  %v1075_v30 = vrot.slane %v1073_v16, 4  ;;  %v258_v10 = vld [vmem:[%s7697_s29 + $0x54] sm:$0xff]  }
  0x66   : > { %v1071_v17 = vsel %vm7735_vm4, %v1066_v42, %v1070_v5  ;;  %v1078_v31 = vrot.slane %v1076_v20, 5  ;;  %v453_v32 = vadd.f32 %v8040_v26, %v392_v23  ;;  %v1089_v40 = vor.u32 %v1088_v22, %v1084_v15  ;;  %v260_v16 = vld [vmem:[%s7697_s29 + $0x5c] sm:$0x1] }
  0x67   : > { %v6137_v39 = vcombine.low %v1061_v21, %v1071_v17  ;;  %v1094_v41 = vrot.slane %v1092_v24, 5  ;;  %v454_v43 = vadd.f32 %v8040_v26, %v393_v14  ;;  %v506_v48 = vmax.f32 %v452_v28, 0.0 }
  0x68   : > { %v1079_v44 = vor.u32 %v1078_v31, %v1075_v30  ;;  %v507_v49 = vmax.f32 %v453_v32, 0.0  ;;  %v6634_v25 = vunpack.c.l.bf16 %v6778_v47  ;;  %v1090_v51 = vrot.slane %v1089_v40, 4 }
  0x69   : > { %7047 = vmatprep.mubr.bf16.mxu0 %v6137_v39  ;;  %v508_v52 = vmax.f32 %v454_v43, 0.0  ;;  %v6635_v46 = vunpack.c.h.bf16 %v6778_v47  ;;  %v311_v53 = vunpack.c.l.bf16 %v257_v34  ;;  %v582_v56 = vsel %vm525_vm1, %v506_v48, 0.0 }
  0x6a   : > { %v1080_v54 = vrot.slane %v1079_v44, 4  ;;  %v8049_v55 = vld [vmem:[#allocation2 + $0x90] sm:$0xf]  ;;  %v8051_v36 = vld [vmem:[#allocation2 + $0x94] sm:$0xf]  ;;  %v6581_v57 = vpack.c.bf16 %v507_v49, %v507_v49  ;;  %v370_v58 = vmul.f32 %v8021_v2, %v6634_v25  ;;  %v1095_v59 = vsel %vm7735_vm4, %v1090_v51, %v1094_v41 }
  0x6b   : > { %v1241_v60 = vshrl.u32 %v8049_v55, 16  ;;  %v1244_v62 = vshll.u32 %v8049_v55, 16  ;;  %v1250_v63 = vshll.u32 %v8051_v36, 16  ;;  %v1254_v5 = vshrl.u32 %v8051_v36, 16 }
  0x6c   : > { %v1085_v3 = vsel %vm7735_vm4, %v1080_v54, %v1084_v15  ;;  %v8063_v4 = vld [vmem:[#allocation2 + $0x98] sm:$0x1]  ;;  %v584_v7 = vsel %vm536_vm3, %v508_v52, 0.0  ;;  %v6580_v9 = vpack.c.bf16 %v582_v56, %v582_v56  ;;  %871 = vst [vmem:[#allocation2 + $0xa0] sm:$0xf] %v6581_v57  ;;  %v371_v15 = vmul.f32 %v8021_v2, %v6635_v46 }
  0x6d   : > { %v6138_v13 = vcombine.low %v1085_v3, %v1095_v59  ;;  %v1243_v23 = vrot.slane %v1241_v60, 4  ;;  %v1246_v14 = vrot.slane %v1244_v62, 5  ;;  %v1252_v42 = vrot.slane %v1250_v63, 5 }
  0x6e   : > { %v1256_v20 = vrot.slane %v1254_v5, 4  ;;  %v1260_v21 = vshll.u32 %v8063_v4, 16  ;;  %v6582_v22 = vpack.c.bf16 %v584_v7, %v584_v7  ;;  %870 = vst [vmem:[#allocation2 + $0x9c] sm:$0xf] %v6580_v9  ;;  %v372_v28 = vmul.f32 %v8021_v2, %v311_v53  ;;  %v6782_v7 = vld [vmem:[%s7697_s29 + $0xa8] sm:$0xff]  }
  0x6f   : > { %7048 = vmatmul.mubr.bf16.gmra.mxu0 %v6138_v13  ;;  %v1247_v24 = vor.u32 %v1246_v14, %v1243_v23  ;;  %v431_v47 = vadd.f32 %v8040_v26, %v370_v58  ;;  %v312_v17 = vunpack.c.l.bf16 %v258_v10  ;;  %v432_v32 = vadd.f32 %v8040_v26, %v371_v15  ;;  %v281_v14 = vld [vmem:[%s7697_s29 + $0xb0] sm:$0x1] }
  0x70   : > { %v1257_v30 = vor.u32 %v1256_v20, %v1252_v42  ;;  %v1262_v31 = vrot.slane %v1260_v21, 5  ;;  %872 = vst [vmem:[#allocation2 + $0xa4] sm:$0x1] %v6582_v22  ;;  %v313_v34 = vunpack.c.h.bf16 %v258_v10  ;;  %v433_v40 = vadd.f32 %v8040_v26, %v372_v28 }
  0x71   : > { %v1248_v39 = vrot.slane %v1247_v24, 4  ;;  %v485_v41 = vmax.f32 %v431_v47, 0.0  ;;  %v314_v43 = vunpack.c.l.bf16 %v260_v16  ;;  %v486_v48 = vmax.f32 %v432_v32, 0.0 }
  0x72   : > { %v1258_v44 = vrot.slane %v1257_v30, 4  ;;  %v373_v49 = vmul.f32 %v8021_v2, %v312_v17  ;;  %v374_v25 = vmul.f32 %v8021_v2, %v313_v34  ;;  %v487_v46 = vmax.f32 %v433_v40, 0.0  ;;  %v8106_v34 = vld [vmem:[%s7697_s29 + $0xb4] sm:$0xff]  }
  0x73   : > { %v1253_v51 = vsel %vm7735_vm4, %v1248_v39, %v1252_v42  ;;  %v8080_v52 = vld [vmem:[#allocation2 + $0xa0] sm:$0xf]  ;;  %v561_v53 = vsel %vm525_vm1, %v485_v41, 0.0  ;;  %v375_v54 = vmul.f32 %v8021_v2, %v314_v43  ;;  %v6650_v32 = vunpack.c.l.bf16 %v6782_v7 }
  0x74   : > { %v1263_v56 = vsel %vm7735_vm4, %v1258_v44, %v1262_v31  ;;  %v1274_v57 = vshll.u32 %v8080_v52, 16  ;;  %v1278_v58 = vshrl.u32 %v8080_v52, 16  ;;  %v6669_v59 = vpack.c.bf16 %v486_v48, %v561_v53 }
  0x75   : > { %v6145_v60 = vcombine.low %v1253_v51, %v1263_v56  ;;  %v8089_v62 = vld [vmem:[#allocation2 + $0x9c] sm:$0xf]  ;;  %v563_v63 = vsel %vm536_vm3, %v487_v46, 0.0  ;;  %v434_v3 = vadd.f32 %v8040_v26, %v373_v49  ;;  %v435_v5 = vadd.f32 %v8040_v26, %v374_v25 }
  0x76   : > { %v1265_v9 = vshrl.u32 %v8089_v62, 16  ;;  %v1268_v10 = vshll.u32 %v8089_v62, 16  ;;  %v1276_v13 = vrot.slane %v1274_v57, 5  ;;  %v1280_v23 = vrot.slane %v1278_v58, 4  ;;  %6786 = vst [vmem:[#allocation2 + $0x48] sm:$0xff] %v6669_v59  }
  0x77   : > { %7063 = vmatprep.mubr.bf16.mxu1 %v6145_v60  ;;  %v8099_v42 = vld [vmem:[#allocation2 + $0xa4] sm:$0x1]  ;;  %v6561_v16 = vpack.c.bf16 %v563_v63, %v563_v63  ;;  %v436_v20 = vadd.f32 %v8040_v26, %v375_v54  ;;  %v488_v21 = vmax.f32 %v434_v3, 0.0  ;;  %v489_v22 = vmax.f32 %v435_v5, 0.0 }
  0x78   : > { %v1267_v15 = vrot.slane %v1265_v9, 4  ;;  %v1270_v24 = vrot.slane %v1268_v10, 5  ;;  %v1281_v28 = vor.u32 %v1280_v23, %v1276_v13  ;;  %v1284_v47 = vshll.u32 %v8099_v42, 16 }
  0x79   : > { %851 = vst [vmem:[#allocation2 + $0x50] sm:$0x1] %v6561_v16  ;;  %v490_v17 = vmax.f32 %v436_v20, 0.0  ;;  %v564_v30 = vsel %vm525_vm1, %v488_v21, 0.0  ;;  %v6563_v31 = vpack.c.bf16 %v489_v22, %v489_v22  ;;  %v6651_v48 = vunpack.c.h.bf16 %v6782_v7  ;;  %v284_v20 = vld [vmem:[%s7697_s29 + $0xbc] sm:$0x1] }
  0x7a   : > { %v1271_v39 = vor.u32 %v1270_v24, %v1267_v15  ;;  %v1282_v40 = vrot.slane %v1281_v28, 4  ;;  %v1286_v41 = vrot.slane %v1284_v47, 5  ;;  %v6562_v43 = vpack.c.bf16 %v564_v30, %v564_v30 }
  0x7b   : > { %v566_v44 = vsel %vm536_vm3, %v490_v17, 0.0  ;;  %853 = vst [vmem:[#allocation2 + $0x58] sm:$0xf] %v6563_v31  ;;  %v335_v49 = vunpack.c.l.bf16 %v281_v14  ;;  %v394_v25 = vmul.f32 %v8021_v2, %v6650_v32  ;;  %v336_v54 = vunpack.c.l.bf16 %v8106_v34 }
  0x7c   : > { %v1272_v51 = vrot.slane %v1271_v39, 4  ;;  %v1287_v46 = vsel %vm7735_vm4, %v1282_v40, %v1286_v41  ;;  %v6564_v53 = vpack.c.bf16 %v566_v44, %v566_v44  ;;  %852 = vst [vmem:[#allocation2 + $0x54] sm:$0xf] %v6562_v43  ;;  %v395_v58 = vmul.f32 %v8021_v2, %v6651_v48 }
  0x7d   : > { %v8114_v56 = vld [vmem:[#allocation2 + $0x48] sm:$0xf]  ;;  %v8116_v57 = vld [vmem:[#allocation2 + $0x4c] sm:$0xf]  ;;  %v396_v59 = vmul.f32 %v8021_v2, %v335_v49  ;;  %v455_v60 = vadd.f32 %v8040_v26, %v394_v25  ;;  %v337_v63 = vunpack.c.h.bf16 %v8106_v34  ;;  %v338_v39 = vunpack.c.l.bf16 %v284_v20 }
  0x7e   : > { %v1277_v3 = vsel %vm7735_vm4, %v1272_v51, %v1276_v13  ;;  %v1097_v5 = vshrl.u32 %v8114_v56, 16  ;;  %v1100_v7 = vshll.u32 %v8114_v56, 16  ;;  %v1106_v9 = vshll.u32 %v8116_v57, 16  ;;  %854 = vst [vmem:[#allocation2 + $0x5c] sm:$0x1] %v6564_v53 }
  0x7f   : > { %v6146_v10 = vcombine.low %v1277_v3, %v1287_v46  ;;  %v1110_v23 = vshrl.u32 %v8116_v57, 16  ;;  %v456_v14 = vadd.f32 %v8040_v26, %v395_v58  ;;  %v457_v16 = vadd.f32 %v8040_v26, %v396_v59 }
  0x80   : > { %v8131_v21 = vld [vmem:[#allocation2 + $0x50] sm:$0x1]  ;;  %v1099_v22 = vrot.slane %v1097_v5, 4  ;;  %v1102_v15 = vrot.slane %v1100_v7, 5  ;;  %v1108_v13 = vrot.slane %v1106_v9, 5  ;;  %v509_v24 = vmax.f32 %v455_v60, 0.0 }
  0x81   : > { %7064 = vmatmul.mubr.bf16.gmra.mxu1 %v6146_v10  ;;  %v1112_v28 = vrot.slane %v1110_v23, 4  ;;  %v1116_v47 = vshll.u32 %v8131_v21, 16  ;;  %v510_v17 = vmax.f32 %v456_v14, 0.0  ;;  %v511_v30 = vmax.f32 %v457_v16, 0.0 }
  0x82   : > { %v1103_v31 = vor.u32 %v1102_v15, %v1099_v22  ;;  %v8134_v32 = vld [vmem:[#allocation2 + $0x58] sm:$0xf]  ;;  %v585_v34 = vsel %vm525_vm1, %v509_v24, 0.0  ;;  %v397_v40 = vmul.f32 %v8021_v2, %v336_v54  ;;  %v398_v20 = vmul.f32 %v8021_v2, %v337_v63  ;;  %v1931_v22 = vld [vmem:[#allocation2] sm:$0xe] }
  0x83   : > { %v1113_v41 = vor.u32 %v1112_v28, %v1108_v13  ;;  %v1118_v43 = vrot.slane %v1116_v47, 5  ;;  %v8139_v44 = vld [vmem:[#allocation2 + $0x54] sm:$0xf]  ;;  %v1130_v48 = vshll.u32 %v8134_v32, 16  ;;  %v1134_v49 = vshrl.u32 %v8134_v32, 16 }
  0x84   : > { %v1104_v25 = vrot.slane %v1103_v31, 4  ;;  %v1121_v51 = vshrl.u32 %v8139_v44, 16  ;;  %v1124_v46 = vshll.u32 %v8139_v44, 16  ;;  %v587_v53 = vsel %vm536_vm3, %v511_v30, 0.0 }
  0x85   : > { %v1114_v58 = vrot.slane %v1113_v41, 4  ;;  %v8147_v59 = vld [vmem:[#allocation2 + $0x5c] sm:$0x1]  ;;  %v1132_v54 = vrot.slane %v1130_v48, 5  ;;  %v1136_v60 = vrot.slane %v1134_v49, 4  ;;  %v6585_v3 = vpack.c.bf16 %v587_v53, %v587_v53 }
  0x86   : > { %v1109_v5 = vsel %vm7735_vm4, %v1104_v25, %v1108_v13  ;;  %v1123_v7 = vrot.slane %v1121_v51, 4  ;;  %v1126_v9 = vrot.slane %v1124_v46, 5  ;;  %v1140_v10 = vshll.u32 %v8147_v59, 16  ;;  %v1932_v41 = vld [vmem:[#allocation2 + $0xc] sm:$0xe] }
  0x87   : > { %v1119_v23 = vsel %vm7735_vm4, %v1114_v58, %v1118_v43  ;;  %v1137_v14 = vor.u32 %v1136_v60, %v1132_v54  ;;  %v6689_v16 = vpack.c.bf16 %v510_v17, %v585_v34  ;;  %875 = vst [vmem:[#allocation2 + $0xb0] sm:$0x1] %v6585_v3  ;;  %v399_v47 = vmul.f32 %v8021_v2, %v338_v39  ;;  %v8161_v2 = vld [vmem:[#allocation2 + $0x4] sm:$0xf]  ;;  %v7604_v53 = vld [vmem:[#allocation2 + $0x14] sm:$0x1] }
  0x88   : > { %v6139_v15 = vcombine.low %v1109_v5, %v1119_v23  ;;  %v1127_v24 = vor.u32 %v1126_v9, %v1123_v7  ;;  %v1142_v28 = vrot.slane %v1140_v10, 5  ;;  %v458_v13 = vadd.f32 %v8040_v26, %v397_v40  ;;  %v1933_v40 = vld [vmem:[#allocation2 + $0x18] sm:$0xe]  ;;  %v8177_v23 = vld [vmem:[#allocation2 + $0x10] sm:$0xf] }
  0x89   : > { %v1138_v30 = vrot.slane %v1137_v14, 4  ;;  %6790 = vst [vmem:[#allocation2 + $0xa8] sm:$0xff] %v6689_v16   ;;  %v459_v31 = vadd.f32 %v8040_v26, %v398_v20  ;;  %v460_v17 = vadd.f32 %v8040_v26, %v399_v47  ;;  %v6181_v63 = vrot.slane %v1931_v22, 9 }
  0x8a   : > { %7051 = vmatprep.mubr.bf16.mxu0 %v6139_v15  ;;  %v1128_v43 = vrot.slane %v1127_v24, 4  ;;  %v512_v48 = vmax.f32 %v458_v13, 0.0  ;;  %v1984_v39 = vrot.slane %v8161_v2, 5  ;;  %v6182_v26 = vrot.slane %v1932_v41, 9 }
  0x8b   : > { %v1143_v34 = vsel %vm7735_vm4, %v1138_v30, %v1142_v28  ;;  %v513_v49 = vmax.f32 %v459_v31, 0.0  ;;  %v514_v51 = vmax.f32 %v460_v17, 0.0  ;;  %v1994_v58 = vrot.slane %v7604_v53, 5  ;;  %v8193_v31 = vld [vmem:[#allocation2 + $0x1c] sm:$0xf] }
  0x8c   : > { %v1133_v25 = vsel %vm7735_vm4, %v1128_v43, %v1132_v54  ;;  %v588_v3 = vsel %vm525_vm1, %v512_v48, 0.0  ;;  %v1986_v10 = vrot.slane %v1984_v39, 4  ;;  %v1991_v14 = vrot.slane %v8177_v23, 5  ;;  %v1934_v43 = vld [vmem:[#allocation2 + $0x24] sm:$0xe] }
  0x8d   : > { %v6140_v60 = vcombine.low %v1133_v25, %v1143_v34  ;;  %v6587_v5 = vpack.c.bf16 %v513_v49, %v513_v49  ;;  %v590_v9 = vsel %vm536_vm3, %v514_v51, 0.0  ;;  %v6586_v54 = vpack.c.bf16 %v588_v3, %v588_v3  ;;  %v1935_v48 = vld [vmem:[#allocation2 + $0x30] sm:$0xe]  ;;  %v7607_v3 = vld [vmem:[#allocation2 + $0x20] sm:$0x1] }
  0x8e   : > { %v8173_v7 = vld [vmem:[#allocation2 + $0xb0] sm:$0x1]  ;;  %v6588_v20 = vpack.c.bf16 %v590_v9, %v590_v9  ;;  %v1985_v22 = vsel %vm8167_vm7, %v6181_v63, %v1984_v39  ;;  %v6183_v15 = vrot.slane %v1933_v40, 9  ;;  %v1988_v47 = vsel %vm8167_vm7, %v1986_v10, %v1987_v33 }
  0x8f   : > { %7052 = vmatmul.mubr.bf16.gmra.mxu0 %v6140_v60  ;;  %v1308_v16 = vshll.u32 %v8173_v7, 16  ;;  %877 = vst [vmem:[#allocation2 + $0xb8] sm:$0xf] %v6587_v5  ;;  %876 = vst [vmem:[#allocation2 + $0xb4] sm:$0xf] %v6586_v54  ;;  %v1992_v30 = vsel %vm8167_vm7, %v6182_v26, %v1991_v14  ;;  %v1993_v13 = vrot.slane %v1991_v14, 4  ;;  %v6213_v49 = vcombine.low %v1985_v22, %v1988_v47 }
  0x90   : > { %v8183_v24 = vld [vmem:[#allocation2 + $0xa8] sm:$0xf]  ;;  %v8185_v28 = vld [vmem:[#allocation2 + $0xac] sm:$0xf]  ;;  %v1998_v41 = vrot.slane %v8193_v31, 5  ;;  %v2001_v5 = vrot.slane %v7607_v3, 5 }
  0x91   : > { %v1289_v17 = vshrl.u32 %v8183_v24, 16  ;;  %v1292_v63 = vshll.u32 %v8183_v24, 16  ;;  %v1298_v34 = vshll.u32 %v8185_v28, 16  ;;  %v1302_v18 = vshrl.u32 %v8185_v28, 16  ;;  %878 = vst [vmem:[#allocation2 + $0xbc] sm:$0x1] %v6588_v20  ;;  %7135 = vmatprep.mubr.bf16.mxu0 %v6213_v49 }
  0x92   : > { %v1310_v33 = vrot.slane %v1308_v16, 5  ;;  %v1995_v39 = vsel %vm8167_vm7, %v1993_v13, %v1994_v58  ;;  %v2000_v60 = vrot.slane %v1998_v41, 4  ;;  %v1999_v10 = vsel %vm8167_vm7, %v6183_v15, %v1998_v41  ;;  %v7512_v16 = vld [vmem:[%s10264_s3 + $0x130] sm:$0xff]   ;;  %v1936_v49 = vld [vmem:[#allocation2 + $0x3c] sm:$0xe] }
  0x93   : > { %v1291_v40 = vrot.slane %v1289_v17, 4  ;;  %v1294_v25 = vrot.slane %v1292_v63, 5  ;;  %v1300_v51 = vrot.slane %v1298_v34, 5  ;;  %v1304_v26 = vrot.slane %v1302_v18, 4 }
  0x94   : > { %v6214_v53 = vcombine.low %v1992_v30, %v1995_v39  ;;  %v6184_v14 = vrot.slane %v1934_v43, 9  ;;  %v2002_v20 = vsel %vm8167_vm7, %v2000_v60, %v2001_v5  ;;  %v2005_v22 = vrot.slane %v7893_v19, 5  ;;  %v7516_v43 = vld [vmem:[%s10264_s3 + $0x128] sm:$0xff]  }
  0x95   : > { %v1295_v9 = vor.u32 %v1294_v25, %v1291_v40  ;;  %v1305_v54 = vor.u32 %v1304_v26, %v1300_v51  ;;  %v2008_v47 = vrot.slane %v7904_v29, 5  ;;  %v6185_v30 = vrot.slane %v1935_v48, 9 }
  0x96   : > { %v8207_v58 = vld [vmem:[#allocation2 + $0xb8] sm:$0xf]  ;;  %v8213_v63 = vld [vmem:[#allocation2 + $0xb4] sm:$0xf]  ;;  %v6215_v18 = vcombine.low %v1999_v10, %v2002_v20  ;;  %v2006_v48 = vsel %vm8167_vm7, %v6184_v14, %v2005_v22  ;;  %v2015_v10 = vrot.slane %v8006_v50, 5  ;;  %v6186_v20 = vrot.slane %v1936_v49, 9 }
  0x97   : > { %v1296_v13 = vrot.slane %v1295_v9, 4  ;;  %v1306_v17 = vrot.slane %v1305_v54, 4  ;;  %v1322_v15 = vshll.u32 %v8207_v58, 16  ;;  %v1326_v41 = vshrl.u32 %v8207_v58, 16  ;;  %7136 = vmatmul.mubr.bf16.vlgmr.msra.gmra.mxu0 %v6214_v53 }
  0x98   : > { %v8220_v34 = vld [vmem:[#allocation2 + $0xbc] sm:$0x1]  ;;  %v1313_v19 = vshrl.u32 %v8213_v63, 16  ;;  %v1316_v29 = vshll.u32 %v8213_v63, 16  ;;  %7216 = vmatpush3.bf16.msra.mxu0 %v7945_v27  ;;  %7139 = vmatprep.mubr.bf16.mxu0 %v6215_v18  ;;  %v2007_v9 = vrot.slane %v2005_v22, 4  ;;  %v2012_v54 = vrot.slane %v7998_v37, 5 }
  0x99   : > { %v1301_v39 = vsel %vm7735_vm4, %v1296_v13, %v1300_v51  ;;  %v1311_v40 = vsel %vm7735_vm4, %v1306_v17, %v1310_v33  ;;  %v1324_v25 = vrot.slane %v1322_v15, 5  ;;  %v1328_v26 = vrot.slane %v1326_v41, 4  ;;  %7217 = vmatprep.subr.bf16.mxu0 %v7512_v16  ;;  %v1937_v13 = vld [vmem:[#allocation2 + $0x48] sm:$0xe]  ;;  %v7520_v18 = vld [vmem:[%s10264_s3 + $0x120] sm:$0xff]  }
  0x9a   : > { %v6147_v53 = vcombine.low %v1301_v39, %v1311_v40  ;;  %v1315_v60 = vrot.slane %v1313_v19, 4  ;;  %v1318_v3 = vrot.slane %v1316_v29, 5  ;;  %v1332_v5 = vshll.u32 %v8220_v34, 16  ;;  %v7608_v40 = vld [vmem:[#allocation2] sm:$0xf] }
  0x9b   : > { %v1329_v27 = vor.u32 %v1328_v26, %v1324_v25  ;;  %v6161_v33 = vcombine.low %v7996_v35, %v7998_v37  ;;  %v2009_v15 = vsel %vm8167_vm7, %v2007_v9, %v2008_v47  ;;  %v2013_v22 = vsel %vm8167_vm7, %v6185_v30, %v2012_v54 }
  0x9c   : > { %7067 = vmatprep.mubr.bf16.mxu1 %v6147_v53  ;;  %v1319_v51 = vor.u32 %v1318_v3, %v1315_v60  ;;  %v1334_v14 = vrot.slane %v1332_v5, 5  ;;  %7218 = vmatpush3.bf16.msra.mxu0 %v7512_v16  ;;  %v2014_v41 = vrot.slane %v2012_v54, 4  ;;  %v6216_v50 = vcombine.low %v2006_v48, %v2009_v15  ;;  %v1938_v60 = vld [vmem:[#allocation2 + $0x54] sm:$0xe] }
  0x9d   : > { %v1330_v17 = vrot.slane %v1329_v27, 4  ;;  %7219 = vmatprep.subr.bf16.mxu0 %v7516_v43  ;;  %v2019_v29 = vrot.slane %v8014_v61, 5  ;;  %v2022_v16 = vrot.slane %v8028_v12, 5  ;;  %v6187_v39 = vrot.slane %v1937_v13, 9 }
  0x9e   : > { %v1320_v19 = vrot.slane %v1319_v51, 4  ;;  %v2016_v47 = vsel %vm8167_vm7, %v2014_v41, %v2015_v10  ;;  %v6157_v12 = vcombine.low %v7608_v40, %v8161_v2  ;;  %v2026_v27 = vrot.slane %v8116_v57, 5  ;;  %v7524_v2 = vld [vmem:[%s10264_s3 + $0x118] sm:$0xff]   ;;  %v7609_v10 = vld [vmem:[#allocation2 + $0x68] sm:$0x1] }
  0x9f   : > { %v1335_v49 = vsel %vm7735_vm4, %v1330_v17, %v1334_v14  ;;  %7140 = vmatmul.mubr.bf16.gmra.mxu0 %v6216_v50  ;;  %v6217_v26 = vcombine.low %v2013_v22, %v2016_v47  ;;  %v2021_v53 = vrot.slane %v2019_v29, 4  ;;  %v2020_v5 = vsel %vm8167_vm7, %v6186_v20, %v2019_v29  ;;  %v8267_v22 = vld [vmem:[#allocation2 + $0x64] sm:$0xf]  ;;  %v8272_v29 = vld [vmem:[#allocation2 + $0x70] sm:$0xf] }
  0xa0   : > { %v1325_v48 = vsel %vm7735_vm4, %v1320_v19, %v1324_v25  ;;  %7220 = vmatpush3.bf16.msra.mxu0 %v7516_v43  ;;  %v2029_v9 = vrot.slane %v8131_v21, 5  ;;  %v2033_v54 = vrot.slane %v8134_v32, 5  ;;  %v2043_v51 = vrot.slane %v7609_v10, 5  ;;  %v1939_v21 = vld [vmem:[#allocation2 + $0x60] sm:$0xe] }
  0xa1   : > { %v6148_v3 = vcombine.low %v1325_v48, %v1335_v49  ;;  %7143 = vmatprep.mubr.bf16.mxu0 %v6217_v26  ;;  %v2023_v25 = vsel %vm8167_vm7, %v2021_v53, %v2022_v16  ;;  %7221 = vmatprep.subr.bf16.mxu0 %v7520_v18  ;;  %v2027_v43 = vsel %vm8167_vm7, %v6187_v39, %v2026_v27  ;;  %v2028_v14 = vrot.slane %v2026_v27, 4  ;;  %v1940_v19 = vld [vmem:[#allocation2 + $0x6c] sm:$0xe]  ;;  %v7528_v49 = vld [vmem:[%s10264_s3 + $0x110] sm:$0xff]  }
  0xa2   : > { %v6188_v20 = vrot.slane %v1938_v60, 9  ;;  %v6218_v13 = vcombine.low %v2020_v5, %v2023_v25  ;;  %v2035_v17 = vrot.slane %v2033_v54, 4  ;;  %v2036_v15 = vrot.slane %v8147_v59, 5  ;;  %v7612_v48 = vld [vmem:[#allocation2 + $0xc] sm:$0xf] }
  0xa3   : > { %7068 = vmatmul.mubr.bf16.gmra.mxu1 %v6148_v3  ;;  %v2040_v41 = vrot.slane %v8267_v22, 5  ;;  %v2030_v50 = vsel %vm8167_vm7, %v2028_v14, %v2029_v9  ;;  %v2047_v16 = vrot.slane %v8272_v29, 5  ;;  %v6189_v39 = vrot.slane %v1939_v21, 9  ;;  %v7614_v5 = vld [vmem:[#allocation2 + $0x74] sm:$0x1] }
  0xa4   : > { %7087 = vmatprep.mubr.bf16.mxu1 %v6157_v12  ;;  %7222 = vmatpush3.bf16.msra.mxu0 %v7520_v18  ;;  %v6219_v47 = vcombine.low %v2027_v43, %v2030_v50  ;;  %v6158_v40 = vcombine.low %v7612_v48, %v8177_v23  ;;  %v7613_v12 = vld [vmem:[#allocation2 + $0x18] sm:$0xf]  ;;  %v2034_v18 = vsel %vm8167_vm7, %v6188_v20, %v2033_v54  ;;  %v6190_v53 = vrot.slane %v1940_v19, 9  ;;  %v8284_v25 = vld [vmem:[#allocation2 + $0x7c] sm:$0xf]  ;;  %v7510_v23 = vld [vmem:[%s10264_s3 + $0xf0] sm:$0xff]  }
  0xa5   : > { %v2042_v59 = vrot.slane %v2040_v41, 4  ;;  %7223 = vmatprep.subr.bf16.mxu0 %v7524_v2  ;;  %v6159_v26 = vcombine.low %v7613_v12, %v8193_v31  ;;  %v2037_v60 = vsel %vm8167_vm7, %v2035_v17, %v2036_v15  ;;  %v2049_v3 = vrot.slane %v2047_v16, 4  ;;  %v1941_v9 = vld [vmem:[#allocation2 + $0x78] sm:$0xe]  ;;  %v8290_v31 = vld [vmem:[#allocation2 + $0x24] sm:$0xf] }
  0xa6   : > { %v2050_v27 = vrot.slane %v7614_v5, 5  ;;  %v2054_v10 = vrot.slane %v8284_v25, 5  ;;  %v8292_v54 = vld [vmem:[#allocation2 + $0x28] sm:$0xf]  ;;  %v1942_v14 = vld [vmem:[#allocation2 + $0x84] sm:$0xe]  ;;  %v6220_v50 = vcombine.low %v2034_v18, %v2037_v60 }
  0xa7   : > { %7144 = vmatmul.mubr.bf16.gmra.mxu0 %v6218_v13  ;;  %v6160_v43 = vcombine.low %v8290_v31, %v8292_v54  ;;  %v2041_v13 = vsel %vm8167_vm7, %v6189_v39, %v2040_v41  ;;  %v2044_v17 = vsel %vm8167_vm7, %v2042_v59, %v2043_v51  ;;  %v1944_v15 = vld [vmem:[#allocation2 + $0x9c] sm:$0xe]  ;;  %v7532_v19 = vld [vmem:[%s10264_s3 + $0x108] sm:$0xff]   ;;  %v7618_v48 = vld [vmem:[#allocation2 + $0x80] sm:$0x1]  ;;  %v2061_v41 = vrot.slane %v7975_v1, 5 }
  0xa8   : > { %7147 = vmatprep.mubr.bf16.mxu0 %v6219_v47  ;;  %7224 = vmatpush3.bf16.msra.mxu0 %v7524_v2  ;;  %v8310_v2 = vld [vmem:[%s10264_s3 + $0xe8] sm:$0xff]   ;;  %v6191_v47 = vrot.slane %v1941_v9, 9  ;;  %v2057_v12 = vrot.slane %v7618_v48, 5  ;;  %v8313_v39 = vld [vmem:[#allocation2 + $0x90] sm:$0xe]  ;;  %v8318_v51 = vsel %vm8167_vm7, %v6190_v53, %v2047_v16  ;;  %v8322_v59 = vsel %vm8167_vm7, %v2049_v3, %v2050_v27 }
  0xa9   : > { %7225 = vmatprep.subr.bf16.mxu0 %v7528_v49  ;;  %v6192_v18 = vrot.slane %v1942_v14, 9  ;;  %v6221_v60 = vcombine.low %v2041_v13, %v2044_v17  ;;  %v8324_v5 = vld [vmem:[#allocation2 + $0x60] sm:$0xf]  ;;  %v2063_v9 = vrot.slane %v2061_v41, 4  ;;  %v2068_v16 = vrot.slane %v8051_v36, 5 }
  0xaa   : > { %v2075_v53 = vrot.slane %v8080_v52, 5  ;;  %v2078_v3 = vrot.slane %v8099_v42, 5  ;;  %v6222_v27 = vcombine.low %v8318_v51, %v8322_v59  ;;  %v8334_v14 = vld [vmem:[#allocation2 + $0x6c] sm:$0xf]  ;;  %v8338_v17 = vld [vmem:[#allocation2 + $0x78] sm:$0xf]  ;;  %v8349_v48 = vsel %vm8167_vm7, %v6191_v47, %v2054_v10 }
  0xab   : > { %7088 = vmatmul.mubr.bf16.vlgmr.msra.gmra.mxu1 %v6158_v40  ;;  %v2056_v40 = vrot.slane %v2054_v10, 4  ;;  %v7536_v42 = vld [vmem:[%s10264_s3 + $0x100] sm:$0xff]   ;;  %v6193_v13 = vrot.slane %v8313_v39, 9  ;;  %v2804_v21 = vld [vmem:[#allocation2 + $0x10] sm:$0xf]  ;;  %v8364_v10 = vsel %vm8167_vm7, %v6192_v18, %v2061_v41  ;;  %v2085_v18 = vrot.slane %v8173_v7, 5 }
  0xac   : > { %7168 = vmatpush3.bf16.msra.mxu1 %v7973_v0  ;;  %7091 = vmatprep.mubr.bf16.mxu1 %v6159_v26  ;;  %v2064_v0 = vrot.slane %v7977_v38, 5  ;;  %v6194_v26 = vrot.slane %v1944_v15, 9  ;;  %v2803_v15 = vld [vmem:[#allocation2 + $0xc] sm:$0xf]  ;;  %v2077_v38 = vrot.slane %v2075_v53, 4 }
  0xad   : > { %7169 = vmatprep.subr.bf16.mxu1 %v7510_v23  ;;  %7226 = vmatpush3.bf16.msra.mxu0 %v7528_v49  ;;  %v7518_v49 = vld [vmem:[%s10264_s3 + $0xe0] sm:$0xff]   ;;  %v8368_v47 = vld [vmem:[#allocation2 + $0x88] sm:$0xf]  ;;  %v2806_v20 = vld [vmem:[#allocation2 + $0x18] sm:$0xf]  ;;  %v8407_v54 = vsel %vm8167_vm7, %v6193_v13, %v2068_v16  ;;  %v2855_v37 = vshll.u32 %v2803_v15, 16 }
  0xae   : > { %7227 = vmatprep.subr.bf16.mxu0 %v7532_v19  ;;  %v8354_v1 = vsel %vm8167_vm7, %v6194_v26, %v2075_v53  ;;  %v2071_v26 = vrot.slane %v8063_v4, 5  ;;  %v1945_v53 = vld [vmem:[#allocation2 + $0xa8] sm:$0xe]  ;;  %v8379_v41 = vsel %vm8167_vm7, %v2077_v38, %v2078_v3  ;;  %v8398_v3 = vld [vmem:[%s10264_s3 + $0x1b8] sm:$0xff]   ;;  %v2852_v38 = vshrl.u32 %v2803_v15, 16 }
  0xaf   : > { %7148 = vmatmul.mubr.bf16.gmra.mxu0 %v6220_v50  ;;  %v8366_v50 = vld [vmem:[#allocation2 + $0x84] sm:$0xf]  ;;  %v2876_v13 = vshrl.u32 %v2806_v20, 16  ;;  %v2857_v35 = vrot.slane %v2855_v37, 5 }
  0xb0   : > { %7170 = vmatpush3.bf16.msra.mxu1 %v7510_v23  ;;  %7151 = vmatprep.mubr.bf16.mxu0 %v6221_v60  ;;  %v2058_v23 = vsel %vm8167_vm7, %v2056_v40, %v2057_v12  ;;  %v8375_v60 = vsel %vm8167_vm7, %v2063_v9, %v2064_v0  ;;  %v2070_v12 = vrot.slane %v2068_v16, 4  ;;  %v2082_v0 = vrot.slane %v8185_v28, 5  ;;  %v2807_v9 = vld [vmem:[#allocation2 + $0x1c] sm:$0xf]  ;;  %v2809_v4 = vld [vmem:[#allocation2 + $0x24] sm:$0xf] }
  0xb1   : > { %7171 = vmatprep.subr.bf16.mxu1 %v8310_v2  ;;  %7228 = vmatpush3.bf16.msra.mxu0 %v7532_v19  ;;  %v8393_v19 = vld [vmem:[#allocation2 + $0x14] sm:$0x1]  ;;  %v6223_v31 = vcombine.low %v8349_v48, %v2058_v23  ;;  %v7522_v40 = vld [vmem:[%s10264_s3 + $0xd8] sm:$0xff]   ;;  %v2854_v16 = vrot.slane %v2852_v38, 4  ;;  %v2879_v23 = vshll.u32 %v2806_v20, 16  ;;  %v2885_v7 = vshll.u32 %v2807_v9, 16 }
  0xb2   : > { %7229 = vmatprep.subr.bf16.mxu0 %v7536_v42  ;;  %v8416_v48 = vsel %vm8167_vm7, %v2070_v12, %v2071_v26  ;;  %v2084_v39 = vrot.slane %v2082_v0, 4  ;;  %v1946_v20 = vld [vmem:[#allocation2 + $0xb4] sm:$0xe]  ;;  %v2871_v12 = vshll.u32 %v8393_v19, 16  ;;  %v2808_v38 = vld [vmem:[#allocation2 + $0x20] sm:$0x1]  ;;  %v10277_v19 = vcombine.low %v8026_v11, %v8014_v61 }
  0xb3   : > { %7092 = vmatmul.mubr.bf16.gmra.mxu1 %v6160_v43  ;;  %v6195_v43 = vrot.slane %v1945_v53, 9  ;;  %v7526_v53 = vld [vmem:[%s10264_s3 + $0xd0] sm:$0xff]   ;;  %v6225_v37 = vcombine.low %v8407_v54, %v8416_v48  ;;  %v2878_v15 = vrot.slane %v2876_v13, 4  ;;  %v2889_v51 = vshrl.u32 %v2807_v9, 16  ;;  %v8444_v48 = vld [vmem:[#allocation2 + $0x2c] sm:$0x1] }
  0xb4   : > { %7095 = vmatprep.mubr.bf16.mxu1 %v6161_v33  ;;  %7172 = vmatpush3.bf16.msra.mxu1 %v8310_v2  ;;  %v2861_v33 = vshll.u32 %v2804_v21, 16  ;;  %v2865_v2 = vshrl.u32 %v2804_v21, 16  ;;  %v8424_v21 = vld [vmem:[#allocation2 + $0x28] sm:$0xf]  ;;  %v2858_v59 = vor.u32 %v2857_v35, %v2854_v16  ;;  %v2903_v30 = vshll.u32 %v2809_v4, 16 }
  0xb5   : > { %7173 = vmatprep.subr.bf16.mxu1 %v7518_v49  ;;  %7230 = vmatpush3.bf16.msra.mxu0 %v7536_v42  ;;  %v6196_v8 = vrot.slane %v1946_v20, 9  ;;  %v8442_v6 = vrot.slane %v2885_v7, 5  ;;  %v2891_v54 = vrot.slane %v2889_v51, 4  ;;  %v2909_v61 = vshll.u32 %v8424_v21, 16  ;;  %v8452_v11 = vld [vmem:[#allocation2 + $0x34] sm:$0xf] }
  0xb6   : > { %7311 = vmatprep.subr.bf16.mxu0 %v8398_v3  ;;  %v8429_v42 = vrot.slane %v2861_v33, 5  ;;  %v2867_v26 = vrot.slane %v2865_v2, 4  ;;  %v2900_v33 = vshrl.u32 %v2809_v4, 16  ;;  %v2812_v2 = vld [vmem:[#allocation2 + $0x30] sm:$0xf]  ;;  %v10279_v4 = vrot.slane %v8207_v58, 5 }
  0xb7   : > { %7152 = vmatmul.mubr.bf16.gmra.mxu0 %v6222_v27  ;;  %v2881_v27 = vrot.slane %v2879_v23, 5  ;;  %v2905_v35 = vrot.slane %v2903_v30, 5  ;;  %v8458_v13 = vrot.slane %v2871_v12, 5  ;;  %v8465_v30 = vrot.slane %v2858_v59, 4  ;;  %v7534_v7 = vld [vmem:[%s10264_s3 + $0xc0] sm:$0xff]  }
  0xb8   : > { %7174 = vmatpush3.bf16.msra.mxu1 %v7518_v49  ;;  %7155 = vmatprep.mubr.bf16.mxu0 %v6223_v31  ;;  %v8436_v49 = vsel %vm8167_vm7, %v6195_v43, %v2082_v0  ;;  %v2092_v31 = vrot.slane %v8220_v34, 5  ;;  %v10278_v0 = vcombine.low %v8114_v56, %v8116_v57  ;;  %v2091_v9 = vrot.slane %v10279_v4, 4  ;;  %v7530_v34 = vld [vmem:[%s10264_s3 + $0xc8] sm:$0xff]  }
  0xb9   : > { %7175 = vmatprep.subr.bf16.mxu1 %v7522_v40  ;;  %v2902_v43 = vrot.slane %v2900_v33, 4  ;;  %v2868_v16 = vor.u32 %v2867_v26, %v8429_v42  ;;  %v2895_v56 = vshll.u32 %v2808_v38, 16  ;;  %v2913_v57 = vshrl.u32 %v8424_v21, 16  ;;  %v8473_v38 = vld [vmem:[#allocation2 + $0x38] sm:$0x1] }
  0xba   : > { %v2882_v23 = vor.u32 %v2881_v27, %v2878_v15  ;;  %v8467_v20 = vrot.slane %v2909_v61, 5  ;;  %v2892_v26 = vor.u32 %v2891_v54, %v8442_v6  ;;  %v2924_v33 = vshrl.u32 %v2812_v2, 16 }
  0xbb   : > { %7096 = vmatmul.mubr.bf16.gmra.mxu1 %v10277_v19  ;;  %v2906_v12 = vor.u32 %v2905_v35, %v2902_v43  ;;  %v2915_v51 = vrot.slane %v2913_v57, 4  ;;  %v2927_v15 = vshll.u32 %v2812_v2, 16  ;;  %v2933_v59 = vshll.u32 %v8452_v11, 16  ;;  %v2815_v19 = vld [vmem:[#allocation2 + $0x3c] sm:$0xf] }
  0xbc   : > { %7099 = vmatprep.mubr.bf16.mxu1 %v10278_v0  ;;  %7176 = vmatpush3.bf16.msra.mxu1 %v7522_v40  ;;  %v8463_v40 = vsel %vm8167_vm7, %v2084_v39, %v2085_v18  ;;  %v10280_v39 = vcombine.low %v8364_v10, %v8375_v60  ;;  %v2919_v18 = vshll.u32 %v8444_v48, 16  ;;  %v2937_v27 = vshrl.u32 %v8452_v11, 16  ;;  %v8486_v60 = vld [vmem:[#allocation2 + $0x40] sm:$0xf]  ;;  %v8504_v57 = vld [vmem:[%s10264_s3 + $0x178] sm:$0xff]  }
  0xbd   : > { %7177 = vmatprep.subr.bf16.mxu1 %v7526_v53  ;;  %v6227_v54 = vcombine.low %v8436_v49, %v8463_v40  ;;  %v8483_v0 = vrot.slane %v2868_v16, 4  ;;  %v2916_v4 = vor.u32 %v2915_v51, %v8467_v20  ;;  %v2926_v10 = vrot.slane %v2924_v33, 4  ;;  %v2818_v51 = vld [vmem:[#allocation2 + $0x48] sm:$0xf] }
  0xbe   : > { %v2897_v43 = vrot.slane %v2895_v56, 5  ;;  %v2929_v35 = vrot.slane %v2927_v15, 5  ;;  %v10282_v49 = vcombine.low %v8139_v44, %v8134_v32  ;;  %v2883_v61 = vrot.slane %v2882_v23, 4  ;;  %v8512_v23 = vld [vmem:[#allocation2 + $0x4c] sm:$0xf] }
  0xbf   : > { %7156 = vmatmul.mubr.bf16.gmra.mxu0 %v10280_v39  ;;  %v2893_v16 = vrot.slane %v2892_v26, 4  ;;  %v8506_v40 = vrot.slane %v2933_v59, 5  ;;  %v2921_v56 = vrot.slane %v2919_v18, 5  ;;  %v2943_v32 = vshll.u32 %v8473_v38, 16  ;;  %v2821_v18 = vld [vmem:[#allocation2 + $0x54] sm:$0xf] }
  0xc0   : > { %7178 = vmatpush3.bf16.msra.mxu1 %v7526_v53  ;;  %7159 = vmatprep.mubr.bf16.mxu0 %v6225_v37  ;;  %v10281_v53 = vrot.slane %v8207_v58, 5  ;;  %v8496_v37 = vsel %vm8167_vm7, %v2091_v9, %v2092_v31  ;;  %v10283_v31 = vcombine.low %v8324_v5, %v8267_v22  ;;  %v2907_v9 = vrot.slane %v2906_v12, 4 }
  0xc1   : > { %7179 = vmatprep.subr.bf16.mxu1 %v7530_v34  ;;  %v2948_v44 = vshrl.u32 %v2815_v19, 16  ;;  %v2917_v33 = vrot.slane %v2916_v4, 4  ;;  %v2930_v39 = vor.u32 %v2929_v35, %v2926_v10  ;;  %v2951_v15 = vshll.u32 %v2815_v19, 16  ;;  %v8539_v4 = vld [vmem:[#allocation2 + $0x44] sm:$0x1] }
  0xc2   : > { %v8492_v2 = vsel %vm8167_vm7, %v6196_v8, %v10281_v53  ;;  %v2939_v8 = vrot.slane %v2937_v27, 4  ;;  %v2864_v22 = vsel %vm7735_vm4, %v8465_v30, %v8429_v42  ;;  %v2874_v5 = vsel %vm7735_vm4, %v8483_v0, %v8458_v13  ;;  %v8532_v30 = vld [vmem:[#allocation2 + $0x58] sm:$0xf] }
  0xc3   : > { %7100 = vmatmul.mubr.bf16.gmra.mxu1 %v10282_v49  ;;  %v6228_v26 = vcombine.low %v8492_v2, %v8496_v37  ;;  %v2961_v12 = vshrl.u32 %v8486_v60, 16  ;;  %v2888_v59 = vsel %vm7735_vm4, %v2883_v61, %v8442_v6  ;;  %v2898_v27 = vsel %vm7735_vm4, %v2893_v16, %v2897_v43  ;;  %v8553_v16 = vld [vmem:[#allocation2 + $0x50] sm:$0x1] }
  0xc4   : > { %7103 = vmatprep.mubr.bf16.mxu1 %v10283_v31  ;;  %7180 = vmatpush3.bf16.msra.mxu1 %v7530_v34  ;;  %v2957_v34 = vshll.u32 %v8486_v60, 16  ;;  %v2940_v19 = vor.u32 %v2939_v8, %v8506_v40  ;;  %v2972_v42 = vshrl.u32 %v2818_v51, 16  ;;  %v10284_v13 = vcombine.low %v8354_v1, %v8379_v41  ;;  %v2824_v31 = vld [vmem:[#allocation2 + $0x60] sm:$0xf] }
  0xc5   : > { %7181 = vmatprep.subr.bf16.mxu1 %v7534_v7  ;;  %v8537_v0 = vrot.slane %v2943_v32, 5  ;;  %v2950_v10 = vrot.slane %v2948_v44, 4  ;;  %v2975_v53 = vshll.u32 %v2818_v51, 16  ;;  %v2981_v6 = vshll.u32 %v8512_v23, 16 }
  0xc6   : > { %v2912_v2 = vsel %vm7735_vm4, %v2907_v9, %v8467_v20  ;;  %v2922_v1 = vsel %vm7735_vm4, %v2917_v33, %v2921_v56  ;;  %v2931_v41 = vrot.slane %v2930_v39, 4  ;;  %v8548_v37 = vrot.slane %v2957_v34, 5  ;;  %v8565_v34 = vld [vmem:[#allocation2 + $0x64] sm:$0xf] }
  0xc7   : > { %7160 = vmatmul.mubr.bf16.gmra.mxu0 %v10284_v13  ;;  %v2963_v43 = vrot.slane %v2961_v12, 4  ;;  %v2974_v35 = vrot.slane %v2972_v42, 4  ;;  %v2977_v49 = vrot.slane %v2975_v53, 5  ;;  %v10285_v61 = vcombine.low %v8334_v14, %v8272_v29 }
  0xc8   : > { %7182 = vmatpush3.bf16.msra.mxu1 %v7534_v7  ;;  %7163 = vmatprep.mubr.bf16.mxu0 %v6227_v54  ;;  %v2953_v7 = vrot.slane %v2951_v15, 5  ;;  %v2941_v54 = vrot.slane %v2940_v19, 4  ;;  %v8555_v8 = vrot.slane %v2981_v6, 5  ;;  %v2985_v20 = vshrl.u32 %v8512_v23, 16 }
  0xc9   : > { %7263 = vmatprep.subr.bf16.mxu1 %v8504_v57  ;;  %v2996_v51 = vshrl.u32 %v2821_v18, 16  ;;  %v10286_v9 = vcombine.low %v8338_v17, %v8284_v25  ;;  %v6293_v56 = vcombine.low %v2864_v22, %v2874_v5  ;;  %v6294_v32 = vcombine.low %v2888_v59, %v2898_v27  ;;  %v8569_v25 = vld [vmem:[#allocation2 + $0x5c] sm:$0x1]  ;;  %v2827_v27 = vld [vmem:[#allocation2 + $0x6c] sm:$0xf] }
  0xca   : > { %v2999_v44 = vshll.u32 %v2821_v18, 16  ;;  %v3005_v33 = vshll.u32 %v8532_v30, 16  ;;  %v8562_v29 = vcombine.low %v2912_v2, %v2922_v1  ;;  %v2954_v14 = vor.u32 %v2953_v7, %v2950_v10 }
  0xcb   : > { %7104 = vmatmul.mubr.bf16.gmra.mxu1 %v10285_v61  ;;  %v2967_v39 = vshll.u32 %v8539_v4, 16  ;;  %v2987_v15 = vrot.slane %v2985_v20, 4  ;;  %v2964_v12 = vor.u32 %v2963_v43, %v8548_v37  ;;  %v2978_v19 = vor.u32 %v2977_v49, %v2974_v35 }
  0xcc   : > { %7107 = vmatprep.mubr.bf16.mxu1 %v10286_v9  ;;  %v2991_v42 = vshll.u32 %v8553_v16, 16  ;;  %v2998_v17 = vrot.slane %v2996_v51, 4  ;;  %v3001_v5 = vrot.slane %v2999_v44, 5  ;;  %v8572_v18 = vrot.slane %v3005_v33, 5  ;;  %v8589_v51 = vld [vmem:[#allocation2 + $0x70] sm:$0xf] }
  0xcd   : > { %v2988_v22 = vor.u32 %v2987_v15, %v8555_v8  ;;  %v3009_v59 = vshrl.u32 %v8532_v30, 16  ;;  %v2936_v13 = vsel %vm7735_vm4, %v2931_v41, %v8506_v40  ;;  %v2946_v10 = vsel %vm7735_vm4, %v2941_v54, %v8537_v0 }
  0xce   : > { %v3020_v53 = vshrl.u32 %v2824_v31, 16  ;;  %v3023_v6 = vshll.u32 %v2824_v31, 16  ;;  %v2955_v2 = vrot.slane %v2954_v14, 4  ;;  %v2969_v1 = vrot.slane %v2967_v39, 5  ;;  %v2830_v39 = vld [vmem:[#allocation2 + $0x78] sm:$0xf] }
  0xcf   : > { %7164 = vmatmul.mubr.bf16.gmra.mxu0 %v6228_v26  ;;  %v3011_v7 = vrot.slane %v3009_v59, 4  ;;  %v3029_v43 = vshll.u32 %v8565_v34, 16  ;;  %v2965_v35 = vrot.slane %v2964_v12, 4  ;;  %v2979_v49 = vrot.slane %v2978_v19, 4  ;;  %v8582_v26 = vld [vmem:[#allocation2 + $0x68] sm:$0x1] }
  0xd0   : > { %7231 = vmatprep.mubr.bf16.mxu0 %v6293_v56  ;;  %v2993_v61 = vrot.slane %v2991_v42, 5  ;;  %v3033_v20 = vshrl.u32 %v8565_v34, 16  ;;  %v10287_v40 = vcombine.low %v8366_v50, %v8368_v47  ;;  %v2989_v0 = vrot.slane %v2988_v22, 4  ;;  %v8602_v19 = vld [vmem:[#allocation2 + $0x7c] sm:$0xf] }
  0xd1   : > { %v3002_v41 = vor.u32 %v3001_v5, %v2998_v17  ;;  %v3015_v54 = vshll.u32 %v8569_v25, 16  ;;  %v3044_v31 = vshrl.u32 %v2827_v27, 16  ;;  %v10288_v9 = vcombine.low %v8049_v55, %v8051_v36  ;;  %v7544_v55 = vld [vmem:[%s10264_s3 + $0x1b0] sm:$0xff]  }
  0xd2   : > { %v8594_v56 = vcombine.low %v2936_v13, %v2946_v10  ;;  %v3012_v44 = vor.u32 %v3011_v7, %v8572_v18  ;;  %v3022_v33 = vrot.slane %v3020_v53, 4  ;;  %v3025_v14 = vrot.slane %v3023_v6, 5  ;;  %v2833_v10 = vld [vmem:[#allocation2 + $0x84] sm:$0xf] }
  0xd3   : > { %7108 = vmatmul.mubr.bf16.gmra.mxu1 %v10287_v40  ;;  %v2960_v50 = vsel %vm7735_vm4, %v2955_v2, %v8548_v37  ;;  %v8600_v47 = vrot.slane %v3029_v43, 5  ;;  %v3035_v15 = vrot.slane %v3033_v20, 4  ;;  %v3047_v12 = vshll.u32 %v2827_v27, 16  ;;  %v8615_v27 = vld [vmem:[#allocation2 + $0x74] sm:$0x1] }
  0xd4   : > { %7111 = vmatprep.mubr.bf16.mxu1 %v10288_v9  ;;  %v2970_v36 = vsel %vm7735_vm4, %v2965_v35, %v2969_v1  ;;  %v3046_v42 = vrot.slane %v3044_v31, 4  ;;  %v3053_v17 = vshll.u32 %v8589_v51, 16  ;;  %v3057_v22 = vshrl.u32 %v8589_v51, 16  ;;  %v8639_v31 = vld [vmem:[#allocation2 + $0x88] sm:$0xf] }
  0xd5   : > { %v2984_v37 = vsel %vm7735_vm4, %v2979_v49, %v8555_v8  ;;  %v3003_v5 = vrot.slane %v3002_v41, 4  ;;  %v3039_v59 = vshll.u32 %v8582_v26, 16  ;;  %v3049_v13 = vrot.slane %v3047_v12, 5  ;;  %v8657_v12 = vld [vmem:[#allocation2 + $0x94] sm:$0xf] }
  0xd6   : > { %v2994_v53 = vsel %vm7735_vm4, %v2989_v0, %v2993_v61  ;;  %v3013_v6 = vrot.slane %v3012_v44, 4  ;;  %v3017_v2 = vrot.slane %v3015_v54, 5  ;;  %v3026_v1 = vor.u32 %v3025_v14, %v3022_v33  ;;  %v8649_v33 = vld [vmem:[#allocation2 + $0x80] sm:$0x1]  ;;  %v2836_v14 = vld [vmem:[#allocation2 + $0x90] sm:$0xf] }
  0xd7   : > { %7232 = vmatmul.mubr.bf16.vlgmr.msra.gmra.mxu0 %v6294_v32  ;;  %v3036_v8 = vor.u32 %v3035_v15, %v8600_v47  ;;  %v8622_v7 = vrot.slane %v3053_v17, 5  ;;  %v3059_v43 = vrot.slane %v3057_v22, 4  ;;  %v3068_v35 = vshrl.u32 %v2830_v39, 16  ;;  %v7548_v32 = vld [vmem:[%s10264_s3 + $0x1a8] sm:$0xff]  }
  0xd8   : > { %7312 = vmatpush3.bf16.msra.mxu0 %v8398_v3  ;;  %7235 = vmatprep.mubr.bf16.mxu0 %v8562_v29  ;;  %v6297_v49 = vcombine.low %v2960_v50, %v2970_v36  ;;  %v3050_v61 = vor.u32 %v3049_v13, %v3046_v42  ;;  %v3071_v20 = vshll.u32 %v2830_v39, 16  ;;  %v3077_v40 = vshll.u32 %v8602_v19, 16  ;;  %v7552_v50 = vld [vmem:[%s10264_s3 + $0x1a0] sm:$0xff]   ;;  %v7537_v36 = vld [vmem:[#allocation2 + $0xc] sm:$0xff]  }
  0xd9   : > { %7313 = vmatprep.subr.bf16.mxu0 %v7544_v55  ;;  %v10289_v3 = vcombine.low %v8089_v62, %v8080_v52  ;;  %v8631_v29 = vcombine.low %v2984_v37, %v2994_v53  ;;  %v3008_v0 = vsel %vm7735_vm4, %v3003_v5, %v8572_v18  ;;  %v8636_v41 = vrot.slane %v3039_v59, 5 }
  0xda   : > { %v3081_v54 = vshrl.u32 %v8602_v19, 16  ;;  %v10290_v9 = vcombine.low %v8183_v24, %v8185_v28  ;;  %v3018_v52 = vsel %vm7735_vm4, %v3013_v6, %v3017_v2  ;;  %v8646_v62 = vrot.slane %v3026_v1, 4  ;;  %v7556_v1 = vld [vmem:[%s10264_s3 + $0x198] sm:$0xff]  }
  0xdb   : > { %7112 = vmatmul.mubr.bf16.gmra.mxu1 %v10289_v3  ;;  %v3063_v44 = vshll.u32 %v8615_v27, 16  ;;  %v3092_v18 = vshrl.u32 %v2833_v10, 16  ;;  %v8651_v39 = vrot.slane %v3036_v8, 4  ;;  %v3060_v24 = vor.u32 %v3059_v43, %v8622_v7  ;;  %v2839_v43 = vld [vmem:[#allocation2 + $0x9c] sm:$0xf] }
  0xdc   : > { %7115 = vmatprep.mubr.bf16.mxu1 %v10290_v9  ;;  %7314 = vmatpush3.bf16.msra.mxu0 %v7544_v55  ;;  %v3070_v28 = vrot.slane %v3068_v35, 4  ;;  %v3095_v15 = vshll.u32 %v2833_v10, 16  ;;  %v8659_v42 = vrot.slane %v3050_v61, 4  ;;  %v3073_v17 = vrot.slane %v3071_v20, 5  ;;  %v8663_v55 = vld [vmem:[#allocation2 + $0x8c] sm:$0x1] }
  0xdd   : > { %7315 = vmatprep.subr.bf16.mxu0 %v7548_v32  ;;  %v8661_v22 = vrot.slane %v3077_v40, 5  ;;  %v3101_v37 = vshll.u32 %v8639_v31, 16  ;;  %v3083_v5 = vrot.slane %v3081_v54, 4  ;;  %v3094_v59 = vrot.slane %v3092_v18, 4  ;;  %v8680_v40 = vld [vmem:[#allocation2 + $0xa0] sm:$0xf] }
  0xde   : > { %v3097_v13 = vrot.slane %v3095_v15, 5  ;;  %v3105_v53 = vshrl.u32 %v8639_v31, 16  ;;  %v6299_v10 = vcombine.low %v3008_v0, %v3018_v52  ;;  %v3032_v6 = vsel %vm7735_vm4, %v8646_v62, %v8600_v47 }
  0xdf   : > { %7236 = vmatmul.mubr.bf16.gmra.mxu0 %v8594_v56  ;;  %v8672_v2 = vrot.slane %v3063_v44, 5  ;;  %v8677_v8 = vrot.slane %v3101_v37, 5  ;;  %v3061_v35 = vrot.slane %v3060_v24, 4  ;;  %v3087_v56 = vshll.u32 %v8649_v33, 16  ;;  %v8697_v44 = vld [vmem:[#allocation2 + $0x98] sm:$0x1] }
  0xe0   : > { %7239 = vmatprep.mubr.bf16.mxu0 %v6297_v49  ;;  %7316 = vmatpush3.bf16.msra.mxu0 %v7548_v32  ;;  %v3107_v61 = vrot.slane %v3105_v53, 4  ;;  %v3116_v20 = vshrl.u32 %v2836_v14, 16  ;;  %v3042_v47 = vsel %vm7735_vm4, %v8651_v39, %v8636_v41  ;;  %v3074_v3 = vor.u32 %v3073_v17, %v3070_v28  ;;  %v7560_v17 = vld [vmem:[%s10264_s3 + $0x190] sm:$0xff]  }
  0xe1   : > { %7317 = vmatprep.subr.bf16.mxu0 %v7552_v50  ;;  %v3119_v0 = vshll.u32 %v2836_v14, 16  ;;  %v3125_v54 = vshll.u32 %v8657_v12, 16  ;;  %v10291_v49 = vcombine.low %v8213_v63, %v8207_v58  ;;  %v3056_v32 = vsel %vm7735_vm4, %v8659_v42, %v8622_v7  ;;  %v7539_v63 = vld [vmem:[#allocation2 + $0x18] sm:$0xff]  }
  0xe2   : > { %v3084_v9 = vor.u32 %v3083_v5, %v8661_v22  ;;  %v3098_v52 = vor.u32 %v3097_v13, %v3094_v59  ;;  %v3111_v62 = vshll.u32 %v8663_v55, 16  ;;  %v3108_v41 = vor.u32 %v3107_v61, %v8677_v8 }
  0xe3   : > { %7116 = vmatmul.mubr.bf16.gmra.mxu1 %v10291_v49  ;;  %v3118_v18 = vrot.slane %v3116_v20, 4  ;;  %v3121_v14 = vrot.slane %v3119_v0, 5  ;;  %v3129_v58 = vshrl.u32 %v8657_v12, 16  ;;  %v8700_v39 = vrot.slane %v3087_v56, 5  ;;  %v7541_v56 = vld [vmem:[#allocation2 + $0x24] sm:$0xff]  }
  0xe4   : > { %7183 = vmatprep.mubr.bf16.mxu1 %v7537_v36  ;;  %7318 = vmatpush3.bf16.msra.mxu0 %v7552_v50  ;;  %v8702_v24 = vrot.slane %v3125_v54, 5  ;;  %v3140_v7 = vshrl.u32 %v2839_v43, 16  ;;  %v3143_v28 = vshll.u32 %v2839_v43, 16  ;;  %v3066_v15 = vsel %vm7735_vm4, %v3061_v35, %v8672_v2  ;;  %v2842_v50 = vld [vmem:[#allocation2 + $0xa8] sm:$0xf] }
  0xe5   : > { %v3075_v36 = vrot.slane %v3074_v3, 4  ;;  %7319 = vmatprep.subr.bf16.mxu0 %v7556_v1  ;;  %v3131_v42 = vrot.slane %v3129_v58, 4  ;;  %v3149_v37 = vshll.u32 %v8680_v40, 16  ;;  %v3085_v5 = vrot.slane %v3084_v9, 4  ;;  %v8712_v43 = vld [vmem:[#allocation2 + $0xac] sm:$0xf] }
  0xe6   : > { %v3142_v59 = vrot.slane %v3140_v7, 4  ;;  %v3145_v13 = vrot.slane %v3143_v28, 5  ;;  %v3153_v53 = vshrl.u32 %v8680_v40, 16  ;;  %v3099_v2 = vrot.slane %v3098_v52, 4  ;;  %v7542_v3 = vld [vmem:[%s10264_s3 + $0x170] sm:$0xff]   ;;  %v7546_v58 = vld [vmem:[%s10264_s3 + $0x168] sm:$0xff]  }
  0xe7   : > { %7240 = vmatmul.mubr.bf16.gmra.mxu0 %v8631_v29  ;;  %v3109_v35 = vrot.slane %v3108_v41, 4  ;;  %v3113_v61 = vrot.slane %v3111_v62, 5  ;;  %v3122_v20 = vor.u32 %v3121_v14, %v3118_v18  ;;  %v6300_v0 = vcombine.low %v3032_v6, %v3042_v47  ;;  %v7564_v29 = vld [vmem:[%s10264_s3 + $0x188] sm:$0xff]   ;;  %v8723_v52 = vld [vmem:[#allocation2 + $0xa4] sm:$0x1] }
  0xe8   : > { %7243 = vmatprep.mubr.bf16.mxu0 %v6299_v10  ;;  %7320 = vmatpush3.bf16.msra.mxu0 %v7556_v1  ;;  %v3132_v54 = vor.u32 %v3131_v42, %v8702_v24  ;;  %v3135_v49 = vshll.u32 %v8697_v44, 16  ;;  %v3164_v9 = vshrl.u32 %v2842_v50, 16  ;;  %v8725_v62 = vrot.slane %v3149_v37, 5  ;;  %v8749_v42 = vld [vmem:[#allocation2 + $0xb8] sm:$0xf] }
  0xe9   : > { %7321 = vmatprep.subr.bf16.mxu0 %v7560_v17  ;;  %v3155_v41 = vrot.slane %v3153_v53, 4  ;;  %v3167_v18 = vshll.u32 %v2842_v50, 16  ;;  %v3173_v10 = vshll.u32 %v8712_v43, 16  ;;  %v6301_v6 = vcombine.low %v3056_v32, %v3066_v15 }
  0xea   : > { %v3080_v1 = vsel %vm7735_vm4, %v3075_v36, %v8661_v22  ;;  %v3090_v47 = vsel %vm7735_vm4, %v3085_v5, %v8700_v39  ;;  %v3146_v14 = vor.u32 %v3145_v13, %v3142_v59  ;;  %v3104_v32 = vsel %vm7735_vm4, %v3099_v2, %v8677_v8  ;;  %v2845_v39 = vld [vmem:[#allocation2 + $0xb4] sm:$0xf]  ;;  %v8756_v5 = vld [vmem:[#allocation2 + $0xb0] sm:$0x1] }
  0xeb   : > { %7184 = vmatmul.mubr.bf16.vlgmr.msra.gmra.mxu1 %v7539_v63  ;;  %v3114_v63 = vsel %vm7735_vm4, %v3109_v35, %v3113_v61  ;;  %v8743_v22 = vrot.slane %v3122_v20, 4  ;;  %v3177_v7 = vshrl.u32 %v8712_v43, 16  ;;  %v3166_v28 = vrot.slane %v3164_v9, 4  ;;  %v6783_v35 = vld [vmem:[%s7697_s29 + $0xc0] sm:$0xff]  }
  0xec   : > { %7264 = vmatpush3.bf16.msra.mxu1 %v8504_v57  ;;  %7187 = vmatprep.mubr.bf16.mxu1 %v7541_v56  ;;  %v3159_v57 = vshll.u32 %v8723_v52, 16  ;;  %v3169_v15 = vrot.slane %v3167_v18, 5  ;;  %v8747_v36 = vrot.slane %v3173_v10, 5  ;;  %v8751_v8 = vrot.slane %v3132_v54, 4  ;;  %v7568_v61 = vld [vmem:[%s10264_s3 + $0x180] sm:$0xff]  }
  0xed   : > { %7265 = vmatprep.subr.bf16.mxu1 %v7542_v3  ;;  %7322 = vmatpush3.bf16.msra.mxu0 %v7560_v17  ;;  %v8753_v37 = vrot.slane %v3135_v49, 5  ;;  %v3156_v50 = vor.u32 %v3155_v41, %v8725_v62  ;;  %v3179_v59 = vrot.slane %v3177_v7, 4  ;;  %v7543_v17 = vld [vmem:[#allocation2 + $0x30] sm:$0xff]   ;;  %v6302_v13 = vcombine.low %v3080_v1, %v3090_v47  ;;  %v7545_v20 = vld [vmem:[#allocation2 + $0x3c] sm:$0xff]   ;;  %v287_v18 = vld [vmem:[%s7697_s29 + $0xc8] sm:$0x1] }
  0xee   : > { %7323 = vmatprep.subr.bf16.mxu0 %v7564_v29  ;;  %v8758_v53 = vrot.slane %v3146_v14, 4  ;;  %v3188_v56 = vshrl.u32 %v2845_v39, 16  ;;  %v3191_v2 = vshll.u32 %v2845_v39, 16  ;;  %v6303_v54 = vcombine.low %v3104_v32, %v3114_v63  ;;  %v7550_v10 = vld [vmem:[%s10264_s3 + $0x160] sm:$0xff]  }
  0xef   : > { %7244 = vmatmul.mubr.bf16.gmra.mxu0 %v6300_v0  ;;  %v3128_v49 = vsel %vm7735_vm4, %v8743_v22, %v8702_v24  ;;  %v3197_v9 = vshll.u32 %v8749_v42, 16  ;;  %v3201_v41 = vshrl.u32 %v8749_v42, 16  ;;  %v3170_v1 = vor.u32 %v3169_v15, %v3166_v28  ;;  %v8784_v22 = vld [vmem:[#allocation2 + $0xbc] sm:$0x1] }
  0xf0   : > { %7266 = vmatpush3.bf16.msra.mxu1 %v7542_v3  ;;  %7247 = vmatprep.mubr.bf16.mxu0 %v6301_v6  ;;  %v3161_v3 = vrot.slane %v3159_v57, 5  ;;  %v3180_v0 = vor.u32 %v3179_v59, %v8747_v36  ;;  %v3183_v47 = vshll.u32 %v8756_v5, 16  ;;  %v3138_v24 = vsel %vm7735_vm4, %v8751_v8, %v8753_v37  ;;  %v8789_v28 = vld [vmem:[%s10264_s3 + $0x238] sm:$0xff]  }
  0xf1   : > { %7267 = vmatprep.subr.bf16.mxu1 %v7546_v58  ;;  %v3157_v14 = vrot.slane %v3156_v50, 4  ;;  %7324 = vmatpush3.bf16.msra.mxu0 %v7564_v29  ;;  %v6654_v32 = vunpack.c.l.bf16 %v6783_v35  ;;  %v6655_v63 = vunpack.c.h.bf16 %v6783_v35  ;;  %v3152_v6 = vsel %vm7735_vm4, %v8758_v53, %v8725_v62  ;;  %v7624_v62 = vld [vmem:[%s10262_s1] ss:$0 sm:$0xff]  ;;  %v7554_v50 = vld [vmem:[%s10264_s3 + $0x158] sm:$0xff]  }
  0xf2   : > { %v3190_v7 = vrot.slane %v3188_v56, 4  ;;  %v3193_v39 = vrot.slane %v3191_v2, 5  ;;  %v341_v57 = vunpack.c.l.bf16 %v287_v18  ;;  %7325 = vmatprep.subr.bf16.mxu0 %v7568_v61  ;;  %v8791_v29 = vrot.slane %v3197_v9, 5  ;;  %v7625_v35 = vld [vmem:[%s10263_s2] ss:$0 sm:$0xff] }
  0xf3   : > { %7188 = vmatmul.mubr.bf16.gmra.mxu1 %v7543_v17  ;;  %v3203_v15 = vrot.slane %v3201_v41, 4  ;;  %v400_v8 = vmul.f32 %v7624_v62, %v6654_v32  ;;  %v401_v37 = vmul.f32 %v7624_v62, %v6655_v63  ;;  %v3171_v59 = vrot.slane %v3170_v1, 4  ;;  %v7547_v41 = vld [vmem:[#allocation2 + $0x48] sm:$0xff]   ;;  %v3559_v1 = vld [vmem:[#allocation2 + $0x24] sm:$0xe] }
  0xf4   : > { %7191 = vmatprep.mubr.bf16.mxu1 %v7545_v20  ;;  %7268 = vmatpush3.bf16.msra.mxu1 %v7546_v58  ;;  %v3181_v17 = vrot.slane %v3180_v0, 4  ;;  %v3185_v53 = vrot.slane %v3183_v47, 5  ;;  %v402_v56 = vmul.f32 %v7624_v62, %v341_v57  ;;  %v3162_v58 = vsel %vm7735_vm4, %v3157_v14, %v3161_v3  ;;  %v7549_v0 = vld [vmem:[#allocation2 + $0x54] sm:$0xff]   ;;  %v3560_v62 = vld [vmem:[#allocation2 + $0x30] sm:$0xe] }
  0xf5   : > { %7269 = vmatprep.subr.bf16.mxu1 %v7550_v10  ;;  %v3207_v2 = vshll.u32 %v8784_v22, 16  ;;  %v461_v20 = vadd.f32 %v7625_v35, %v400_v8  ;;  %v462_v9 = vadd.f32 %v7625_v35, %v401_v37  ;;  %7326 = vmatpush3.bf16.msra.mxu0 %v7568_v61  ;;  %v3194_v18 = vor.u32 %v3193_v39, %v3190_v7  ;;  %v7558_v61 = vld [vmem:[%s10264_s3 + $0x150] sm:$0xff]  }
  0xf6   : > { %v463_v32 = vadd.f32 %v7625_v35, %v402_v56  ;;  %7407 = vmatprep.subr.bf16.mxu0 %v8789_v28  ;;  %v6304_v47 = vcombine.low %v3128_v49, %v3138_v24  ;;  %v3204_v3 = vor.u32 %v3203_v15, %v8791_v29  ;;  %v6305_v57 = vcombine.low %v3152_v6, %v3162_v58 }
  0xf7   : > { %7248 = vmatmul.mubr.bf16.gmra.mxu0 %v6302_v13  ;;  %v515_v14 = vmax.f32 %v461_v20, 0.0  ;;  %v516_v63 = vmax.f32 %v462_v9, 0.0  ;;  %v3176_v7 = vsel %vm7735_vm4, %v3171_v59, %v8747_v36  ;;  %v8815_v49 = vrot.slane %v3207_v2, 5  ;;  %v3561_v59 = vld [vmem:[#allocation2 + $0x3c] sm:$0xe] }
  0xf8   : > { %7270 = vmatpush3.bf16.msra.mxu1 %v7550_v10  ;;  %7251 = vmatprep.mubr.bf16.mxu0 %v6303_v54  ;;  %v3186_v10 = vsel %vm7735_vm4, %v3181_v17, %v3185_v53  ;;  %v517_v13 = vmax.f32 %v463_v32, 0.0  ;;  %v6319_v15 = vrot.slane %v3559_v1, 9  ;;  %v3637_v54 = vrot.slane %v8424_v21, 5  ;;  %v7562_v53 = vld [vmem:[%s10264_s3 + $0x148] sm:$0xff]  }
  0xf9   : > { %7271 = vmatprep.subr.bf16.mxu1 %v7554_v50  ;;  %v591_v39 = vsel %vm525_vm1, %v515_v14, 0.0  ;;  %v3195_v8 = vrot.slane %v3194_v18, 4  ;;  %v3640_v36 = vrot.slane %v8444_v48, 5  ;;  %v8823_v17 = vcombine.low %v3176_v7, %v3186_v10  ;;  %v3562_v9 = vld [vmem:[#allocation2 + $0x48] sm:$0xe]  ;;  %v7551_v14 = vld [vmem:[#allocation2 + $0x60] sm:$0xff]  }
  0xfa   : > { %v593_v37 = vsel %vm536_vm3, %v517_v13, 0.0  ;;  %v6694_v56 = vpack.c.bf16 %v516_v63, %v591_v39  ;;  %v3205_v58 = vrot.slane %v3204_v3, 4  ;;  %v8830_v2 = vsel %vm8167_vm7, %v6319_v15, %v3637_v54  ;;  %v3563_v3 = vld [vmem:[#allocation2 + $0x54] sm:$0xe]  ;;  %v7553_v10 = vld [vmem:[#allocation2 + $0x6c] sm:$0xff]  }
  0xfb   : > { %7192 = vmatmul.mubr.bf16.gmra.mxu1 %v7547_v41  ;;  %v6591_v21 = vpack.c.bf16 %v593_v37, %v593_v37  ;;  %v3639_v35 = vrot.slane %v3637_v54, 4  ;;  %v6320_v20 = vrot.slane %v3560_v62, 9  ;;  %v3644_v48 = vrot.slane %v8452_v11, 5  ;;  %v8834_v41 = vld [vmem:[#allocation2 + $0x10] sm:$0xf]  ;;  %v8878_v37 = vld [vmem:[%s10264_s3 + $0x1f8] sm:$0xff]  }
  0xfc   : > { %7195 = vmatprep.mubr.bf16.mxu1 %v7549_v0  ;;  %7272 = vmatpush3.bf16.msra.mxu1 %v7554_v50  ;;  %6791 = vst [vmem:[#allocation2 + $0xc0] sm:$0xff] %v6694_v56   ;;  %v3647_v50 = vrot.slane %v8473_v38, 5  ;;  %v3623_v18 = vrot.slane %v8834_v41, 5  ;;  %v6321_v32 = vrot.slane %v3561_v59, 9  ;;  %v3651_v1 = vrot.slane %v8486_v60, 5 }
  0xfd   : > { %7273 = vmatprep.subr.bf16.mxu1 %v7558_v61  ;;  %881 = vst [vmem:[#allocation2 + $0xc8] sm:$0x1] %v6591_v21  ;;  %v3654_v0 = vrot.slane %v8539_v4, 5  ;;  %v3200_v63 = vsel %vm7735_vm4, %v3195_v8, %v8791_v29  ;;  %v8844_v11 = vsel %vm8167_vm7, %v3639_v35, %v3640_v36  ;;  %v8848_v38 = vsel %vm8167_vm7, %v6320_v20, %v3644_v48  ;;  %v3564_v39 = vld [vmem:[#allocation2 + $0x60] sm:$0xe] }
  0xfe   : > { %v3646_v7 = vrot.slane %v3644_v48, 4  ;;  %v6351_v60 = vcombine.low %v8830_v2, %v8844_v11  ;;  %v8854_v4 = vsel %vm8167_vm7, %v6321_v32, %v3651_v1  ;;  %v3653_v29 = vrot.slane %v3651_v1, 4  ;;  %v7555_v32 = vld [vmem:[#allocation2 + $0x78] sm:$0xff]   ;;  %v5197_v2 = vld [vmem:[#allocation2 + $0x24] sm:$0xe] }
  0xff   : > { %7252 = vmatmul.mubr.bf16.gmra.mxu0 %v6304_v47  ;;  %v6322_v13 = vrot.slane %v3562_v9, 9  ;;  %v3210_v15 = vsel %vm7735_vm4, %v3205_v58, %v8815_v49  ;;  %v7566_v47 = vld [vmem:[%s10264_s3 + $0x140] sm:$0xff]   ;;  %v3658_v54 = vrot.slane %v8512_v23, 5  ;;  %v6323_v62 = vrot.slane %v3563_v3, 9  ;;  %v3565_v9 = vld [vmem:[#allocation2 + $0x6c] sm:$0xe] }
 0x100   : > { %7274 = vmatpush3.bf16.msra.mxu1 %v7558_v61  ;;  %7255 = vmatprep.mubr.bf16.mxu0 %v6305_v57  ;;  %v8864_v61 = vsel %vm8167_vm7, %v3646_v7, %v3647_v50  ;;  %v8871_v57 = vsel %vm8167_vm7, %v3653_v29, %v3654_v0  ;;  %v3661_v49 = vrot.slane %v8553_v16, 5  ;;  %v3665_v6 = vrot.slane %v8532_v30, 5  ;;  %v7583_v23 = vld [vmem:[%s10264_s3 + $0x1e0] sm:$0xff]  }
 0x101   : > { %7275 = vmatprep.subr.bf16.mxu1 %v7562_v53  ;;  %v3660_v56 = vrot.slane %v3658_v54, 4  ;;  %v3668_v36 = vrot.slane %v8569_v25, 5  ;;  %v6324_v59 = vrot.slane %v3564_v39, 9  ;;  %v6307_v58 = vcombine.low %v3200_v63, %v3210_v15  ;;  %v9091_v15 = vld [vmem:[#allocation2 + $0x34] sm:$0xf] }
 0x102   : > { %v8887_v30 = vsel %vm8167_vm7, %v6322_v13, %v3658_v54  ;;  %v8891_v35 = vsel %vm8167_vm7, %v6323_v62, %v3665_v6  ;;  %v3667_v3 = vrot.slane %v3665_v6, 4  ;;  %v7557_v13 = vld [vmem:[#allocation2 + $0x84] sm:$0xff]  }
 0x103   : > { %7196 = vmatmul.mubr.bf16.gmra.mxu1 %v7551_v14  ;;  %v2848_v21 = vld [vmem:[#allocation2 + $0xc0] sm:$0xf]  ;;  %v8883_v16 = vld [vmem:[#allocation2 + $0xc4] sm:$0xf]  ;;  %v8900_v0 = vsel %vm8167_vm7, %v3660_v56, %v3661_v49  ;;  %v3672_v14 = vrot.slane %v8565_v34, 5  ;;  %v3675_v56 = vrot.slane %v8582_v26, 5 }
 0x104   : > { %7199 = vmatprep.mubr.bf16.mxu1 %v7553_v10  ;;  %7276 = vmatpush3.bf16.msra.mxu1 %v7562_v53  ;;  %v8893_v20 = vld [vmem:[#allocation2 + $0xc8] sm:$0x1]  ;;  %v3212_v48 = vshrl.u32 %v2848_v21, 16  ;;  %v3215_v50 = vshll.u32 %v2848_v21, 16  ;;  %v3221_v25 = vshll.u32 %v8883_v16, 16  ;;  %v3225_v53 = vshrl.u32 %v8883_v16, 16 }
 0x105   : > { %7277 = vmatprep.subr.bf16.mxu1 %v7566_v47  ;;  %v3231_v1 = vshll.u32 %v8893_v20, 16  ;;  %v8908_v54 = vsel %vm8167_vm7, %v3667_v3, %v3668_v36  ;;  %v8912_v62 = vsel %vm8167_vm7, %v6324_v59, %v3672_v14  ;;  %v3566_v34 = vld [vmem:[#allocation2 + $0x78] sm:$0xe]  ;;  %v6325_v21 = vrot.slane %v3565_v9, 9 }
 0x106   : > { %v3214_v63 = vrot.slane %v3212_v48, 4  ;;  %v3217_v7 = vrot.slane %v3215_v50, 5  ;;  %v3223_v10 = vrot.slane %v3221_v25, 5  ;;  %v3227_v29 = vrot.slane %v3225_v53, 4  ;;  %v3567_v53 = vld [vmem:[#allocation2 + $0x84] sm:$0xe] }
 0x107   : > { %7256 = vmatmul.mubr.bf16.gmra.mxu0 %v8823_v17  ;;  %v3233_v39 = vrot.slane %v3231_v1, 5  ;;  %v3679_v36 = vrot.slane %v8589_v51, 5  ;;  %v3682_v48 = vrot.slane %v8615_v27, 5  ;;  %v6326_v25 = vrot.slane %v3566_v34, 9  ;;  %v3568_v27 = vld [vmem:[#allocation2 + $0x90] sm:$0xe] }
 0x108   : > { %7278 = vmatpush3.bf16.msra.mxu1 %v7566_v47  ;;  %7259 = vmatprep.mubr.bf16.mxu0 %v6307_v58  ;;  %v3218_v49 = vor.u32 %v3217_v7, %v3214_v63  ;;  %v3228_v6 = vor.u32 %v3227_v29, %v3223_v10  ;;  %v3674_v47 = vrot.slane %v3672_v14, 4  ;;  %v3686_v58 = vrot.slane %v8602_v19, 5  ;;  %v7569_v3 = vld [vmem:[#allocation2 + $0x18] sm:$0xff]   ;;  %v9076_v14 = vld [vmem:[#allocation2 + $0x2c] sm:$0x1] }
 0x109   : > { %7359 = vmatprep.subr.bf16.mxu1 %v8878_v37  ;;  %v8927_v26 = vsel %vm8167_vm7, %v6325_v21, %v3679_v36  ;;  %v3681_v9 = vrot.slane %v3679_v36, 4  ;;  %v3689_v51 = vrot.slane %v8649_v33, 5  ;;  %v3569_v7 = vld [vmem:[#allocation2 + $0x9c] sm:$0xe]  ;;  %v6327_v34 = vrot.slane %v3567_v53, 9 }
 0x10a   : > { %v3219_v59 = vrot.slane %v3218_v49, 4  ;;  %v3229_v50 = vrot.slane %v3228_v6, 4  ;;  %v8923_v1 = vsel %vm8167_vm7, %v3674_v47, %v3675_v56  ;;  %v8938_v63 = vsel %vm8167_vm7, %v6326_v25, %v3686_v58  ;;  %v3570_v56 = vld [vmem:[#allocation2 + $0xa8] sm:$0xe]  ;;  %v7561_v21 = vld [vmem:[#allocation2 + $0x9c] sm:$0xff]  }
 0x10b   : > { %7200 = vmatmul.mubr.bf16.gmra.mxu1 %v7555_v32  ;;  %v8942_v33 = vsel %vm8167_vm7, %v3681_v9, %v3682_v48  ;;  %v3693_v49 = vrot.slane %v8639_v31, 5  ;;  %v3696_v6 = vrot.slane %v8663_v55, 5  ;;  %v6328_v47 = vrot.slane %v3568_v27, 9  ;;  %v3571_v53 = vld [vmem:[#allocation2 + $0xb4] sm:$0xe] }
 0x10c   : > { %7203 = vmatprep.mubr.bf16.mxu1 %v7557_v13  ;;  %v3224_v32 = vsel %vm7735_vm4, %v3219_v59, %v3223_v10  ;;  %v3234_v19 = vsel %vm7735_vm4, %v3229_v50, %v3233_v39  ;;  %v3688_v13 = vrot.slane %v3686_v58, 4  ;;  %v7559_v10 = vld [vmem:[#allocation2 + $0x90] sm:$0xff]   ;;  %v3700_v48 = vrot.slane %v8657_v12, 5 }
 0x10d   : > { %v6308_v29 = vcombine.low %v3224_v32, %v3234_v19  ;;  %v3703_v59 = vrot.slane %v8697_v44, 5  ;;  %v6329_v50 = vrot.slane %v3569_v7, 9  ;;  %v8958_v31 = vsel %vm8167_vm7, %v6327_v34, %v3693_v49  ;;  %v7570_v7 = vld [vmem:[#allocation2 + $0x24] sm:$0xff]  }
 0x10e   : > { %v8950_v36 = vsel %vm8167_vm7, %v3688_v13, %v3689_v51  ;;  %v3695_v55 = vrot.slane %v3693_v49, 4  ;;  %v3707_v58 = vrot.slane %v8680_v40, 5  ;;  %v8963_v9 = vsel %vm8167_vm7, %v6328_v47, %v3700_v48  ;;  %v7573_v49 = vld [vmem:[#allocation2 + $0x30] sm:$0xff]  }
 0x10f   : > { %7260 = vmatmul.mubr.bf16.gmra.mxu0 %v6308_v29  ;;  %v3702_v12 = vrot.slane %v3700_v48, 4  ;;  %v3710_v44 = vrot.slane %v8723_v52, 5  ;;  %v6330_v51 = vrot.slane %v3570_v56, 9  ;;  %v3714_v40 = vrot.slane %v8712_v43, 5 }
 0x110   : > { %7327 = vmatprep.mubr.bf16.mxu0 %v7569_v3  ;;  %v8968_v27 = vsel %vm8167_vm7, %v3695_v55, %v3696_v6  ;;  %v8972_v32 = vsel %vm8167_vm7, %v6329_v50, %v3707_v58  ;;  %v3709_v19 = vrot.slane %v3707_v58, 4  ;;  %v3572_v3 = vld [vmem:[#allocation2 + $0xc0] sm:$0xe]  ;;  %v3717_v13 = vrot.slane %v8756_v5, 5  ;;  %v7563_v55 = vld [vmem:[#allocation2 + $0xa8] sm:$0xff]  }
 0x111   : > { %v8979_v52 = vsel %vm8167_vm7, %v3702_v12, %v3703_v59  ;;  %v6331_v34 = vrot.slane %v3571_v53, 9  ;;  %v8990_v47 = vsel %vm8167_vm7, %v6330_v51, %v3714_v40  ;;  %v3716_v56 = vrot.slane %v3714_v40, 4 }
 0x112   : > { %v8986_v43 = vsel %vm8167_vm7, %v3709_v19, %v3710_v44  ;;  %v3721_v48 = vrot.slane %v8749_v42, 5  ;;  %v3724_v59 = vrot.slane %v8784_v22, 5  ;;  %v6332_v50 = vrot.slane %v3572_v3, 9  ;;  %v7565_v44 = vld [vmem:[#allocation2 + $0xb4] sm:$0xff]  }
 0x113   : > { %7204 = vmatmul.mubr.bf16.gmra.mxu1 %v7559_v10  ;;  %v3557_v10 = vld [vmem:[#allocation2 + $0xc] sm:$0xe]  ;;  %v9001_v58 = vsel %vm8167_vm7, %v3716_v56, %v3717_v13  ;;  %v3728_v53 = vrot.slane %v8883_v16, 5  ;;  %v3731_v12 = vrot.slane %v8893_v20, 5  ;;  %v3625_v40 = vrot.slane %v3623_v18, 4 }
 0x114   : > { %7207 = vmatprep.mubr.bf16.mxu1 %v7561_v21  ;;  %v7576_v21 = vld [vmem:[%s10264_s3 + $0x230] sm:$0xff]   ;;  %v6317_v51 = vrot.slane %v3557_v10, 9  ;;  %v9009_v42 = vsel %vm8167_vm7, %v6331_v34, %v3721_v48  ;;  %v3723_v22 = vrot.slane %v3721_v48, 4  ;;  %v7574_v48 = vld [vmem:[#allocation2 + $0x3c] sm:$0xff]  }
 0x115   : > { %v7627_v3 = vld [vmem:[#allocation2 + $0x14] sm:$0x1]  ;;  %v9016_v16 = vsel %vm8167_vm7, %v6332_v50, %v3728_v53  ;;  %v3730_v20 = vrot.slane %v3728_v53, 4  ;;  %v3558_v53 = vld [vmem:[#allocation2 + $0x18] sm:$0xe] }
 0x116   : > { %v3626_v13 = vrot.slane %v7627_v3, 5  ;;  %v9023_v34 = vsel %vm8167_vm7, %v3723_v22, %v3724_v59  ;;  %v3624_v59 = vsel %vm8167_vm7, %v6317_v51, %v3623_v18  ;;  %v7577_v22 = vld [vmem:[#allocation2 + $0x48] sm:$0xff]   ;;  %v9042_v3 = vpop.f32.mrf.mxu0  ;;  %v7629_v50 = vld [vmem:[#allocation2 + $0x20] sm:$0x1]  ;;  %v7588_v18 = vld [vmem:[%s10264_s3 + $0x218] sm:$0xff]  }
 0x117   : > { %7328 = vmatmul.mubr.bf16.vlgmr.msra.gmra.mxu0 %v7570_v7  ;;  %v7580_v7 = vld [vmem:[%s10264_s3 + $0x228] sm:$0xff]   ;;  %10294 = vst [vmem:[#allocation4_spill] sm:$0xff] %v9042_v3  ;;  %v3633_v10 = vrot.slane %v7629_v50, 5 }
 0x118   : > { %7408 = vmatpush3.bf16.msra.mxu0 %v8789_v28  ;;  %7331 = vmatprep.mubr.bf16.mxu0 %v7573_v49  ;;  %v9029_v28 = vsel %vm8167_vm7, %v3730_v20, %v3731_v12  ;;  %v7628_v49 = vld [vmem:[#allocation2 + $0x1c] sm:$0xf]  ;;  %v7584_v12 = vld [vmem:[%s10264_s3 + $0x220] sm:$0xff]   ;;  %v9047_v51 = vpop.f32.mrf.mxu0 }
 0x119   : > { %7409 = vmatprep.subr.bf16.mxu0 %v7576_v21  ;;  %v3630_v56 = vrot.slane %v7628_v49, 5  ;;  %v6318_v49 = vrot.slane %v3558_v53, 9  ;;  %10295 = vst [vmem:[#allocation5_spill] sm:$0xff] %v9047_v51  ;;  %v7592_v53 = vld [vmem:[%s10264_s3 + $0x210] sm:$0xff]   ;;  %v5200_v51 = vld [vmem:[#allocation2 + $0x48] sm:$0xe] }
 0x11b   : > { %7208 = vmatmul.mubr.bf16.gmra.mxu1 %v7563_v55  ;;  %v3627_v55 = vsel %vm8167_vm7, %v3625_v40, %v3626_v13  ;;  %v3632_v41 = vrot.slane %v3630_v56, 4  ;;  %v4443_v40 = vld [vmem:[#allocation2 + $0x1c] sm:$0xf]  ;;  %v3631_v13 = vsel %vm8167_vm7, %v6318_v49, %v3630_v56  ;;  %v4444_v56 = vld [vmem:[#allocation2 + $0x20] sm:$0x1] }
 0x11c   : > { %7211 = vmatprep.mubr.bf16.mxu1 %v7565_v44  ;;  %7410 = vmatpush3.bf16.msra.mxu0 %v7576_v21  ;;  %v7567_v44 = vld [vmem:[#allocation2 + $0xc0] sm:$0xff]   ;;  %v6349_v20 = vcombine.low %v3624_v59, %v3627_v55  ;;  %v4442_v21 = vld [vmem:[#allocation2 + $0x18] sm:$0xf]  ;;  %v5262_v5 = vrot.slane %v4443_v40, 5  ;;  %v5265_v25 = vrot.slane %v4444_v56, 5  ;;  %v4510_v39 = vshll.u32 %v4444_v56, 16 }
 0x11d   : > { %7411 = vmatprep.subr.bf16.mxu0 %v7580_v7  ;;  %v3634_v50 = vsel %vm8167_vm7, %v3632_v41, %v3633_v10  ;;  %v7581_v59 = vld [vmem:[#allocation2 + $0x60] sm:$0xff]   ;;  %v4494_v55 = vshll.u32 %v4442_v21, 16  ;;  %v5196_v49 = vld [vmem:[#allocation2 + $0x18] sm:$0xe]  ;;  %v7575_v10 = vld [vmem:[%s10264_s3 + $0x1f0] sm:$0xff]  }
 0x11e   : > { %v6350_v19 = vcombine.low %v3631_v13, %v3634_v50  ;;  %v7596_v13 = vld [vmem:[%s10264_s3 + $0x208] sm:$0xff]   ;;  %v6453_v6 = vrot.slane %v5196_v49, 9  ;;  %v5264_v29 = vrot.slane %v5262_v5, 4 }
 0x11f   : > { %7332 = vmatmul.mubr.bf16.gmra.mxu0 %v7574_v48  ;;  %v7578_v48 = vld [vmem:[#allocation2 + $0x54] sm:$0xff]   ;;  %v4496_v41 = vrot.slane %v4494_v55, 5 }
 0x120   : > { %7335 = vmatprep.mubr.bf16.mxu0 %v7577_v22  ;;  %7412 = vmatpush3.bf16.msra.mxu0 %v7580_v7  ;;  %v4491_v7 = vshrl.u32 %v4442_v21, 16  ;;  %v4500_v22 = vshll.u32 %v4443_v40, 16  ;;  %v4445_v21 = vld [vmem:[#allocation2 + $0x24] sm:$0xf] }
 0x121   : > { %7413 = vmatprep.subr.bf16.mxu0 %v7584_v12  ;;  %v4518_v55 = vshll.u32 %v4445_v21, 16 }
 0x122   : > { %v9064_v50 = vrot.slane %v4500_v22, 5  ;;  %v7585_v22 = vld [vmem:[#allocation2 + $0x78] sm:$0xff]  }
 0x123   : > { %7212 = vmatmul.mubr.bf16.gmra.mxu1 %v7567_v44  ;;  %v4504_v44 = vshrl.u32 %v4443_v40, 16 }
 0x124   : > { %7279 = vmatprep.mubr.bf16.mxu1 %v6349_v20  ;;  %7414 = vmatpush3.bf16.msra.mxu0 %v7584_v12  ;;  %v9056_v20 = vpop.f32.mrf.mxu0  ;;  %v4493_v12 = vrot.slane %v4491_v7, 4  ;;  %v4515_v7 = vshrl.u32 %v4445_v21, 16  ;;  %v9085_v21 = vsel %vm8167_vm7, %v6453_v6, %v5262_v5  ;;  %v6454_v5 = vrot.slane %v5197_v2, 9 }
 0x125   : > { %7415 = vmatprep.subr.bf16.mxu0 %v7588_v18  ;;  %10296 = vst [vmem:[#allocation6_spill] sm:$0xff] %v9056_v20  ;;  %v4506_v40 = vrot.slane %v4504_v44, 4  ;;  %v4548_v2 = vshll.u32 %v9091_v15, 16 }
 0x126   : > { %v4497_v44 = vor.u32 %v4496_v41, %v4493_v12  ;;  %v4448_v12 = vld [vmem:[#allocation2 + $0x30] sm:$0xf]  ;;  %v4517_v56 = vrot.slane %v4515_v7, 4  ;;  %v4520_v41 = vrot.slane %v4518_v55, 5  ;;  %v9100_v55 = vpop.f32.mrf.mxu1 }
 0x127   : > { %7336 = vmatmul.mubr.bf16.gmra.mxu0 %v7578_v48  ;;  %v9066_v48 = vpop.f32.mrf.mxu0  ;;  %v4542_v7 = vshll.u32 %v4448_v12, 16  ;;  %10300 = vst [vmem:[#allocation9_spill] sm:$0xff] %v9100_v55  ;;  %v4451_v55 = vld [vmem:[#allocation2 + $0x3c] sm:$0xf] }
 0x128   : > { %7339 = vmatprep.mubr.bf16.mxu0 %v7581_v59  ;;  %7416 = vmatpush3.bf16.msra.mxu0 %v7588_v18  ;;  %10297 = vst [vmem:[#allocation7_spill] sm:$0xff] %v9066_v48  ;;  %v7582_v18 = vld [vmem:[#allocation2 + $0x6c] sm:$0xff]   ;;  %v4446_v59 = vld [vmem:[#allocation2 + $0x28] sm:$0xf]  ;;  %v4498_v6 = vrot.slane %v4497_v44, 4 }
 0x129   : > { %7417 = vmatprep.subr.bf16.mxu0 %v7592_v53  ;;  %v5269_v49 = vrot.slane %v4446_v59, 5  ;;  %v9078_v11 = vpop.f32.mrf.mxu0  ;;  %v4528_v17 = vshrl.u32 %v4446_v59, 16  ;;  %v5198_v44 = vld [vmem:[#allocation2 + $0x30] sm:$0xe] }
 0x12a   : > { %10298 = vst [vmem:[#allocation8_spill] sm:$0xff] %v9078_v11  ;;  %v9131_v11 = vld [vmem:[#allocation2 + $0x40] sm:$0xf] }
 0x12b   : > { %7280 = vmatmul.mubr.bf16.vlgmr.msra.gmra.mxu1 %v6350_v19  ;;  %v7579_v19 = vld [vmem:[%s10264_s3 + $0x1e8] sm:$0xff]   ;;  %v5271_v8 = vrot.slane %v5269_v49, 4  ;;  %v9102_v24 = vpop.f32.mrf.mxu0 }
 0x12c   : > { %7360 = vmatpush3.bf16.msra.mxu1 %v8878_v37  ;;  %7283 = vmatprep.mubr.bf16.mxu1 %v6351_v60  ;;  %v4507_v37 = vor.u32 %v4506_v40, %v9064_v50  ;;  %v7600_v60 = vld [vmem:[%s10264_s3 + $0x200] sm:$0xff]   ;;  %v4524_v40 = vshll.u32 %v4446_v59, 16  ;;  %v10299_v59 = vcombine.low %v8848_v38, %v8864_v61  ;;  %10301 = vst [vmem:[#allocation10_spill] sm:$0xff] %v9102_v24  ;;  %v7589_v24 = vld [vmem:[#allocation2 + $0x90] sm:$0xff]  }
 0x12d   : > { %7361 = vmatprep.subr.bf16.mxu1 %v7575_v10  ;;  %7418 = vmatpush3.bf16.msra.mxu0 %v7592_v53  ;;  %v9089_v53 = vsel %vm8167_vm7, %v5264_v29, %v5265_v25  ;;  %v5272_v25 = vrot.slane %v9076_v14, 5  ;;  %v7586_v38 = vld [vmem:[#allocation2 + $0x84] sm:$0xff]   ;;  %v4521_v61 = vor.u32 %v4520_v41, %v4517_v56  ;;  %v6455_v41 = vrot.slane %v5198_v44, 9 }
 0x12e   : > { %7419 = vmatprep.subr.bf16.mxu0 %v7596_v13  ;;  %v4508_v29 = vrot.slane %v4507_v37, 4  ;;  %v9111_v37 = vrot.slane %v4524_v40, 5 }
 0x12f   : > { %7340 = vmatmul.mubr.bf16.gmra.mxu0 %v7582_v18  ;;  %v4539_v18 = vshrl.u32 %v4448_v12, 16  ;;  %v4530_v12 = vrot.slane %v4528_v17, 4  ;;  %v9126_v17 = vsel %vm8167_vm7, %v5271_v8, %v5272_v25  ;;  %v4566_v25 = vshll.u32 %v4451_v55, 16 }
 0x130   : > { %7362 = vmatpush3.bf16.msra.mxu1 %v7575_v10  ;;  %7343 = vmatprep.mubr.bf16.mxu0 %v7585_v22  ;;  %v4512_v10 = vrot.slane %v4510_v39, 5  ;;  %v10302_v39 = vcombine.low %v8854_v4, %v8871_v57  ;;  %v7587_v22 = vld [vmem:[%s10264_s3 + $0x1d8] sm:$0xff]   ;;  %v4503_v4 = vsel %vm7735_vm4, %v4498_v6, %v9064_v50  ;;  %v9122_v57 = vsel %vm8167_vm7, %v6454_v5, %v5269_v49  ;;  %v9133_v50 = vpop.f32.mrf.mxu1  ;;  %v9135_v49 = vpop.f32.mrf.mxu0 }
 0x131   : > { %7363 = vmatprep.subr.bf16.mxu1 %v7579_v19  ;;  %7420 = vmatpush3.bf16.msra.mxu0 %v7596_v13  ;;  %v4552_v13 = vshrl.u32 %v9091_v15, 16  ;;  %v4541_v40 = vrot.slane %v4539_v18, 4  ;;  %10303 = vst [vmem:[#allocation11_spill] sm:$0xff] %v9133_v50  ;;  %10304 = vst [vmem:[#allocation12_spill] sm:$0xff] %v9135_v49  ;;  %v9137_v6 = vrot.slane %v4548_v2, 5  ;;  %v4563_v5 = vshrl.u32 %v4451_v55, 16 }
 0x132   : > { %7421 = vmatprep.subr.bf16.mxu0 %v7600_v60  ;;  %v4513_v56 = vsel %vm7735_vm4, %v4508_v29, %v4512_v10  ;;  %v9144_v29 = vrot.slane %v4521_v61, 4  ;;  %v4531_v10 = vor.u32 %v4530_v12, %v9111_v37  ;;  %v4576_v55 = vshrl.u32 %v9131_v11, 16  ;;  %v4454_v2 = vld [vmem:[#allocation2 + $0x48] sm:$0xf] }
 0x133   : > { %7284 = vmatmul.mubr.bf16.gmra.mxu1 %v10299_v59  ;;  %v4534_v59 = vshll.u32 %v9076_v14, 16  ;;  %v4450_v14 = vld [vmem:[#allocation2 + $0x38] sm:$0x1]  ;;  %v4554_v8 = vrot.slane %v4552_v13, 4  ;;  %v9151_v13 = vcombine.low %v4503_v4, %v4513_v56  ;;  %v5283_v61 = vrot.slane %v9131_v11, 5 }
 0x134   : > { %7287 = vmatprep.mubr.bf16.mxu1 %v10302_v39  ;;  %7364 = vmatpush3.bf16.msra.mxu1 %v7579_v19  ;;  %v5276_v19 = vrot.slane %v9091_v15, 5  ;;  %v4544_v39 = vrot.slane %v4542_v7, 5  ;;  %v7591_v15 = vld [vmem:[%s10264_s3 + $0x1d0] sm:$0xff]   ;;  %v5279_v44 = vrot.slane %v4450_v14, 5  ;;  %v4558_v50 = vshll.u32 %v4450_v14, 16 }
 0x135   : > { %7365 = vmatprep.subr.bf16.mxu1 %v7583_v23  ;;  %7422 = vmatpush3.bf16.msra.mxu0 %v7600_v60  ;;  %v9147_v18 = vrot.slane %v4534_v59, 5  ;;  %v5199_v60 = vld [vmem:[#allocation2 + $0x3c] sm:$0xe]  ;;  %v10305_v12 = vcombine.low %v8887_v30, %v8900_v0  ;;  %v9157_v59 = vpop.f32.mrf.mxu1  ;;  %v4555_v4 = vor.u32 %v4554_v8, %v9137_v6  ;;  %v4453_v56 = vld [vmem:[#allocation2 + $0x44] sm:$0x1]  ;;  %v4568_v14 = vrot.slane %v4566_v25, 5 }
 0x136   : > { %v5278_v7 = vrot.slane %v5276_v19, 4  ;;  %10306 = vst [vmem:[#allocation13_spill] sm:$0xff] %v9157_v59  ;;  %v9163_v49 = vsel %vm8167_vm7, %v6455_v41, %v5276_v19  ;;  %v7590_v30 = vld [vmem:[#allocation2 + $0x9c] sm:$0xff]   ;;  %v7593_v0 = vld [vmem:[#allocation2 + $0xa8] sm:$0xff]   ;;  %v4587_v19 = vshrl.u32 %v4454_v2, 16  ;;  %v4590_v41 = vshll.u32 %v4454_v2, 16 }
 0x137   : > { %7344 = vmatmul.mubr.bf16.gmra.mxu0 %v7586_v38  ;;  %v4545_v38 = vor.u32 %v4544_v39, %v4541_v40  ;;  %v4565_v40 = vrot.slane %v4563_v5, 4  ;;  %v4527_v39 = vsel %vm7735_vm4, %v9144_v29, %v9111_v37  ;;  %v7595_v8 = vld [vmem:[%s10264_s3 + $0x1c8] sm:$0xff]   ;;  %v4578_v5 = vrot.slane %v4576_v55, 4 }
 0x138   : > { %7366 = vmatpush3.bf16.msra.mxu1 %v7583_v23  ;;  %7347 = vmatprep.mubr.bf16.mxu0 %v7589_v24  ;;  %v4572_v23 = vshll.u32 %v9131_v11, 16  ;;  %v9159_v24 = vpop.f32.mrf.mxu0  ;;  %v10308_v11 = vcombine.low %v8891_v35, %v8908_v54  ;;  %v9178_v35 = vsel %vm8167_vm7, %v5278_v7, %v5279_v44  ;;  %v6456_v54 = vrot.slane %v5199_v60, 9  ;;  %v4455_v25 = vld [vmem:[#allocation2 + $0x4c] sm:$0xf]  ;;  %v4456_v60 = vld [vmem:[#allocation2 + $0x50] sm:$0x1] }
 0x139   : > { %7367 = vmatprep.subr.bf16.mxu1 %v7587_v22  ;;  %10307 = vst [vmem:[#allocation14_spill] sm:$0xff] %v9159_v24  ;;  %v4560_v59 = vrot.slane %v4558_v50, 5  ;;  %v5285_v37 = vrot.slane %v5283_v61, 4  ;;  %v5286_v29 = vrot.slane %v4453_v56, 5  ;;  %v4556_v24 = vrot.slane %v4555_v4, 4  ;;  %v7599_v50 = vld [vmem:[%s10264_s3 + $0x1c0] sm:$0xff]  }
 0x13a   : > { %v9184_v2 = vpop.f32.mrf.mxu0  ;;  %v4569_v48 = vor.u32 %v4568_v14, %v4565_v40  ;;  %v4582_v20 = vshll.u32 %v4453_v56, 16  ;;  %v5290_v3 = vrot.slane %v4455_v25, 5  ;;  %v4589_v7 = vrot.slane %v4587_v19, 4 }
 0x13b   : > { %7288 = vmatmul.mubr.bf16.gmra.mxu1 %v10305_v12  ;;  %v4532_v12 = vrot.slane %v4531_v10, 4  ;;  %v9182_v10 = vpop.f32.mrf.mxu1  ;;  %10310 = vst [vmem:[#allocation16_spill] sm:$0xff] %v9184_v2  ;;  %v4592_v44 = vrot.slane %v4590_v41, 5  ;;  %v4600_v55 = vshrl.u32 %v4455_v25, 16  ;;  %v9200_v40 = vsel %vm8167_vm7, %v6456_v54, %v5283_v61 }
 0x13c   : > { %7291 = vmatprep.mubr.bf16.mxu1 %v10308_v11  ;;  %7368 = vmatpush3.bf16.msra.mxu1 %v7587_v22  ;;  %v9180_v22 = vrot.slane %v4572_v23, 5  ;;  %v4546_v11 = vrot.slane %v4545_v38, 4  ;;  %10309 = vst [vmem:[#allocation15_spill] sm:$0xff] %v9182_v10  ;;  %v4596_v23 = vshll.u32 %v4455_v25, 16  ;;  %v9204_v14 = vsel %vm8167_vm7, %v5285_v37, %v5286_v29  ;;  %v9211_v19 = vpop.f32.mrf.mxu0  ;;  %v7594_v25 = vld [vmem:[#allocation2 + $0xb4] sm:$0xff]  }
 0x13d   : > { %7369 = vmatprep.subr.bf16.mxu1 %v7591_v15  ;;  %v4537_v38 = vsel %vm7735_vm4, %v4532_v12, %v9147_v18  ;;  %v10311_v18 = vcombine.low %v8912_v62, %v8923_v1  ;;  %v9209_v12 = vpop.f32.mrf.mxu1  ;;  %10313 = vst [vmem:[#allocation18_spill] sm:$0xff] %v9211_v19  ;;  %v9215_v41 = vrot.slane %v4569_v48, 4  ;;  %v5292_v61 = vrot.slane %v5290_v3, 4  ;;  %v5201_v29 = vld [vmem:[#allocation2 + $0x54] sm:$0xe] }
 0x13e   : > { %v4551_v56 = vsel %vm7735_vm4, %v4546_v11, %v9137_v6  ;;  %10312 = vst [vmem:[#allocation17_spill] sm:$0xff] %v9209_v12  ;;  %v4561_v6 = vsel %vm7735_vm4, %v4556_v24, %v4560_v59  ;;  %v5293_v54 = vrot.slane %v4456_v60, 5  ;;  %v9220_v62 = vrot.slane %v4582_v20, 5  ;;  %v9284_v10 = vld [vmem:[#allocation2 + $0x70] sm:$0xf] }
 0x13f   : > { %7348 = vmatmul.mubr.bf16.gmra.mxu0 %v7590_v30  ;;  %v6457_v30 = vrot.slane %v5200_v51, 9  ;;  %v10314_v51 = vcombine.low %v8927_v26, %v8942_v33  ;;  %v4593_v1 = vor.u32 %v4592_v44, %v4589_v7  ;;  %v9222_v11 = vrot.slane %v4596_v23, 5  ;;  %v9238_v7 = vpop.f32.mrf.mxu0 }
 0x140   : > { %7370 = vmatpush3.bf16.msra.mxu1 %v7591_v15  ;;  %7351 = vmatprep.mubr.bf16.mxu0 %v7593_v0  ;;  %v4579_v15 = vor.u32 %v4578_v5, %v9180_v22  ;;  %v4457_v0 = vld [vmem:[#allocation2 + $0x54] sm:$0xf]  ;;  %v4458_v5 = vld [vmem:[#allocation2 + $0x58] sm:$0xf]  ;;  %v4602_v37 = vrot.slane %v4600_v55, 4  ;;  %v4606_v59 = vshll.u32 %v4456_v60, 16  ;;  %v9226_v12 = vcombine.low %v4527_v39, %v4537_v38 }
 0x141   : > { %7371 = vmatprep.subr.bf16.mxu1 %v7595_v8  ;;  %v4611_v24 = vshrl.u32 %v4457_v0, 16  ;;  %v4614_v4 = vshll.u32 %v4457_v0, 16  ;;  %v9228_v26 = vcombine.low %v4551_v56, %v4561_v6  ;;  %v9234_v20 = vsel %vm8167_vm7, %v6457_v30, %v5290_v3  ;;  %10317 = vst [vmem:[#allocation21_spill] sm:$0xff] %v9238_v7  ;;  %v9248_v55 = vld [vmem:[#allocation2 + $0x64] sm:$0xf]  ;;  %v7598_v60 = vld [vmem:[#allocation2 + $0xcc] sm:$0xff]  }
 0x142   : > { %v9224_v48 = vrot.slane %v4579_v15, 4  ;;  %v9246_v39 = vsel %vm8167_vm7, %v5292_v61, %v5293_v54  ;;  %v4620_v44 = vshll.u32 %v4458_v5, 16  ;;  %v4624_v23 = vshrl.u32 %v4458_v5, 16  ;;  %v4460_v38 = vld [vmem:[#allocation2 + $0x60] sm:$0xf] }
 0x143   : > { %7292 = vmatmul.mubr.bf16.gmra.mxu1 %v10311_v18  ;;  %v7597_v18 = vld [vmem:[#allocation2 + $0xc0] sm:$0xff]   ;;  %10315 = vst [vmem:[#allocation19_spill] sm:$0xff] %v9228_v26  ;;  %v9250_v3 = vrot.slane %v4593_v1, 4  ;;  %v4603_v15 = vor.u32 %v4602_v37, %v9222_v11  ;;  %v4459_v56 = vld [vmem:[#allocation2 + $0x5c] sm:$0x1]  ;;  %v6458_v30 = vrot.slane %v5201_v29, 9 }
 0x144   : > { %7295 = vmatprep.mubr.bf16.mxu1 %v10314_v51  ;;  %7372 = vmatpush3.bf16.msra.mxu1 %v7595_v8  ;;  %v9236_v8 = vpop.f32.mrf.mxu1  ;;  %v5297_v0 = vrot.slane %v4458_v5, 5  ;;  %v9257_v61 = vrot.slane %v4606_v59, 5  ;;  %v4613_v54 = vrot.slane %v4611_v24, 4  ;;  %v4616_v51 = vrot.slane %v4614_v4, 5  ;;  %v4463_v37 = vld [vmem:[#allocation2 + $0x6c] sm:$0xf] }
 0x145   : > { %7373 = vmatprep.subr.bf16.mxu1 %v7599_v50  ;;  %10316 = vst [vmem:[#allocation20_spill] sm:$0xff] %v9236_v8  ;;  %v4635_v33 = vshrl.u32 %v4460_v38, 16  ;;  %v4648_v1 = vshrl.u32 %v9248_v55, 16  ;;  %v10318_v5 = vcombine.low %v8938_v63, %v8950_v36  ;;  %v5300_v59 = vrot.slane %v4459_v56, 5 }
 0x146   : > { %v9264_v29 = vpop.f32.mrf.mxu1  ;;  %v9268_v6 = vrot.slane %v4620_v44, 5  ;;  %v4626_v4 = vrot.slane %v4624_v23, 4  ;;  %v5304_v24 = vrot.slane %v9248_v55, 5  ;;  %v9278_v36 = vrot.slane %v4603_v15, 4  ;;  %v5202_v23 = vld [vmem:[#allocation2 + $0x60] sm:$0xe] }
 0x147   : > { %7352 = vmatmul.mubr.bf16.gmra.mxu0 %v7594_v25  ;;  %v4638_v25 = vshll.u32 %v4460_v38, 16  ;;  %10319 = vst [vmem:[#allocation22_spill] sm:$0xff] %v9264_v29  ;;  %v10321_v38 = vcombine.low %v8958_v31, %v8968_v27  ;;  %v5299_v44 = vrot.slane %v5297_v0, 4  ;;  %v4462_v29 = vld [vmem:[#allocation2 + $0x68] sm:$0x1]  ;;  %v4617_v8 = vor.u32 %v4616_v51, %v4613_v54 }
 0x148   : > { %7374 = vmatpush3.bf16.msra.mxu1 %v7599_v50  ;;  %7355 = vmatprep.mubr.bf16.mxu0 %v7597_v18  ;;  %v4644_v50 = vshll.u32 %v9248_v55, 16  ;;  %v9266_v18 = vpop.f32.mrf.mxu0  ;;  %v4630_v55 = vshll.u32 %v4459_v56, 16  ;;  %v4659_v31 = vshrl.u32 %v4463_v37, 16  ;;  %v4662_v27 = vshll.u32 %v4463_v37, 16  ;;  %v9288_v15 = vpop.f32.mrf.mxu1  ;;  %v5203_v54 = vld [vmem:[#allocation2 + $0x6c] sm:$0xe] }
 0x149   : > { %10320 = vst [vmem:[#allocation23_spill] sm:$0xff] %v9266_v18  ;;  %v4640_v18 = vrot.slane %v4638_v25, 5  ;;  %v4650_v63 = vrot.slane %v4648_v1, 4  ;;  %10322 = vst [vmem:[#allocation24_spill] sm:$0xff] %v9288_v15  ;;  %v5306_v2 = vrot.slane %v5304_v24, 4  ;;  %v5307_v26 = vrot.slane %v4462_v29, 5 }
 0x14a   : > { %v9286_v7 = vrot.slane %v4644_v50, 5  ;;  %v9295_v56 = vsel %vm8167_vm7, %v5299_v44, %v5300_v59  ;;  %v4668_v51 = vshll.u32 %v9284_v10, 16  ;;  %v4672_v25 = vshrl.u32 %v9284_v10, 16  ;;  %v9309_v59 = vld [vmem:[#allocation2 + $0x74] sm:$0x1] }
 0x14b   : > { %7296 = vmatmul.mubr.bf16.gmra.mxu1 %v10318_v5  ;;  %v9282_v5 = vsel %vm8167_vm7, %v6458_v30, %v5297_v0  ;;  %v4627_v30 = vor.u32 %v4626_v4, %v9268_v6  ;;  %v6459_v0 = vrot.slane %v5202_v23, 9  ;;  %v10325_v1 = vcombine.low %v9085_v21, %v9089_v53  ;;  %v9315_v21 = vpop.f32.mrf.mxu1 }
 0x14c   : > { %7299 = vmatprep.mubr.bf16.mxu1 %v10321_v38  ;;  %v4637_v38 = vrot.slane %v4635_v33, 4  ;;  %v5311_v33 = vrot.slane %v9284_v10, 5  ;;  %v4632_v37 = vrot.slane %v4630_v55, 5  ;;  %v4661_v4 = vrot.slane %v4659_v31, 4  ;;  %10327 = vst [vmem:[#allocation27_spill] sm:$0xff] %v9315_v21 }
 0x14d   : > { %v4664_v44 = vrot.slane %v4662_v27, 5  ;;  %v4618_v23 = vrot.slane %v4617_v8, 4  ;;  %v4651_v10 = vor.u32 %v4650_v63, %v9286_v7  ;;  %v9325_v8 = vsel %vm8167_vm7, %v5306_v2, %v5307_v26  ;;  %v4467_v55 = vld [vmem:[#allocation2 + $0x7c] sm:$0xf]  ;;  %v9349_v27 = vld [vmem:[#allocation2 + $0x80] sm:$0x1] }
 0x14e   : > { %v4641_v15 = vor.u32 %v4640_v18, %v4637_v38  ;;  %v6460_v18 = vrot.slane %v5203_v54, 9  ;;  %v9331_v63 = vrot.slane %v4668_v51, 5  ;;  %v10329_v2 = vsel %vm7735_vm4, %v9224_v48, %v9220_v62  ;;  %v5204_v48 = vld [vmem:[#allocation2 + $0x78] sm:$0xe]  ;;  %v9353_v51 = vpop.f32.mrf.mxu1 }
 0x14f   : > { %v9290_v19 = vpop.f32.mrf.mxu0  ;;  %7356 = vmatmul.mubr.bf16.gmra.mxu0 %v7598_v60  ;;  %v4609_v60 = vsel %vm7735_vm4, %v9278_v36, %v9257_v61  ;;  %v9321_v61 = vsel %vm8167_vm7, %v6459_v0, %v5304_v24  ;;  %v4674_v36 = vrot.slane %v4672_v25, 4  ;;  %v6489_v26 = vcombine.low %v9234_v20, %v9246_v39  ;;  %10331 = vst [vmem:[#allocation28_spill] sm:$0xff] %v9353_v51 }
 0x150   : > { %10323 = vst [vmem:[#allocation25_spill] sm:$0xff] %v9290_v19  ;;  %7423 = vmatprep.mubr.bf16.mxu0 %v10325_v1  ;;  %v4654_v19 = vshll.u32 %v4462_v29, 16  ;;  %v4628_v1 = vrot.slane %v4627_v30, 4  ;;  %v10328_v29 = vcombine.low %v8972_v32, %v8986_v43  ;;  %v10330_v32 = vsel %vm7735_vm4, %v9215_v41, %v9180_v22 }
 0x151   : > { %v9300_v50 = vpop.f32.mrf.mxu0  ;;  %v9345_v43 = vcombine.low %v10330_v32, %v10329_v2  ;;  %v4665_v24 = vor.u32 %v4664_v44, %v4661_v4  ;;  %v5318_v38 = vrot.slane %v4467_v55, 5  ;;  %v6490_v30 = vcombine.low %v9282_v5, %v9295_v56  ;;  %v4466_v4 = vld [vmem:[#allocation2 + $0x78] sm:$0xf] }
 0x152   : > { %10324 = vst [vmem:[#allocation26_spill] sm:$0xff] %v9300_v50  ;;  %v10326_v50 = vcombine.low %v8963_v9, %v8979_v52  ;;  %v5313_v9 = vrot.slane %v5311_v33, 4  ;;  %v5314_v52 = vrot.slane %v9309_v59, 5  ;;  %v4642_v0 = vrot.slane %v4641_v15, 4 }
 0x153   : > { %v9317_v53 = vpop.f32.mrf.mxu0  ;;  %v4652_v54 = vrot.slane %v4651_v10, 4  ;;  %v4656_v62 = vrot.slane %v4654_v19, 5  ;;  %v10332_v22 = vsel %vm7735_vm4, %v9250_v3, %v9222_v11  ;;  %v4633_v15 = vsel %vm7735_vm4, %v4628_v1, %v4632_v37  ;;  %v4469_v1 = vld [vmem:[#allocation2 + $0x84] sm:$0xf] }
 0x154   : > { %7300 = vmatmul.mubr.bf16.gmra.mxu1 %v10326_v50  ;;  %v9362_v41 = vcombine.low %v10332_v22, %v4609_v60  ;;  %v4623_v50 = vsel %vm7735_vm4, %v4618_v23, %v9268_v6  ;;  %v10333_v44 = vcombine.low %v9122_v57, %v9126_v17  ;;  %v9376_v11 = vsel %vm8167_vm7, %v6460_v18, %v5311_v33 }
 0x155   : > { %7303 = vmatprep.mubr.bf16.mxu1 %v10328_v29  ;;  %v9333_v31 = vpop.f32.mrf.mxu0  ;;  %v9380_v3 = vsel %vm8167_vm7, %v5313_v9, %v5314_v52  ;;  %v4675_v6 = vor.u32 %v4674_v36, %v9331_v63  ;;  %v4678_v60 = vshll.u32 %v9309_v59, 16  ;;  %v10334_v23 = vcombine.low %v9163_v49, %v9178_v35  ;;  %v9398_v49 = vpop.f32.mrf.mxu1 }
 0x156   : > { %v4666_v57 = vrot.slane %v4665_v24, 4  ;;  %v6461_v17 = vrot.slane %v5204_v48, 9  ;;  %v5320_v10 = vrot.slane %v5318_v38, 4  ;;  %v5321_v33 = vrot.slane %v9349_v27, 5  ;;  %10336 = vst [vmem:[#allocation29_spill] sm:$0xff] %v9398_v49 }
 0x157   : > { %v9355_v25 = vpop.f32.mrf.mxu0  ;;  %7424 = vmatmul.mubr.bf16.vlgmr.msra.gmra.mxu0 %v10333_v44  ;;  %v4647_v18 = vsel %vm7735_vm4, %v4642_v0, %v9286_v7  ;;  %v4657_v29 = vsel %vm7735_vm4, %v4652_v54, %v4656_v62  ;;  %v4683_v59 = vshrl.u32 %v4466_v4, 16  ;;  %v4686_v9 = vshll.u32 %v4466_v4, 16  ;;  %v9406_v24 = vld [vmem:[#allocation2 + $0x88] sm:$0xf] }
 0x158   : > { %7427 = vmatprep.mubr.bf16.mxu0 %v10334_v23  ;;  %v10335_v52 = vcombine.low %v8990_v47, %v9001_v58  ;;  %v9402_v36 = vcombine.low %v4623_v50, %v4633_v15  ;;  %v4692_v32 = vshll.u32 %v4467_v55, 16  ;;  %v4696_v7 = vshrl.u32 %v4467_v55, 16  ;;  %v9430_v23 = vpop.f32.mrf.mxu1 }
 0x159   : > { %v9384_v37 = vpop.f32.mrf.mxu0  ;;  %v10337_v0 = vcombine.low %v9009_v42, %v9023_v34  ;;  %v4676_v54 = vrot.slane %v4675_v6, 4  ;;  %v4680_v47 = vrot.slane %v4678_v60, 5  ;;  %v4707_v58 = vshrl.u32 %v4469_v1, 16  ;;  %v9426_v34 = vld [vmem:[#allocation2 + $0x94] sm:$0xf]  ;;  %10338 = vst [vmem:[#allocation30_spill] sm:$0xff] %v9430_v23 }
 0x15a   : > { %v4710_v62 = vshll.u32 %v4469_v1, 16  ;;  %v9413_v22 = vcombine.low %v4647_v18, %v4657_v29  ;;  %v4671_v50 = vsel %vm7735_vm4, %v4666_v57, %v9331_v63  ;;  %v9420_v55 = vsel %vm8167_vm7, %v6461_v17, %v5318_v38  ;;  %v4472_v60 = vld [vmem:[#allocation2 + $0x90] sm:$0xf]  ;;  %v5205_v17 = vld [vmem:[#allocation2 + $0x84] sm:$0xe] }
 0x15b   : > { %v9400_v35 = vpop.f32.mrf.mxu0  ;;  %v9424_v42 = vsel %vm8167_vm7, %v5320_v10, %v5321_v33  ;;  %v4685_v15 = vrot.slane %v4683_v59, 4  ;;  %v4688_v4 = vrot.slane %v4686_v9, 5  ;;  %v4716_v44 = vshll.u32 %v9406_v24, 16  ;;  %v4471_v59 = vld [vmem:[#allocation2 + $0x8c] sm:$0x1] }
 0x15c   : > { %7304 = vmatmul.mubr.bf16.gmra.mxu1 %v10335_v52  ;;  %v4720_v6 = vshrl.u32 %v9406_v24, 16  ;;  %v9432_v63 = vrot.slane %v4692_v32, 5  ;;  %v4698_v57 = vrot.slane %v4696_v7, 4  ;;  %v4702_v38 = vshll.u32 %v9349_v27, 16 }
 0x15d   : > { %7307 = vmatprep.mubr.bf16.mxu1 %v10337_v0  ;;  %v9411_v48 = vpop.f32.mrf.mxu0  ;;  %v5325_v10 = vrot.slane %v9406_v24, 5  ;;  %v10339_v1 = vcombine.low %v9200_v40, %v9204_v14  ;;  %v4681_v18 = vsel %vm7735_vm4, %v4676_v54, %v4680_v47  ;;  %v4709_v9 = vrot.slane %v4707_v58, 4 }
 0x15e   : > { %v4712_v52 = vrot.slane %v4710_v62, 5  ;;  %v4731_v27 = vshrl.u32 %v4472_v60, 16  ;;  %v4734_v32 = vshll.u32 %v4472_v60, 16  ;;  %v4740_v7 = vshll.u32 %v9426_v34, 16  ;;  %v4475_v60 = vld [vmem:[#allocation2 + $0x9c] sm:$0xf] }
 0x15f   : > { %v9436_v33 = vpop.f32.mrf.mxu0  ;;  %7428 = vmatmul.mubr.bf16.gmra.mxu0 %v10339_v1  ;;  %v4744_v40 = vshrl.u32 %v9426_v34, 16  ;;  %v4689_v24 = vor.u32 %v4688_v4, %v4685_v15  ;;  %v6462_v0 = vrot.slane %v5205_v17, 9  ;;  %v9452_v54 = vrot.slane %v4716_v44, 5  ;;  %v9467_v17 = vld [vmem:[#allocation2 + $0x98] sm:$0x1] }
 0x160   : > { %7431 = vmatprep.mubr.bf16.mxu0 %v6489_v26  ;;  %v4722_v47 = vrot.slane %v4720_v6, 4  ;;  %v10341_v58 = vcombine.low %v9016_v16, %v9029_v28  ;;  %v9459_v20 = vcombine.low %v4671_v50, %v4681_v18  ;;  %v4699_v39 = vor.u32 %v4698_v57, %v9432_v63  ;;  %v5206_v50 = vld [vmem:[#allocation2 + $0x90] sm:$0xe] }
 0x161   : > { %v9450_v14 = vpop.f32.mrf.mxu0  ;;  %v5327_v26 = vrot.slane %v5325_v10, 4  ;;  %v5328_v62 = vrot.slane %v4471_v59, 5  ;;  %v9465_v4 = vrot.slane %v4702_v38, 5  ;;  %v4713_v44 = vor.u32 %v4712_v52, %v4709_v9  ;;  %v4476_v9 = vld [vmem:[#allocation2 + $0xa0] sm:$0xf] }
 0x162   : > { %v4726_v6 = vshll.u32 %v4471_v59, 16  ;;  %v5332_v16 = vrot.slane %v9426_v34, 5  ;;  %v4733_v18 = vrot.slane %v4731_v27, 4  ;;  %v4736_v57 = vrot.slane %v4734_v32, 5 }
 0x163   : > { %v9454_v1 = vpop.f32.mrf.mxu1  ;;  %v9463_v15 = vpop.f32.mrf.mxu0  ;;  %v4746_v29 = vrot.slane %v4744_v40, 4  ;;  %v4723_v38 = vor.u32 %v4722_v47, %v9452_v54  ;;  %v4755_v59 = vshrl.u32 %v4475_v60, 16  ;;  %v4758_v52 = vshll.u32 %v4475_v60, 16 }
 0x164   : > { %10340 = vst [vmem:[#allocation31_spill] sm:$0xff] %v9454_v1  ;;  %7308 = vmatmul.mubr.bf16.gmra.mxu1 %v10341_v58  ;;  %v9472_v58 = vrot.slane %v4740_v7, 5  ;;  %v9481_v34 = vrot.slane %v4699_v39, 4  ;;  %v9485_v27 = vsel %vm8167_vm7, %v6462_v0, %v5325_v10  ;;  %v9489_v32 = vsel %vm8167_vm7, %v5327_v26, %v5328_v62  ;;  %v5207_v7 = vld [vmem:[#allocation2 + $0x9c] sm:$0xe] }
 0x165   : > { %7375 = vmatprep.mubr.bf16.mxu1 %v9151_v13  ;;  %v9470_v28 = vpop.f32.mrf.mxu1  ;;  %v9474_v2 = vpop.f32.mrf.mxu0  ;;  %v9476_v13 = vrot.slane %v4689_v24, 4  ;;  %v5339_v40 = vrot.slane %v4476_v9, 5  ;;  %v9496_v47 = vrot.slane %v4713_v44, 4  ;;  %v9498_v39 = vrot.slane %v4726_v6, 5  ;;  %v9501_v0 = vld [vmem:[#allocation2 + $0xa4] sm:$0x1] }
 0x166   : > { %10342 = vst [vmem:[#allocation32_spill] sm:$0xff] %v9470_v28  ;;  %v6463_v60 = vrot.slane %v5206_v50, 9  ;;  %v5335_v10 = vrot.slane %v9467_v17, 5  ;;  %v10345_v26 = vcombine.low %v9321_v61, %v9325_v8  ;;  %v5334_v62 = vrot.slane %v5332_v16, 4 }
 0x167   : > { %v9479_v19 = vpop.f32.mrf.mxu1  ;;  %v9491_v24 = vpop.f32.mrf.mxu0  ;;  %7432 = vmatmul.mubr.bf16.gmra.mxu0 %v6490_v30  ;;  %v4737_v28 = vor.u32 %v4736_v57, %v4733_v18  ;;  %v4747_v5 = vor.u32 %v4746_v29, %v9472_v58  ;;  %v4750_v56 = vshll.u32 %v9467_v17, 16  ;;  %v4724_v44 = vrot.slane %v4723_v38, 4  ;;  %v10346_v18 = vld [vmem:[#allocation19_spill] sm:$0xff]  ;;  %v9529_v38 = vld [vmem:[#allocation2 + $0xb0] sm:$0x1] }
 0x168   : > { %10343 = vst [vmem:[#allocation33_spill] sm:$0xff] %v9479_v19  ;;  %7435 = vmatprep.mubr.bf16.mxu0 %v10345_v26  ;;  %v6464_v6 = vrot.slane %v5207_v7, 9  ;;  %v4757_v50 = vrot.slane %v4755_v59, 4  ;;  %v4760_v1 = vrot.slane %v4758_v52, 5  ;;  %v5342_v49 = vrot.slane %v9501_v0, 5 }
 0x169   : > { %v9503_v19 = vpop.f32.mrf.mxu1  ;;  %v9510_v30 = vpop.f32.mrf.mxu0  ;;  %v4764_v61 = vshll.u32 %v4476_v9, 16  ;;  %v4768_v8 = vshrl.u32 %v4476_v9, 16  ;;  %v9514_v26 = vld [vmem:[#allocation2 + $0xac] sm:$0xf]  ;;  %v4695_v17 = vsel %vm7735_vm4, %v9476_v13, %v9432_v63  ;;  %v9534_v52 = vsel %vm8167_vm7, %v6463_v60, %v5332_v16  ;;  %v5208_v13 = vld [vmem:[#allocation2 + $0xa8] sm:$0xe] }
 0x16a   : > { %10344 = vst [vmem:[#allocation34_spill] sm:$0xff] %v9503_v19  ;;  %v5341_v19 = vrot.slane %v5339_v40, 4  ;;  %v5346_v9 = vrot.slane %v9514_v26, 5  ;;  %v4738_v7 = vrot.slane %v4737_v28, 4  ;;  %v4752_v63 = vrot.slane %v4750_v56, 5 }
 0x16b   : > { %v7089_v23 = vpop.f32.mrf.mxu1  ;;  %v9517_v29 = vpop.f32.mrf.mxu0  ;;  %v9547_v57 = vsel %vm8167_vm7, %v5334_v62, %v5335_v10  ;;  %v4761_v16 = vor.u32 %v4760_v1, %v4757_v50  ;;  %v4478_v28 = vld [vmem:[#allocation2 + $0xa8] sm:$0xf]  ;;  %v4774_v1 = vshll.u32 %v9501_v0, 16  ;;  %v6465_v10 = vrot.slane %v5208_v13, 9 }
 0x16c   : > { %7376 = vmatmul.mubr.bf16.vlgmr.msra.gmra.mxu1 %v9226_v12  ;;  %v4705_v12 = vsel %vm7735_vm4, %v9481_v34, %v9465_v4  ;;  %v4719_v4 = vsel %vm7735_vm4, %v9496_v47, %v9452_v54  ;;  %v4729_v34 = vsel %vm7735_vm4, %v4724_v44, %v9498_v39  ;;  %v9555_v56 = vsel %vm8167_vm7, %v5341_v19, %v5342_v49 }
 0x16d   : > { %7379 = vmatprep.mubr.bf16.mxu1 %v10346_v18  ;;  %v1804_v59 = vpop.f32.mrf.mxu1  ;;  %v4748_v18 = vrot.slane %v4747_v5, 4  ;;  %v9536_v51 = vpop.f32.mrf.mxu0  ;;  %v9551_v5 = vsel %vm8167_vm7, %v6464_v6, %v5339_v40  ;;  %v9557_v54 = vrot.slane %v4764_v61, 5  ;;  %v4770_v47 = vrot.slane %v4768_v8, 4 }
 0x16e   : > { %v10348_v39 = vcombine.low %v9376_v11, %v9380_v3  ;;  %v5348_v62 = vrot.slane %v5346_v9, 4  ;;  %v5349_v40 = vrot.slane %v9529_v38, 5  ;;  %v10349_v19 = vcombine.low %v9420_v55, %v9424_v42 }
 0x16f   : > { %v7090_v60 = vpop.f32.mrf.mxu1  ;;  %10347 = vst [vmem:[#allocation19_spill] sm:$0xff] %v9557_v54  ;;  %v9559_v21 = vpop.f32.mrf.mxu0  ;;  %v4743_v49 = vsel %vm7735_vm4, %v4738_v7, %v9472_v58  ;;  %v4753_v6 = vsel %vm7735_vm4, %v4748_v18, %v4752_v63  ;;  %v4779_v11 = vshrl.u32 %v4478_v28, 16  ;;  %v4782_v3 = vshll.u32 %v4478_v28, 16  ;;  %v5209_v28 = vld [vmem:[#allocation2 + $0xb4] sm:$0xe] }
 0x170   : > { %7436 = vmatmul.mubr.bf16.gmra.mxu0 %v10348_v39  ;;  %v9576_v0 = vcombine.low %v4695_v17, %v4705_v12  ;;  %v9578_v61 = vrot.slane %v4761_v16, 4  ;;  %v4788_v8 = vshll.u32 %v9514_v26, 16  ;;  %v4792_v55 = vshrl.u32 %v9514_v26, 16 }
 0x171   : > { %v1807_v44 = vpop.f32.mrf.mxu1  ;;  %7439 = vmatprep.mubr.bf16.mxu0 %v10349_v19  ;;  %v9574_v50 = vpop.f32.mrf.mxu0  ;;  %v9583_v13 = vcombine.low %v4719_v4, %v4729_v34  ;;  %v6495_v58 = vcombine.low %v9534_v52, %v9547_v57  ;;  %v4771_v17 = vor.u32 %v4770_v47, %v9557_v54  ;;  %v9593_v18 = vcombine.low %v4743_v49, %v4753_v6  ;;  %v10350_v52 = vld [vmem:[#allocation4_spill] sm:$0xff]  ;;  %v10351_v47 = vld [vmem:[#allocation5_spill] sm:$0xff]  ;;  %v10353_v19 = vld [vmem:[#allocation7_spill] sm:$0xff] }
 0x172   : > { %v9595_v26 = vrot.slane %v4774_v1, 5  ;;  %v9603_v57 = vsel %vm8167_vm7, %v5348_v62, %v5349_v40  ;;  %v1813_v63 = vadd.f32 %v7089_v23, %v10350_v52  ;;  %v4781_v34 = vrot.slane %v4779_v11, 4  ;;  %v10352_v40 = vld [vmem:[#allocation6_spill] sm:$0xff] }
 0x173   : > { %v7093_v42 = vpop.f32.mrf.mxu1  ;;  %v9591_v12 = vpop.f32.mrf.mxu0  ;;  %v4784_v16 = vrot.slane %v4782_v3, 5  ;;  %v1805_v39 = vadd.f32 %v1804_v59, %v10351_v47  ;;  %v4794_v62 = vrot.slane %v4792_v55, 4  ;;  %v1816_v23 = vadd.f32 %v7090_v60, %v10352_v40  ;;  %v9622_v59 = vld [vmem:[#allocation2 + $0xb8] sm:$0xf]  ;;  %v10354_v3 = vld [vmem:[#allocation8_spill] sm:$0xff]  ;;  %v10355_v47 = vld [vmem:[#allocation10_spill] sm:$0xff] }
 0x174   : > { %7380 = vmatmul.mubr.bf16.gmra.mxu1 %v9345_v43  ;;  %v9599_v43 = vsel %vm8167_vm7, %v6465_v10, %v5346_v9  ;;  %v9614_v10 = vrot.slane %v4788_v8, 5  ;;  %v1808_v49 = vadd.f32 %v1807_v44, %v10353_v19  ;;  %v9618_v11 = vrot.slane %v4771_v17, 4  ;;  %v10356_v9 = vld [vmem:[#allocation12_spill] sm:$0xff]  ;;  %v9632_v44 = vld [vmem:[#allocation2 + $0xbc] sm:$0x1]  ;;  %v10358_v19 = vld [vmem:[#allocation14_spill] sm:$0xff] }
 0x175   : > { %7383 = vmatprep.mubr.bf16.mxu1 %v9362_v41  ;;  %v1820_v4 = vpop.f32.mrf.mxu1  ;;  %v4798_v41 = vshll.u32 %v9529_v38, 16  ;;  %v9608_v1 = vpop.f32.mrf.mxu0  ;;  %v6497_v38 = vcombine.low %v9599_v43, %v9603_v57  ;;  %v1829_v52 = vadd.f32 %v7093_v42, %v10354_v3  ;;  %v10357_v60 = vcombine.low %v9485_v27, %v9489_v32  ;;  %v9634_v17 = vld [vmem:[#allocation2 + $0xb4] sm:$0xf] }
 0x176   : > { %v1821_v7 = vadd.f32 %v1820_v4, %v10355_v47  ;;  %v6466_v55 = vrot.slane %v5209_v28, 9  ;;  %v4785_v57 = vor.u32 %v4784_v16, %v4781_v34  ;;  %v5353_v42 = vrot.slane %v9622_v59, 5  ;;  %v9639_v4 = vld [vmem:[#allocation2 + $0xc4] sm:$0xf] }
 0x177   : > { %v7094_v6 = vpop.f32.mrf.mxu1  ;;  %v9627_v54 = vpop.f32.mrf.mxu0  ;;  %v9636_v40 = vrot.slane %v4798_v41, 5  ;;  %v4795_v28 = vor.u32 %v4794_v62, %v9614_v10  ;;  %v5360_v3 = vrot.slane %v9639_v4, 5  ;;  %v5356_v16 = vrot.slane %v9632_v44, 5  ;;  %v10359_v47 = vld [vmem:[#allocation16_spill] sm:$0xff] }
 0x178   : > { %v1832_v8 = vadd.f32 %v7094_v6, %v10356_v9  ;;  %7440 = vmatmul.mubr.bf16.gmra.mxu0 %v10357_v60  ;;  %v9642_v9 = vadd.f32 %v9355_v25, %v1813_v63  ;;  %v5210_v6 = vld [vmem:[#allocation2 + $0xc0] sm:$0xe]  ;;  %v4803_v25 = vshrl.u32 %v9634_v17, 16  ;;  %v9655_v63 = vld [vmem:[#allocation2 + $0xc8] sm:$0x1]  ;;  %v9658_v41 = vadd.f32 %v9400_v35, %v1816_v23 }
 0x179   : > { %v1823_v43 = vpop.f32.mrf.mxu1  ;;  %7443 = vmatprep.mubr.bf16.mxu0 %v6495_v58  ;;  %v9645_v32 = vpop.f32.mrf.mxu0  ;;  %v9650_v58 = vadd.f32 %v9384_v37, %v1805_v39  ;;  %v9661_v62 = vadd.f32 %v9411_v48, %v1808_v49  ;;  %v9671_v39 = vadd.f32 %v9450_v14, %v1821_v7  ;;  %v5355_v23 = vrot.slane %v5353_v42, 4  ;;  %v4484_v14 = vld [vmem:[#allocation2 + $0xc0] sm:$0xf] }
 0x17a   : > { %v1824_v27 = vadd.f32 %v1823_v43, %v10358_v19  ;;  %v9674_v43 = vadd.f32 %v9463_v15, %v1832_v8  ;;  %v4806_v48 = vshll.u32 %v9634_v17, 16  ;;  %v6467_v49 = vrot.slane %v5210_v6, 9 }
 0x17b   : > { %v7097_v34 = vpop.f32.mrf.mxu1  ;;  %v9665_v37 = vpop.f32.mrf.mxu0  ;;  %10360 = vst [vmem:[#allocation4_spill] sm:$0xff] %v9671_v39  ;;  %v9687_v8 = vrot.slane %v4785_v57, 4  ;;  %v4812_v17 = vshll.u32 %v9622_v59, 16  ;;  %v4816_v57 = vshrl.u32 %v9622_v59, 16 }
 0x17c   : > { %7384 = vmatmul.mubr.bf16.gmra.mxu1 %v9402_v36  ;;  %v1845_v60 = vadd.f32 %v7097_v34, %v10359_v47  ;;  %v9668_v36 = vadd.f32 %v9436_v33, %v1829_v52  ;;  %10361 = vst [vmem:[#allocation5_spill] sm:$0xff] %v9674_v43  ;;  %v9678_v19 = vadd.f32 %v9474_v2, %v1824_v27  ;;  %v5362_v33 = vrot.slane %v5360_v3, 4  ;;  %v10365_v27 = vld [vmem:[#allocation21_spill] sm:$0xff] }
 0x17d   : > { %7387 = vmatprep.mubr.bf16.mxu1 %v9413_v22  ;;  %v1836_v35 = vpop.f32.mrf.mxu1  ;;  %v10363_v22 = vld [vmem:[#allocation18_spill] sm:$0xff]  ;;  %v9681_v47 = vpop.f32.mrf.mxu0  ;;  %v5363_v52 = vrot.slane %v9655_v63, 5  ;;  %v9689_v43 = vrot.slane %v4795_v28, 4  ;;  %v5354_v2 = vsel %vm8167_vm7, %v6466_v55, %v5353_v42  ;;  %v5357_v42 = vsel %vm8167_vm7, %v5355_v23, %v5356_v16 }
 0x17e   : > { %10362 = vst [vmem:[#allocation6_spill] sm:$0xff] %v9678_v19  ;;  %v1837_v34 = vadd.f32 %v1836_v35, %v10363_v22  ;;  %v9685_v7 = vadd.f32 %v9491_v24, %v1845_v60  ;;  %v10366_v22 = vcombine.low %v9551_v5, %v9555_v56  ;;  %v9700_v24 = vrot.slane %v4803_v25, 4  ;;  %v9703_v60 = vld [vmem:[#allocation2 + $0xd0] sm:$0xf]  ;;  %v10368_v5 = vld [vmem:[#allocation23_spill] sm:$0xff] }
 0x17f   : > { %v7098_v15 = vpop.f32.mrf.mxu1  ;;  %v9695_v35 = vpop.f32.mrf.mxu0  ;;  %v5361_v59 = vsel %vm8167_vm7, %v6467_v49, %v5360_v3  ;;  %v4808_v23 = vrot.slane %v4806_v48, 5  ;;  %v10370_v3 = vld [vmem:[#allocation25_spill] sm:$0xff]  ;;  %v10371_v19 = vld [vmem:[#allocation26_spill] sm:$0xff]  ;;  %v4860_v46 = vshll.u32 %v9703_v60, 16 }
 0x180   : > { %10364 = vst [vmem:[#allocation7_spill] sm:$0xff] %v9685_v7  ;;  %v1848_v6 = vadd.f32 %v7098_v15, %v10365_v27  ;;  %7444 = vmatmul.mubr.bf16.gmra.mxu0 %v10366_v22  ;;  %v9706_v28 = vadd.f32 %v9510_v30, %v1837_v34  ;;  %v4827_v15 = vshrl.u32 %v4484_v14, 16  ;;  %v4830_v27 = vshll.u32 %v4484_v14, 16  ;;  %v9718_v34 = vld [vmem:[#allocation2 + $0xd4] sm:$0x1] }
 0x181   : > { %v1839_v55 = vpop.f32.mrf.mxu1  ;;  %7447 = vmatprep.mubr.bf16.mxu0 %v6497_v38  ;;  %v5367_v7 = vrot.slane %v9703_v60, 5  ;;  %v9712_v25 = vpop.f32.mrf.mxu0  ;;  %v5364_v30 = vsel %vm8167_vm7, %v5362_v33, %v5363_v52  ;;  %v5211_v38 = vld [vmem:[#allocation2 + $0xcc] sm:$0xe]  ;;  %v9724_v14 = vrot.slane %v4812_v17, 5  ;;  %v6498_v52 = vcombine.low %v5354_v2, %v5357_v42 }
 0x182   : > { %10367 = vst [vmem:[#allocation8_spill] sm:$0xff] %v9706_v28  ;;  %v1840_v56 = vadd.f32 %v1839_v55, %v10368_v5  ;;  %v9721_v22 = vadd.f32 %v9517_v29, %v1848_v6  ;;  %v4836_v55 = vshll.u32 %v9639_v4, 16  ;;  %v4840_v5 = vshrl.u32 %v9639_v4, 16 }
 0x183   : > { %v7101_v16 = vpop.f32.mrf.mxu1  ;;  %v9730_v33 = vpop.f32.mrf.mxu0  ;;  %v4818_v28 = vrot.slane %v4816_v57, 4  ;;  %v6468_v48 = vrot.slane %v5211_v38, 9  ;;  %v5369_v17 = vrot.slane %v5367_v7, 4  ;;  %v4791_v57 = vsel %vm7735_vm4, %v9687_v8, %v9614_v10 }
 0x184   : > { %10369 = vst [vmem:[#allocation10_spill] sm:$0xff] %v9721_v22  ;;  %7388 = vmatmul.mubr.bf16.gmra.mxu1 %v9459_v20  ;;  %v1861_v49 = vadd.f32 %v7101_v16, %v10370_v3  ;;  %v9733_v29 = vadd.f32 %v9536_v51, %v1840_v56  ;;  %v6499_v20 = vcombine.low %v5361_v59, %v5364_v30  ;;  %v5370_v22 = vrot.slane %v9718_v34, 5 }
 0x185   : > { %7391 = vmatprep.mubr.bf16.mxu1 %v9576_v0  ;;  %v1852_v6 = vpop.f32.mrf.mxu1  ;;  %v9737_v4 = vpop.f32.mrf.mxu0  ;;  %v4829_v16 = vrot.slane %v4827_v15, 4  ;;  %v4832_v3 = vrot.slane %v4830_v27, 5  ;;  %v4777_v51 = vsel %vm7735_vm4, %v9618_v11, %v9595_v26  ;;  %v9750_v42 = vrot.slane %v4836_v55, 5  ;;  %v4487_v11 = vld [vmem:[#allocation2 + $0xcc] sm:$0xf] }
 0x186   : > { %v1853_v39 = vadd.f32 %v1852_v6, %v10371_v19  ;;  %v9740_v0 = vadd.f32 %v9559_v21, %v1861_v49  ;;  %v4842_v19 = vrot.slane %v4840_v5, 4  ;;  %v4801_v21 = vsel %vm7735_vm4, %v9689_v43, %v9636_v40 }
 0x187   : > { %v7102_v2 = vpop.f32.mrf.mxu1  ;;  %v9753_v27 = vpop.f32.mrf.mxu0  ;;  %v4822_v26 = vshll.u32 %v9632_v44, 16  ;;  %v4809_v8 = vor.u32 %v4808_v23, %v9700_v24  ;;  %v4819_v59 = vor.u32 %v4818_v28, %v9724_v14  ;;  %v5371_v30 = vsel %vm8167_vm7, %v5369_v17, %v5370_v22  ;;  %v10372_v22 = vld [vmem:[#allocation9_spill] sm:$0xff]  ;;  %v10375_v17 = vld [vmem:[#allocation11_spill] sm:$0xff] }
 0x188   : > { %v1864_v15 = vadd.f32 %v7102_v2, %v9317_v53  ;;  %7448 = vmatmul.mubr.bf16.gmra.mxu0 %v6498_v52  ;;  %v9761_v56 = vadd.f32 %v9574_v50, %v1853_v39  ;;  %v5368_v53 = vsel %vm8167_vm7, %v6468_v48, %v5367_v7  ;;  %v4833_v44 = vor.u32 %v4832_v3, %v4829_v16 }
 0x189   : > { %v1855_v10 = vpop.f32.mrf.mxu1  ;;  %7451 = vmatprep.mubr.bf16.mxu0 %v6499_v20  ;;  %v9770_v43 = vpop.f32.mrf.mxu0  ;;  %v4846_v50 = vshll.u32 %v9655_v63, 16  ;;  %v4843_v28 = vor.u32 %v4842_v19, %v9750_v42  ;;  %v4851_v38 = vshrl.u32 %v4487_v11, 16  ;;  %v4854_v7 = vshll.u32 %v4487_v11, 16 }
 0x18a   : > { %v1856_v40 = vadd.f32 %v1855_v10, %v9333_v31  ;;  %v9774_v39 = vadd.f32 %v9591_v12, %v1864_v15  ;;  %v6500_v55 = vcombine.low %v5368_v53, %v5371_v30  ;;  %v4864_v63 = vshrl.u32 %v9703_v60, 16  ;;  %v10376_v53 = vld [vmem:[#allocation13_spill] sm:$0xff] }
 0x18b   : > { %v7105_v24 = vpop.f32.mrf.mxu1  ;;  %v9781_v31 = vpop.f32.mrf.mxu0  ;;  %v6441_v6 = vcombine.low %v4791_v57, %v4801_v21  ;;  %v4810_v20 = vrot.slane %v4809_v8, 4  ;;  %v4824_v48 = vrot.slane %v4822_v26, 5  ;;  %v4820_v16 = vrot.slane %v4819_v59, 4  ;;  %v10377_v59 = vld [vmem:[#allocation15_spill] sm:$0xff] }
 0x18c   : > { %7392 = vmatmul.mubr.bf16.gmra.mxu1 %v9583_v13  ;;  %v1877_v23 = vadd.f32 %v7105_v24, %v10372_v22  ;;  %v9785_v12 = vadd.f32 %v9608_v1, %v1856_v40  ;;  %v10373_v13 = vld [vmem:[#allocation19_spill] sm:$0xff]  ;;  %v4848_v2 = vrot.slane %v4846_v50, 5  ;;  %v4834_v19 = vrot.slane %v4833_v44, 4 }
 0x18d   : > { %7395 = vmatprep.mubr.bf16.mxu1 %v9593_v18  ;;  %v1868_v5 = vpop.f32.mrf.mxu1  ;;  %v10374_v49 = vsel %vm7735_vm4, %v9578_v61, %v10373_v13  ;;  %v9793_v3 = vpop.f32.mrf.mxu0  ;;  %v4844_v15 = vrot.slane %v4843_v28, 4  ;;  %v4853_v11 = vrot.slane %v4851_v38, 4  ;;  %v4856_v10 = vrot.slane %v4854_v7, 5 }
 0x18e   : > { %v6440_v52 = vcombine.low %v10374_v49, %v4777_v51  ;;  %v1869_v18 = vadd.f32 %v1868_v5, %v10375_v17  ;;  %v9796_v60 = vadd.f32 %v9627_v54, %v1877_v23  ;;  %v4862_v57 = vrot.slane %v4860_v46, 5 }
 0x18f   : > { %v7106_v1 = vpop.f32.mrf.mxu1  ;;  %v9799_v51 = vpop.f32.mrf.mxu0  ;;  %v4866_v21 = vrot.slane %v4864_v63, 4  ;;  %v4815_v54 = vsel %vm7735_vm4, %v4810_v20, %v9724_v14  ;;  %v4825_v24 = vsel %vm7735_vm4, %v4820_v16, %v4824_v48  ;;  %v4849_v28 = vsel %vm7735_vm4, %v4844_v15, %v4848_v2  ;;  %v10378_v14 = vld [vmem:[#allocation17_spill] sm:$0xff]  ;;  %v10379_v63 = vld [vmem:[#allocation20_spill] sm:$0xff]  ;;  %v10380_v48 = vld [vmem:[#allocation22_spill] sm:$0xff] }
 0x190   : > { %v1880_v61 = vadd.f32 %v7106_v1, %v10376_v53  ;;  %7452 = vmatmul.mubr.bf16.gmra.mxu0 %v6500_v55  ;;  %v9802_v26 = vadd.f32 %v9645_v32, %v1869_v18  ;;  %v4839_v32 = vsel %vm7735_vm4, %v4834_v19, %v9750_v42  ;;  %v4870_v38 = vshll.u32 %v9718_v34, 16  ;;  %v10381_v1 = vld [vmem:[#allocation24_spill] sm:$0xff] }
 0x191   : > { %v1871_v8 = vpop.f32.mrf.mxu1  ;;  %v9808_v40 = vpop.f32.mrf.mxu0  ;;  %v4857_v46 = vor.u32 %v4856_v10, %v4853_v11  ;;  %v6443_v20 = vcombine.low %v4839_v32, %v4849_v28  ;;  %v10382_v10 = vld [vmem:[#allocation27_spill] sm:$0xff]  ;;  %v10384_v28 = vld [vmem:[#allocation29_spill] sm:$0xff] }
 0x192   : > { %v1872_v30 = vadd.f32 %v1871_v8, %v10377_v59  ;;  %v9811_v44 = vadd.f32 %v9665_v37, %v1880_v61  ;;  %v4867_v37 = vor.u32 %v4866_v21, %v4862_v57  ;;  %v4872_v34 = vrot.slane %v4870_v38, 5 }
 0x193   : > { %v7109_v50 = vpop.f32.mrf.mxu1  ;;  %v7166_v22 = vpop.f32.mrf.mxu0 }
 0x194   : > { %7396 = vmatmul.mubr.bf16.gmra.mxu1 %v6440_v52  ;;  %v1893_v7 = vadd.f32 %v7109_v50, %v10378_v14  ;;  %v9823_v23 = vadd.f32 %v9681_v47, %v1872_v30  ;;  %v6442_v52 = vcombine.low %v4815_v54, %v4825_v24  ;;  %v4868_v18 = vrot.slane %v4867_v37, 4  ;;  %v10383_v30 = vld [vmem:[#allocation28_spill] sm:$0xff] }
 0x195   : > { %7399 = vmatprep.mubr.bf16.mxu1 %v6441_v6  ;;  %v1884_v55 = vpop.f32.mrf.mxu1  ;;  %v2372_v13 = vpop.f32.mrf.mxu0  ;;  %v4858_v6 = vrot.slane %v4857_v46, 4 }
 0x196   : > { %v1885_v5 = vadd.f32 %v1884_v55, %v10379_v63  ;;  %v9827_v42 = vadd.f32 %v9695_v35, %v1893_v7  ;;  %v4873_v21 = vsel %vm7735_vm4, %v4868_v18, %v4872_v34  ;;  %v10385_v7 = vld [vmem:[#allocation30_spill] sm:$0xff]  ;;  %v10386_v63 = vld [vmem:[#allocation31_spill] sm:$0xff] }
 0x197   : > { %v7110_v49 = vpop.f32.mrf.mxu1  ;;  %v7233_v16 = vpop.f32.mrf.mxu0  ;;  %v4863_v61 = vsel %vm7735_vm4, %v4858_v6, %v4862_v57  ;;  %v10388_v6 = vld [vmem:[#allocation33_spill] sm:$0xff] }
 0x198   : > { %v1896_v17 = vadd.f32 %v7110_v49, %v10380_v48  ;;  %v9831_v2 = vadd.f32 %v9712_v25, %v1885_v5  ;;  %v6444_v32 = vcombine.low %v4863_v61, %v4873_v21 }
 0x199   : > { %v1887_v47 = vpop.f32.mrf.mxu1  ;;  %v3398_v15 = vpop.f32.mrf.mxu0 }
 0x19a   : > { %v1888_v19 = vadd.f32 %v1887_v47, %v10381_v1  ;;  %v9835_v11 = vadd.f32 %v9730_v33, %v1896_v17 }
 0x19b   : > { %v7113_v35 = vpop.f32.mrf.mxu1  ;;  %v7234_v25 = vpop.f32.mrf.mxu0 }
 0x19c   : > { %7400 = vmatmul.mubr.bf16.gmra.mxu1 %v6442_v52  ;;  %v1909_v53 = vadd.f32 %v7113_v35, %v10382_v10  ;;  %v9843_v8 = vadd.f32 %v9737_v4, %v1888_v19  ;;  %v10389_v19 = vld [vmem:[#allocation34_spill] sm:$0xff] }
 0x19d   : > { %7403 = vmatprep.mubr.bf16.mxu1 %v6443_v20  ;;  %v1900_v59 = vpop.f32.mrf.mxu1  ;;  %v3401_v33 = vpop.f32.mrf.mxu0  ;;  %v10387_v20 = vld [vmem:[#allocation32_spill] sm:$0xff] }
 0x19e   : > { %v1901_v54 = vadd.f32 %v1900_v59, %v10383_v30  ;;  %v9847_v50 = vadd.f32 %v9753_v27, %v1909_v53 }
 0x19f   : > { %v7114_v24 = vpop.f32.mrf.mxu1  ;;  %v7237_v14 = vpop.f32.mrf.mxu0 }
 0x1a0   : > { %v1912_v38 = vadd.f32 %v7114_v24, %v10384_v28  ;;  %v9851_v57 = vadd.f32 %v9770_v43, %v1901_v54 }
 0x1a1   : > { %v1903_v45 = vpop.f32.mrf.mxu1  ;;  %v3414_v4 = vpop.f32.mrf.mxu0 }
 0x1a2   : > { %v1904_v46 = vadd.f32 %v1903_v45, %v10385_v7  ;;  %v9855_v37 = vadd.f32 %v9781_v31, %v1912_v38 }
 0x1a3   : > { %v7117_v55 = vpop.f32.mrf.mxu1  ;;  %v7238_v5 = vpop.f32.mrf.mxu0 }
 0x1a4   : > { %7404 = vmatmul.mubr.bf16.gmra.mxu1 %v6444_v32  ;;  %v1925_v27 = vadd.f32 %v7117_v55, %v10386_v63  ;;  %v9859_v49 = vadd.f32 %v9793_v3, %v1904_v46  ;;  %v10390_v63 = vld [vmem:[#allocation4_spill] sm:$0xff] }
 0x1a5   : > { %v1916_v52 = vpop.f32.mrf.mxu1  ;;  %v3417_v43 = vpop.f32.mrf.mxu0 }
 0x1a6   : > { %v1917_v34 = vadd.f32 %v1916_v52, %v10387_v20  ;;  %v9863_v48 = vadd.f32 %v9799_v51, %v1925_v27  ;;  %v10391_v20 = vld [vmem:[#allocation5_spill] sm:$0xff] }
 0x1a7   : > { %v7118_v17 = vpop.f32.mrf.mxu1  ;;  %v7241_v31 = vpop.f32.mrf.mxu0 }
 0x1a8   : > { %v1928_v18 = vadd.f32 %v7118_v17, %v10388_v6  ;;  %v9867_v47 = vadd.f32 %v9808_v40, %v1917_v34  ;;  %v10392_v6 = vld [vmem:[#allocation6_spill] sm:$0xff] }
 0x1a9   : > { %v1919_v1 = vpop.f32.mrf.mxu1  ;;  %v3430_v10 = vpop.f32.mrf.mxu0 }
 0x1aa   : > { %v1920_v35 = vadd.f32 %v1919_v1, %v10389_v19  ;;  %v9870_v3 = vadd.f32 %v7166_v22, %v1928_v18  ;;  %v10393_v19 = vld [vmem:[#allocation7_spill] sm:$0xff] }
 0x1ab   : > { %v7185_v53 = vpop.f32.mrf.mxu1  ;;  %v7242_v21 = vpop.f32.mrf.mxu0 }
 0x1ac   : > { %v2773_v61 = vadd.f32 %v7185_v53, %v9642_v9  ;;  %v9873_v59 = vadd.f32 %v2372_v13, %v1920_v35 }
 0x1ad   : > { %v2644_v51 = vpop.f32.mrf.mxu1  ;;  %v3433_v54 = vpop.f32.mrf.mxu0 }
 0x1ae   : > { %v2771_v30 = vadd.f32 %v2644_v51, %v9650_v58  ;;  %v9876_v24 = vadd.f32 %v7233_v16, %v2773_v61  ;;  %v10394_v51 = vld [vmem:[#allocation8_spill] sm:$0xff] }
 0x1af   : > { %v7186_v40 = vpop.f32.mrf.mxu1  ;;  %v7245_v28 = vpop.f32.mrf.mxu0 }
 0x1b0   : > { %v2774_v32 = vadd.f32 %v7186_v40, %v9658_v41  ;;  %v9879_v38 = vadd.f32 %v3398_v15, %v2771_v30 }
 0x1b1   : > { %v2647_v22 = vpop.f32.mrf.mxu1  ;;  %v3446_v7 = vpop.f32.mrf.mxu0 }
 0x1b2   : > { %v2772_v45 = vadd.f32 %v2647_v22, %v9661_v62  ;;  %v9882_v9 = vadd.f32 %v7234_v25, %v2774_v32  ;;  %v10395_v22 = vld [vmem:[#allocation10_spill] sm:$0xff] }
 0x1b3   : > { %v7189_v13 = vpop.f32.mrf.mxu1  ;;  %v7246_v55 = vpop.f32.mrf.mxu0 }
 0x1b4   : > { %v2777_v46 = vadd.f32 %v7189_v13, %v9668_v36  ;;  %v9885_v58 = vadd.f32 %v3401_v33, %v2772_v45 }
 0x1b5   : > { %v2660_v16 = vpop.f32.mrf.mxu1  ;;  %v3449_v52 = vpop.f32.mrf.mxu0 }
 0x1b6   : > { %v2775_v27 = vadd.f32 %v2660_v16, %v10390_v63  ;;  %v9888_v41 = vadd.f32 %v7237_v14, %v2777_v46 }
 0x1b7   : > { %v7190_v15 = vpop.f32.mrf.mxu1  ;;  %v7249_v17 = vpop.f32.mrf.mxu0 }
 0x1b8   : > { %v2778_v34 = vadd.f32 %v7190_v15, %v10391_v20  ;;  %v9891_v62 = vadd.f32 %v3414_v4, %v2775_v27 }
 0x1b9   : > { %v2663_v25 = vpop.f32.mrf.mxu1  ;;  %v3462_v1 = vpop.f32.mrf.mxu0 }
 0x1ba   : > { %v2776_v18 = vadd.f32 %v2663_v25, %v10392_v6  ;;  %v9894_v36 = vadd.f32 %v7238_v5, %v2778_v34 }
 0x1bb   : > { %v7193_v33 = vpop.f32.mrf.mxu1  ;;  %v7250_v53 = vpop.f32.mrf.mxu0 }
 0x1bc   : > { %v2781_v35 = vadd.f32 %v7193_v33, %v10393_v19  ;;  %v9897_v61 = vadd.f32 %v3417_v43, %v2776_v18 }
 0x1bd   : > { %v2676_v14 = vpop.f32.mrf.mxu1  ;;  %v3465_v40 = vpop.f32.mrf.mxu0 }
 0x1be   : > { %v2779_v30 = vadd.f32 %v2676_v14, %v10394_v51  ;;  %v9900_v32 = vadd.f32 %v7241_v31, %v2781_v35 }
 0x1bf   : > { %v7194_v4 = vpop.f32.mrf.mxu1  ;;  %v7253_v13 = vpop.f32.mrf.mxu0 }
 0x1c0   : > { %v2782_v45 = vadd.f32 %v7194_v4, %v10395_v22  ;;  %v9903_v46 = vadd.f32 %v3430_v10, %v2779_v30 }
 0x1c1   : > { %v2679_v5 = vpop.f32.mrf.mxu1  ;;  %v3478_v63 = vpop.f32.mrf.mxu0 }
 0x1c2   : > { %v2780_v16 = vadd.f32 %v2679_v5, %v9733_v29  ;;  %v9906_v27 = vadd.f32 %v7242_v21, %v2782_v45 }
 0x1c3   : > { %v7197_v43 = vpop.f32.mrf.mxu1  ;;  %v7254_v20 = vpop.f32.mrf.mxu0 }
 0x1c4   : > { %v2785_v15 = vadd.f32 %v7197_v43, %v9740_v0  ;;  %v9909_v34 = vadd.f32 %v3433_v54, %v2780_v16 }
 0x1c5   : > { %v2692_v31 = vpop.f32.mrf.mxu1  ;;  %v3481_v6 = vpop.f32.mrf.mxu0 }
 0x1c6   : > { %v2783_v25 = vadd.f32 %v2692_v31, %v9761_v56  ;;  %v9912_v18 = vadd.f32 %v7245_v28, %v2785_v15 }
 0x1c7   : > { %v7198_v10 = vpop.f32.mrf.mxu1  ;;  %v7257_v19 = vpop.f32.mrf.mxu0 }
 0x1c8   : > { %v2786_v33 = vadd.f32 %v7198_v10, %v9774_v39  ;;  %v9915_v29 = vadd.f32 %v3446_v7, %v2783_v25 }
 0x1c9   : > { %v2695_v21 = vpop.f32.mrf.mxu1  ;;  %v3494_v14 = vpop.f32.mrf.mxu0 }
 0x1ca   : > { %v2784_v35 = vadd.f32 %v2695_v21, %v9785_v12  ;;  %v9918_v0 = vadd.f32 %v7246_v55, %v2786_v33 }
 0x1cb   : > { %v7201_v54 = vpop.f32.mrf.mxu1  ;;  %v7258_v30 = vpop.f32.mrf.mxu0 }
 0x1cc   : > { %v2789_v51 = vadd.f32 %v7201_v54, %v9796_v60  ;;  %v9921_v56 = vadd.f32 %v3449_v52, %v2784_v35 }
 0x1cd   : > { %v2708_v28 = vpop.f32.mrf.mxu1  ;;  %v3497_v22 = vpop.f32.mrf.mxu0 }
 0x1ce   : > { %v2787_v4 = vadd.f32 %v2708_v28, %v9802_v26  ;;  %v9924_v39 = vadd.f32 %v7249_v17, %v2789_v51 }
 0x1cf   : > { %v7202_v7 = vpop.f32.mrf.mxu1  ;;  %v7261_v5 = vpop.f32.mrf.mxu0 }
 0x1d0   : > { %v2790_v45 = vadd.f32 %v7202_v7, %v9811_v44  ;;  %v9927_v12 = vadd.f32 %v3462_v1, %v2787_v4 }
 0x1d1   : > { %v2711_v55 = vpop.f32.mrf.mxu1  ;;  %v3510_v43 = vpop.f32.mrf.mxu0 }
 0x1d2   : > { %v2788_v16 = vadd.f32 %v2711_v55, %v9823_v23  ;;  %v9930_v60 = vadd.f32 %v7250_v53, %v2790_v45 }
 0x1d3   : > { %v7205_v52 = vpop.f32.mrf.mxu1  ;;  %v7262_v31 = vpop.f32.mrf.mxu0 }
 0x1d4   : > { %v2793_v15 = vadd.f32 %v7205_v52, %v9827_v42  ;;  %v9933_v26 = vadd.f32 %v3465_v40, %v2788_v16 }
 0x1d5   : > { %v2724_v17 = vpop.f32.mrf.mxu1  ;;  %v3513_v10 = vpop.f32.mrf.mxu0 }
 0x1d6   : > { %v2791_v25 = vadd.f32 %v2724_v17, %v9831_v2  ;;  %v9936_v44 = vadd.f32 %v7253_v13, %v2793_v15 }
 0x1d7   : > { %v7206_v1 = vpop.f32.mrf.mxu1  ;;  %v7329_v21 = vpop.f32.mrf.mxu0 }
 0x1d8   : > { %v2794_v33 = vadd.f32 %v7206_v1, %v9835_v11  ;;  %v9939_v23 = vadd.f32 %v3478_v63, %v2791_v25 }
 0x1d9   : > { %v2727_v53 = vpop.f32.mrf.mxu1  ;;  %v4283_v54 = vpop.f32.mrf.mxu0 }
 0x1da   : > { %10396 = vst [vmem:[#allocation12_spill] sm:$0xff] %v9939_v23  ;;  %v2792_v35 = vadd.f32 %v2727_v53, %v9843_v8  ;;  %v9942_v42 = vadd.f32 %v7254_v20, %v2794_v33 }
 0x1db   : > { %v7209_v40 = vpop.f32.mrf.mxu1  ;;  %v9945_v28 = vpop.f32.mrf.mxu0 }
 0x1dc   : > { %10397 = vst [vmem:[#allocation14_spill] sm:$0xff] %v9942_v42  ;;  %v2797_v51 = vadd.f32 %v7209_v40, %v9847_v50  ;;  %v9947_v2 = vadd.f32 %v3481_v6, %v2792_v35 }
 0x1dd   : > { %v2740_v13 = vpop.f32.mrf.mxu1  ;;  %v9950_v11 = vpop.f32.mrf.mxu0 }
 0x1de   : > { %10398 = vst [vmem:[#allocation16_spill] sm:$0xff] %v9947_v2  ;;  %v2795_v4 = vadd.f32 %v2740_v13, %v9851_v57  ;;  %v9952_v63 = vadd.f32 %v7257_v19, %v2797_v51 }
 0x1df   : > { %v7210_v7 = vpop.f32.mrf.mxu1  ;;  %v7333_v45 = vpop.f32.mrf.mxu0 }
 0x1e0   : > { %v2798_v8 = vadd.f32 %v7210_v7, %v9855_v37  ;;  %v9955_v20 = vadd.f32 %v3494_v14, %v2795_v4 }
 0x1e1   : > { %v2743_v55 = vpop.f32.mrf.mxu1  ;;  %v9958_v16 = vpop.f32.mrf.mxu0 }
 0x1e2   : > { %10399 = vst [vmem:[#allocation18_spill] sm:$0xff] %v9955_v20  ;;  %v2796_v50 = vadd.f32 %v2743_v55, %v9859_v49  ;;  %v9960_v6 = vadd.f32 %v7258_v30, %v2798_v8 }
 0x1e3   : > { %v7213_v52 = vpop.f32.mrf.mxu1  ;;  %v9963_v15 = vpop.f32.mrf.mxu0 }
 0x1e4   : > { %10400 = vst [vmem:[#allocation21_spill] sm:$0xff] %v9960_v6  ;;  %v2801_v57 = vadd.f32 %v7213_v52, %v9863_v48  ;;  %v9965_v19 = vadd.f32 %v3497_v22, %v2796_v50 }
 0x1e5   : > { %v2756_v17 = vpop.f32.mrf.mxu1  ;;  %v9968_v25 = vpop.f32.mrf.mxu0 }
 0x1e6   : > { %10401 = vst [vmem:[#allocation23_spill] sm:$0xff] %v9965_v19  ;;  %v2799_v37 = vadd.f32 %v2756_v17, %v9867_v47  ;;  %v9970_v14 = vadd.f32 %v7261_v5, %v2801_v57 }
 0x1e7   : > { %v7214_v1 = vpop.f32.mrf.mxu1  ;;  %v7337_v33 = vpop.f32.mrf.mxu0 }
 0x1e8   : > { %v2802_v49 = vadd.f32 %v7214_v1, %v9870_v3  ;;  %v9973_v30 = vadd.f32 %v3510_v43, %v2799_v37 }
 0x1e9   : > { %v2759_v53 = vpop.f32.mrf.mxu1  ;;  %v9976_v35 = vpop.f32.mrf.mxu0 }
 0x1ea   : > { %10402 = vst [vmem:[#allocation25_spill] sm:$0xff] %v9973_v30  ;;  %v2800_v48 = vadd.f32 %v2759_v53, %v9873_v59  ;;  %v9978_v22 = vadd.f32 %v7262_v31, %v2802_v49 }
 0x1eb   : > { %v7281_v40 = vpop.f32.mrf.mxu1  ;;  %v9981_v51 = vpop.f32.mrf.mxu0 }
 0x1ec   : > { %10403 = vst [vmem:[#allocation26_spill] sm:$0xff] %v9978_v22  ;;  %v4025_v47 = vadd.f32 %v7281_v40, %v9876_v24  ;;  %v9983_v5 = vadd.f32 %v3513_v10, %v2800_v48 }
 0x1ed   : > { %v3896_v13 = vpop.f32.mrf.mxu1  ;;  %v9986_v4 = vpop.f32.mrf.mxu0 }
 0x1ee   : > { %10404 = vst [vmem:[#allocation9_spill] sm:$0xff] %v9983_v5  ;;  %v4023_v3 = vadd.f32 %v3896_v13, %v9879_v38  ;;  %v9988_v43 = vadd.f32 %v7329_v21, %v4025_v47 }
 0x1ef   : > { %v9990_v7 = vpop.f32.mrf.mxu1  ;;  %v7341_v59 = vpop.f32.mrf.mxu0 }
 0x1f0   : > { %v9992_v8 = vadd.f32 %v4283_v54, %v4023_v3 }
 0x1f1   : > { %v9994_v31 = vpop.f32.mrf.mxu1  ;;  %v9996_v55 = vpop.f32.mrf.mxu0 }
 0x1f3   : > { %v7285_v24 = vpop.f32.mrf.mxu1  ;;  %v9999_v50 = vpop.f32.mrf.mxu0 }
 0x1f4   : > { %v4029_v10 = vadd.f32 %v7285_v24, %v9888_v41 }
 0x1f5   : > { %v10001_v52 = vpop.f32.mrf.mxu1  ;;  %v10003_v38 = vpop.f32.mrf.mxu0 }
 0x1f6   : > { %v10005_v21 = vadd.f32 %v7333_v45, %v4029_v10 }
 0x1f7   : > { %v10007_v57 = vpop.f32.mrf.mxu1  ;;  %v7345_v17 = vpop.f32.mrf.mxu0 }
 0x1f9   : > { %v10009_v54 = vpop.f32.mrf.mxu1  ;;  %v10011_v37 = vpop.f32.mrf.mxu0 }
 0x1fa   : > { %10405 = vst [vmem:[#allocation19_spill] sm:$0xff] %v10011_v37 }
 0x1fb   : > { %v7289_v1 = vpop.f32.mrf.mxu1  ;;  %v10014_v53 = vpop.f32.mrf.mxu0 }
 0x1fc   : > { %v4033_v49 = vadd.f32 %v7289_v1, %v9900_v32  ;;  %10406 = vst [vmem:[#allocation11_spill] sm:$0xff] %v10014_v53 }
 0x1fd   : > { %v10016_v41 = vpop.f32.mrf.mxu1  ;;  %v10018_v48 = vpop.f32.mrf.mxu0 }
 0x1fe   : > { %10407 = vst [vmem:[#allocation13_spill] sm:$0xff] %v10018_v48  ;;  %v10020_v40 = vadd.f32 %v7337_v33, %v4033_v49 }
 0x1ff   : > { %v10022_v45 = vpop.f32.mrf.mxu1  ;;  %v7349_v47 = vpop.f32.mrf.mxu0 }
 0x201   : > { %v10024_v13 = vpop.f32.mrf.mxu1  ;;  %v10026_v3 = vpop.f32.mrf.mxu0 }
 0x202   : > { %10408 = vst [vmem:[#allocation15_spill] sm:$0xff] %v10026_v3 }
 0x203   : > { %v7293_v24 = vpop.f32.mrf.mxu1  ;;  %v10029_v5 = vpop.f32.mrf.mxu0 }
 0x204   : > { %v4037_v10 = vadd.f32 %v7293_v24, %v9912_v18  ;;  %10409 = vst [vmem:[#allocation17_spill] sm:$0xff] %v10029_v5 }
 0x205   : > { %v10031_v32 = vpop.f32.mrf.mxu1  ;;  %v10033_v1 = vpop.f32.mrf.mxu0 }
 0x206   : > { %10410 = vst [vmem:[#allocation20_spill] sm:$0xff] %v10033_v1  ;;  %v10035_v22 = vadd.f32 %v7341_v59, %v4037_v10 }
 0x207   : > { %v10037_v33 = vpop.f32.mrf.mxu1  ;;  %v7353_v49 = vpop.f32.mrf.mxu0 }
 0x209   : > { %v10039_v30 = vpop.f32.mrf.mxu1  ;;  %v10041_v19 = vpop.f32.mrf.mxu0 }
 0x20a   : > { %10411 = vst [vmem:[#allocation22_spill] sm:$0xff] %v10041_v19 }
 0x20b   : > { %v7297_v6 = vpop.f32.mrf.mxu1  ;;  %v10044_v3 = vpop.f32.mrf.mxu0 }
 0x20c   : > { %v4041_v20 = vadd.f32 %v7297_v6, %v9924_v39  ;;  %10412 = vst [vmem:[#allocation24_spill] sm:$0xff] %v10044_v3 }
 0x20d   : > { %v10046_v18 = vpop.f32.mrf.mxu1  ;;  %v10048_v24 = vpop.f32.mrf.mxu0 }
 0x20e   : > { %10413 = vst [vmem:[#allocation27_spill] sm:$0xff] %v10048_v24  ;;  %v10050_v5 = vadd.f32 %v7345_v17, %v4041_v20 }
 0x20f   : > { %v10052_v59 = vpop.f32.mrf.mxu1  ;;  %v7357_v10 = vpop.f32.mrf.mxu0 }
 0x210   : > { %10414 = vst [vmem:[#allocation28_spill] sm:$0xff] %v10050_v5 }
 0x211   : > { %v10054_v1 = vpop.f32.mrf.mxu1  ;;  %v10056_v2 = vpop.f32.mrf.mxu0 }
 0x212   : > { %10415 = vst [vmem:[#allocation29_spill] sm:$0xff] %v10054_v1  ;;  %10416 = vst [vmem:[#allocation30_spill] sm:$0xff] %v10056_v2 }
 0x213   : > { %v10059_v42 = vpop.f32.mrf.mxu0 }
 0x214   : > { %v7301_v48 = vpop.f32.mrf.mxu1  ;;  %10417 = vst [vmem:[#allocation31_spill] sm:$0xff] %v10059_v42 }
 0x215   : > { %v4045_v19 = vadd.f32 %v7301_v48, %v9936_v44  ;;  %v10063_v6 = vpop.f32.mrf.mxu0 }
 0x216   : > { %v10061_v39 = vpop.f32.mrf.mxu1  ;;  %10419 = vst [vmem:[#allocation33_spill] sm:$0xff] %v10063_v6 }
 0x217   : > { %10418 = vst [vmem:[#allocation32_spill] sm:$0xff] %v10061_v39  ;;  %v10065_v3 = vadd.f32 %v7349_v47, %v4045_v19  ;;  %v7425_v17 = vpop.f32.mrf.mxu0 }
 0x218   : > { %v10067_v20 = vpop.f32.mrf.mxu1 }
 0x219   : > { %10420 = vst [vmem:[#allocation34_spill] sm:$0xff] %v10065_v3  ;;  %10421 = vst [vmem:[#allocation4_spill] sm:$0xff] %v10067_v20  ;;  %v5535_v23 = vpop.f32.mrf.mxu0 }
 0x21a   : > { %v10069_v24 = vpop.f32.mrf.mxu1 }
 0x21b   : > { %10422 = vst [vmem:[#allocation5_spill] sm:$0xff] %v10069_v24  ;;  %v7426_v53 = vpop.f32.mrf.mxu0 }
 0x21c   : > { %v7305_v5 = vpop.f32.mrf.mxu1 }
 0x21d   : > { %v4049_v2 = vadd.f32 %v7305_v5, %v9952_v63  ;;  %v5538_v44 = vpop.f32.mrf.mxu0 }
 0x21e   : > { %v10072_v37 = vpop.f32.mrf.mxu1 }
 0x21f   : > { %10423 = vst [vmem:[#allocation6_spill] sm:$0xff] %v10072_v37  ;;  %v10074_v48 = vadd.f32 %v7353_v49, %v4049_v2  ;;  %v10078_v6 = vpop.f32.mrf.mxu0 }
 0x220   : > { %v10076_v42 = vpop.f32.mrf.mxu1 }
 0x221   : > { %10424 = vst [vmem:[#allocation7_spill] sm:$0xff] %v10074_v48  ;;  %10425 = vst [vmem:[#allocation8_spill] sm:$0xff] %v10076_v42  ;;  %v5551_v47 = vpop.f32.mrf.mxu0 }
 0x222   : > { %v10080_v19 = vpop.f32.mrf.mxu1 }
 0x223   : > { %10426 = vst [vmem:[#allocation10_spill] sm:$0xff] %v10080_v19  ;;  %v10083_v20 = vpop.f32.mrf.mxu0  ;;  %v4026_v19 = vadd.f32 %v9990_v7, %v9882_v9 }
 0x224   : > { %v7309_v3 = vpop.f32.mrf.mxu1 }
 0x225   : > { %v4053_v24 = vadd.f32 %v7309_v3, %v9970_v14  ;;  %v10087_v63 = vpop.f32.mrf.mxu0  ;;  %v4024_v3 = vadd.f32 %v9994_v31, %v9885_v58  ;;  %v4027_v58 = vadd.f32 %v10001_v52, %v9891_v62  ;;  %v4030_v31 = vadd.f32 %v10007_v57, %v9894_v36 }
 0x226   : > { %v10085_v39 = vpop.f32.mrf.mxu1 }
 0x227   : > { %10427 = vst [vmem:[#allocation35_spill] sm:$0xff] %v10085_v39  ;;  %v10089_v5 = vadd.f32 %v7357_v10, %v4053_v24  ;;  %v10093_v49 = vpop.f32.mrf.mxu0  ;;  %v4411_v7 = vadd.f32 %v9950_v11, %v4024_v3  ;;  %v4414_v57 = vadd.f32 %v9958_v16, %v4027_v58 }
 0x228   : > { %v10091_v2 = vpop.f32.mrf.mxu1 }
 0x229   : > { %10428 = vst [vmem:[#allocation36_spill] sm:$0xff] %v10089_v5  ;;  %10429 = vst [vmem:[#allocation37_spill] sm:$0xff] %v10091_v2  ;;  %v10099_v42 = vpop.f32.mrf.mxu0  ;;  %v4413_v5 = vadd.f32 %v9945_v28, %v4026_v19 }
 0x22a   : > { %v10095_v48 = vpop.f32.mrf.mxu1 }
 0x22b   : > { %10430 = vst [vmem:[#allocation38_spill] sm:$0xff] %v10095_v48  ;;  %v10103_v39 = vpop.f32.mrf.mxu0 }
 0x22c   : > { %v7377_v14 = vpop.f32.mrf.mxu1 }
 0x22d   : > { %v5166_v24 = vadd.f32 %v7377_v14, %v9988_v43  ;;  %v10108_v2 = vpop.f32.mrf.mxu0 }
 0x22e   : > { %v5037_v37 = vpop.f32.mrf.mxu1 }
 0x22f   : > { %v5164_v10 = vadd.f32 %v5037_v37, %v9992_v8  ;;  %v5664_v14 = vadd.f32 %v7425_v17, %v5166_v24  ;;  %v4417_v17 = vadd.f32 %v9963_v15, %v4030_v31  ;;  %v4034_v31 = vadd.f32 %v10022_v45, %v9906_v27 }
 0x230   : > { %v7378_v48 = vpop.f32.mrf.mxu1  ;;  %v10112_v1 = vpop.f32.mrf.mxu0 }
 0x231   : > { %v5167_v9 = vadd.f32 %v7378_v48, %v4413_v5  ;;  %v5662_v8 = vadd.f32 %v5535_v23, %v5164_v10  ;;  %v4028_v48 = vadd.f32 %v10009_v54, %v9897_v61 }
 0x232   : > { %v5040_v43 = vpop.f32.mrf.mxu1  ;;  %v10118_v19 = vpop.f32.mrf.mxu0 }
 0x233   : > { %v5665_v37 = vadd.f32 %v7426_v53, %v5167_v9  ;;  %v5165_v28 = vadd.f32 %v5040_v43, %v4411_v7  ;;  %v5891_v61 = vmul.f32 %v5662_v8, %v5662_v8  ;;  %v4415_v7 = vadd.f32 %v9968_v25, %v4028_v48 }
 0x234   : > { %v7381_v62 = vpop.f32.mrf.mxu1  ;;  %v10127_v36 = vpop.f32.mrf.mxu0 }
 0x235   : > { %v6704_v11 = vpack.c.bf16 %v5665_v37, %v5664_v14  ;;  %v5663_v52 = vadd.f32 %v5538_v44, %v5165_v28  ;;  %v5170_v23 = vadd.f32 %v7381_v62, %v10005_v21  ;;  %v4031_v44 = vadd.f32 %v10016_v41, %v9903_v46 }
 0x236   : > { %v5053_v53 = vpop.f32.mrf.mxu1  ;;  %v10133_v24 = vpop.f32.mrf.mxu0  ;;  %v5893_v21 = vmul.f32 %v5664_v14, %v5664_v14 }
 0x237   : > { %6792 = vst [vmem:[%s10125_s25 + $0x8] sm:$0xff] %v6704_v11   ;;  %v6699_v54 = vpack.c.bf16 %v5663_v52, %v5662_v8  ;;  %v5854_v5 = vadd.f32 %v5663_v52, %v5662_v8  ;;  %v5892_v3 = vmul.f32 %v5663_v52, %v5663_v52  ;;  %v5168_v10 = vadd.f32 %v5053_v53, %v4414_v57 }
 0x238   : > { %v7382_v9 = vpop.f32.mrf.mxu1  ;;  %v10139_v15 = vpop.f32.mrf.mxu0  ;;  %v5894_v8 = vmul.f32 %v5665_v37, %v5665_v37  ;;  %v5668_v28 = vadd.f32 %v10078_v6, %v5170_v23  ;;  %v4418_v53 = vadd.f32 %v9976_v35, %v4031_v44 }
 0x239   : > { %6700 = vst [vmem:[%s10125_s25] sm:$0xff] %v6699_v54   ;;  %v5855_v16 = vadd.f32 %v5854_v5, %v5664_v14  ;;  %v5923_v58 = vadd.f32 %v5892_v3, %v5891_v61  ;;  %v5171_v43 = vadd.f32 %v7382_v9, %v4417_v17  ;;  %v5666_v62 = vadd.f32 %v5551_v47, %v5168_v10 }
 0x23a   : > { %v5056_v11 = vpop.f32.mrf.mxu1  ;;  %v10145_v52 = vpop.f32.mrf.mxu0  ;;  %v4032_v14 = vadd.f32 %v10024_v13, %v9909_v34  ;;  %v4421_v34 = vadd.f32 %v9981_v51, %v4034_v31  ;;  %v4035_v10 = vadd.f32 %v10031_v32, %v9915_v29 }
 0x23b   : > { %v5924_v46 = vadd.f32 %v5923_v58, %v5893_v21  ;;  %v5856_v41 = vadd.f32 %v5855_v16, %v5665_v37  ;;  %v5669_v25 = vadd.f32 %v10083_v20, %v5171_v43  ;;  %v5169_v48 = vadd.f32 %v5056_v11, %v4415_v7 }
 0x23c   : > { %v7385_v57 = vpop.f32.mrf.mxu1  ;;  %v5895_v45 = vmul.f32 %v5666_v62, %v5666_v62  ;;  %v10150_v47 = vpop.f32.mrf.mxu0  ;;  %v4419_v7 = vadd.f32 %v9986_v4, %v4032_v14  ;;  %v4036_v11 = vadd.f32 %v10039_v30, %v9921_v56 }
 0x23d   : > { %v5857_v27 = vadd.f32 %v5856_v41, %v5666_v62  ;;  %v5925_v17 = vadd.f32 %v5924_v46, %v5894_v8  ;;  %v6714_v6 = vpack.c.bf16 %v5669_v25, %v5668_v28  ;;  %v5667_v23 = vadd.f32 %v10087_v63, %v5169_v48 }
 0x23e   : > { %v5069_v37 = vpop.f32.mrf.mxu1  ;;  %v5174_v20 = vadd.f32 %v7385_v57, %v10020_v40  ;;  %v10156_v13 = vpop.f32.mrf.mxu0  ;;  %v4038_v63 = vadd.f32 %v10037_v33, %v9918_v0  ;;  %v5897_v40 = vmul.f32 %v5668_v28, %v5668_v28  ;;  %v5898_v32 = vmul.f32 %v5669_v25, %v5669_v25 }
 0x23f   : > { %v5926_v61 = vadd.f32 %v5925_v17, %v5895_v45  ;;  %6794 = vst [vmem:[%s10125_s25 + $0x18] sm:$0xff] %v6714_v6   ;;  %v5172_v54 = vadd.f32 %v5069_v37, %v4418_v53  ;;  %v6709_v35 = vpack.c.bf16 %v5667_v23, %v5666_v62  ;;  %v5858_v5 = vadd.f32 %v5857_v27, %v5667_v23 }
 0x240   : > { %v5896_v3 = vmul.f32 %v5667_v23, %v5667_v23  ;;  %v7386_v44 = vpop.f32.mrf.mxu1  ;;  %v10163_v21 = vpop.f32.mrf.mxu0  ;;  %v5672_v31 = vadd.f32 %v10093_v49, %v5174_v20  ;;  %v4425_v14 = vadd.f32 %v9999_v50, %v4038_v63  ;;  %v4423_v50 = vadd.f32 %v10003_v38, %v4036_v11  ;;  %v10431_v38 = vld [vmem:[#allocation29_spill] sm:$0xff]  ;;  %v10437_v11 = vld [vmem:[#allocation14_spill] sm:$0xff] }
 0x241   : > { %v5175_v9 = vadd.f32 %v7386_v44, %v4421_v34  ;;  %6793 = vst [vmem:[%s10125_s25 + $0x10] sm:$0xff] %v6709_v35   ;;  %v5859_v51 = vadd.f32 %v5858_v5, %v5668_v28  ;;  %v5670_v58 = vadd.f32 %v10099_v42, %v5172_v54  ;;  %v4422_v42 = vadd.f32 %v9996_v55, %v4035_v10 }
 0x242   : > { %v5927_v16 = vadd.f32 %v5926_v61, %v5896_v3  ;;  %v5072_v43 = vpop.f32.mrf.mxu1  ;;  %v10169_v4 = vpop.f32.mrf.mxu0  ;;  %v4039_v55 = vadd.f32 %v10046_v18, %v9927_v12  ;;  %v5901_v23 = vmul.f32 %v5672_v31, %v5672_v31  ;;  %v4040_v3 = vadd.f32 %v10431_v38, %v9933_v26 }
 0x243   : > { %v5673_v8 = vadd.f32 %v10103_v39, %v5175_v9  ;;  %v5173_v29 = vadd.f32 %v5072_v43, %v4419_v7  ;;  %v5860_v33 = vadd.f32 %v5859_v51, %v5669_v25  ;;  %v5899_v49 = vmul.f32 %v5670_v58, %v5670_v58  ;;  %v10434_v43 = vld [vmem:[#allocation28_spill] sm:$0xff] }
 0x244   : > { %v5928_v0 = vadd.f32 %v5927_v16, %v5897_v40  ;;  %v7389_v62 = vpop.f32.mrf.mxu1  ;;  %v10178_v17 = vpop.f32.mrf.mxu0  ;;  %v10433_v40 = vld [vmem:[#allocation11_spill] sm:$0xff] }
 0x245   : > { %v6724_v28 = vpack.c.bf16 %v5673_v8, %v5672_v31  ;;  %v5671_v46 = vadd.f32 %v10108_v2, %v5173_v29  ;;  %v5861_v41 = vadd.f32 %v5860_v33, %v5670_v58  ;;  %v5178_v53 = vadd.f32 %v7389_v62, %v10035_v22  ;;  %v10436_v33 = vld [vmem:[#allocation32_spill] sm:$0xff] }
 0x246   : > { %v5929_v39 = vadd.f32 %v5928_v0, %v5898_v32  ;;  %v5085_v48 = vpop.f32.mrf.mxu1  ;;  %v4042_v2 = vadd.f32 %v10052_v59, %v9930_v60  ;;  %v5902_v12 = vmul.f32 %v5673_v8, %v5673_v8  ;;  %v10189_v59 = vpop.f32.mrf.mxu0 }
 0x247   : > { %6796 = vst [vmem:[%s10125_s25 + $0x28] sm:$0xff] %v6724_v28   ;;  %v6719_v25 = vpack.c.bf16 %v5671_v46, %v5670_v58  ;;  %v5900_v57 = vmul.f32 %v5671_v46, %v5671_v46  ;;  %v5176_v27 = vadd.f32 %v5085_v48, %v4422_v42  ;;  %v5862_v56 = vadd.f32 %v5861_v41, %v5671_v46  ;;  %v10438_v28 = vld [vmem:[#allocation4_spill] sm:$0xff]  ;;  %v10439_v41 = vld [vmem:[#allocation13_spill] sm:$0xff] }
 0x248   : > { %v5930_v45 = vadd.f32 %v5929_v39, %v5899_v49  ;;  %v7390_v30 = vpop.f32.mrf.mxu1  ;;  %v5676_v54 = vadd.f32 %v10112_v1, %v5178_v53  ;;  %v4429_v51 = vadd.f32 %v10433_v40, %v4042_v2  ;;  %v10198_v0 = vpop.f32.mrf.mxu0  ;;  %v4046_v46 = vadd.f32 %v10438_v28, %v10437_v11 }
 0x249   : > { %6795 = vst [vmem:[%s10125_s25 + $0x20] sm:$0xff] %v6719_v25   ;;  %v5179_v6 = vadd.f32 %v7390_v30, %v4425_v14  ;;  %v5863_v37 = vadd.f32 %v5862_v56, %v5672_v31  ;;  %v5674_v22 = vadd.f32 %v10118_v19, %v5176_v27  ;;  %v10432_v19 = vld [vmem:[#allocation19_spill] sm:$0xff]  ;;  %v4427_v49 = vadd.f32 %v10439_v41, %v4040_v3 }
 0x24a   : > { %v5931_v61 = vadd.f32 %v5930_v45, %v5900_v57  ;;  %v5088_v20 = vpop.f32.mrf.mxu1  ;;  %v4426_v63 = vadd.f32 %v10432_v19, %v4039_v55  ;;  %v5905_v39 = vmul.f32 %v5676_v54, %v5676_v54  ;;  %v10450_v41 = vld [vmem:[#allocation23_spill] sm:$0xff] }
 0x24b   : > { %v5677_v34 = vadd.f32 %v10127_v36, %v5179_v6  ;;  %v5177_v35 = vadd.f32 %v5088_v20, %v4423_v50  ;;  %v5864_v5 = vadd.f32 %v5863_v37, %v5673_v8  ;;  %v5903_v1 = vmul.f32 %v5674_v22, %v5674_v22  ;;  %v10209_v6 = vpop.f32.mrf.mxu0  ;;  %v10440_v50 = vld [vmem:[#allocation16_spill] sm:$0xff] }
 0x24c   : > { %v5932_v18 = vadd.f32 %v5931_v61, %v5901_v23  ;;  %v7393_v60 = vpop.f32.mrf.mxu1  ;;  %v10441_v23 = vld [vmem:[#allocation5_spill] sm:$0xff] }
 0x24d   : > { %v6734_v44 = vpack.c.bf16 %v5677_v34, %v5676_v54  ;;  %v5675_v10 = vadd.f32 %v10133_v24, %v5177_v35  ;;  %v5865_v9 = vadd.f32 %v5864_v5, %v5674_v22  ;;  %v5182_v31 = vadd.f32 %v7393_v60, %v10434_v43  ;;  %v10435_v24 = vld [vmem:[#allocation12_spill] sm:$0xff]  ;;  %v10444_v60 = vld [vmem:[#allocation34_spill] sm:$0xff] }
 0x24e   : > { %v5933_v36 = vadd.f32 %v5932_v18, %v5902_v12  ;;  %v5101_v7 = vpop.f32.mrf.mxu1  ;;  %v4043_v62 = vadd.f32 %v10436_v33, %v10435_v24  ;;  %v5906_v56 = vmul.f32 %v5677_v34, %v5677_v34  ;;  %v4044_v37 = vadd.f32 %v10441_v23, %v10440_v50  ;;  %v10443_v12 = vld [vmem:[#allocation17_spill] sm:$0xff] }
 0x24f   : > { %6798 = vst [vmem:[%s10125_s25 + $0x38] sm:$0xff] %v6734_v44   ;;  %v6729_v16 = vpack.c.bf16 %v5675_v10, %v5674_v22  ;;  %v5904_v58 = vmul.f32 %v5675_v10, %v5675_v10  ;;  %v5180_v8 = vadd.f32 %v5101_v7, %v4426_v63  ;;  %v5866_v26 = vadd.f32 %v5865_v9, %v5675_v10  ;;  %v7450_v63 = vpop.f32.mrf.mxu0  ;;  %v10446_v9 = vld [vmem:[#allocation6_spill] sm:$0xff]  ;;  %v10448_v7 = vld [vmem:[#allocation8_spill] sm:$0xff] }
 0x250   : > { %v5934_v29 = vadd.f32 %v5933_v36, %v5903_v1  ;;  %v7394_v32 = vpop.f32.mrf.mxu1  ;;  %v5680_v53 = vadd.f32 %v10139_v15, %v5182_v31  ;;  %v4433_v18 = vadd.f32 %v10443_v12, %v4046_v46  ;;  %v10447_v36 = vld [vmem:[#allocation21_spill] sm:$0xff]  ;;  %v10459_v12 = vld [vmem:[#allocation27_spill] sm:$0xff] }
 0x251   : > { %6797 = vst [vmem:[%s10125_s25 + $0x30] sm:$0xff] %v6729_v16   ;;  %v5183_v42 = vadd.f32 %v7394_v32, %v4429_v51  ;;  %v5867_v48 = vadd.f32 %v5866_v26, %v5676_v54  ;;  %v5678_v25 = vadd.f32 %v10145_v52, %v5180_v8  ;;  %v10442_v52 = vld [vmem:[#allocation15_spill] sm:$0xff]  ;;  %v4050_v40 = vadd.f32 %v10448_v7, %v10447_v36  ;;  %v10449_v16 = vld [vmem:[#allocation20_spill] sm:$0xff] }
 0x252   : > { %v5935_v14 = vadd.f32 %v5934_v29, %v5904_v58  ;;  %v5104_v57 = vpop.f32.mrf.mxu1  ;;  %v4430_v20 = vadd.f32 %v10442_v52, %v4043_v62  ;;  %v4431_v58 = vadd.f32 %v10449_v16, %v4044_v37  ;;  %v5909_v43 = vmul.f32 %v5680_v53, %v5680_v53  ;;  %v10456_v52 = vld [vmem:[#allocation35_spill] sm:$0xff] }
 0x253   : > { %v5681_v27 = vadd.f32 %v10150_v47, %v5183_v42  ;;  %v5181_v45 = vadd.f32 %v5104_v57, %v4427_v49  ;;  %v5868_v55 = vadd.f32 %v5867_v48, %v5677_v34  ;;  %v5907_v15 = vmul.f32 %v5678_v25, %v5678_v25  ;;  %v5634_v42 = vpop.f32.mrf.mxu0  ;;  %v10451_v49 = vld [vmem:[#allocation10_spill] sm:$0xff] }
 0x254   : > { %v5936_v30 = vadd.f32 %v5935_v14, %v5905_v39  ;;  %v7397_v2 = vpop.f32.mrf.mxu1  ;;  %v4048_v39 = vadd.f32 %v10451_v49, %v10450_v41 }
 0x255   : > { %v6744_v61 = vpack.c.bf16 %v5681_v27, %v5680_v53  ;;  %v5679_v22 = vadd.f32 %v10156_v13, %v5181_v45  ;;  %v5869_v54 = vadd.f32 %v5868_v55, %v5678_v25  ;;  %v5186_v38 = vadd.f32 %v7397_v2, %v10444_v60  ;;  %v10445_v13 = vld [vmem:[#allocation18_spill] sm:$0xff]  ;;  %v10453_v45 = vld [vmem:[#allocation24_spill] sm:$0xff]  ;;  %v10454_v55 = vld [vmem:[#allocation7_spill] sm:$0xff] }
 0x256   : > { %v5937_v47 = vadd.f32 %v5936_v30, %v5906_v56  ;;  %v5117_v35 = vpop.f32.mrf.mxu1  ;;  %v4047_v1 = vadd.f32 %v10446_v9, %v10445_v13  ;;  %v5910_v62 = vmul.f32 %v5681_v27, %v5681_v27  ;;  %v4437_v56 = vadd.f32 %v10453_v45, %v4050_v40  ;;  %v10460_v40 = vld [vmem:[#allocation9_spill] sm:$0xff] }
 0x257   : > { %6800 = vst [vmem:[%s10125_s25 + $0x48] sm:$0xff] %v6744_v61   ;;  %v6739_v34 = vpack.c.bf16 %v5679_v22, %v5678_v25  ;;  %v5908_v5 = vmul.f32 %v5679_v22, %v5679_v22  ;;  %v5184_v3 = vadd.f32 %v5117_v35, %v4430_v20  ;;  %v5870_v10 = vadd.f32 %v5869_v54, %v5679_v22  ;;  %v10452_v25 = vld [vmem:[#allocation22_spill] sm:$0xff]  ;;  %v7453_v22 = vpop.f32.mrf.mxu0 }
 0x258   : > { %v5938_v44 = vadd.f32 %v5937_v47, %v5907_v15  ;;  %v7398_v19 = vpop.f32.mrf.mxu1  ;;  %v5684_v32 = vadd.f32 %v10163_v21, %v5186_v38  ;;  %v10457_v54 = vld [vmem:[#allocation26_spill] sm:$0xff]  ;;  %v10458_v15 = vld [vmem:[#allocation37_spill] sm:$0xff] }
 0x259   : > { %6799 = vst [vmem:[%s10125_s25 + $0x40] sm:$0xff] %v6739_v34   ;;  %v5187_v51 = vadd.f32 %v7398_v19, %v4433_v18  ;;  %v5871_v31 = vadd.f32 %v5870_v10, %v5680_v53  ;;  %v5682_v29 = vadd.f32 %v10169_v4, %v5184_v3  ;;  %v4434_v4 = vadd.f32 %v10452_v25, %v4047_v1  ;;  %v5647_v7 = vpop.f32.mrf.mxu0 }
 0x25a   : > { %v5939_v8 = vadd.f32 %v5938_v44, %v5908_v5  ;;  %v5120_v26 = vpop.f32.mrf.mxu1  ;;  %v4054_v47 = vadd.f32 %v10458_v15, %v10457_v54  ;;  %v4435_v18 = vadd.f32 %v10459_v12, %v4048_v39  ;;  %v5913_v34 = vmul.f32 %v5684_v32, %v5684_v32 }
 0x25b   : > { %v5685_v24 = vadd.f32 %v10178_v17, %v5187_v51  ;;  %v5185_v33 = vadd.f32 %v5120_v26, %v4431_v58  ;;  %v5872_v28 = vadd.f32 %v5871_v31, %v5681_v27  ;;  %v5911_v21 = vmul.f32 %v5682_v29, %v5682_v29  ;;  %v10461_v51 = vld [vmem:[#allocation38_spill] sm:$0xff]  ;;  %v7454_v49 = vpop.f32.mrf.mxu0 }
 0x25c   : > { %v5940_v11 = vadd.f32 %v5939_v8, %v5909_v43  ;;  %v7401_v46 = vpop.f32.mrf.mxu1  ;;  %v4052_v16 = vadd.f32 %v10461_v51, %v10460_v40  ;;  %v10462_v31 = vld [vmem:[#allocation30_spill] sm:$0xff]  ;;  %v10466_v40 = vld [vmem:[#allocation3_spill] sm:$0xff] }
 0x25d   : > { %v6754_v48 = vpack.c.bf16 %v5685_v24, %v5684_v32  ;;  %v5683_v14 = vadd.f32 %v10189_v59, %v5185_v33  ;;  %v5873_v57 = vadd.f32 %v5872_v28, %v5682_v29  ;;  %v5190_v2 = vadd.f32 %v7401_v46, %v10454_v55  ;;  %v10455_v59 = vld [vmem:[#allocation25_spill] sm:$0xff] }
 0x25e   : > { %v5941_v53 = vadd.f32 %v5940_v11, %v5910_v62  ;;  %v5133_v17 = vpop.f32.mrf.mxu1  ;;  %v4051_v20 = vadd.f32 %v10456_v52, %v10455_v59  ;;  %v5914_v13 = vmul.f32 %v5685_v24, %v5685_v24  ;;  %vm5960_vm8 = vcmp.eq.s32.totalorder %v10466_v40, 0 }
 0x25f   : > { %6802 = vst [vmem:[%s10125_s25 + $0x58] sm:$0xff] %v6754_v48   ;;  %v6749_v30 = vpack.c.bf16 %v5683_v14, %v5682_v29  ;;  %v5912_v27 = vmul.f32 %v5683_v14, %v5683_v14  ;;  %v5188_v50 = vadd.f32 %v5133_v17, %v4434_v4  ;;  %v5874_v37 = vadd.f32 %v5873_v57, %v5683_v14  ;;  %v10465_v48 = vld [vmem:[#allocation33_spill] sm:$0xff] }
 0x260   : > { %v5942_v23 = vadd.f32 %v5941_v53, %v5911_v21  ;;  %v7402_v61 = vpop.f32.mrf.mxu1  ;;  %v5688_v44 = vadd.f32 %v10198_v0, %v5190_v2  ;;  %v4438_v8 = vadd.f32 %v10462_v31, %v4051_v20  ;;  %v4439_v14 = vadd.f32 %v10465_v48, %v4052_v16  ;;  %v5650_v2 = vpop.f32.mrf.mxu0 }
 0x261   : > { %6801 = vst [vmem:[%s10125_s25 + $0x50] sm:$0xff] %v6749_v30   ;;  %v5191_v35 = vadd.f32 %v7402_v61, %v4437_v56  ;;  %v5875_v5 = vadd.f32 %v5874_v37, %v5684_v32  ;;  %v5686_v38 = vadd.f32 %v10209_v6, %v5188_v50  ;;  %vm5962_vm9 = vcmp.eq.s32.totalorder %v10466_v40, 1 }
 0x262   : > { %v5943_v60 = vadd.f32 %v5942_v23, %v5912_v27  ;;  %v5136_v3 = vpop.f32.mrf.mxu1  ;;  %v5917_v25 = vmul.f32 %v5688_v44, %v5688_v44 }
 0x263   : > { %v5689_v10 = vadd.f32 %v7450_v63, %v5191_v35  ;;  %v5189_v19 = vadd.f32 %v5136_v3, %v4435_v18  ;;  %v5876_v1 = vadd.f32 %v5875_v5, %v5685_v24  ;;  %v5915_v29 = vmul.f32 %v5686_v38, %v5686_v38  ;;  %v10463_v63 = vld [vmem:[#allocation31_spill] sm:$0xff]  ;;  %v10464_v24 = vld [vmem:[#allocation36_spill] sm:$0xff] }
 0x264   : > { %v5944_v9 = vadd.f32 %v5943_v60, %v5913_v34  ;;  %v7405_v36 = vpop.f32.mrf.mxu1  ;;  %v4441_v32 = vadd.f32 %v10463_v63, %v4054_v47 }
 0x265   : > { %v6764_v58 = vpack.c.bf16 %v5689_v10, %v5688_v44  ;;  %v5687_v43 = vadd.f32 %v5634_v42, %v5189_v19  ;;  %v5877_v6 = vadd.f32 %v5876_v1, %v5686_v38  ;;  %v5194_v11 = vadd.f32 %v7405_v36, %v10464_v24 }
 0x266   : > { %v5945_v26 = vadd.f32 %v5944_v9, %v5914_v13  ;;  %v5149_v0 = vpop.f32.mrf.mxu1  ;;  %v5918_v30 = vmul.f32 %v5689_v10, %v5689_v10 }
 0x267   : > { %6804 = vst [vmem:[%s10125_s25 + $0x68] sm:$0xff] %v6764_v58   ;;  %v6759_v33 = vpack.c.bf16 %v5687_v43, %v5686_v38  ;;  %v5916_v62 = vmul.f32 %v5687_v43, %v5687_v43  ;;  %v5192_v28 = vadd.f32 %v5149_v0, %v4438_v8  ;;  %v5878_v41 = vadd.f32 %v5877_v6, %v5687_v43 }
 0x268   : > { %v5946_v46 = vadd.f32 %v5945_v26, %v5915_v29  ;;  %v7406_v39 = vpop.f32.mrf.mxu1  ;;  %v5692_v17 = vadd.f32 %v7453_v22, %v5194_v11 }
 0x269   : > { %6803 = vst [vmem:[%s10125_s25 + $0x60] sm:$0xff] %v6759_v33   ;;  %v5195_v42 = vadd.f32 %v7406_v39, %v4441_v32  ;;  %v5879_v4 = vadd.f32 %v5878_v41, %v5688_v44  ;;  %v5690_v21 = vadd.f32 %v5647_v7, %v5192_v28 }
 0x26a   : > { %v5947_v57 = vadd.f32 %v5946_v46, %v5916_v62  ;;  %v5152_v53 = vpop.f32.mrf.mxu1  ;;  %v5921_v47 = vmul.f32 %v5692_v17, %v5692_v17 }
 0x26b   : > { %v5693_v45 = vadd.f32 %v7454_v49, %v5195_v42  ;;  %v5193_v56 = vadd.f32 %v5152_v53, %v4439_v14  ;;  %v5880_v55 = vadd.f32 %v5879_v4, %v5689_v10  ;;  %v5919_v61 = vmul.f32 %v5690_v21, %v5690_v21 }
 0x26c   : > { %v5948_v27 = vadd.f32 %v5947_v57, %v5917_v25 }
 0x26d   : > { %v6774_v50 = vpack.c.bf16 %v5693_v45, %v5692_v17  ;;  %v5691_v23 = vadd.f32 %v5650_v2, %v5193_v56  ;;  %v5881_v37 = vadd.f32 %v5880_v55, %v5690_v21  ;;  %v5922_v12 = vmul.f32 %v5693_v45, %v5693_v45 }
 0x26e   : > { %v5949_v59 = vadd.f32 %v5948_v27, %v5918_v30 }
 0x26f   : > { %6806 = vst [vmem:[%s10125_s25 + $0x78] sm:$0xff] %v6774_v50   ;;  %v6769_v52 = vpack.c.bf16 %v5691_v23, %v5690_v21  ;;  %v5920_v20 = vmul.f32 %v5691_v23, %v5691_v23  ;;  %v5882_v15 = vadd.f32 %v5881_v37, %v5691_v23 }
 0x270   : > { %v5950_v54 = vadd.f32 %v5949_v59, %v5919_v61 }
 0x271   : > { %6805 = vst [vmem:[%s10125_s25 + $0x70] sm:$0xff] %v6769_v52   ;;  %v5883_v22 = vadd.f32 %v5882_v15, %v5692_v17 }
 0x272   : > { %v5951_v35 = vadd.f32 %v5950_v54, %v5920_v20 }
 0x273   : > { %v5884_v18 = vadd.f32 %v5883_v22, %v5693_v45 }
 0x274   : > { %v5952_v34 = vadd.f32 %v5951_v35, %v5921_v47 }
 0x275   : > { %v5885_v5 = vrot.slane %v5884_v18, 4 }
 0x276   : > { %v5953_v60 = vadd.f32 %v5952_v34, %v5922_v12 }
 0x277   : > { %v5886_v38 = vadd.f32 %v5885_v5, %v5884_v18 }
 0x278   : > { %v5954_v3 = vrot.slane %v5953_v60, 4 }
 0x279   : > { %v5887_v44 = vrot.slane %v5886_v38, 2 }
 0x27a   : > { %v5955_v10 = vadd.f32 %v5954_v3, %v5953_v60 }
 0x27b   : > { %v5888_v19 = vadd.f32 %v5887_v44, %v5886_v38 }
 0x27c   : > { %v5956_v13 = vrot.slane %v5955_v10, 2 }
 0x27d   : > { %v5889_v9 = vrot.slane %v5888_v19, 1 }
 0x27e   : > { %v5957_v1 = vadd.f32 %v5956_v13, %v5955_v10 }
 0x27f   : > { %v5890_v36 = vadd.f32 %v5889_v9, %v5888_v19 }
 0x280   : > { %v5958_v7 = vrot.slane %v5957_v1, 1 }
 0x281   : > { %v5961_v16 = vsel %vm5960_vm8, %v5890_v36, 0.0 }
 0x282   : > { %v5959_v51 = vadd.f32 %v5958_v7, %v5957_v1 }
 0x284   : > { %v5963_v58 = vsel %vm5962_vm9, %v5959_v51, 0.0 }
 0x285   : > { %v5964_v43 = vadd.f32 %v5963_v58, %v5961_v16 }
 0x287   : > { %5965 = vst [vmem:[%s235_s30] sm:$0xff] %v5964_v43 }
 0x288 PF: > { %s16_s18 = sadd.s32 1, %s7636_s18  }
 0x289   : > { %p13_p4 = scmp.ge.s32.totalorder %s16_s18, 4  }
 0x28b   :  { %15 = sbr.rel (!%p13_p4) target bundleno = 1 (0x1), region = 88 }

</bundles_post_ra>
